<compile_context>
chip_gen: v6e
topology: v6e:2x2x1
jax: 0.10.0
libtpu: 0.0.40
codegen_flags: <defaults>
</compile_context>

<pallas_src>
import functools

import jax
import jax.numpy as jnp
from jax.experimental import pallas as pl
from jax.experimental.pallas import tpu as pltpu


# --------------------------------------------------------------------------
# Fused Pallas kernel: whole network for one batch element per grid step
# --------------------------------------------------------------------------
def _simplenet_kernel(x_ref,
                      w1_ref, b1_ref,      # conv_first  (+ folded bn_first)
                      w2_ref, b2_ref,      # hidden[0..2] conv (+ folded bn) + relu
                      w3_ref, b3_ref,      # hidden[-3]  conv only
                      w4_ref, b4_ref,      # last_conv   (+ folded last_bn)
                      o_ref,
                      pad_ref, patch_ref,
                      *, H, W, C, K, D, P, NC, cy, cx):
    """x_ref : (1, H, W, 3)     raw 3-channel input block
       wN_ref: (K*K*C, CoutN)   im2col-flattened weights (BN scale pre-folded)
       bN_ref: (1, CoutN)       folded affine bias (bn_shift + bn_scale*conv_bias)
       o_ref : (1, H, W, NC)
       pad_ref  : VMEM (H+2P, W+2P, C)  resident zero-padded activation
       patch_ref: VMEM (H*W, K*K*C)     im2col patch matrix
    """
    Hp, Wp = H + 2 * P, W + 2 * P
    HW = H * W

    # ---- in-kernel zero padding: halo AND spare input channels are exactly zero.
    # Re-zeroed every grid step so the kernel stays correct when the batch grid
    # axis is sharded across TensorCores (v7x megacore).
    pad_ref[...] = jnp.zeros((Hp, Wp, C), jnp.float32)
    # Only the 3 real input channels are written; channels 3..C-1 stay zero, so
    # the zero-padded rows of w1 see zeros (implicit 3 -> C widening, no HBM pad).
    pad_ref[P:P + H, P:P + W, 0:3] = x_ref[0]

    def conv(w_ref, b_ref):
        # im2col: build one (HW, K*K*C) patch matrix, then a single MXU matmul.
        for kh in range(K):
            for kw in range(K):
                tap = kh * K + kw
                win = pad_ref[kh * D:kh * D + H, kw * D:kw * D + W, :]   # (H, W, C)
                patch_ref[:, tap * C:(tap + 1) * C] = win.reshape(HW, C)
        acc = jnp.dot(patch_ref[...], w_ref[...],
                      preferred_element_type=jnp.float32)                # (HW, Cout)
        # BN scale already folded into w_ref; only the folded bias remains.
        return acc + b_ref[...]

    def writeback(y):
        # keep the next layer's input resident; the zero halo is never overwritten
        pad_ref[P:P + H, P:P + W, :] = y.reshape(H, W, C)

    # x = relu(bn_first(conv_first(x)))
    writeback(jnp.maximum(conv(w1_ref, b1_ref), 0.0))

    # x = hidden[2](hidden[1](hidden[0](x)))   (conv, bn, relu)
    writeback(jnp.maximum(conv(w2_ref, b2_ref), 0.0))

    # x = hidden[-3](x)  (conv only), then fused depthwise x-corr with the 1x1
    # template x[:, :, cy, cx] and ReLU:  out = relu(x * x[cy, cx])
    y = conv(w3_ref, b3_ref)                                             # (HW, C)
    row = cy * W + cx
    v = y[row:row + 1, :]                                                # (1, C) template
    writeback(jnp.maximum(y * v, 0.0))

    # x = last_bn(last_conv(x))
    y = conv(w4_ref, b4_ref)                                             # (HW, NC)
    o_ref[...] = y.reshape(1, H, W, NC)


# --------------------------------------------------------------------------
# Parameter initialisation (module-like) and trace-time fusion
# --------------------------------------------------------------------------
def init_params(cfg, key):
    K = cfg['KERNEL_SIZE']
    OC = cfg['OUT_CHANNEL']
    NC = cfg['NUM_CLASSES']
    eps = 1e-5

    def conv_init(k, cin, cout):
        kw, kb = jax.random.split(k)
        fan_in = cin * K * K
        w = jax.random.normal(kw, (K, K, cin, cout), jnp.float32) / jnp.sqrt(fan_in)
        b = 0.01 * jax.random.normal(kb, (cout,), jnp.float32)
        return w, b

    def bn_init(k, c):
        k1, k2, k3, k4 = jax.random.split(k, 4)
        gamma = 1.0 + 0.1 * jax.random.normal(k1, (c,), jnp.float32)
        beta = 0.1 * jax.random.normal(k2, (c,), jnp.float32)
        mean = 0.1 * jax.random.normal(k3, (c,), jnp.float32)
        var = 1.0 + 0.1 * jax.random.uniform(k4, (c,), jnp.float32)
        scale = gamma / jnp.sqrt(var + eps)
        shift = beta - mean * scale
        return scale, shift

    keys = jax.random.split(key, 7)
    p = {}
    p['conv_first_w'], p['conv_first_b'] = conv_init(keys[0], 3, OC)
    p['bn_first_scale'], p['bn_first_shift'] = bn_init(keys[1], OC)
    p['h0_conv_w'], p['h0_conv_b'] = conv_init(keys[2], OC, OC)        # hidden[0]
    p['h0_bn_scale'], p['h0_bn_shift'] = bn_init(keys[3], OC)          # hidden[1]
    p['hlast_conv_w'], p['hlast_conv_b'] = conv_init(keys[4], OC, OC)  # hidden[-3]
    p['last_conv_w'], p['last_conv_b'] = conv_init(keys[5], OC, NC)
    p['last_bn_scale'], p['last_bn_shift'] = bn_init(keys[6], NC)
    return p


def fuse_params(params, cfg):
    """Trace-time algebra:
       bn(conv(x, w) + bias) = conv(x, w*scale) + (shift + scale*bias)
       so BN scale folds into the weights and conv bias folds into the BN shift.
       conv_first is zero-padded to C input channels, and all weights are
       flattened to the im2col layout (K*K*Cin, Cout)."""
    K = cfg['KERNEL_SIZE']
    C = cfg['OUT_CHANNEL']

    def fold(w, scale, shift, bias, cin_to=None):
        w = w * scale[None, None, None, :]
        b = shift + scale * bias
        kh, kw, cin, cout = w.shape
        if cin_to is not None and cin_to > cin:
            w = jnp.pad(w, ((0, 0), (0, 0), (0, cin_to - cin), (0, 0)))
            cin = cin_to
        return w.reshape(kh * kw * cin, cout), b[None, :]

    ones_c = jnp.ones((C,), jnp.float32)
    zeros_c = jnp.zeros((C,), jnp.float32)
    fp = {}
    fp['w1'], fp['b1'] = fold(params['conv_first_w'], params['bn_first_scale'],
                              params['bn_first_shift'], params['conv_first_b'],
                              cin_to=C)
    fp['w2'], fp['b2'] = fold(params['h0_conv_w'], params['h0_bn_scale'],
                              params['h0_bn_shift'], params['h0_conv_b'])
    fp['w3'], fp['b3'] = fold(params['hlast_conv_w'], ones_c, zeros_c,
                              params['hlast_conv_b'])                  # conv only
    fp['w4'], fp['b4'] = fold(params['last_conv_w'], params['last_bn_scale'],
                              params['last_bn_shift'], params['last_conv_b'])
    return fp


def _template_center(H, W, img_h, img_w):
    # hard-coded box from the PyTorch forward; cx/cy are Python ints at trace time
    scale_x = W / img_w
    scale_y = H / img_h
    x1, y1, bw, bh = 70, 80, 350, 128
    cx = int((x1 + bw / 2) * scale_x)
    cy = int((y1 + bh / 2) * scale_y)
    return cy, cx


# --------------------------------------------------------------------------
# SimpleNet forward (single fused pallas_call)
# --------------------------------------------------------------------------
def simplenet_forward(params, x_nchw, img_h, img_w, cfg):
    K = cfg['KERNEL_SIZE']
    D = cfg['DILATION']
    C = cfg['OUT_CHANNEL']
    NC = cfg['NUM_CLASSES']
    P = (D * (K - 1) + 1) // 2
    assert 2 * P == D * (K - 1), "padding formula only gives 'same' conv for even D*(K-1)"

    B, Cin, H, W = x_nchw.shape
    assert Cin == 3 and C >= 3
    Hp, Wp = H + 2 * P, W + 2 * P
    KKC = K * K * C

    cy, cx = _template_center(H, W, img_h, img_w)
    assert 0 <= cx < W and 0 <= cy < H, (cx, cy)   # guard against OOB template

    fp = fuse_params(params, cfg)

    # NCHW (PyTorch) -> NHWC (channels on TPU lanes); the 3 -> C channel widening
    # happens inside the kernel via the zero-initialised resident buffer.
    x = jnp.transpose(x_nchw, (0, 2, 3, 1)).astype(jnp.float32)

    kernel = functools.partial(_simplenet_kernel, H=H, W=W, C=C, K=K, D=D, P=P,
                               NC=NC, cy=cy, cx=cx)

    def full(shape):
        return pl.BlockSpec(shape, lambda b: (0,) * len(shape))

    flops = 2 * B * H * W * KKC * (3 * C + NC)
    bytes_accessed = 4 * (x.size + sum(int(v.size) for v in fp.values()) + B * H * W * NC)

    out = pl.pallas_call(
        kernel,
        out_shape=jax.ShapeDtypeStruct((B, H, W, NC), jnp.float32),
        grid=(B,),
        in_specs=[
            pl.BlockSpec((1, H, W, 3), lambda b: (b, 0, 0, 0)),
            full((KKC, C)), full((1, C)),      # conv_first (+bn_first folded)
            full((KKC, C)), full((1, C)),      # hidden conv (+bn folded)
            full((KKC, C)), full((1, C)),      # hidden[-3] conv
            full((KKC, NC)), full((1, NC)),    # last_conv (+last_bn folded)
        ],
        out_specs=pl.BlockSpec((1, H, W, NC), lambda b: (b, 0, 0, 0)),
        scratch_shapes=[
            pltpu.VMEM((Hp, Wp, C), jnp.float32),       # resident padded activation
            pltpu.VMEM((H * W, KKC), jnp.float32),      # im2col patch matrix
        ],
        compiler_params=pltpu.CompilerParams(dimension_semantics=("parallel",)),
        cost_estimate=pl.CostEstimate(flops=flops, transcendentals=0,
                                      bytes_accessed=bytes_accessed),
    )(x,
      fp['w1'], fp['b1'],
      fp['w2'], fp['b2'],
      fp['w3'], fp['b3'],
      fp['w4'], fp['b4'])

    # NHWC -> NCHW
    return jnp.transpose(out, (0, 3, 1, 2))


# --------------------------------------------------------------------------
# Pure-JAX reference (unfused params) for a silent correctness check
# --------------------------------------------------------------------------
def _reference_forward(params, x_nchw, img_h, img_w, cfg):
    K = cfg['KERNEL_SIZE']
    D = cfg['DILATION']
    P = (D * (K - 1) + 1) // 2
    x = jnp.transpose(x_nchw, (0, 2, 3, 1)).astype(jnp.float32)
    _, H, W, _ = x.shape
    cy, cx = _template_center(H, W, img_h, img_w)

    def conv(h, w, b):
        y = jax.lax.conv_general_dilated(
            h, w, window_strides=(1, 1), padding=[(P, P), (P, P)],
            rhs_dilation=(D, D), dimension_numbers=('NHWC', 'HWIO', 'NHWC'),
            precision=jax.lax.Precision.HIGHEST)
        return y + b

    def bn(h, scale, shift):
        return h * scale + shift

    h = jax.nn.relu(bn(conv(x, params['conv_first_w'], params['conv_first_b']),
                       params['bn_first_scale'], params['bn_first_shift']))
    h = jax.nn.relu(bn(conv(h, params['h0_conv_w'], params['h0_conv_b']),
                       params['h0_bn_scale'], params['h0_bn_shift']))
    h = conv(h, params['hlast_conv_w'], params['hlast_conv_b'])
    v = h[:, cy, cx, :][:, None, None, :]
    h = jax.nn.relu(h * v)
    h = bn(conv(h, params['last_conv_w'], params['last_conv_b']),
           params['last_bn_scale'], params['last_bn_shift'])
    return jnp.transpose(h, (0, 3, 1, 2))


if __name__ == "__main__":
    cfg = dict(NUM_CLASSES=4, OUT_CHANNEL=32, KERNEL_SIZE=3, DILATION=2,
               LAYER_NUMBER=6)
    key = jax.random.PRNGKey(0)
    kp, kx = jax.random.split(key)
    params = init_params(cfg, kp)

    # PyTorch-convention NCHW input: (batch=2, channels=3, H=16, W=16)
    x = jax.random.normal(kx, (2, 3, 16, 16), jnp.float32)
    img_h, img_w = 256, 256

    fwd = jax.jit(functools.partial(simplenet_forward, img_h=img_h, img_w=img_w,
                                    cfg=cfg))
    out = jax.block_until_ready(fwd(params, x))
    assert out.shape == (2, cfg['NUM_CLASSES'], 16, 16), out.shape
    assert out.dtype == jnp.float32

    ref = jax.block_until_ready(_reference_forward(params, x, img_h, img_w, cfg))
    assert jnp.allclose(out, ref, rtol=2e-2, atol=2e-3), \
        float(jnp.max(jnp.abs(out - ref)))

    print("KERNEL_OK")
</pallas_src>

<mosaic_0001>
module attributes {stable_mosaic.version = 11 : i64} {
  func.func @_simplenet_kernel(%arg0: i32, %arg1: memref<1x16x16x3xf32, #tpu.memory_space<vmem>>, %arg2: memref<288x32xf32, #tpu.memory_space<vmem>>, %arg3: memref<1x32xf32, #tpu.memory_space<vmem>>, %arg4: memref<288x32xf32, #tpu.memory_space<vmem>>, %arg5: memref<1x32xf32, #tpu.memory_space<vmem>>, %arg6: memref<288x32xf32, #tpu.memory_space<vmem>>, %arg7: memref<1x32xf32, #tpu.memory_space<vmem>>, %arg8: memref<288x4xf32, #tpu.memory_space<vmem>>, %arg9: memref<1x4xf32, #tpu.memory_space<vmem>>, %arg10: memref<1x16x16x4xf32, #tpu.memory_space<vmem>>, %arg11: memref<20x20x32xf32, #tpu.memory_space<vmem>>, %arg12: memref<256x288xf32, #tpu.memory_space<vmem>>) attributes {dimension_semantics = [#tpu.dimension_semantics<parallel>], iteration_bounds = array<i64: 2>, scalar_prefetch = 0 : i64, scratch_operands = 2 : i64, tpu.core_type = #tpu.core_type<tc>, window_params = [{transform_indices = @transform_0, window_bounds = array<i64: 1, 16, 16, 3>}, {pipeline_mode = #tpu.pipeline_mode<synchronous>, transform_indices = @transform_1, window_bounds = array<i64: 288, 32>}, {pipeline_mode = #tpu.pipeline_mode<synchronous>, transform_indices = @transform_2, window_bounds = array<i64: 1, 32>}, {pipeline_mode = #tpu.pipeline_mode<synchronous>, transform_indices = @transform_3, window_bounds = array<i64: 288, 32>}, {pipeline_mode = #tpu.pipeline_mode<synchronous>, transform_indices = @transform_4, window_bounds = array<i64: 1, 32>}, {pipeline_mode = #tpu.pipeline_mode<synchronous>, transform_indices = @transform_5, window_bounds = array<i64: 288, 32>}, {pipeline_mode = #tpu.pipeline_mode<synchronous>, transform_indices = @transform_6, window_bounds = array<i64: 1, 32>}, {pipeline_mode = #tpu.pipeline_mode<synchronous>, transform_indices = @transform_7, window_bounds = array<i64: 288, 4>}, {pipeline_mode = #tpu.pipeline_mode<synchronous>, transform_indices = @transform_8, window_bounds = array<i64: 1, 4>}, {transform_indices = @transform_9, window_bounds = array<i64: 1, 16, 16, 4>}]} {
    %cst = arith.constant 0.000000e+00 : f32
    %0 = vector.broadcast %cst : f32 to vector<20x20x32xf32>
    %c0 = arith.constant 0 : index
    %c0_0 = arith.constant 0 : index
    %c0_1 = arith.constant 0 : index
    %1 = vector.load %arg11[%c0, %c0_0, %c0_1] : memref<20x20x32xf32, #tpu.memory_space<vmem>>, vector<20x20x32xf32>
    tpu.vector_store %arg11[%c0, %c0_0, %c0_1], %0 {strides = array<i32>} : memref<20x20x32xf32, #tpu.memory_space<vmem>>, vector<20x20x32xf32>,
    %c0_2 = arith.constant 0 : index
    %c0_3 = arith.constant 0 : index
    %c0_4 = arith.constant 0 : index
    %c0_5 = arith.constant 0 : index
    %2 = vector.load %arg1[%c0_2, %c0_3, %c0_4, %c0_5] : memref<1x16x16x3xf32, #tpu.memory_space<vmem>>, vector<1x16x16x3xf32>
    %3 = vector.shape_cast %2 : vector<1x16x16x3xf32> to vector<16x16x3xf32>
    %c2 = arith.constant 2 : index
    %c2_6 = arith.constant 2 : index
    %c0_7 = arith.constant 0 : index
    %4 = vector.load %arg11[%c2, %c2_6, %c0_7] : memref<20x20x32xf32, #tpu.memory_space<vmem>>, vector<16x16x3xf32>
    tpu.vector_store %arg11[%c2, %c2_6, %c0_7], %3 {strides = array<i32>} : memref<20x20x32xf32, #tpu.memory_space<vmem>>, vector<16x16x3xf32>,
    %c0_8 = arith.constant 0 : index
    %c0_9 = arith.constant 0 : index
    %c0_10 = arith.constant 0 : index
    %5 = vector.load %arg11[%c0_8, %c0_9, %c0_10] : memref<20x20x32xf32, #tpu.memory_space<vmem>>, vector<16x16x32xf32>
    %6 = vector.shape_cast %5 : vector<16x16x32xf32> to vector<256x32xf32>
    %c0_11 = arith.constant 0 : index
    %c0_12 = arith.constant 0 : index
    %7 = vector.load %arg12[%c0_11, %c0_12] : memref<256x288xf32, #tpu.memory_space<vmem>>, vector<256x32xf32>
    tpu.vector_store %arg12[%c0_11, %c0_12], %6 {strides = array<i32>} : memref<256x288xf32, #tpu.memory_space<vmem>>, vector<256x32xf32>,
    %c0_13 = arith.constant 0 : index
    %c2_14 = arith.constant 2 : index
    %c0_15 = arith.constant 0 : index
    %8 = vector.load %arg11[%c0_13, %c2_14, %c0_15] : memref<20x20x32xf32, #tpu.memory_space<vmem>>, vector<16x16x32xf32>
    %9 = vector.shape_cast %8 : vector<16x16x32xf32> to vector<256x32xf32>
    %c0_16 = arith.constant 0 : index
    %c32 = arith.constant 32 : index
    %10 = vector.load %arg12[%c0_16, %c32] : memref<256x288xf32, #tpu.memory_space<vmem>>, vector<256x32xf32>
    tpu.vector_store %arg12[%c0_16, %c32], %9 {strides = array<i32>} : memref<256x288xf32, #tpu.memory_space<vmem>>, vector<256x32xf32>,
    %c0_17 = arith.constant 0 : index
    %c4 = arith.constant 4 : index
    %c0_18 = arith.constant 0 : index
    %11 = vector.load %arg11[%c0_17, %c4, %c0_18] : memref<20x20x32xf32, #tpu.memory_space<vmem>>, vector<16x16x32xf32>
    %12 = vector.shape_cast %11 : vector<16x16x32xf32> to vector<256x32xf32>
    %c0_19 = arith.constant 0 : index
    %c64 = arith.constant 64 : index
    %13 = vector.load %arg12[%c0_19, %c64] : memref<256x288xf32, #tpu.memory_space<vmem>>, vector<256x32xf32>
    tpu.vector_store %arg12[%c0_19, %c64], %12 {strides = array<i32>} : memref<256x288xf32, #tpu.memory_space<vmem>>, vector<256x32xf32>,
    %c2_20 = arith.constant 2 : index
    %c0_21 = arith.constant 0 : index
    %c0_22 = arith.constant 0 : index
    %14 = vector.load %arg11[%c2_20, %c0_21, %c0_22] : memref<20x20x32xf32, #tpu.memory_space<vmem>>, vector<16x16x32xf32>
    %15 = vector.shape_cast %14 : vector<16x16x32xf32> to vector<256x32xf32>
    %c0_23 = arith.constant 0 : index
    %c96 = arith.constant 96 : index
    %16 = vector.load %arg12[%c0_23, %c96] : memref<256x288xf32, #tpu.memory_space<vmem>>, vector<256x32xf32>
    tpu.vector_store %arg12[%c0_23, %c96], %15 {strides = array<i32>} : memref<256x288xf32, #tpu.memory_space<vmem>>, vector<256x32xf32>,
    %c2_24 = arith.constant 2 : index
    %c2_25 = arith.constant 2 : index
    %c0_26 = arith.constant 0 : index
    %17 = vector.load %arg11[%c2_24, %c2_25, %c0_26] : memref<20x20x32xf32, #tpu.memory_space<vmem>>, vector<16x16x32xf32>
    %18 = vector.shape_cast %17 : vector<16x16x32xf32> to vector<256x32xf32>
    %c0_27 = arith.constant 0 : index
    %c128 = arith.constant 128 : index
    %19 = vector.load %arg12[%c0_27, %c128] : memref<256x288xf32, #tpu.memory_space<vmem>>, vector<256x32xf32>
    tpu.vector_store %arg12[%c0_27, %c128], %18 {strides = array<i32>} : memref<256x288xf32, #tpu.memory_space<vmem>>, vector<256x32xf32>,
    %c2_28 = arith.constant 2 : index
    %c4_29 = arith.constant 4 : index
    %c0_30 = arith.constant 0 : index
    %20 = vector.load %arg11[%c2_28, %c4_29, %c0_30] : memref<20x20x32xf32, #tpu.memory_space<vmem>>, vector<16x16x32xf32>
    %21 = vector.shape_cast %20 : vector<16x16x32xf32> to vector<256x32xf32>
    %c0_31 = arith.constant 0 : index
    %c160 = arith.constant 160 : index
    %22 = vector.load %arg12[%c0_31, %c160] : memref<256x288xf32, #tpu.memory_space<vmem>>, vector<256x32xf32>
    tpu.vector_store %arg12[%c0_31, %c160], %21 {strides = array<i32>} : memref<256x288xf32, #tpu.memory_space<vmem>>, vector<256x32xf32>,
    %c4_32 = arith.constant 4 : index
    %c0_33 = arith.constant 0 : index
    %c0_34 = arith.constant 0 : index
    %23 = vector.load %arg11[%c4_32, %c0_33, %c0_34] : memref<20x20x32xf32, #tpu.memory_space<vmem>>, vector<16x16x32xf32>
    %24 = vector.shape_cast %23 : vector<16x16x32xf32> to vector<256x32xf32>
    %c0_35 = arith.constant 0 : index
    %c192 = arith.constant 192 : index
    %25 = vector.load %arg12[%c0_35, %c192] : memref<256x288xf32, #tpu.memory_space<vmem>>, vector<256x32xf32>
    tpu.vector_store %arg12[%c0_35, %c192], %24 {strides = array<i32>} : memref<256x288xf32, #tpu.memory_space<vmem>>, vector<256x32xf32>,
    %c4_36 = arith.constant 4 : index
    %c2_37 = arith.constant 2 : index
    %c0_38 = arith.constant 0 : index
    %26 = vector.load %arg11[%c4_36, %c2_37, %c0_38] : memref<20x20x32xf32, #tpu.memory_space<vmem>>, vector<16x16x32xf32>
    %27 = vector.shape_cast %26 : vector<16x16x32xf32> to vector<256x32xf32>
    %c0_39 = arith.constant 0 : index
    %c224 = arith.constant 224 : index
    %28 = vector.load %arg12[%c0_39, %c224] : memref<256x288xf32, #tpu.memory_space<vmem>>, vector<256x32xf32>
    tpu.vector_store %arg12[%c0_39, %c224], %27 {strides = array<i32>} : memref<256x288xf32, #tpu.memory_space<vmem>>, vector<256x32xf32>,
    %c4_40 = arith.constant 4 : index
    %c4_41 = arith.constant 4 : index
    %c0_42 = arith.constant 0 : index
    %29 = vector.load %arg11[%c4_40, %c4_41, %c0_42] : memref<20x20x32xf32, #tpu.memory_space<vmem>>, vector<16x16x32xf32>
    %30 = vector.shape_cast %29 : vector<16x16x32xf32> to vector<256x32xf32>
    %c0_43 = arith.constant 0 : index
    %c256 = arith.constant 256 : index
    %31 = vector.load %arg12[%c0_43, %c256] : memref<256x288xf32, #tpu.memory_space<vmem>>, vector<256x32xf32>
    tpu.vector_store %arg12[%c0_43, %c256], %30 {strides = array<i32>} : memref<256x288xf32, #tpu.memory_space<vmem>>, vector<256x32xf32>,
    %c0_44 = arith.constant 0 : index
    %c0_45 = arith.constant 0 : index
    %32 = vector.load %arg12[%c0_44, %c0_45] : memref<256x288xf32, #tpu.memory_space<vmem>>, vector<256x288xf32>
    %c0_46 = arith.constant 0 : index
    %c0_47 = arith.constant 0 : index
    %33 = vector.load %arg2[%c0_46, %c0_47] : memref<288x32xf32, #tpu.memory_space<vmem>>, vector<288x32xf32>
    %cst_48 = arith.constant dense<0.000000e+00> : vector<256x32xf32>
    %34 = tpu.matmul %32, %33, %cst_48 {dimension_numbers = #tpu.dot_dimension_numbers<[1], [0], [0], [1], [0, 0, 1, 1], [], []>} : vector<256x288xf32>, vector<288x32xf32>, vector<256x32xf32> -> vector<256x32xf32>
    %c0_49 = arith.constant 0 : index
    %c0_50 = arith.constant 0 : index
    %35 = vector.load %arg3[%c0_49, %c0_50] : memref<1x32xf32, #tpu.memory_space<vmem>>, vector<1x32xf32>
    %36 = vector.broadcast %35 : vector<1x32xf32> to vector<256x32xf32>
    %37 = arith.addf %34, %36 : vector<256x32xf32>
    %cst_51 = arith.constant 0.000000e+00 : f32
    %38 = vector.broadcast %cst_51 : f32 to vector<256x32xf32>
    %39 = arith.maximumf %37, %38 : vector<256x32xf32>
    %40 = vector.shape_cast %39 : vector<256x32xf32> to vector<16x16x32xf32>
    %c2_52 = arith.constant 2 : index
    %c2_53 = arith.constant 2 : index
    %c0_54 = arith.constant 0 : index
    %41 = vector.load %arg11[%c2_52, %c2_53, %c0_54] : memref<20x20x32xf32, #tpu.memory_space<vmem>>, vector<16x16x32xf32>
    tpu.vector_store %arg11[%c2_52, %c2_53, %c0_54], %40 {strides = array<i32>} : memref<20x20x32xf32, #tpu.memory_space<vmem>>, vector<16x16x32xf32>,
    %c0_55 = arith.constant 0 : index
    %c0_56 = arith.constant 0 : index
    %c0_57 = arith.constant 0 : index
    %42 = vector.load %arg11[%c0_55, %c0_56, %c0_57] : memref<20x20x32xf32, #tpu.memory_space<vmem>>, vector<16x16x32xf32>
    %43 = vector.shape_cast %42 : vector<16x16x32xf32> to vector<256x32xf32>
    %c0_58 = arith.constant 0 : index
    %c0_59 = arith.constant 0 : index
    %44 = vector.load %arg12[%c0_58, %c0_59] : memref<256x288xf32, #tpu.memory_space<vmem>>, vector<256x32xf32>
    tpu.vector_store %arg12[%c0_58, %c0_59], %43 {strides = array<i32>} : memref<256x288xf32, #tpu.memory_space<vmem>>, vector<256x32xf32>,
    %c0_60 = arith.constant 0 : index
    %c2_61 = arith.constant 2 : index
    %c0_62 = arith.constant 0 : index
    %45 = vector.load %arg11[%c0_60, %c2_61, %c0_62] : memref<20x20x32xf32, #tpu.memory_space<vmem>>, vector<16x16x32xf32>
    %46 = vector.shape_cast %45 : vector<16x16x32xf32> to vector<256x32xf32>
    %c0_63 = arith.constant 0 : index
    %c32_64 = arith.constant 32 : index
    %47 = vector.load %arg12[%c0_63, %c32_64] : memref<256x288xf32, #tpu.memory_space<vmem>>, vector<256x32xf32>
    tpu.vector_store %arg12[%c0_63, %c32_64], %46 {strides = array<i32>} : memref<256x288xf32, #tpu.memory_space<vmem>>, vector<256x32xf32>,
    %c0_65 = arith.constant 0 : index
    %c4_66 = arith.constant 4 : index
    %c0_67 = arith.constant 0 : index
    %48 = vector.load %arg11[%c0_65, %c4_66, %c0_67] : memref<20x20x32xf32, #tpu.memory_space<vmem>>, vector<16x16x32xf32>
    %49 = vector.shape_cast %48 : vector<16x16x32xf32> to vector<256x32xf32>
    %c0_68 = arith.constant 0 : index
    %c64_69 = arith.constant 64 : index
    %50 = vector.load %arg12[%c0_68, %c64_69] : memref<256x288xf32, #tpu.memory_space<vmem>>, vector<256x32xf32>
    tpu.vector_store %arg12[%c0_68, %c64_69], %49 {strides = array<i32>} : memref<256x288xf32, #tpu.memory_space<vmem>>, vector<256x32xf32>,
    %c2_70 = arith.constant 2 : index
    %c0_71 = arith.constant 0 : index
    %c0_72 = arith.constant 0 : index
    %51 = vector.load %arg11[%c2_70, %c0_71, %c0_72] : memref<20x20x32xf32, #tpu.memory_space<vmem>>, vector<16x16x32xf32>
    %52 = vector.shape_cast %51 : vector<16x16x32xf32> to vector<256x32xf32>
    %c0_73 = arith.constant 0 : index
    %c96_74 = arith.constant 96 : index
    %53 = vector.load %arg12[%c0_73, %c96_74] : memref<256x288xf32, #tpu.memory_space<vmem>>, vector<256x32xf32>
    tpu.vector_store %arg12[%c0_73, %c96_74], %52 {strides = array<i32>} : memref<256x288xf32, #tpu.memory_space<vmem>>, vector<256x32xf32>,
    %c2_75 = arith.constant 2 : index
    %c2_76 = arith.constant 2 : index
    %c0_77 = arith.constant 0 : index
    %54 = vector.load %arg11[%c2_75, %c2_76, %c0_77] : memref<20x20x32xf32, #tpu.memory_space<vmem>>, vector<16x16x32xf32>
    %55 = vector.shape_cast %54 : vector<16x16x32xf32> to vector<256x32xf32>
    %c0_78 = arith.constant 0 : index
    %c128_79 = arith.constant 128 : index
    %56 = vector.load %arg12[%c0_78, %c128_79] : memref<256x288xf32, #tpu.memory_space<vmem>>, vector<256x32xf32>
    tpu.vector_store %arg12[%c0_78, %c128_79], %55 {strides = array<i32>} : memref<256x288xf32, #tpu.memory_space<vmem>>, vector<256x32xf32>,
    %c2_80 = arith.constant 2 : index
    %c4_81 = arith.constant 4 : index
    %c0_82 = arith.constant 0 : index
    %57 = vector.load %arg11[%c2_80, %c4_81, %c0_82] : memref<20x20x32xf32, #tpu.memory_space<vmem>>, vector<16x16x32xf32>
    %58 = vector.shape_cast %57 : vector<16x16x32xf32> to vector<256x32xf32>
    %c0_83 = arith.constant 0 : index
    %c160_84 = arith.constant 160 : index
    %59 = vector.load %arg12[%c0_83, %c160_84] : memref<256x288xf32, #tpu.memory_space<vmem>>, vector<256x32xf32>
    tpu.vector_store %arg12[%c0_83, %c160_84], %58 {strides = array<i32>} : memref<256x288xf32, #tpu.memory_space<vmem>>, vector<256x32xf32>,
    %c4_85 = arith.constant 4 : index
    %c0_86 = arith.constant 0 : index
    %c0_87 = arith.constant 0 : index
    %60 = vector.load %arg11[%c4_85, %c0_86, %c0_87] : memref<20x20x32xf32, #tpu.memory_space<vmem>>, vector<16x16x32xf32>
    %61 = vector.shape_cast %60 : vector<16x16x32xf32> to vector<256x32xf32>
    %c0_88 = arith.constant 0 : index
    %c192_89 = arith.constant 192 : index
    %62 = vector.load %arg12[%c0_88, %c192_89] : memref<256x288xf32, #tpu.memory_space<vmem>>, vector<256x32xf32>
    tpu.vector_store %arg12[%c0_88, %c192_89], %61 {strides = array<i32>} : memref<256x288xf32, #tpu.memory_space<vmem>>, vector<256x32xf32>,
    %c4_90 = arith.constant 4 : index
    %c2_91 = arith.constant 2 : index
    %c0_92 = arith.constant 0 : index
    %63 = vector.load %arg11[%c4_90, %c2_91, %c0_92] : memref<20x20x32xf32, #tpu.memory_space<vmem>>, vector<16x16x32xf32>
    %64 = vector.shape_cast %63 : vector<16x16x32xf32> to vector<256x32xf32>
    %c0_93 = arith.constant 0 : index
    %c224_94 = arith.constant 224 : index
    %65 = vector.load %arg12[%c0_93, %c224_94] : memref<256x288xf32, #tpu.memory_space<vmem>>, vector<256x32xf32>
    tpu.vector_store %arg12[%c0_93, %c224_94], %64 {strides = array<i32>} : memref<256x288xf32, #tpu.memory_space<vmem>>, vector<256x32xf32>,
    %c4_95 = arith.constant 4 : index
    %c4_96 = arith.constant 4 : index
    %c0_97 = arith.constant 0 : index
    %66 = vector.load %arg11[%c4_95, %c4_96, %c0_97] : memref<20x20x32xf32, #tpu.memory_space<vmem>>, vector<16x16x32xf32>
    %67 = vector.shape_cast %66 : vector<16x16x32xf32> to vector<256x32xf32>
    %c0_98 = arith.constant 0 : index
    %c256_99 = arith.constant 256 : index
    %68 = vector.load %arg12[%c0_98, %c256_99] : memref<256x288xf32, #tpu.memory_space<vmem>>, vector<256x32xf32>
    tpu.vector_store %arg12[%c0_98, %c256_99], %67 {strides = array<i32>} : memref<256x288xf32, #tpu.memory_space<vmem>>, vector<256x32xf32>,
    %c0_100 = arith.constant 0 : index
    %c0_101 = arith.constant 0 : index
    %69 = vector.load %arg12[%c0_100, %c0_101] : memref<256x288xf32, #tpu.memory_space<vmem>>, vector<256x288xf32>
    %c0_102 = arith.constant 0 : index
    %c0_103 = arith.constant 0 : index
    %70 = vector.load %arg4[%c0_102, %c0_103] : memref<288x32xf32, #tpu.memory_space<vmem>>, vector<288x32xf32>
    %cst_104 = arith.constant dense<0.000000e+00> : vector<256x32xf32>
    %71 = tpu.matmul %69, %70, %cst_104 {dimension_numbers = #tpu.dot_dimension_numbers<[1], [0], [0], [1], [0, 0, 1, 1], [], []>} : vector<256x288xf32>, vector<288x32xf32>, vector<256x32xf32> -> vector<256x32xf32>
    %c0_105 = arith.constant 0 : index
    %c0_106 = arith.constant 0 : index
    %72 = vector.load %arg5[%c0_105, %c0_106] : memref<1x32xf32, #tpu.memory_space<vmem>>, vector<1x32xf32>
    %73 = vector.broadcast %72 : vector<1x32xf32> to vector<256x32xf32>
    %74 = arith.addf %71, %73 : vector<256x32xf32>
    %cst_107 = arith.constant 0.000000e+00 : f32
    %75 = vector.broadcast %cst_107 : f32 to vector<256x32xf32>
    %76 = arith.maximumf %74, %75 : vector<256x32xf32>
    %77 = vector.shape_cast %76 : vector<256x32xf32> to vector<16x16x32xf32>
    %c2_108 = arith.constant 2 : index
    %c2_109 = arith.constant 2 : index
    %c0_110 = arith.constant 0 : index
    %78 = vector.load %arg11[%c2_108, %c2_109, %c0_110] : memref<20x20x32xf32, #tpu.memory_space<vmem>>, vector<16x16x32xf32>
    tpu.vector_store %arg11[%c2_108, %c2_109, %c0_110], %77 {strides = array<i32>} : memref<20x20x32xf32, #tpu.memory_space<vmem>>, vector<16x16x32xf32>,
    %c0_111 = arith.constant 0 : index
    %c0_112 = arith.constant 0 : index
    %c0_113 = arith.constant 0 : index
    %79 = vector.load %arg11[%c0_111, %c0_112, %c0_113] : memref<20x20x32xf32, #tpu.memory_space<vmem>>, vector<16x16x32xf32>
    %80 = vector.shape_cast %79 : vector<16x16x32xf32> to vector<256x32xf32>
    %c0_114 = arith.constant 0 : index
    %c0_115 = arith.constant 0 : index
    %81 = vector.load %arg12[%c0_114, %c0_115] : memref<256x288xf32, #tpu.memory_space<vmem>>, vector<256x32xf32>
    tpu.vector_store %arg12[%c0_114, %c0_115], %80 {strides = array<i32>} : memref<256x288xf32, #tpu.memory_space<vmem>>, vector<256x32xf32>,
    %c0_116 = arith.constant 0 : index
    %c2_117 = arith.constant 2 : index
    %c0_118 = arith.constant 0 : index
    %82 = vector.load %arg11[%c0_116, %c2_117, %c0_118] : memref<20x20x32xf32, #tpu.memory_space<vmem>>, vector<16x16x32xf32>
    %83 = vector.shape_cast %82 : vector<16x16x32xf32> to vector<256x32xf32>
    %c0_119 = arith.constant 0 : index
    %c32_120 = arith.constant 32 : index
    %84 = vector.load %arg12[%c0_119, %c32_120] : memref<256x288xf32, #tpu.memory_space<vmem>>, vector<256x32xf32>
    tpu.vector_store %arg12[%c0_119, %c32_120], %83 {strides = array<i32>} : memref<256x288xf32, #tpu.memory_space<vmem>>, vector<256x32xf32>,
    %c0_121 = arith.constant 0 : index
    %c4_122 = arith.constant 4 : index
    %c0_123 = arith.constant 0 : index
    %85 = vector.load %arg11[%c0_121, %c4_122, %c0_123] : memref<20x20x32xf32, #tpu.memory_space<vmem>>, vector<16x16x32xf32>
    %86 = vector.shape_cast %85 : vector<16x16x32xf32> to vector<256x32xf32>
    %c0_124 = arith.constant 0 : index
    %c64_125 = arith.constant 64 : index
    %87 = vector.load %arg12[%c0_124, %c64_125] : memref<256x288xf32, #tpu.memory_space<vmem>>, vector<256x32xf32>
    tpu.vector_store %arg12[%c0_124, %c64_125], %86 {strides = array<i32>} : memref<256x288xf32, #tpu.memory_space<vmem>>, vector<256x32xf32>,
    %c2_126 = arith.constant 2 : index
    %c0_127 = arith.constant 0 : index
    %c0_128 = arith.constant 0 : index
    %88 = vector.load %arg11[%c2_126, %c0_127, %c0_128] : memref<20x20x32xf32, #tpu.memory_space<vmem>>, vector<16x16x32xf32>
    %89 = vector.shape_cast %88 : vector<16x16x32xf32> to vector<256x32xf32>
    %c0_129 = arith.constant 0 : index
    %c96_130 = arith.constant 96 : index
    %90 = vector.load %arg12[%c0_129, %c96_130] : memref<256x288xf32, #tpu.memory_space<vmem>>, vector<256x32xf32>
    tpu.vector_store %arg12[%c0_129, %c96_130], %89 {strides = array<i32>} : memref<256x288xf32, #tpu.memory_space<vmem>>, vector<256x32xf32>,
    %c2_131 = arith.constant 2 : index
    %c2_132 = arith.constant 2 : index
    %c0_133 = arith.constant 0 : index
    %91 = vector.load %arg11[%c2_131, %c2_132, %c0_133] : memref<20x20x32xf32, #tpu.memory_space<vmem>>, vector<16x16x32xf32>
    %92 = vector.shape_cast %91 : vector<16x16x32xf32> to vector<256x32xf32>
    %c0_134 = arith.constant 0 : index
    %c128_135 = arith.constant 128 : index
    %93 = vector.load %arg12[%c0_134, %c128_135] : memref<256x288xf32, #tpu.memory_space<vmem>>, vector<256x32xf32>
    tpu.vector_store %arg12[%c0_134, %c128_135], %92 {strides = array<i32>} : memref<256x288xf32, #tpu.memory_space<vmem>>, vector<256x32xf32>,
    %c2_136 = arith.constant 2 : index
    %c4_137 = arith.constant 4 : index
    %c0_138 = arith.constant 0 : index
    %94 = vector.load %arg11[%c2_136, %c4_137, %c0_138] : memref<20x20x32xf32, #tpu.memory_space<vmem>>, vector<16x16x32xf32>
    %95 = vector.shape_cast %94 : vector<16x16x32xf32> to vector<256x32xf32>
    %c0_139 = arith.constant 0 : index
    %c160_140 = arith.constant 160 : index
    %96 = vector.load %arg12[%c0_139, %c160_140] : memref<256x288xf32, #tpu.memory_space<vmem>>, vector<256x32xf32>
    tpu.vector_store %arg12[%c0_139, %c160_140], %95 {strides = array<i32>} : memref<256x288xf32, #tpu.memory_space<vmem>>, vector<256x32xf32>,
    %c4_141 = arith.constant 4 : index
    %c0_142 = arith.constant 0 : index
    %c0_143 = arith.constant 0 : index
    %97 = vector.load %arg11[%c4_141, %c0_142, %c0_143] : memref<20x20x32xf32, #tpu.memory_space<vmem>>, vector<16x16x32xf32>
    %98 = vector.shape_cast %97 : vector<16x16x32xf32> to vector<256x32xf32>
    %c0_144 = arith.constant 0 : index
    %c192_145 = arith.constant 192 : index
    %99 = vector.load %arg12[%c0_144, %c192_145] : memref<256x288xf32, #tpu.memory_space<vmem>>, vector<256x32xf32>
    tpu.vector_store %arg12[%c0_144, %c192_145], %98 {strides = array<i32>} : memref<256x288xf32, #tpu.memory_space<vmem>>, vector<256x32xf32>,
    %c4_146 = arith.constant 4 : index
    %c2_147 = arith.constant 2 : index
    %c0_148 = arith.constant 0 : index
    %100 = vector.load %arg11[%c4_146, %c2_147, %c0_148] : memref<20x20x32xf32, #tpu.memory_space<vmem>>, vector<16x16x32xf32>
    %101 = vector.shape_cast %100 : vector<16x16x32xf32> to vector<256x32xf32>
    %c0_149 = arith.constant 0 : index
    %c224_150 = arith.constant 224 : index
    %102 = vector.load %arg12[%c0_149, %c224_150] : memref<256x288xf32, #tpu.memory_space<vmem>>, vector<256x32xf32>
    tpu.vector_store %arg12[%c0_149, %c224_150], %101 {strides = array<i32>} : memref<256x288xf32, #tpu.memory_space<vmem>>, vector<256x32xf32>,
    %c4_151 = arith.constant 4 : index
    %c4_152 = arith.constant 4 : index
    %c0_153 = arith.constant 0 : index
    %103 = vector.load %arg11[%c4_151, %c4_152, %c0_153] : memref<20x20x32xf32, #tpu.memory_space<vmem>>, vector<16x16x32xf32>
    %104 = vector.shape_cast %103 : vector<16x16x32xf32> to vector<256x32xf32>
    %c0_154 = arith.constant 0 : index
    %c256_155 = arith.constant 256 : index
    %105 = vector.load %arg12[%c0_154, %c256_155] : memref<256x288xf32, #tpu.memory_space<vmem>>, vector<256x32xf32>
    tpu.vector_store %arg12[%c0_154, %c256_155], %104 {strides = array<i32>} : memref<256x288xf32, #tpu.memory_space<vmem>>, vector<256x32xf32>,
    %c0_156 = arith.constant 0 : index
    %c0_157 = arith.constant 0 : index
    %106 = vector.load %arg12[%c0_156, %c0_157] : memref<256x288xf32, #tpu.memory_space<vmem>>, vector<256x288xf32>
    %c0_158 = arith.constant 0 : index
    %c0_159 = arith.constant 0 : index
    %107 = vector.load %arg6[%c0_158, %c0_159] : memref<288x32xf32, #tpu.memory_space<vmem>>, vector<288x32xf32>
    %cst_160 = arith.constant dense<0.000000e+00> : vector<256x32xf32>
    %108 = tpu.matmul %106, %107, %cst_160 {dimension_numbers = #tpu.dot_dimension_numbers<[1], [0], [0], [1], [0, 0, 1, 1], [], []>} : vector<256x288xf32>, vector<288x32xf32>, vector<256x32xf32> -> vector<256x32xf32>
    %c0_161 = arith.constant 0 : index
    %c0_162 = arith.constant 0 : index
    %109 = vector.load %arg7[%c0_161, %c0_162] : memref<1x32xf32, #tpu.memory_space<vmem>>, vector<1x32xf32>
    %110 = vector.broadcast %109 : vector<1x32xf32> to vector<256x32xf32>
    %111 = arith.addf %108, %110 : vector<256x32xf32>
    %112 = vector.extract_strided_slice %111 {offsets = [159, 0], sizes = [1, 32], strides = [1, 1]} : vector<256x32xf32> to vector<1x32xf32>
    %113 = vector.broadcast %112 : vector<1x32xf32> to vector<256x32xf32>
    %114 = arith.mulf %111, %113 : vector<256x32xf32>
    %cst_163 = arith.constant 0.000000e+00 : f32
    %115 = vector.broadcast %cst_163 : f32 to vector<256x32xf32>
    %116 = arith.maximumf %114, %115 : vector<256x32xf32>
    %117 = vector.shape_cast %116 : vector<256x32xf32> to vector<16x16x32xf32>
    %c2_164 = arith.constant 2 : index
    %c2_165 = arith.constant 2 : index
    %c0_166 = arith.constant 0 : index
    %118 = vector.load %arg11[%c2_164, %c2_165, %c0_166] : memref<20x20x32xf32, #tpu.memory_space<vmem>>, vector<16x16x32xf32>
    tpu.vector_store %arg11[%c2_164, %c2_165, %c0_166], %117 {strides = array<i32>} : memref<20x20x32xf32, #tpu.memory_space<vmem>>, vector<16x16x32xf32>,
    %c0_167 = arith.constant 0 : index
    %c0_168 = arith.constant 0 : index
    %c0_169 = arith.constant 0 : index
    %119 = vector.load %arg11[%c0_167, %c0_168, %c0_169] : memref<20x20x32xf32, #tpu.memory_space<vmem>>, vector<16x16x32xf32>
    %120 = vector.shape_cast %119 : vector<16x16x32xf32> to vector<256x32xf32>
    %c0_170 = arith.constant 0 : index
    %c0_171 = arith.constant 0 : index
    %121 = vector.load %arg12[%c0_170, %c0_171] : memref<256x288xf32, #tpu.memory_space<vmem>>, vector<256x32xf32>
    tpu.vector_store %arg12[%c0_170, %c0_171], %120 {strides = array<i32>} : memref<256x288xf32, #tpu.memory_space<vmem>>, vector<256x32xf32>,
    %c0_172 = arith.constant 0 : index
    %c2_173 = arith.constant 2 : index
    %c0_174 = arith.constant 0 : index
    %122 = vector.load %arg11[%c0_172, %c2_173, %c0_174] : memref<20x20x32xf32, #tpu.memory_space<vmem>>, vector<16x16x32xf32>
    %123 = vector.shape_cast %122 : vector<16x16x32xf32> to vector<256x32xf32>
    %c0_175 = arith.constant 0 : index
    %c32_176 = arith.constant 32 : index
    %124 = vector.load %arg12[%c0_175, %c32_176] : memref<256x288xf32, #tpu.memory_space<vmem>>, vector<256x32xf32>
    tpu.vector_store %arg12[%c0_175, %c32_176], %123 {strides = array<i32>} : memref<256x288xf32, #tpu.memory_space<vmem>>, vector<256x32xf32>,
    %c0_177 = arith.constant 0 : index
    %c4_178 = arith.constant 4 : index
    %c0_179 = arith.constant 0 : index
    %125 = vector.load %arg11[%c0_177, %c4_178, %c0_179] : memref<20x20x32xf32, #tpu.memory_space<vmem>>, vector<16x16x32xf32>
    %126 = vector.shape_cast %125 : vector<16x16x32xf32> to vector<256x32xf32>
    %c0_180 = arith.constant 0 : index
    %c64_181 = arith.constant 64 : index
    %127 = vector.load %arg12[%c0_180, %c64_181] : memref<256x288xf32, #tpu.memory_space<vmem>>, vector<256x32xf32>
    tpu.vector_store %arg12[%c0_180, %c64_181], %126 {strides = array<i32>} : memref<256x288xf32, #tpu.memory_space<vmem>>, vector<256x32xf32>,
    %c2_182 = arith.constant 2 : index
    %c0_183 = arith.constant 0 : index
    %c0_184 = arith.constant 0 : index
    %128 = vector.load %arg11[%c2_182, %c0_183, %c0_184] : memref<20x20x32xf32, #tpu.memory_space<vmem>>, vector<16x16x32xf32>
    %129 = vector.shape_cast %128 : vector<16x16x32xf32> to vector<256x32xf32>
    %c0_185 = arith.constant 0 : index
    %c96_186 = arith.constant 96 : index
    %130 = vector.load %arg12[%c0_185, %c96_186] : memref<256x288xf32, #tpu.memory_space<vmem>>, vector<256x32xf32>
    tpu.vector_store %arg12[%c0_185, %c96_186], %129 {strides = array<i32>} : memref<256x288xf32, #tpu.memory_space<vmem>>, vector<256x32xf32>,
    %c2_187 = arith.constant 2 : index
    %c2_188 = arith.constant 2 : index
    %c0_189 = arith.constant 0 : index
    %131 = vector.load %arg11[%c2_187, %c2_188, %c0_189] : memref<20x20x32xf32, #tpu.memory_space<vmem>>, vector<16x16x32xf32>
    %132 = vector.shape_cast %131 : vector<16x16x32xf32> to vector<256x32xf32>
    %c0_190 = arith.constant 0 : index
    %c128_191 = arith.constant 128 : index
    %133 = vector.load %arg12[%c0_190, %c128_191] : memref<256x288xf32, #tpu.memory_space<vmem>>, vector<256x32xf32>
    tpu.vector_store %arg12[%c0_190, %c128_191], %132 {strides = array<i32>} : memref<256x288xf32, #tpu.memory_space<vmem>>, vector<256x32xf32>,
    %c2_192 = arith.constant 2 : index
    %c4_193 = arith.constant 4 : index
    %c0_194 = arith.constant 0 : index
    %134 = vector.load %arg11[%c2_192, %c4_193, %c0_194] : memref<20x20x32xf32, #tpu.memory_space<vmem>>, vector<16x16x32xf32>
    %135 = vector.shape_cast %134 : vector<16x16x32xf32> to vector<256x32xf32>
    %c0_195 = arith.constant 0 : index
    %c160_196 = arith.constant 160 : index
    %136 = vector.load %arg12[%c0_195, %c160_196] : memref<256x288xf32, #tpu.memory_space<vmem>>, vector<256x32xf32>
    tpu.vector_store %arg12[%c0_195, %c160_196], %135 {strides = array<i32>} : memref<256x288xf32, #tpu.memory_space<vmem>>, vector<256x32xf32>,
    %c4_197 = arith.constant 4 : index
    %c0_198 = arith.constant 0 : index
    %c0_199 = arith.constant 0 : index
    %137 = vector.load %arg11[%c4_197, %c0_198, %c0_199] : memref<20x20x32xf32, #tpu.memory_space<vmem>>, vector<16x16x32xf32>
    %138 = vector.shape_cast %137 : vector<16x16x32xf32> to vector<256x32xf32>
    %c0_200 = arith.constant 0 : index
    %c192_201 = arith.constant 192 : index
    %139 = vector.load %arg12[%c0_200, %c192_201] : memref<256x288xf32, #tpu.memory_space<vmem>>, vector<256x32xf32>
    tpu.vector_store %arg12[%c0_200, %c192_201], %138 {strides = array<i32>} : memref<256x288xf32, #tpu.memory_space<vmem>>, vector<256x32xf32>,
    %c4_202 = arith.constant 4 : index
    %c2_203 = arith.constant 2 : index
    %c0_204 = arith.constant 0 : index
    %140 = vector.load %arg11[%c4_202, %c2_203, %c0_204] : memref<20x20x32xf32, #tpu.memory_space<vmem>>, vector<16x16x32xf32>
    %141 = vector.shape_cast %140 : vector<16x16x32xf32> to vector<256x32xf32>
    %c0_205 = arith.constant 0 : index
    %c224_206 = arith.constant 224 : index
    %142 = vector.load %arg12[%c0_205, %c224_206] : memref<256x288xf32, #tpu.memory_space<vmem>>, vector<256x32xf32>
    tpu.vector_store %arg12[%c0_205, %c224_206], %141 {strides = array<i32>} : memref<256x288xf32, #tpu.memory_space<vmem>>, vector<256x32xf32>,
    %c4_207 = arith.constant 4 : index
    %c4_208 = arith.constant 4 : index
    %c0_209 = arith.constant 0 : index
    %143 = vector.load %arg11[%c4_207, %c4_208, %c0_209] : memref<20x20x32xf32, #tpu.memory_space<vmem>>, vector<16x16x32xf32>
    %144 = vector.shape_cast %143 : vector<16x16x32xf32> to vector<256x32xf32>
    %c0_210 = arith.constant 0 : index
    %c256_211 = arith.constant 256 : index
    %145 = vector.load %arg12[%c0_210, %c256_211] : memref<256x288xf32, #tpu.memory_space<vmem>>, vector<256x32xf32>
    tpu.vector_store %arg12[%c0_210, %c256_211], %144 {strides = array<i32>} : memref<256x288xf32, #tpu.memory_space<vmem>>, vector<256x32xf32>,
    %c0_212 = arith.constant 0 : index
    %c0_213 = arith.constant 0 : index
    %146 = vector.load %arg12[%c0_212, %c0_213] : memref<256x288xf32, #tpu.memory_space<vmem>>, vector<256x288xf32>
    %c0_214 = arith.constant 0 : index
    %c0_215 = arith.constant 0 : index
    %147 = vector.load %arg8[%c0_214, %c0_215] : memref<288x4xf32, #tpu.memory_space<vmem>>, vector<288x4xf32>
    %cst_216 = arith.constant dense<0.000000e+00> : vector<256x4xf32>
    %148 = tpu.matmul %146, %147, %cst_216 {dimension_numbers = #tpu.dot_dimension_numbers<[1], [0], [0], [1], [0, 0, 1, 1], [], []>} : vector<256x288xf32>, vector<288x4xf32>, vector<256x4xf32> -> vector<256x4xf32>
    %c0_217 = arith.constant 0 : index
    %c0_218 = arith.constant 0 : index
    %149 = vector.load %arg9[%c0_217, %c0_218] : memref<1x4xf32, #tpu.memory_space<vmem>>, vector<1x4xf32>
    %150 = vector.broadcast %149 : vector<1x4xf32> to vector<256x4xf32>
    %151 = arith.addf %148, %150 : vector<256x4xf32>
    %152 = vector.shape_cast %151 : vector<256x4xf32> to vector<1x16x16x4xf32>
    %c0_219 = arith.constant 0 : index
    %c0_220 = arith.constant 0 : index
    %c0_221 = arith.constant 0 : index
    %c0_222 = arith.constant 0 : index
    %153 = vector.load %arg10[%c0_219, %c0_220, %c0_221, %c0_222] : memref<1x16x16x4xf32, #tpu.memory_space<vmem>>, vector<1x16x16x4xf32>
    tpu.vector_store %arg10[%c0_219, %c0_220, %c0_221, %c0_222], %152 {strides = array<i32>} : memref<1x16x16x4xf32, #tpu.memory_space<vmem>>, vector<1x16x16x4xf32>,
    return
  }
  func.func @transform_0(%arg0: i32) -> (i32, i32, i32, i32) {
    %c0_i32 = arith.constant 0 : i32
    %c0_i32_0 = arith.constant 0 : i32
    %c0_i32_1 = arith.constant 0 : i32
    %c0_i32_2 = arith.constant 0 : i32
    return %arg0, %c0_i32, %c0_i32_0, %c0_i32_1 : i32, i32, i32, i32
  }
  func.func @transform_1(%arg0: i32) -> (i32, i32) {
    %c0_i32 = arith.constant 0 : i32
    %c0_i32_0 = arith.constant 0 : i32
    %c0_i32_1 = arith.constant 0 : i32
    return %c0_i32, %c0_i32_0 : i32, i32
  }
  func.func @transform_2(%arg0: i32) -> (i32, i32) {
    %c0_i32 = arith.constant 0 : i32
    %c0_i32_0 = arith.constant 0 : i32
    %c0_i32_1 = arith.constant 0 : i32
    return %c0_i32, %c0_i32_0 : i32, i32
  }
  func.func @transform_3(%arg0: i32) -> (i32, i32) {
    %c0_i32 = arith.constant 0 : i32
    %c0_i32_0 = arith.constant 0 : i32
    %c0_i32_1 = arith.constant 0 : i32
    return %c0_i32, %c0_i32_0 : i32, i32
  }
  func.func @transform_4(%arg0: i32) -> (i32, i32) {
    %c0_i32 = arith.constant 0 : i32
    %c0_i32_0 = arith.constant 0 : i32
    %c0_i32_1 = arith.constant 0 : i32
    return %c0_i32, %c0_i32_0 : i32, i32
  }
  func.func @transform_5(%arg0: i32) -> (i32, i32) {
    %c0_i32 = arith.constant 0 : i32
    %c0_i32_0 = arith.constant 0 : i32
    %c0_i32_1 = arith.constant 0 : i32
    return %c0_i32, %c0_i32_0 : i32, i32
  }
  func.func @transform_6(%arg0: i32) -> (i32, i32) {
    %c0_i32 = arith.constant 0 : i32
    %c0_i32_0 = arith.constant 0 : i32
    %c0_i32_1 = arith.constant 0 : i32
    return %c0_i32, %c0_i32_0 : i32, i32
  }
  func.func @transform_7(%arg0: i32) -> (i32, i32) {
    %c0_i32 = arith.constant 0 : i32
    %c0_i32_0 = arith.constant 0 : i32
    %c0_i32_1 = arith.constant 0 : i32
    return %c0_i32, %c0_i32_0 : i32, i32
  }
  func.func @transform_8(%arg0: i32) -> (i32, i32) {
    %c0_i32 = arith.constant 0 : i32
    %c0_i32_0 = arith.constant 0 : i32
    %c0_i32_1 = arith.constant 0 : i32
    return %c0_i32, %c0_i32_0 : i32, i32
  }
  func.func @transform_9(%arg0: i32) -> (i32, i32, i32, i32) {
    %c0_i32 = arith.constant 0 : i32
    %c0_i32_0 = arith.constant 0 : i32
    %c0_i32_1 = arith.constant 0 : i32
    %c0_i32_2 = arith.constant 0 : i32
    return %arg0, %c0_i32, %c0_i32_0, %c0_i32_1 : i32, i32, i32, i32
  }
}

</mosaic_0001>

<bundles_post_ra>
// kernel: simplenet_forward.1
= control target key start
LH: loop header
LB: loop body
LE: loop exit
PB: predicated region body
PF: predicated region fallthrough
CT: control target
= control target key end

     0   :  { %s9578_s30 = smov 0   ;;  %s14417_s0 = inlined_call_operand.vmem [shape: f32[2,16,16,3], index: 0, kind: input, shape index: {}]   ;;  %s14418_s1 = inlined_call_operand.vmem [shape: f32[288,32], index: 1, kind: input, shape index: {}]   ;;  %s14419_s2 = inlined_call_operand.vmem [shape: f32[1,32], index: 2, kind: input, shape index: {}]   ;;  %s14420_s3 = inlined_call_operand.vmem [shape: f32[288,32], index: 3, kind: input, shape index: {}]   ;;  %s14421_s4 = inlined_call_operand.vmem [shape: f32[1,32], index: 4, kind: input, shape index: {}]   ;;  %s14422_s5 = inlined_call_operand.vmem [shape: f32[288,32], index: 5, kind: input, shape index: {}]   ;;  %s14423_s6 = inlined_call_operand.vmem [shape: f32[1,32], index: 6, kind: input, shape index: {}]   ;;  %s14424_s7 = inlined_call_operand.vmem [shape: f32[288,4], index: 7, kind: input, shape index: {}]   ;;  %s14425_s8 = inlined_call_operand.vmem [shape: f32[1,4], index: 8, kind: input, shape index: {}]   ;;  %s14426_s9 = inlined_call_operand.vmem [shape: f32[2,16,16,4], index: 9, kind: output, shape index: {}]  }
   0x1 LB: > { %s8897_s10 = sadd.s32 4294967295, %s9522_s30   ;;  %p8901_p0 = scmp.ge.s32.totalorder %s9522_s30, 1  ;;  %s9522_s30 = sphi %s9578_s30, %s19_s30  }
   0x2   : > { %p287_p1 = scmp.lt.s32.totalorder %s9522_s30, 3 }
   0x4   : > { %p288_p2 = pnand %p8901_p0, %p287_p1 }
   0x6   : > { %291 = sbr.rel (%p288_p2) target bundleno = 2483 (0x9b3), region = 56 }
   0xb   : > { %vm333_vm0 = vcmask 261120   ;;  %vm336_vm1 = vcmask 257024   ;;  %p9588_p3 = scmp.lt.s32.totalorder %s8897_s10, 1  ;;  %v14427_v0 = vmov 0.0   ;;  %vm428_vm2 = vcmask 23552   ;;  %s9525_s16 = smov 32  }
   0xc   : > { %334 = vst.msk [vmem:[#allocation2] sm:$0xff] %vm333_vm0, %v14427_v0  ;;  %335 = vst.msk [vmem:[#allocation2 + $0x8] sm:$0xff] %vm333_vm0, %v14427_v0  ;;  %2044 = vmatprep.subr.mxu0 %v14427_v0  ;;  %s9526_s17 = smov 64   ;;  %vm685_vm3 = vcmask 523520   ;;  %s9527_s18 = smov 96   ;;  %vm878_vm4 = vcmask 785920  }
   0xd   : > { %338 = vst.msk [vmem:[#allocation2 + $0x18] sm:$0xff] %vm333_vm0, %v14427_v0  ;;  %339 = vst.msk [vmem:[#allocation2 + $0x20] sm:$0xff] %vm333_vm0, %v14427_v0  ;;  %s14492_s10 = smov (!%p9588_p3, %s8897_s10), 1  ;;  %vm1071_vm5 = vcmask 1048320   ;;  %vm8809_vm6 = vcmask 31744  }
   0xe   : > { %341 = vst.msk [vmem:[#allocation2 + $0x30] sm:$0xff] %vm333_vm0, %v14427_v0  ;;  %342 = vst.msk [vmem:[#allocation2 + $0x38] sm:$0xff] %vm333_vm0, %v14427_v0  ;;  %s9040_s12 = sshll.u32 %s14492_s10, 8 }
   0xf   : > { %344 = vst.msk [vmem:[#allocation2 + $0x48] sm:$0xff] %vm333_vm0, %v14427_v0  ;;  %345 = vst.msk [vmem:[#allocation2 + $0x50] sm:$0xff] %vm333_vm0, %v14427_v0  ;;  %s9725_s15 = scalar_lea.vmem %s14417_s0, %s9040_s12  ;;  %s14280_s20 = scalar_lea.vmem %s14426_s9, %s9040_s12 }
  0x10   : > { %347 = vst.msk [vmem:[#allocation2 + $0x60] sm:$0xff] %vm333_vm0, %v14427_v0  ;;  %348 = vst.msk [vmem:[#allocation2 + $0x68] sm:$0xff] %vm333_vm0, %v14427_v0  ;;  %v395_v1 = vld [vmem:[%s9725_s15] sm:$0xff]  ;;  %v396_v2 = vld [vmem:[%s9725_s15 + $0x8] sm:$0xff] }
  0x11   : > { %350 = vst.msk [vmem:[#allocation2 + $0x78] sm:$0xff] %vm333_vm0, %v14427_v0  ;;  %351 = vst.msk [vmem:[#allocation2 + $0x80] sm:$0xff] %vm333_vm0, %v14427_v0  ;;  %v397_v3 = vld [vmem:[%s9725_s15 + $0x10] sm:$0xff]  ;;  %v398_v4 = vld [vmem:[%s9725_s15 + $0x18] sm:$0xff] }
  0x12   : > { %353 = vst.msk [vmem:[#allocation2 + $0x90] sm:$0xff] %vm333_vm0, %v14427_v0  ;;  %354 = vst.msk [vmem:[#allocation2 + $0x98] sm:$0xff] %vm333_vm0, %v14427_v0  ;;  %v399_v5 = vld [vmem:[%s9725_s15 + $0x20] sm:$0xff]  ;;  %v400_v6 = vld [vmem:[%s9725_s15 + $0x28] sm:$0xff] }
  0x13   : > { %356 = vst.msk [vmem:[#allocation2 + $0xa8] sm:$0xff] %vm333_vm0, %v14427_v0  ;;  %357 = vst.msk [vmem:[#allocation2 + $0xb0] sm:$0xff] %vm333_vm0, %v14427_v0  ;;  %v525_v7 = vld [vmem:[#allocation2 + $0x2] sm:$0xff]  ;;  %v401_v11 = vld [vmem:[%s9725_s15 + $0x30] sm:$0xff] }
  0x14   : > { %359 = vst.msk [vmem:[#allocation2 + $0xc0] sm:$0xff] %vm333_vm0, %v14427_v0  ;;  %360 = vst.msk [vmem:[#allocation2 + $0xc8] sm:$0xff] %vm333_vm0, %v14427_v0  ;;  %v527_v8 = vld [vmem:[#allocation2 + $0x1a] sm:$0xff]  ;;  %589 = vrot.lane.b32.xlu0 %v525_v7, %s9525_s16  ;;  %v404_v14 = vld [vmem:[%s9725_s15 + $0x48] sm:$0xff] }
  0x15   : > { %362 = vst.msk [vmem:[#allocation2 + $0xd8] sm:$0xff] %vm333_vm0, %v14427_v0  ;;  %363 = vst.msk [vmem:[#allocation2 + $0xe0] sm:$0xff] %vm333_vm0, %v14427_v0  ;;  %593 = vrot.lane.b32.xlu1 %v527_v8, %s9525_s16  ;;  %v402_v12 = vld [vmem:[%s9725_s15 + $0x38] sm:$0xff]  ;;  %v403_v13 = vld [vmem:[%s9725_s15 + $0x40] sm:$0xff] }
  0x16   : > { %365 = vst.msk [vmem:[#allocation2 + $0xf0] sm:$0xff] %vm333_vm0, %v14427_v0  ;;  %366 = vst.msk [vmem:[#allocation2 + $0xf8] sm:$0xff] %vm333_vm0, %v14427_v0  ;;  %v405_v15 = vld [vmem:[%s9725_s15 + $0x50] sm:$0xff]  ;;  %v406_v16 = vld [vmem:[%s9725_s15 + $0x58] sm:$0xff] }
  0x17   : > { %368 = vst.msk [vmem:[#allocation2 + $0x108] sm:$0xff] %vm333_vm0, %v14427_v0  ;;  %369 = vst.msk [vmem:[#allocation2 + $0x110] sm:$0xff] %vm333_vm0, %v14427_v0  ;;  %v407_v17 = vld [vmem:[%s9725_s15 + $0x60] sm:$0xff]  ;;  %v408_v18 = vld [vmem:[%s9725_s15 + $0x68] sm:$0xff] }
  0x18   : > { %371 = vst.msk [vmem:[#allocation2 + $0x120] sm:$0xff] %vm333_vm0, %v14427_v0  ;;  %372 = vst.msk [vmem:[#allocation2 + $0x128] sm:$0xff] %vm333_vm0, %v14427_v0  ;;  %v409_v19 = vld [vmem:[%s9725_s15 + $0x70] sm:$0xff]  ;;  %v410_v20 = vld [vmem:[%s9725_s15 + $0x78] sm:$0xff] }
  0x19   : > { %374 = vst.msk [vmem:[#allocation2 + $0x138] sm:$0xff] %vm333_vm0, %v14427_v0  ;;  %375 = vst.msk [vmem:[#allocation2 + $0x140] sm:$0xff] %vm333_vm0, %v14427_v0  ;;  %v411_v21 = vld [vmem:[%s9725_s15 + $0x80] sm:$0xff]  ;;  %v412_v22 = vld [vmem:[%s9725_s15 + $0x88] sm:$0xff] }
  0x1a   : > { %377 = vst.msk [vmem:[#allocation2 + $0x150] sm:$0xff] %vm333_vm0, %v14427_v0  ;;  %378 = vst.msk [vmem:[#allocation2 + $0x158] sm:$0xff] %vm333_vm0, %v14427_v0  ;;  %v413_v23 = vld [vmem:[%s9725_s15 + $0x90] sm:$0xff]  ;;  %v414_v26 = vld [vmem:[%s9725_s15 + $0x98] sm:$0xff] }
  0x1b   : > { %380 = vst.msk [vmem:[#allocation2 + $0x168] sm:$0xff] %vm333_vm0, %v14427_v0  ;;  %381 = vst.msk [vmem:[#allocation2 + $0x170] sm:$0xff] %vm333_vm0, %v14427_v0  ;;  %v415_v27 = vld [vmem:[%s9725_s15 + $0xa0] sm:$0xff]  ;;  %v416_v28 = vld [vmem:[%s9725_s15 + $0xa8] sm:$0xff] }
  0x1c   : > { %383 = vst.msk [vmem:[#allocation2 + $0x180] sm:$0xff] %vm333_vm0, %v14427_v0  ;;  %384 = vst.msk [vmem:[#allocation2 + $0x188] sm:$0xff] %vm333_vm0, %v14427_v0  ;;  %v417_v29 = vld [vmem:[%s9725_s15 + $0xb0] sm:$0xff]  ;;  %v418_v34 = vld [vmem:[%s9725_s15 + $0xb8] sm:$0xff] }
  0x1d   : > { %386 = vst.msk [vmem:[#allocation2 + $0x198] sm:$0xff] %vm333_vm0, %v14427_v0  ;;  %387 = vst.msk [vmem:[#allocation2 + $0x1a0] sm:$0xff] %vm333_vm0, %v14427_v0  ;;  %v419_v35 = vld [vmem:[%s9725_s15 + $0xc0] sm:$0xff]  ;;  %v420_v36 = vld [vmem:[%s9725_s15 + $0xc8] sm:$0xff] }
  0x1e   : > { %389 = vst.msk [vmem:[#allocation2 + $0x1b0] sm:$0xff] %vm333_vm0, %v14427_v0  ;;  %390 = vst.msk [vmem:[#allocation2 + $0x1b8] sm:$0xff] %vm333_vm0, %v14427_v0  ;;  %v421_v37 = vld [vmem:[%s9725_s15 + $0xd0] sm:$0xff]  ;;  %v422_v38 = vld [vmem:[%s9725_s15 + $0xd8] sm:$0xff] }
  0x1f   : > { %392 = vst.msk [vmem:[#allocation2 + $0x1c8] sm:$0xff] %vm333_vm0, %v14427_v0  ;;  %393 = vst.msk [vmem:[#allocation2 + $0x1d0] sm:$0xff] %vm333_vm0, %v14427_v0  ;;  %v461_v45 = vld [vmem:[#allocation2] sm:$0xff]  ;;  %v463_v46 = vld [vmem:[#allocation2 + $0x18] sm:$0xff] }
  0x20   : > { %337 = vst.msk [vmem:[#allocation2 + $0x10] sm:$0xf] %vm336_vm1, %v14427_v0  ;;  %340 = vst.msk [vmem:[#allocation2 + $0x28] sm:$0xf] %vm336_vm1, %v14427_v0  ;;  %v462_v47 = vld [vmem:[#allocation2 + $0x8] sm:$0xff]  ;;  %v464_v48 = vld [vmem:[#allocation2 + $0x20] sm:$0xff] }
  0x21   : > { %343 = vst.msk [vmem:[#allocation2 + $0x40] sm:$0xf] %vm336_vm1, %v14427_v0  ;;  %346 = vst.msk [vmem:[#allocation2 + $0x58] sm:$0xf] %vm336_vm1, %v14427_v0 }
  0x22   : > { %349 = vst.msk [vmem:[#allocation2 + $0x70] sm:$0xf] %vm336_vm1, %v14427_v0  ;;  %352 = vst.msk [vmem:[#allocation2 + $0x88] sm:$0xf] %vm336_vm1, %v14427_v0 }
  0x23   : > { %355 = vst.msk [vmem:[#allocation2 + $0xa0] sm:$0xf] %vm336_vm1, %v14427_v0  ;;  %358 = vst.msk [vmem:[#allocation2 + $0xb8] sm:$0xf] %vm336_vm1, %v14427_v0 }
  0x24   : > { %361 = vst.msk [vmem:[#allocation2 + $0xd0] sm:$0xf] %vm336_vm1, %v14427_v0  ;;  %364 = vst.msk [vmem:[#allocation2 + $0xe8] sm:$0xf] %vm336_vm1, %v14427_v0 }
  0x25   : > { %367 = vst.msk [vmem:[#allocation2 + $0x100] sm:$0xf] %vm336_vm1, %v14427_v0  ;;  %370 = vst.msk [vmem:[#allocation2 + $0x118] sm:$0xf] %vm336_vm1, %v14427_v0 }
  0x26   : > { %373 = vst.msk [vmem:[#allocation2 + $0x130] sm:$0xf] %vm336_vm1, %v14427_v0  ;;  %376 = vst.msk [vmem:[#allocation2 + $0x148] sm:$0xf] %vm336_vm1, %v14427_v0 }
  0x27   : > { %379 = vst.msk [vmem:[#allocation2 + $0x160] sm:$0xf] %vm336_vm1, %v14427_v0  ;;  %382 = vst.msk [vmem:[#allocation2 + $0x178] sm:$0xf] %vm336_vm1, %v14427_v0  ;;  %v526_v9 = vld [vmem:[#allocation2 + $0xa] sm:$0xff]  ;;  %v528_v10 = vld [vmem:[#allocation2 + $0x22] sm:$0xff] }
  0x28   : > { %385 = vst.msk [vmem:[#allocation2 + $0x190] sm:$0xf] %vm336_vm1, %v14427_v0  ;;  %388 = vst.msk [vmem:[#allocation2 + $0x1a8] sm:$0xf] %vm336_vm1, %v14427_v0  ;;  %591 = vrot.lane.b32.xlu0 %v526_v9, %s9525_s16  ;;  %595 = vrot.lane.b32.xlu1 %v528_v10, %s9525_s16 }
  0x29   : > { %391 = vst.msk [vmem:[#allocation2 + $0x1c0] sm:$0xf] %vm336_vm1, %v14427_v0  ;;  %394 = vst.msk [vmem:[#allocation2 + $0x1d8] sm:$0xf] %vm336_vm1, %v14427_v0 }
  0x2a   : > { %429 = vst.msk [vmem:[#allocation2 + $0x32] sm:$0xff] %vm428_vm2, %v395_v1  ;;  %430 = vst.msk [vmem:[#allocation2 + $0x3a] sm:$0xff] %vm428_vm2, %v396_v2 }
  0x2b   : > { %431 = vst.msk [vmem:[#allocation2 + $0x4a] sm:$0xff] %vm428_vm2, %v397_v3  ;;  %432 = vst.msk [vmem:[#allocation2 + $0x52] sm:$0xff] %vm428_vm2, %v398_v4 }
  0x2c   : > { %433 = vst.msk [vmem:[#allocation2 + $0x62] sm:$0xff] %vm428_vm2, %v399_v5  ;;  %434 = vst.msk [vmem:[#allocation2 + $0x6a] sm:$0xff] %vm428_vm2, %v400_v6 }
  0x2d   : > { %435 = vst.msk [vmem:[#allocation2 + $0x7a] sm:$0xff] %vm428_vm2, %v401_v11  ;;  %436 = vst.msk [vmem:[#allocation2 + $0x82] sm:$0xff] %vm428_vm2, %v402_v12 }
  0x2e   : > { %437 = vst.msk [vmem:[#allocation2 + $0x92] sm:$0xff] %vm428_vm2, %v403_v13  ;;  %438 = vst.msk [vmem:[#allocation2 + $0x9a] sm:$0xff] %vm428_vm2, %v404_v14 }
  0x2f   : > { %439 = vst.msk [vmem:[#allocation2 + $0xaa] sm:$0xff] %vm428_vm2, %v405_v15  ;;  %440 = vst.msk [vmem:[#allocation2 + $0xb2] sm:$0xff] %vm428_vm2, %v406_v16 }
  0x30   : > { %441 = vst.msk [vmem:[#allocation2 + $0xc2] sm:$0xff] %vm428_vm2, %v407_v17  ;;  %442 = vst.msk [vmem:[#allocation2 + $0xca] sm:$0xff] %vm428_vm2, %v408_v18 }
  0x31   : > { %443 = vst.msk [vmem:[#allocation2 + $0xda] sm:$0xff] %vm428_vm2, %v409_v19  ;;  %444 = vst.msk [vmem:[#allocation2 + $0xe2] sm:$0xff] %vm428_vm2, %v410_v20  ;;  %v529_v24 = vld [vmem:[#allocation2 + $0x32] sm:$0xff]  ;;  %v530_v25 = vld [vmem:[#allocation2 + $0x3a] sm:$0xff] }
  0x32   : > { %445 = vst.msk [vmem:[#allocation2 + $0xf2] sm:$0xff] %vm428_vm2, %v411_v21  ;;  %446 = vst.msk [vmem:[#allocation2 + $0xfa] sm:$0xff] %vm428_vm2, %v412_v22  ;;  %597 = vrot.lane.b32.xlu0 %v529_v24, %s9525_s16  ;;  %599 = vrot.lane.b32.xlu1 %v530_v25, %s9525_s16  ;;  %v531_v30 = vld [vmem:[#allocation2 + $0x4a] sm:$0xff]  ;;  %v532_v31 = vld [vmem:[#allocation2 + $0x52] sm:$0xff] }
  0x33   : > { %447 = vst.msk [vmem:[#allocation2 + $0x10a] sm:$0xff] %vm428_vm2, %v413_v23  ;;  %448 = vst.msk [vmem:[#allocation2 + $0x112] sm:$0xff] %vm428_vm2, %v414_v26  ;;  %v9781_v32 = vld [vmem:[#allocation2 + $0x62] sm:$0xff]  ;;  %v9783_v33 = vld [vmem:[#allocation2 + $0x6a] sm:$0xff] }
  0x34   : > { %449 = vst.msk [vmem:[#allocation2 + $0x122] sm:$0xff] %vm428_vm2, %v415_v27  ;;  %450 = vst.msk [vmem:[#allocation2 + $0x12a] sm:$0xff] %vm428_vm2, %v416_v28  ;;  %v9799_v39 = vld [vmem:[#allocation2 + $0x7a] sm:$0xff]  ;;  %v536_v40 = vld [vmem:[#allocation2 + $0x82] sm:$0xff] }
  0x35   : > { %451 = vst.msk [vmem:[#allocation2 + $0x13a] sm:$0xff] %vm428_vm2, %v417_v29  ;;  %452 = vst.msk [vmem:[#allocation2 + $0x142] sm:$0xff] %vm428_vm2, %v418_v34  ;;  %v537_v41 = vld [vmem:[#allocation2 + $0x92] sm:$0xff]  ;;  %v538_v42 = vld [vmem:[#allocation2 + $0x9a] sm:$0xff] }
  0x36   : > { %601 = vrot.lane.b32.xlu0 %v531_v30, %s9525_s16  ;;  %603 = vrot.lane.b32.xlu1 %v532_v31, %s9525_s16  ;;  %453 = vst.msk [vmem:[#allocation2 + $0x152] sm:$0xff] %vm428_vm2, %v419_v35  ;;  %454 = vst.msk [vmem:[#allocation2 + $0x15a] sm:$0xff] %vm428_vm2, %v420_v36  ;;  %v539_v43 = vld [vmem:[#allocation2 + $0xaa] sm:$0xff]  ;;  %v540_v44 = vld [vmem:[#allocation2 + $0xb2] sm:$0xff] }
  0x37   : > { %455 = vst.msk [vmem:[#allocation2 + $0x16a] sm:$0xff] %vm428_vm2, %v421_v37  ;;  %456 = vst.msk [vmem:[#allocation2 + $0x172] sm:$0xff] %vm428_vm2, %v422_v38  ;;  %v9812_v49 = vld [vmem:[#allocation2 + $0x30] sm:$0xff]  ;;  %v9814_v50 = vld [vmem:[#allocation2 + $0x38] sm:$0xff] }
  0x38   : > { %493 = vst.msk [vmem:[#allocation3] sm:$0xff] %vm333_vm0, %v461_v45  ;;  %495 = vst.msk [vmem:[#allocation3 + $0x30] sm:$0xff] %vm333_vm0, %v463_v46  ;;  %v541_v51 = vld [vmem:[#allocation2 + $0xc2] sm:$0xff]  ;;  %v542_v52 = vld [vmem:[#allocation2 + $0xca] sm:$0xff] }
  0x39   : > { %494 = vst.msk [vmem:[#allocation3 + $0x18] sm:$0xff] %vm333_vm0, %v462_v47  ;;  %496 = vst.msk [vmem:[#allocation3 + $0x48] sm:$0xff] %vm333_vm0, %v464_v48  ;;  %v9820_v53 = vld [vmem:[#allocation2 + $0x48] sm:$0xff]  ;;  %v9824_v54 = vld [vmem:[#allocation2 + $0x50] sm:$0xff] }
  0x3a   : > { %605 = vrot.lane.b32.xlu0 %v9781_v32, %s9525_s16  ;;  %607 = vrot.lane.b32.xlu1 %v9783_v33, %s9525_s16  ;;  %497 = vst.msk [vmem:[#allocation3 + $0x60] sm:$0xff] %vm333_vm0, %v9812_v49  ;;  %498 = vst.msk [vmem:[#allocation3 + $0x78] sm:$0xff] %vm333_vm0, %v9814_v50  ;;  %v9826_v55 = vld [vmem:[#allocation2 + $0x60] sm:$0xff]  ;;  %v9828_v56 = vld [vmem:[#allocation2 + $0x68] sm:$0xff] }
  0x3b   : > { %499 = vst.msk [vmem:[#allocation3 + $0x90] sm:$0xff] %vm333_vm0, %v9820_v53  ;;  %v543_v57 = vld [vmem:[#allocation2 + $0xda] sm:$0xff]  ;;  %v544_v58 = vld [vmem:[#allocation2 + $0xe2] sm:$0xff]  ;;  %500 = vst.msk [vmem:[#allocation3 + $0xa8] sm:$0xff] %vm333_vm0, %v9824_v54 }
  0x3c   : > { %501 = vst.msk [vmem:[#allocation3 + $0xc0] sm:$0xff] %vm333_vm0, %v9826_v55  ;;  %502 = vst.msk [vmem:[#allocation3 + $0xd8] sm:$0xff] %vm333_vm0, %v9828_v56  ;;  %v9836_v59 = vld [vmem:[#allocation2 + $0x78] sm:$0xff]  ;;  %v9838_v60 = vld [vmem:[#allocation2 + $0x80] sm:$0xff] }
  0x3d   : > { %v9840_v61 = vld [vmem:[#allocation2 + $0x90] sm:$0xff]  ;;  %503 = vst.msk [vmem:[#allocation3 + $0xf0] sm:$0xff] %vm333_vm0, %v9836_v59  ;;  %504 = vst.msk [vmem:[#allocation3 + $0x108] sm:$0xff] %vm333_vm0, %v9838_v60  ;;  %v9850_v62 = vld [vmem:[#allocation2 + $0x98] sm:$0xff] }
  0x3e   : > { %609 = vrot.lane.b32.xlu0 %v9799_v39, %s9525_s16  ;;  %611 = vrot.lane.b32.xlu1 %v536_v40, %s9525_s16  ;;  %505 = vst.msk [vmem:[#allocation3 + $0x120] sm:$0xff] %vm333_vm0, %v9840_v61  ;;  %v9852_v63 = vld [vmem:[#allocation2 + $0xa8] sm:$0xff]  ;;  %v9854_v1 = vld [vmem:[#allocation2 + $0xb0] sm:$0xff]  ;;  %506 = vst.msk [vmem:[#allocation3 + $0x138] sm:$0xff] %vm333_vm0, %v9850_v62 }
  0x3f   : > { %507 = vst.msk [vmem:[#allocation3 + $0x150] sm:$0xff] %vm333_vm0, %v9852_v63  ;;  %508 = vst.msk [vmem:[#allocation3 + $0x168] sm:$0xff] %vm333_vm0, %v9854_v1  ;;  %v9862_v2 = vld [vmem:[#allocation2 + $0xc0] sm:$0xff]  ;;  %v9864_v3 = vld [vmem:[#allocation2 + $0xc8] sm:$0xff] }
  0x40   : > { %v9866_v4 = vld [vmem:[#allocation2 + $0xd8] sm:$0xff]  ;;  %509 = vst.msk [vmem:[#allocation3 + $0x180] sm:$0xff] %vm333_vm0, %v9862_v2  ;;  %510 = vst.msk [vmem:[#allocation3 + $0x198] sm:$0xff] %vm333_vm0, %v9864_v3  ;;  %v9874_v5 = vld [vmem:[#allocation2 + $0xe0] sm:$0xff] }
  0x41   : > { %511 = vst.msk [vmem:[#allocation3 + $0x1b0] sm:$0xff] %vm333_vm0, %v9866_v4  ;;  %v9876_v6 = vld [vmem:[#allocation2 + $0xf0] sm:$0xff]  ;;  %v9878_v7 = vld [vmem:[#allocation2 + $0xf8] sm:$0xff]  ;;  %512 = vst.msk [vmem:[#allocation3 + $0x1c8] sm:$0xff] %vm333_vm0, %v9874_v5 }
  0x42   : > { %613 = vrot.lane.b32.xlu0 %v537_v41, %s9525_s16  ;;  %615 = vrot.lane.b32.xlu1 %v538_v42, %s9525_s16  ;;  %513 = vst.msk [vmem:[#allocation3 + $0x1e0] sm:$0xff] %vm333_vm0, %v9876_v6  ;;  %514 = vst.msk [vmem:[#allocation3 + $0x1f8] sm:$0xff] %vm333_vm0, %v9878_v7  ;;  %v9886_v8 = vld [vmem:[#allocation2 + $0x108] sm:$0xff]  ;;  %v9888_v9 = vld [vmem:[#allocation2 + $0x110] sm:$0xff] }
  0x43   : > { %v9890_v10 = vld [vmem:[#allocation2 + $0x120] sm:$0xff]  ;;  %515 = vst.msk [vmem:[#allocation3 + $0x210] sm:$0xff] %vm333_vm0, %v9886_v8  ;;  %516 = vst.msk [vmem:[#allocation3 + $0x228] sm:$0xff] %vm333_vm0, %v9888_v9  ;;  %v9900_v11 = vld [vmem:[#allocation2 + $0x128] sm:$0xff] }
  0x44   : > { %517 = vst.msk [vmem:[#allocation3 + $0x240] sm:$0xff] %vm333_vm0, %v9890_v10  ;;  %v9902_v12 = vld [vmem:[#allocation2 + $0x138] sm:$0xff]  ;;  %518 = vst.msk [vmem:[#allocation3 + $0x258] sm:$0xff] %vm333_vm0, %v9900_v11  ;;  %v9908_v15 = vld [vmem:[#allocation2 + $0x140] sm:$0xff] }
  0x45   : > { %v545_v13 = vld [vmem:[#allocation2 + $0xf2] sm:$0xff]  ;;  %v546_v14 = vld [vmem:[#allocation2 + $0xfa] sm:$0xff]  ;;  %519 = vst.msk [vmem:[#allocation3 + $0x270] sm:$0xff] %vm333_vm0, %v9902_v12  ;;  %520 = vst.msk [vmem:[#allocation3 + $0x288] sm:$0xff] %vm333_vm0, %v9908_v15 }
  0x46   : > { %617 = vrot.lane.b32.xlu0 %v539_v43, %s9525_s16  ;;  %619 = vrot.lane.b32.xlu1 %v540_v44, %s9525_s16  ;;  %v9914_v16 = vld [vmem:[#allocation2 + $0x150] sm:$0xff]  ;;  %v9918_v19 = vld [vmem:[#allocation2 + $0x158] sm:$0xff]  ;;  %v9924_v20 = vld [vmem:[#allocation2 + $0x168] sm:$0xff] }
  0x47   : > { %v547_v17 = vld [vmem:[#allocation2 + $0x10a] sm:$0xff]  ;;  %v548_v18 = vld [vmem:[#allocation2 + $0x112] sm:$0xff]  ;;  %521 = vst.msk [vmem:[#allocation3 + $0x2a0] sm:$0xff] %vm333_vm0, %v9914_v16  ;;  %522 = vst.msk [vmem:[#allocation3 + $0x2b8] sm:$0xff] %vm333_vm0, %v9918_v19 }
  0x48   : > { %v549_v21 = vld [vmem:[#allocation2 + $0x122] sm:$0xff]  ;;  %v550_v22 = vld [vmem:[#allocation2 + $0x12a] sm:$0xff]  ;;  %523 = vst.msk [vmem:[#allocation3 + $0x2d0] sm:$0xff] %vm333_vm0, %v9924_v20  ;;  %v551_v26 = vld [vmem:[#allocation2 + $0x13a] sm:$0xff] }
  0x49   : > { %v9928_v23 = vld [vmem:[#allocation2 + $0x170] sm:$0xff]  ;;  %v423_v24 = vld [vmem:[%s9725_s15 + $0xe0] sm:$0xff]  ;;  %v424_v25 = vld [vmem:[%s9725_s15 + $0xe8] sm:$0xff] }
  0x4a   : > { %621 = vrot.lane.b32.xlu0 %v541_v51, %s9525_s16  ;;  %623 = vrot.lane.b32.xlu1 %v542_v52, %s9525_s16  ;;  %524 = vst.msk [vmem:[#allocation3 + $0x2e8] sm:$0xff] %vm333_vm0, %v9928_v23  ;;  %v552_v27 = vld [vmem:[#allocation2 + $0x142] sm:$0xff]  ;;  %v425_v28 = vld [vmem:[%s9725_s15 + $0xf0] sm:$0xff]  ;;  %v426_v29 = vld [vmem:[%s9725_s15 + $0xf8] sm:$0xff] }
  0x4b   : > { %457 = vst.msk [vmem:[#allocation2 + $0x182] sm:$0xff] %vm428_vm2, %v423_v24  ;;  %458 = vst.msk [vmem:[#allocation2 + $0x18a] sm:$0xff] %vm428_vm2, %v424_v25  ;;  %v553_v30 = vld [vmem:[#allocation2 + $0x152] sm:$0xff]  ;;  %v554_v31 = vld [vmem:[#allocation2 + $0x15a] sm:$0xff] }
  0x4c   : > { %459 = vst.msk [vmem:[#allocation2 + $0x19a] sm:$0xff] %vm428_vm2, %v425_v28  ;;  %460 = vst.msk [vmem:[#allocation2 + $0x1a2] sm:$0xff] %vm428_vm2, %v426_v29  ;;  %v555_v34 = vld [vmem:[#allocation2 + $0x16a] sm:$0xff]  ;;  %v556_v35 = vld [vmem:[#allocation2 + $0x172] sm:$0xff] }
  0x4d   : > { %v718_v36 = vld [vmem:[#allocation2 + $0x4] sm:$0xff]  ;;  %v719_v37 = vld [vmem:[#allocation2 + $0xc] sm:$0xff]  ;;  %v720_v38 = vld [vmem:[#allocation2 + $0x1c] sm:$0xff] }
  0x4e   : > { %625 = vrot.lane.b32.xlu0 %v543_v57, %s9525_s16  ;;  %627 = vrot.lane.b32.xlu1 %v544_v58, %s9525_s16  ;;  %v721_v40 = vld [vmem:[#allocation2 + $0x24] sm:$0xff]  ;;  %v9952_v41 = vld [vmem:[#allocation2 + $0x34] sm:$0xff]  ;;  %v9954_v42 = vld [vmem:[#allocation2 + $0x3c] sm:$0xff] }
  0x4f   : > { %v9960_v43 = vld [vmem:[#allocation2 + $0x4c] sm:$0xff]  ;;  %v9962_v44 = vld [vmem:[#allocation2 + $0x54] sm:$0xff]  ;;  %v9968_v45 = vld [vmem:[#allocation2 + $0x64] sm:$0xff] }
  0x50   : > { %v9970_v46 = vld [vmem:[#allocation2 + $0x6c] sm:$0xff]  ;;  %v9976_v47 = vld [vmem:[#allocation2 + $0x7c] sm:$0xff]  ;;  %v9978_v48 = vld [vmem:[#allocation2 + $0x84] sm:$0xff] }
  0x51   : > { %v9984_v51 = vld [vmem:[#allocation2 + $0x94] sm:$0xff]  ;;  %v9986_v52 = vld [vmem:[#allocation2 + $0x9c] sm:$0xff]  ;;  %v9992_v57 = vld [vmem:[#allocation2 + $0xac] sm:$0xff] }
  0x52   : > { %629 = vrot.lane.b32.xlu0 %v545_v13, %s9525_s16  ;;  %631 = vrot.lane.b32.xlu1 %v546_v14, %s9525_s16  ;;  %v9994_v58 = vld [vmem:[#allocation2 + $0xb4] sm:$0xff]  ;;  %v10000_v13 = vld [vmem:[#allocation2 + $0xc4] sm:$0xff]  ;;  %v735_v14 = vld [vmem:[#allocation2 + $0xcc] sm:$0xff] }
  0x53   : > { %v740_v24 = vld [vmem:[#allocation2 + $0x10c] sm:$0xff]  ;;  %v741_v25 = vld [vmem:[#allocation2 + $0x114] sm:$0xff]  ;;  %v744_v28 = vld [vmem:[#allocation2 + $0x13c] sm:$0xff] }
  0x54   : > { %v745_v29 = vld [vmem:[#allocation2 + $0x144] sm:$0xff] }
  0x56   : > { %633 = vrot.lane.b32.xlu0 %v547_v17, %s9525_s16  ;;  %635 = vrot.lane.b32.xlu1 %v548_v18, %s9525_s16  ;;  %v736_v17 = vld [vmem:[#allocation2 + $0xdc] sm:$0xff]  ;;  %v737_v18 = vld [vmem:[#allocation2 + $0xe4] sm:$0xff] }
  0x5a   : > { %637 = vrot.lane.b32.xlu0 %v549_v21, %s9525_s16  ;;  %639 = vrot.lane.b32.xlu1 %v550_v22, %s9525_s16  ;;  %v738_v21 = vld [vmem:[#allocation2 + $0xf4] sm:$0xff]  ;;  %v739_v22 = vld [vmem:[#allocation2 + $0xfc] sm:$0xff] }
  0x5e   : > { %641 = vrot.lane.b32.xlu0 %v551_v26, %s9525_s16  ;;  %643 = vrot.lane.b32.xlu1 %v552_v27, %s9525_s16  ;;  %v742_v26 = vld [vmem:[#allocation2 + $0x124] sm:$0xff]  ;;  %v743_v27 = vld [vmem:[#allocation2 + $0x12c] sm:$0xff] }
  0x62   : > { %645 = vrot.lane.b32.xlu0 %v553_v30, %s9525_s16  ;;  %647 = vrot.lane.b32.xlu1 %v554_v31, %s9525_s16 }
  0x66   : > { %649 = vrot.lane.b32.xlu0 %v555_v34, %s9525_s16  ;;  %651 = vrot.lane.b32.xlu1 %v556_v35, %s9525_s16  ;;  %v746_v34 = vld [vmem:[#allocation2 + $0x154] sm:$0xff]  ;;  %v747_v35 = vld [vmem:[#allocation2 + $0x15c] sm:$0xff] }
  0x6a   : > { %782 = vrot.lane.b32.xlu0 %v718_v36, %s9526_s17  ;;  %784 = vrot.lane.b32.xlu1 %v719_v37, %s9526_s17 }
  0x6e   : > { %786 = vrot.lane.b32.xlu0 %v720_v38, %s9526_s17  ;;  %788 = vrot.lane.b32.xlu1 %v721_v40, %s9526_s17  ;;  %v748_v38 = vld [vmem:[#allocation2 + $0x16c] sm:$0xff]  ;;  %v749_v40 = vld [vmem:[#allocation2 + $0x174] sm:$0xff] }
  0x72   : > { %790 = vrot.lane.b32.xlu0 %v9952_v41, %s9526_s17  ;;  %792 = vrot.lane.b32.xlu1 %v9954_v42, %s9526_s17 }
  0x76   : > { %794 = vrot.lane.b32.xlu0 %v9960_v43, %s9526_s17  ;;  %796 = vrot.lane.b32.xlu1 %v9962_v44, %s9526_s17 }
  0x7a   : > { %798 = vrot.lane.b32.xlu0 %v9968_v45, %s9526_s17  ;;  %800 = vrot.lane.b32.xlu1 %v9970_v46, %s9526_s17 }
  0x7e   : > { %802 = vrot.lane.b32.xlu0 %v9976_v47, %s9526_s17  ;;  %804 = vrot.lane.b32.xlu1 %v9978_v48, %s9526_s17 }
  0x82   : > { %806 = vrot.lane.b32.xlu0 %v9984_v51, %s9526_s17  ;;  %808 = vrot.lane.b32.xlu1 %v9986_v52, %s9526_s17 }
  0x86   : > { %810 = vrot.lane.b32.xlu0 %v9992_v57, %s9526_s17  ;;  %812 = vrot.lane.b32.xlu1 %v9994_v58, %s9526_s17  ;;  %v590_v30 = vpop.permute.xlu0 %589 }
  0x87   : > { %v594_v31 = vpop.permute.xlu1 %593  ;;  %686 = vst.msk [vmem:[#allocation3] sm:$0xff] %vm685_vm3, %v590_v30 }
  0x88   : > { %688 = vst.msk [vmem:[#allocation3 + $0x30] sm:$0xff] %vm685_vm3, %v594_v31 }
  0x8a   : > { %814 = vrot.lane.b32.xlu0 %v10000_v13, %s9526_s17  ;;  %816 = vrot.lane.b32.xlu1 %v735_v14, %s9526_s17 }
  0x8e   : > { %818 = vrot.lane.b32.xlu0 %v736_v17, %s9526_s17  ;;  %820 = vrot.lane.b32.xlu1 %v737_v18, %s9526_s17 }
  0x92   : > { %822 = vrot.lane.b32.xlu0 %v738_v21, %s9526_s17  ;;  %824 = vrot.lane.b32.xlu1 %v739_v22, %s9526_s17 }
  0x96   : > { %826 = vrot.lane.b32.xlu0 %v740_v24, %s9526_s17  ;;  %828 = vrot.lane.b32.xlu1 %v741_v25, %s9526_s17 }
  0x9a   : > { %830 = vrot.lane.b32.xlu0 %v742_v26, %s9526_s17  ;;  %832 = vrot.lane.b32.xlu1 %v743_v27, %s9526_s17  ;;  %v592_v36 = vpop.permute.xlu0 %591  ;;  %v596_v37 = vpop.permute.xlu1 %595 }
  0x9b   : > { %687 = vst.msk [vmem:[#allocation3 + $0x18] sm:$0xff] %vm685_vm3, %v592_v36  ;;  %689 = vst.msk [vmem:[#allocation3 + $0x48] sm:$0xff] %vm685_vm3, %v596_v37  ;;  %v1916_v37 = vld [vmem:[%s14418_s1 + $0x58] sm:$0xff] }
  0x9e   : > { %834 = vrot.lane.b32.xlu0 %v744_v28, %s9526_s17  ;;  %836 = vrot.lane.b32.xlu1 %v745_v29, %s9526_s17  ;;  %v1919_v28 = vld [vmem:[%s14418_s1 + $0x70] sm:$0xff]  ;;  %v1918_v29 = vld [vmem:[%s14418_s1 + $0x68] sm:$0xff] }
  0xa2   : > { %838 = vrot.lane.b32.xlu0 %v746_v34, %s9526_s17  ;;  %840 = vrot.lane.b32.xlu1 %v747_v35, %s9526_s17  ;;  %v1917_v34 = vld [vmem:[%s14418_s1 + $0x60] sm:$0xff] }
  0xa4   : > { %v598_v14 = vpop.permute.xlu0 %597  ;;  %v600_v17 = vpop.permute.xlu1 %599 }
  0xa5   : > { %690 = vst.msk [vmem:[#allocation3 + $0x60] sm:$0xff] %vm685_vm3, %v598_v14  ;;  %691 = vst.msk [vmem:[#allocation3 + $0x78] sm:$0xff] %vm685_vm3, %v600_v17 }
  0xa6   : > { %842 = vrot.lane.b32.xlu0 %v748_v38, %s9526_s17  ;;  %844 = vrot.lane.b32.xlu1 %v749_v40, %s9526_s17  ;;  %v10082_v38 = vld [vmem:[#allocation2 + $0x10a] sm:$0xff] }
  0xa7   : > { %v1915_v40 = vld [vmem:[%s14418_s1 + $0x50] sm:$0xff]  ;;  %1154 = vst.msk [vmem:[#allocation3 + $0x1b8] sm:$0xff] %vm333_vm0, %v10082_v38 }
  0xa8   : > { %v602_v18 = vpop.permute.xlu0 %601  ;;  %v604_v21 = vpop.permute.xlu1 %603 }
  0xa9   : > { %692 = vst.msk [vmem:[#allocation3 + $0x90] sm:$0xff] %vm685_vm3, %v602_v18  ;;  %693 = vst.msk [vmem:[#allocation3 + $0xa8] sm:$0xff] %vm685_vm3, %v604_v21  ;;  %v1914_v18 = vld [vmem:[%s14418_s1 + $0x48] sm:$0xff]  ;;  %v10103_v21 = vld [vmem:[#allocation2 + $0x112] sm:$0xff] }
  0xaa   : > { %975 = vrot.lane.b32.xlu0 %v9812_v49, %s9527_s18  ;;  %977 = vrot.lane.b32.xlu1 %v9814_v50, %s9527_s18  ;;  %1155 = vst.msk [vmem:[#allocation3 + $0x1d0] sm:$0xff] %vm333_vm0, %v10103_v21 }
  0xac   : > { %v606_v22 = vpop.permute.xlu0 %605  ;;  %v608_v24 = vpop.permute.xlu1 %607 }
  0xad   : > { %694 = vst.msk [vmem:[#allocation3 + $0xc0] sm:$0xff] %vm685_vm3, %v606_v22  ;;  %695 = vst.msk [vmem:[#allocation3 + $0xd8] sm:$0xff] %vm685_vm3, %v608_v24 }
  0xae   : > { %979 = vrot.lane.b32.xlu0 %v9820_v53, %s9527_s18  ;;  %981 = vrot.lane.b32.xlu1 %v9824_v54, %s9527_s18  ;;  %v1920_v53 = vld [vmem:[%s14418_s1 + $0x78] sm:$0xff] }
  0xaf   : > { %2045 = vmatpush1.msra.mxu0 %v1920_v53  ;;  %v1911_v53 = vld [vmem:[%s14418_s1 + $0x30] sm:$0xff] }
  0xb0   : > { %v610_v25 = vpop.permute.xlu0 %609  ;;  %v612_v26 = vpop.permute.xlu1 %611  ;;  %2046 = vmatprep.subr.mxu0 %v14427_v0 }
  0xb1   : > { %696 = vst.msk [vmem:[#allocation3 + $0xf0] sm:$0xff] %vm685_vm3, %v610_v25  ;;  %697 = vst.msk [vmem:[#allocation3 + $0x108] sm:$0xff] %vm685_vm3, %v612_v26  ;;  %2047 = vmatpush1.msra.mxu0 %v1919_v28  ;;  %v1913_v25 = vld [vmem:[%s14418_s1 + $0x40] sm:$0xff]  ;;  %v1912_v26 = vld [vmem:[%s14418_s1 + $0x38] sm:$0xff] }
  0xb2   : > { %983 = vrot.lane.b32.xlu0 %v9826_v55, %s9527_s18  ;;  %985 = vrot.lane.b32.xlu1 %v9828_v56, %s9527_s18 }
  0xb3   : > { %2048 = vmatprep.subr.mxu0 %v14427_v0 }
  0xb4   : > { %v614_v49 = vpop.permute.xlu0 %613  ;;  %v616_v50 = vpop.permute.xlu1 %615  ;;  %2049 = vmatpush1.msra.mxu0 %v1918_v29  ;;  %v1910_v29 = vld [vmem:[%s14418_s1 + $0x28] sm:$0xff] }
  0xb5   : > { %698 = vst.msk [vmem:[#allocation3 + $0x120] sm:$0xff] %vm685_vm3, %v614_v49  ;;  %699 = vst.msk [vmem:[#allocation3 + $0x138] sm:$0xff] %vm685_vm3, %v616_v50  ;;  %2050 = vmatprep.subr.mxu0 %v14427_v0 }
  0xb6   : > { %987 = vrot.lane.b32.xlu0 %v9836_v59, %s9527_s18  ;;  %989 = vrot.lane.b32.xlu1 %v9838_v60, %s9527_s18 }
  0xb7   : > { %2051 = vmatpush1.msra.mxu0 %v1917_v34 }
  0xb8   : > { %v618_v54 = vpop.permute.xlu0 %617  ;;  %v620_v27 = vpop.permute.xlu1 %619  ;;  %2052 = vmatprep.subr.mxu0 %v14427_v0 }
  0xb9   : > { %700 = vst.msk [vmem:[#allocation3 + $0x150] sm:$0xff] %vm685_vm3, %v618_v54  ;;  %701 = vst.msk [vmem:[#allocation3 + $0x168] sm:$0xff] %vm685_vm3, %v620_v27  ;;  %2053 = vmatpush1.msra.mxu0 %v1916_v37  ;;  %v10127_v54 = vld [vmem:[#allocation2 + $0x122] sm:$0xff] }
  0xba   : > { %991 = vrot.lane.b32.xlu0 %v9840_v61, %s9527_s18  ;;  %993 = vrot.lane.b32.xlu1 %v9850_v62, %s9527_s18  ;;  %1156 = vst.msk [vmem:[#allocation3 + $0x1e8] sm:$0xff] %vm333_vm0, %v10127_v54 }
  0xbb   : > { %2054 = vmatprep.subr.mxu0 %v14427_v0 }
  0xbc   : > { %v622_v30 = vpop.permute.xlu0 %621  ;;  %v624_v31 = vpop.permute.xlu1 %623  ;;  %2055 = vmatpush1.msra.mxu0 %v1915_v40 }
  0xbd   : > { %702 = vst.msk [vmem:[#allocation3 + $0x180] sm:$0xff] %vm685_vm3, %v622_v30  ;;  %703 = vst.msk [vmem:[#allocation3 + $0x198] sm:$0xff] %vm685_vm3, %v624_v31  ;;  %2056 = vmatprep.subr.mxu0 %v14427_v0  ;;  %v1909_v30 = vld [vmem:[%s14418_s1 + $0x20] sm:$0xff]  ;;  %v10149_v31 = vld [vmem:[#allocation2 + $0x12a] sm:$0xff] }
  0xbe   : > { %995 = vrot.lane.b32.xlu0 %v9852_v63, %s9527_s18  ;;  %997 = vrot.lane.b32.xlu1 %v9854_v1, %s9527_s18  ;;  %1157 = vst.msk [vmem:[#allocation3 + $0x200] sm:$0xff] %vm333_vm0, %v10149_v31 }
  0xbf   : > { %2057 = vmatpush1.msra.mxu0 %v1914_v18  ;;  %v1906_v18 = vld [vmem:[%s14418_s1 + $0x8] sm:$0xff] }
  0xc0   : > { %v626_v35 = vpop.permute.xlu0 %625  ;;  %v628_v36 = vpop.permute.xlu1 %627  ;;  %2058 = vmatprep.subr.mxu0 %v14427_v0 }
  0xc1   : > { %704 = vst.msk [vmem:[#allocation3 + $0x1b0] sm:$0xff] %vm685_vm3, %v626_v35  ;;  %705 = vst.msk [vmem:[#allocation3 + $0x1c8] sm:$0xff] %vm685_vm3, %v628_v36  ;;  %2059 = vmatpush1.msra.mxu0 %v1913_v25  ;;  %v1908_v36 = vld [vmem:[%s14418_s1 + $0x18] sm:$0xff] }
  0xc2   : > { %999 = vrot.lane.b32.xlu0 %v9862_v2, %s9527_s18  ;;  %1001 = vrot.lane.b32.xlu1 %v9864_v3, %s9527_s18 }
  0xc3   : > { %2060 = vmatprep.subr.mxu0 %v14427_v0 }
  0xc4   : > { %v630_v14 = vpop.permute.xlu0 %629  ;;  %v632_v17 = vpop.permute.xlu1 %631  ;;  %2061 = vmatpush1.msra.mxu0 %v1912_v26 }
  0xc5   : > { %706 = vst.msk [vmem:[#allocation3 + $0x1e0] sm:$0xff] %vm685_vm3, %v630_v14  ;;  %707 = vst.msk [vmem:[#allocation3 + $0x1f8] sm:$0xff] %vm685_vm3, %v632_v17  ;;  %2062 = vmatprep.subr.mxu0 %v14427_v0  ;;  %v1907_v14 = vld [vmem:[%s14418_s1 + $0x10] sm:$0xff]  ;;  %v10170_v17 = vld [vmem:[#allocation2 + $0x13a] sm:$0xff] }
  0xc6   : > { %1003 = vrot.lane.b32.xlu0 %v9866_v4, %s9527_s18  ;;  %1005 = vrot.lane.b32.xlu1 %v9874_v5, %s9527_s18  ;;  %1158 = vst.msk [vmem:[#allocation3 + $0x218] sm:$0xff] %vm333_vm0, %v10170_v17 }
  0xc7   : > { %2063 = vmatpush1.msra.mxu0 %v1911_v53  ;;  %v10197_v53 = vld [vmem:[#allocation2 + $0x142] sm:$0xff] }
  0xc8   : > { %v634_v22 = vpop.permute.xlu0 %633  ;;  %v636_v24 = vpop.permute.xlu1 %635  ;;  %2064 = vmatprep.subr.mxu0 %v14427_v0  ;;  %1159 = vst.msk [vmem:[#allocation3 + $0x230] sm:$0xff] %vm333_vm0, %v10197_v53 }
  0xc9   : > { %708 = vst.msk [vmem:[#allocation3 + $0x210] sm:$0xff] %vm685_vm3, %v634_v22  ;;  %709 = vst.msk [vmem:[#allocation3 + $0x228] sm:$0xff] %vm685_vm3, %v636_v24  ;;  %2065 = vmatpush1.msra.mxu0 %v1910_v29  ;;  %v10179_v22 = vld [vmem:[#allocation2 + $0x114] sm:$0xff]  ;;  %v10201_v29 = vld [vmem:[#allocation2 + $0x188] sm:$0xff] }
  0xca   : > { %1007 = vrot.lane.b32.xlu0 %v9876_v6, %s9527_s18  ;;  %1009 = vrot.lane.b32.xlu1 %v9878_v7, %s9527_s18  ;;  %v1104_v24 = vld [vmem:[#allocation2 + $0x32] sm:$0xff]  ;;  %1792 = vst.msk [vmem:[#allocation3 + $0x178] sm:$0xff] %vm333_vm0, %v10179_v22 }
  0xcb   : > { %2066 = vmatprep.subr.mxu0 %v14427_v0  ;;  %1136 = vst.msk [vmem:[#allocation3 + $0x8] sm:$0xff] %vm333_vm0, %v1104_v24  ;;  %v942_v24 = vld [vmem:[#allocation2 + $0x1a0] sm:$0xff] }
  0xcc   : > { %v638_v49 = vpop.permute.xlu0 %637  ;;  %v640_v50 = vpop.permute.xlu1 %639  ;;  %2067 = vmatpush1.msra.mxu0 %v1909_v30 }
  0xcd   : > { %710 = vst.msk [vmem:[#allocation3 + $0x240] sm:$0xff] %vm685_vm3, %v638_v49  ;;  %711 = vst.msk [vmem:[#allocation3 + $0x258] sm:$0xff] %vm685_vm3, %v640_v50  ;;  %2068 = vmatprep.subr.mxu0 %v14427_v0  ;;  %v1905_v49 = vld [vmem:[%s14418_s1] sm:$0xff] }
  0xce   : > { %1011 = vrot.lane.b32.xlu0 %v9886_v8, %s9527_s18  ;;  %1013 = vrot.lane.b32.xlu1 %v9888_v9, %s9527_s18  ;;  %v1105_v50 = vld [vmem:[#allocation2 + $0x3a] sm:$0xff] }
  0xcf   : > { %2069 = vmatpush1.msra.mxu0 %v1908_v36  ;;  %1137 = vst.msk [vmem:[#allocation3 + $0x20] sm:$0xff] %vm333_vm0, %v1105_v50  ;;  %v1107_v36 = vld [vmem:[#allocation2 + $0x52] sm:$0xff]  ;;  %v1109_v50 = vld [vmem:[#allocation2 + $0x6a] sm:$0xff] }
  0xd0   : > { %v642_v27 = vpop.permute.xlu0 %641  ;;  %v644_v28 = vpop.permute.xlu1 %643  ;;  %2070 = vmatprep.subr.mxu0 %v14427_v0  ;;  %1139 = vst.msk [vmem:[#allocation3 + $0x50] sm:$0xff] %vm333_vm0, %v1107_v36  ;;  %1141 = vst.msk [vmem:[#allocation3 + $0x80] sm:$0xff] %vm333_vm0, %v1109_v50  ;;  %v1745_v50 = vld [vmem:[#allocation2 + $0x64] sm:$0xff] }
  0xd1   : > { %712 = vst.msk [vmem:[#allocation3 + $0x270] sm:$0xff] %vm685_vm3, %v642_v27  ;;  %713 = vst.msk [vmem:[#allocation3 + $0x288] sm:$0xff] %vm685_vm3, %v644_v28  ;;  %2071 = vmatpush1.msra.mxu0 %v1907_v14  ;;  %v1106_v27 = vld [vmem:[#allocation2 + $0x4a] sm:$0xff]  ;;  %v10199_v28 = vld [vmem:[#allocation2 + $0x180] sm:$0xff] }
  0xd2   : > { %1015 = vrot.lane.b32.xlu0 %v9890_v10, %s9527_s18  ;;  %1017 = vrot.lane.b32.xlu1 %v9900_v11, %s9527_s18  ;;  %1138 = vst.msk [vmem:[#allocation3 + $0x38] sm:$0xff] %vm333_vm0, %v1106_v27  ;;  %v1108_v14 = vld [vmem:[#allocation2 + $0x62] sm:$0xff]  ;;  %v10234_v27 = vld [vmem:[#allocation2 + $0x152] sm:$0xff]  ;;  %1777 = vst.msk [vmem:[#allocation3 + $0x10] sm:$0xff] %vm333_vm0, %v1745_v50 }
  0xd3   : > { %2072 = vmatprep.subr.mxu0 %v14427_v0  ;;  %1140 = vst.msk [vmem:[#allocation3 + $0x68] sm:$0xff] %vm333_vm0, %v1108_v14  ;;  %1160 = vst.msk [vmem:[#allocation3 + $0x248] sm:$0xff] %vm333_vm0, %v10234_v27  ;;  %v1111_v14 = vld [vmem:[#allocation2 + $0x82] sm:$0xff]  ;;  %v1928_v50 = vld [vmem:[%s14418_s1 + $0xb8] sm:$0xff] }
  0xd4   : > { %v646_v34 = vpop.permute.xlu0 %645  ;;  %v648_v35 = vpop.permute.xlu1 %647  ;;  %2073 = vmatpush1.msra.mxu0 %v1906_v18  ;;  %v10225_v18 = vld [vmem:[#allocation2 + $0x198] sm:$0xff]  ;;  %1143 = vst.msk [vmem:[#allocation3 + $0xb0] sm:$0xff] %vm333_vm0, %v1111_v14  ;;  %v10295_v14 = vld [vmem:[#allocation2 + $0x16a] sm:$0xff] }
  0xd5   : > { %714 = vst.msk [vmem:[#allocation3 + $0x2a0] sm:$0xff] %vm685_vm3, %v646_v34  ;;  %715 = vst.msk [vmem:[#allocation3 + $0x2b8] sm:$0xff] %vm685_vm3, %v648_v35  ;;  %2074 = vmatprep.subr.mxu0 %v14427_v0  ;;  %v1936_v35 = vld [vmem:[%s14418_s1 + $0xf8] sm:$0xff] }
  0xd6   : > { %1019 = vrot.lane.b32.xlu0 %v9902_v12, %s9527_s18  ;;  %1021 = vrot.lane.b32.xlu1 %v9908_v15, %s9527_s18  ;;  %1162 = vst.msk [vmem:[#allocation3 + $0x278] sm:$0xff] %vm333_vm0, %v10295_v14 }
  0xd7   : > { %2075 = vmatpush1.msra.mxu0 %v1905_v49  ;;  %v1934_v49 = vld [vmem:[%s14418_s1 + $0xe8] sm:$0xff] }
  0xd8   : > { %v650_v37 = vpop.permute.xlu0 %649  ;;  %v652_v40 = vpop.permute.xlu1 %651  ;;  %2076 = vmatprep.subr.mxu0 %v14427_v0 }
  0xd9   : > { %716 = vst.msk [vmem:[#allocation3 + $0x2d0] sm:$0xff] %vm685_vm3, %v650_v37  ;;  %717 = vst.msk [vmem:[#allocation3 + $0x2e8] sm:$0xff] %vm685_vm3, %v652_v40  ;;  %v10213_v37 = vld [vmem:[#allocation2 + $0x124] sm:$0xff]  ;;  %v1935_v40 = vld [vmem:[%s14418_s1 + $0xf0] sm:$0xff]  ;;  %2077 = vmatpush2.msra.mxu0 %v1936_v35 }
  0xda   : > { %1023 = vrot.lane.b32.xlu0 %v9914_v16, %s9527_s18  ;;  %1025 = vrot.lane.b32.xlu1 %v9918_v19, %s9527_s18  ;;  %1793 = vst.msk [vmem:[#allocation3 + $0x190] sm:$0xff] %vm333_vm0, %v10213_v37 }
  0xdb   : > { %2078 = vmatprep.subr.mxu0 %v14427_v0 }
  0xdc   : > { %v783_v25 = vpop.permute.xlu0 %782  ;;  %v785_v26 = vpop.permute.xlu1 %784  ;;  %2079 = vmatpush2.msra.mxu0 %v1935_v40  ;;  %v1933_v40 = vld [vmem:[%s14418_s1 + $0xe0] sm:$0xff] }
  0xdd   : > { %879 = vst.msk [vmem:[#allocation3] sm:$0xff] %vm878_vm4, %v783_v25  ;;  %880 = vst.msk [vmem:[#allocation3 + $0x18] sm:$0xff] %vm878_vm4, %v785_v26  ;;  %2080 = vmatprep.subr.mxu0 %v14427_v0 }
  0xde   : > { %1027 = vrot.lane.b32.xlu0 %v9924_v20, %s9527_s18  ;;  %1029 = vrot.lane.b32.xlu1 %v9928_v23, %s9527_s18 }
  0xdf   : > { %2081 = vmatpush2.msra.mxu0 %v1934_v49 }
  0xe0   : > { %v787_v30 = vpop.permute.xlu0 %786  ;;  %v789_v34 = vpop.permute.xlu1 %788  ;;  %2082 = vmatprep.subr.mxu0 %v14427_v0 }
  0xe1   : > { %881 = vst.msk [vmem:[#allocation3 + $0x30] sm:$0xff] %vm878_vm4, %v787_v30  ;;  %882 = vst.msk [vmem:[#allocation3 + $0x48] sm:$0xff] %vm878_vm4, %v789_v34  ;;  %v10240_v30 = vld [vmem:[#allocation2 + $0x12c] sm:$0xff]  ;;  %v1110_v34 = vld [vmem:[#allocation2 + $0x7a] sm:$0xff]  ;;  %2083 = vmatpush2.msra.mxu0 %v1933_v40 }
  0xe2   : > { %1031 = vrot.lane.b32.xlu0 %v10199_v28, %s9527_s18  ;;  %1033 = vrot.lane.b32.xlu1 %v10201_v29, %s9527_s18  ;;  %1142 = vst.msk [vmem:[#allocation3 + $0x98] sm:$0xff] %vm333_vm0, %v1110_v34  ;;  %1794 = vst.msk [vmem:[#allocation3 + $0x1a8] sm:$0xff] %vm333_vm0, %v10240_v30  ;;  %v1940_v34 = vld [vmem:[%s14418_s1 + $0x118] sm:$0xff]  ;;  %v1939_v40 = vld [vmem:[%s14418_s1 + $0x110] sm:$0xff] }
  0xe3   : > { %2084 = vmatprep.subr.mxu0 %v14427_v0  ;;  %9186 = vmatprep.subr.mxu1 %v1940_v34 }
  0xe4   : > { %v791_v25 = vpop.permute.xlu0 %790  ;;  %v793_v26 = vpop.permute.xlu1 %792  ;;  %9187 = vmatpush3.msra.mxu1 %v1940_v34  ;;  %v1747_v34 = vld [vmem:[#allocation2 + $0x7c] sm:$0xff] }
  0xe5   : > { %883 = vst.msk [vmem:[#allocation3 + $0x60] sm:$0xff] %vm878_vm4, %v791_v25  ;;  %884 = vst.msk [vmem:[#allocation3 + $0x78] sm:$0xff] %vm878_vm4, %v793_v26  ;;  %v10262_v25 = vld [vmem:[#allocation2 + $0x15a] sm:$0xff]  ;;  %9188 = vmatprep.subr.mxu1 %v1939_v40 }
  0xe6   : > { %1035 = vrot.lane.b32.xlu0 %v10225_v18, %s9527_s18  ;;  %1037 = vrot.lane.b32.xlu1 %v942_v24, %s9527_s18  ;;  %v1932_v24 = vld [vmem:[%s14418_s1 + $0xd8] sm:$0xff]  ;;  %1161 = vst.msk [vmem:[#allocation3 + $0x260] sm:$0xff] %vm333_vm0, %v10262_v25  ;;  %1779 = vst.msk [vmem:[#allocation3 + $0x40] sm:$0xff] %vm333_vm0, %v1747_v34 }
  0xe7   : > { %2085 = vmatpush2.msra.mxu0 %v1932_v24  ;;  %v1929_v24 = vld [vmem:[%s14418_s1 + $0xc0] sm:$0xff]  ;;  %9189 = vmatpush3.msra.mxu1 %v1939_v40 }
  0xe8   : > { %v795_v35 = vpop.permute.xlu0 %794  ;;  %v797_v36 = vpop.permute.xlu1 %796  ;;  %2086 = vmatprep.subr.mxu0 %v14427_v0 }
  0xe9   : > { %885 = vst.msk [vmem:[#allocation3 + $0x90] sm:$0xff] %vm878_vm4, %v795_v35  ;;  %886 = vst.msk [vmem:[#allocation3 + $0xa8] sm:$0xff] %vm878_vm4, %v797_v36  ;;  %v1746_v35 = vld [vmem:[#allocation2 + $0x6c] sm:$0xff] }
  0xea   : > { %1232 = vrot.lane.b32.xlu0 %v9952_v41, %s9525_s16  ;;  %1234 = vrot.lane.b32.xlu1 %v9954_v42, %s9525_s16  ;;  %v1931_v41 = vld [vmem:[%s14418_s1 + $0xd0] sm:$0xff]  ;;  %v10272_v42 = vld [vmem:[#allocation2 + $0x13c] sm:$0xff]  ;;  %1778 = vst.msk [vmem:[#allocation3 + $0x28] sm:$0xff] %vm333_vm0, %v1746_v35 }
  0xeb   : > { %1795 = vst.msk [vmem:[#allocation3 + $0x1c0] sm:$0xff] %vm333_vm0, %v10272_v42  ;;  %2087 = vmatpush2.msra.mxu0 %v1931_v41  ;;  %v1937_v41 = vld [vmem:[%s14418_s1 + $0x100] sm:$0xff]  ;;  %v1811_v35 = vld [vmem:[#allocation3 + $0x10] sm:$0xff] }
  0xec   : > { %v799_v26 = vpop.permute.xlu0 %798  ;;  %v801_v49 = vpop.permute.xlu1 %800  ;;  %2088 = vmatprep.subr.mxu0 %v14427_v0  ;;  %9194 = vmatprep.mubr.msk.f32.mxu1 %vm333_vm0, %v1811_v35  ;;  %v10365_v35 = vld [vmem:[#allocation2 + $0x15c] sm:$0xff] }
  0xed   : > { %887 = vst.msk [vmem:[#allocation3 + $0xc0] sm:$0xff] %vm878_vm4, %v799_v26  ;;  %888 = vst.msk [vmem:[#allocation3 + $0xd8] sm:$0xff] %vm878_vm4, %v801_v49  ;;  %v1938_v26 = vld [vmem:[%s14418_s1 + $0x108] sm:$0xff] }
  0xee   : > { %1236 = vrot.lane.b32.xlu0 %v9960_v43, %s9525_s16  ;;  %1238 = vrot.lane.b32.xlu1 %v9962_v44, %s9525_s16  ;;  %v1930_v44 = vld [vmem:[%s14418_s1 + $0xc8] sm:$0xff]  ;;  %1798 = vst.msk [vmem:[#allocation3 + $0x208] sm:$0xff] %vm333_vm0, %v10365_v35 }
  0xef   : > { %v10307_v49 = vld [vmem:[#allocation2 + $0x144] sm:$0xff]  ;;  %2089 = vmatpush2.msra.mxu0 %v1930_v44  ;;  %9190 = vmatprep.subr.mxu1 %v1938_v26 }
  0xf0   : > { %v803_v36 = vpop.permute.xlu0 %802  ;;  %v805_v43 = vpop.permute.xlu1 %804  ;;  %1796 = vst.msk [vmem:[#allocation3 + $0x1d8] sm:$0xff] %vm333_vm0, %v10307_v49  ;;  %2090 = vmatprep.subr.mxu0 %v14427_v0  ;;  %9191 = vmatpush3.msra.mxu1 %v1938_v26  ;;  %v1926_v26 = vld [vmem:[%s14418_s1 + $0xa8] sm:$0xff] }
  0xf1   : > { %889 = vst.msk [vmem:[#allocation3 + $0xf0] sm:$0xff] %vm878_vm4, %v803_v36  ;;  %890 = vst.msk [vmem:[#allocation3 + $0x108] sm:$0xff] %vm878_vm4, %v805_v43  ;;  %2091 = vmatpush2.msra.mxu0 %v1929_v24  ;;  %v10326_v36 = vld [vmem:[#allocation2 + $0x172] sm:$0xff]  ;;  %v1748_v43 = vld [vmem:[#allocation2 + $0x84] sm:$0xff]  ;;  %9192 = vmatprep.subr.mxu1 %v1937_v41 }
  0xf2   : > { %1240 = vrot.lane.b32.xlu0 %v9968_v45, %s9525_s16  ;;  %1242 = vrot.lane.b32.xlu1 %v9970_v46, %s9525_s16  ;;  %1780 = vst.msk [vmem:[#allocation3 + $0x58] sm:$0xff] %vm333_vm0, %v1748_v43  ;;  %1163 = vst.msk [vmem:[#allocation3 + $0x290] sm:$0xff] %vm333_vm0, %v10326_v36  ;;  %v10340_v24 = vld [vmem:[#allocation2 + $0x154] sm:$0xff]  ;;  %v1750_v43 = vld [vmem:[#allocation2 + $0x9c] sm:$0xff] }
  0xf3   : > { %2092 = vmatprep.subr.mxu0 %v14427_v0  ;;  %9193 = vmatpush3.msra.mxu1 %v1937_v41  ;;  %1797 = vst.msk [vmem:[#allocation3 + $0x1f0] sm:$0xff] %vm333_vm0, %v10340_v24  ;;  %v10359_v41 = vld [vmem:[#allocation2 + $0x182] sm:$0xff]  ;;  %1782 = vst.msk [vmem:[#allocation3 + $0x88] sm:$0xff] %vm333_vm0, %v1750_v43 }
  0xf4   : > { %v807_v45 = vpop.permute.xlu0 %806  ;;  %v809_v46 = vpop.permute.xlu1 %808  ;;  %2093 = vmatpush2.msra.mxu0 %v1928_v50  ;;  %4137 = vmatprep.subr.mxu1 %v14427_v0  ;;  %v1749_v50 = vld [vmem:[#allocation2 + $0x94] sm:$0xff]  ;;  %1164 = vst.msk [vmem:[#allocation3 + $0x2a8] sm:$0xff] %vm333_vm0, %v10359_v41 }
  0xf5   : > { %891 = vst.msk [vmem:[#allocation3 + $0x120] sm:$0xff] %vm878_vm4, %v807_v45  ;;  %892 = vst.msk [vmem:[#allocation3 + $0x138] sm:$0xff] %vm878_vm4, %v809_v46  ;;  %2094 = vmatprep.subr.mxu0 %v14427_v0 }
  0xf6   : > { %1244 = vrot.lane.b32.xlu0 %v9976_v47, %s9525_s16  ;;  %1246 = vrot.lane.b32.xlu1 %v9978_v48, %s9525_s16  ;;  %v1927_v47 = vld [vmem:[%s14418_s1 + $0xb0] sm:$0xff]  ;;  %v1814_v48 = vld [vmem:[#allocation3 + $0x28] sm:$0xff]  ;;  %1781 = vst.msk [vmem:[#allocation3 + $0x70] sm:$0xff] %vm333_vm0, %v1749_v50 }
  0xf7   : > { %2095 = vmatpush2.msra.mxu0 %v1927_v47  ;;  %9195 = vmatmul.mubr.msk.f32.vlgmr.msra.gmra.mxu1 %vm333_vm0, %v1814_v48  ;;  %v10389_v47 = vld [vmem:[#allocation2 + $0x18a] sm:$0xff]  ;;  %v1752_v50 = vld [vmem:[#allocation2 + $0xb4] sm:$0xff] }
  0xf8   : > { %v811_v44 = vpop.permute.xlu0 %810  ;;  %v813_v40 = vpop.permute.xlu1 %812  ;;  %2096 = vmatprep.subr.mxu0 %v14427_v0  ;;  %1165 = vst.msk [vmem:[#allocation3 + $0x2c0] sm:$0xff] %vm333_vm0, %v10389_v47  ;;  %1784 = vst.msk [vmem:[#allocation3 + $0xb8] sm:$0xff] %vm333_vm0, %v1752_v50  ;;  %v1753_v50 = vld [vmem:[#allocation2 + $0xc4] sm:$0xff] }
  0xf9   : > { %893 = vst.msk [vmem:[#allocation3 + $0x150] sm:$0xff] %vm878_vm4, %v811_v44  ;;  %894 = vst.msk [vmem:[#allocation3 + $0x168] sm:$0xff] %vm878_vm4, %v813_v40  ;;  %2097 = vmatpush2.msra.mxu0 %v1926_v26  ;;  %v1820_v34 = vld [vmem:[#allocation3 + $0x58] sm:$0xff]  ;;  %v1923_v40 = vld [vmem:[%s14418_s1 + $0x90] sm:$0xff] }
  0xfa   : > { %1425 = vrot.lane.b32.xlu0 %v9826_v55, %s9526_s17  ;;  %1617 = vrot.lane.b32.xlu1 %v9781_v32, %s9527_s18  ;;  %v1925_v55 = vld [vmem:[%s14418_s1 + $0xa0] sm:$0xff]  ;;  %v1924_v44 = vld [vmem:[%s14418_s1 + $0x98] sm:$0xff]  ;;  %1785 = vst.msk [vmem:[#allocation3 + $0xd0] sm:$0xff] %vm333_vm0, %v1753_v50 }
  0xfb   : > { %v1817_v32 = vld [vmem:[#allocation3 + $0x40] sm:$0xff]  ;;  %2098 = vmatprep.subr.mxu0 %v14427_v0 }
  0xfc   : > { %v815_v45 = vpop.permute.xlu0 %814  ;;  %v817_v46 = vpop.permute.xlu1 %816  ;;  %9197 = vmatprep.mubr.msk.f32.mxu1 %vm333_vm0, %v1817_v32  ;;  %2099 = vmatpush2.msra.mxu0 %v1925_v55  ;;  %v9486_v55 = vld [vmem:[#allocation2 + $0x82] sm:$0xff] }
  0xfd   : > { %895 = vst.msk [vmem:[#allocation3 + $0x180] sm:$0xff] %vm878_vm4, %v815_v45  ;;  %896 = vst.msk [vmem:[#allocation3 + $0x198] sm:$0xff] %vm878_vm4, %v817_v46  ;;  %9198 = vmatmul.mubr.msk.f32.gmra.mxu1 %vm333_vm0, %v1820_v34  ;;  %2100 = vmatprep.subr.mxu0 %v14427_v0  ;;  %v10399_v45 = vld [vmem:[#allocation2 + $0x16c] sm:$0xff]  ;;  %v1755_v50 = vld [vmem:[#allocation2 + $0xdc] sm:$0xff] }
  0xfe   : > { %1427 = vrot.lane.b32.xlu0 %v9828_v56, %s9526_s17  ;;  %1619 = vrot.lane.b32.xlu1 %v9783_v33, %s9527_s18  ;;  %v1751_v46 = vld [vmem:[#allocation2 + $0xac] sm:$0xff]  ;;  %1799 = vst.msk [vmem:[#allocation3 + $0x220] sm:$0xff] %vm333_vm0, %v10399_v45  ;;  %1787 = vst.msk [vmem:[#allocation3 + $0x100] sm:$0xff] %vm333_vm0, %v1755_v50  ;;  %v1758_v50 = vld [vmem:[#allocation2 + $0xfc] sm:$0xff] }
  0xff   : > { %2101 = vmatpush2.msra.mxu0 %v1924_v44  ;;  %v1826_v32 = vld [vmem:[#allocation3 + $0x88] sm:$0xff]  ;;  %1783 = vst.msk [vmem:[#allocation3 + $0xa0] sm:$0xff] %vm333_vm0, %v1751_v46  ;;  %v10422_v44 = vld [vmem:[#allocation2 + $0x174] sm:$0xff]  ;;  %1790 = vst.msk [vmem:[#allocation3 + $0x148] sm:$0xff] %vm333_vm0, %v1758_v50 }
 0x100   : > { %v819_v56 = vpop.permute.xlu0 %818  ;;  %v821_v33 = vpop.permute.xlu1 %820  ;;  %2102 = vmatprep.subr.mxu0 %v14427_v0  ;;  %1800 = vst.msk [vmem:[#allocation3 + $0x238] sm:$0xff] %vm333_vm0, %v10422_v44  ;;  %v10434_v46 = vld [vmem:[#allocation2 + $0x1a2] sm:$0xff] }
 0x101   : > { %897 = vst.msk [vmem:[#allocation3 + $0x1b0] sm:$0xff] %vm878_vm4, %v819_v56  ;;  %898 = vst.msk [vmem:[#allocation3 + $0x1c8] sm:$0xff] %vm878_vm4, %v821_v33  ;;  %2103 = vmatpush2.msra.mxu0 %v1923_v40  ;;  %v10417_v56 = vld [vmem:[#allocation2 + $0x19a] sm:$0xff]  ;;  %v9487_v33 = vld [vmem:[#allocation2 + $0x92] sm:$0xff] }
 0x102   : > { %1429 = vrot.lane.b32.xlu0 %v9836_v59, %s9526_s17  ;;  %1621 = vrot.lane.b32.xlu1 %v9799_v39, %s9527_s18  ;;  %v1922_v59 = vld [vmem:[%s14418_s1 + $0x88] sm:$0xff]  ;;  %v1823_v39 = vld [vmem:[#allocation3 + $0x70] sm:$0xff]  ;;  %1166 = vst.msk [vmem:[#allocation3 + $0x2d8] sm:$0xff] %vm333_vm0, %v10417_v56  ;;  %1167 = vst.msk [vmem:[#allocation3 + $0x2f0] sm:$0xff] %vm333_vm0, %v10434_v46 }
 0x103   : > { %2104 = vmatprep.subr.mxu0 %v14427_v0  ;;  %9200 = vmatprep.mubr.msk.f32.mxu1 %vm333_vm0, %v1823_v39  ;;  %v1112_v40 = vld [vmem:[#allocation2 + $0x92] sm:$0xff] }
 0x104   : > { %v823_v48 = vpop.permute.xlu0 %822  ;;  %v825_v26 = vpop.permute.xlu1 %824  ;;  %2105 = vmatpush2.msra.mxu0 %v1922_v59  ;;  %9201 = vmatmul.mubr.msk.f32.gmra.mxu1 %vm333_vm0, %v1826_v32  ;;  %1144 = vst.msk [vmem:[#allocation3 + $0xc8] sm:$0xff] %vm333_vm0, %v1112_v40  ;;  %v9488_v59 = vld [vmem:[#allocation2 + $0x9a] sm:$0xff] }
 0x105   : > { %899 = vst.msk [vmem:[#allocation3 + $0x1e0] sm:$0xff] %vm878_vm4, %v823_v48  ;;  %900 = vst.msk [vmem:[#allocation3 + $0x1f8] sm:$0xff] %vm878_vm4, %v825_v26  ;;  %2106 = vmatprep.subr.mxu0 %v14427_v0  ;;  %v1832_v39 = vld [vmem:[#allocation3 + $0xb8] sm:$0xff] }
 0x106   : > { %1431 = vrot.lane.b32.xlu0 %v9838_v60, %s9526_s17  ;;  %1623 = vrot.lane.b32.xlu1 %v9486_v55, %s9527_s18  ;;  %v1921_v60 = vld [vmem:[%s14418_s1 + $0x80] sm:$0xff] }
 0x107   : > { %2107 = vmatpush2.msra.mxu0 %v1921_v60  ;;  %v9489_v60 = vld [vmem:[#allocation2 + $0xaa] sm:$0xff] }
 0x108   : > { %v827_v34 = vpop.permute.xlu0 %826  ;;  %v829_v43 = vpop.permute.xlu1 %828 }
 0x109   : > { %901 = vst.msk [vmem:[#allocation3 + $0x210] sm:$0xff] %vm878_vm4, %v827_v34  ;;  %902 = vst.msk [vmem:[#allocation3 + $0x228] sm:$0xff] %vm878_vm4, %v829_v43  ;;  %v10442_v34 = vld [vmem:[#allocation2 + $0x184] sm:$0xff]  ;;  %v1754_v43 = vld [vmem:[#allocation2 + $0xcc] sm:$0xff] }
 0x10a   : > { %1433 = vrot.lane.b32.xlu0 %v9840_v61, %s9526_s17  ;;  %1625 = vrot.lane.b32.xlu1 %v9487_v33, %s9527_s18  ;;  %v1829_v61 = vld [vmem:[#allocation3 + $0xa0] sm:$0xff]  ;;  %1786 = vst.msk [vmem:[#allocation3 + $0xe8] sm:$0xff] %vm333_vm0, %v1754_v43  ;;  %1801 = vst.msk [vmem:[#allocation3 + $0x250] sm:$0xff] %vm333_vm0, %v10442_v34 }
 0x10b   : > { %9203 = vmatprep.mubr.msk.f32.mxu1 %vm333_vm0, %v1829_v61  ;;  %v10472_v43 = vld [vmem:[#allocation2 + $0x19c] sm:$0xff] }
 0x10c   : > { %v831_v48 = vpop.permute.xlu0 %830  ;;  %v833_v26 = vpop.permute.xlu1 %832  ;;  %9204 = vmatmul.mubr.msk.f32.gmra.mxu1 %vm333_vm0, %v1832_v39  ;;  %v1835_v39 = vld [vmem:[#allocation3 + $0xd0] sm:$0xff]  ;;  %1803 = vst.msk [vmem:[#allocation3 + $0x280] sm:$0xff] %vm333_vm0, %v10472_v43 }
 0x10d   : > { %903 = vst.msk [vmem:[#allocation3 + $0x240] sm:$0xff] %vm878_vm4, %v831_v48  ;;  %904 = vst.msk [vmem:[#allocation3 + $0x258] sm:$0xff] %vm878_vm4, %v833_v26  ;;  %v10457_v48 = vld [vmem:[#allocation2 + $0x18c] sm:$0xff]  ;;  %9206 = vmatprep.mubr.msk.f32.mxu1 %vm333_vm0, %v1835_v39 }
 0x10e   : > { %1435 = vrot.lane.b32.xlu0 %v9850_v62, %s9526_s17  ;;  %1627 = vrot.lane.b32.xlu1 %v9488_v59, %s9527_s18  ;;  %v1113_v62 = vld [vmem:[#allocation2 + $0x9a] sm:$0xff]  ;;  %v1114_v26 = vld [vmem:[#allocation2 + $0xaa] sm:$0xff]  ;;  %1802 = vst.msk [vmem:[#allocation3 + $0x268] sm:$0xff] %vm333_vm0, %v10457_v48 }
 0x10f   : > { %1145 = vst.msk [vmem:[#allocation3 + $0xe0] sm:$0xff] %vm333_vm0, %v1113_v62  ;;  %1146 = vst.msk [vmem:[#allocation3 + $0xf8] sm:$0xff] %vm333_vm0, %v1114_v26  ;;  %v1115_v62 = vld [vmem:[#allocation2 + $0xb2] sm:$0xff] }
 0x110   : > { %v835_v55 = vpop.permute.xlu0 %834  ;;  %v837_v32 = vpop.permute.xlu1 %836  ;;  %1147 = vst.msk [vmem:[#allocation3 + $0x110] sm:$0xff] %vm333_vm0, %v1115_v62  ;;  %v9493_v62 = vld [vmem:[#allocation2 + $0xda] sm:$0xff] }
 0x111   : > { %905 = vst.msk [vmem:[#allocation3 + $0x270] sm:$0xff] %vm878_vm4, %v835_v55  ;;  %906 = vst.msk [vmem:[#allocation3 + $0x288] sm:$0xff] %vm878_vm4, %v837_v32 }
 0x112   : > { %1437 = vrot.lane.b32.xlu0 %v9852_v63, %s9526_s17  ;;  %1629 = vrot.lane.b32.xlu1 %v9489_v60, %s9527_s18  ;;  %v9490_v63 = vld [vmem:[#allocation2 + $0xb2] sm:$0xff]  ;;  %v1756_v60 = vld [vmem:[#allocation2 + $0xe4] sm:$0xff] }
 0x113   : > { %1788 = vst.msk [vmem:[#allocation3 + $0x118] sm:$0xff] %vm333_vm0, %v1756_v60  ;;  %v9494_v60 = vld [vmem:[#allocation2 + $0xe2] sm:$0xff] }
 0x114   : > { %v839_v33 = vpop.permute.xlu0 %838  ;;  %v841_v40 = vpop.permute.xlu1 %840 }
 0x115   : > { %907 = vst.msk [vmem:[#allocation3 + $0x2a0] sm:$0xff] %vm878_vm4, %v839_v33  ;;  %908 = vst.msk [vmem:[#allocation3 + $0x2b8] sm:$0xff] %vm878_vm4, %v841_v40  ;;  %v9492_v40 = vld [vmem:[#allocation2 + $0xca] sm:$0xff] }
 0x116   : > { %1439 = vrot.lane.b32.xlu0 %v9854_v1, %s9526_s17  ;;  %1631 = vrot.lane.b32.xlu1 %v9490_v63, %s9527_s18  ;;  %v1838_v1 = vld [vmem:[#allocation3 + $0xe8] sm:$0xff] }
 0x117   : > { %9207 = vmatmul.mubr.msk.f32.gmra.mxu1 %vm333_vm0, %v1838_v1  ;;  %v1116_v63 = vld [vmem:[#allocation2 + $0xc2] sm:$0xff] }
 0x118   : > { %v843_v61 = vpop.permute.xlu0 %842  ;;  %v845_v59 = vpop.permute.xlu1 %844  ;;  %1148 = vst.msk [vmem:[#allocation3 + $0x128] sm:$0xff] %vm333_vm0, %v1116_v63 }
 0x119   : > { %909 = vst.msk [vmem:[#allocation3 + $0x2d0] sm:$0xff] %vm878_vm4, %v843_v61  ;;  %910 = vst.msk [vmem:[#allocation3 + $0x2e8] sm:$0xff] %vm878_vm4, %v845_v59  ;;  %v1841_v59 = vld [vmem:[#allocation3 + $0x100] sm:$0xff] }
 0x11a   : > { %1248 = vrot.lane.b32.xlu0 %v9984_v51, %s9525_s16  ;;  %1441 = vrot.lane.b32.xlu1 %v9862_v2, %s9526_s17  ;;  %v9491_v51 = vld [vmem:[#allocation2 + $0xc2] sm:$0xff] }
 0x11b   : > { %9209 = vmatprep.mubr.msk.f32.mxu1 %vm333_vm0, %v1841_v59  ;;  %v9495_v59 = vld [vmem:[#allocation2 + $0xf2] sm:$0xff] }
 0x11c   : > { %v976_v55 = vpop.permute.xlu0 %975  ;;  %v978_v32 = vpop.permute.xlu1 %977 }
 0x11d   : > { %1072 = vst.msk [vmem:[#allocation3] sm:$0xff] %vm1071_vm5, %v976_v55  ;;  %1073 = vst.msk [vmem:[#allocation3 + $0x18] sm:$0xff] %vm1071_vm5, %v978_v32  ;;  %v1757_v55 = vld [vmem:[#allocation2 + $0xf4] sm:$0xff]  ;;  %v1117_v32 = vld [vmem:[#allocation2 + $0xca] sm:$0xff] }
 0x11e   : > { %1633 = vrot.lane.b32.xlu0 %v9491_v51, %s9527_s18  ;;  %1250 = vrot.lane.b32.xlu1 %v9986_v52, %s9525_s16  ;;  %v10487_v52 = vld [vmem:[#allocation2 + $0x1a4] sm:$0xff]  ;;  %1789 = vst.msk [vmem:[#allocation3 + $0x130] sm:$0xff] %vm333_vm0, %v1757_v55  ;;  %1149 = vst.msk [vmem:[#allocation3 + $0x140] sm:$0xff] %vm333_vm0, %v1117_v32  ;;  %v1118_v51 = vld [vmem:[#allocation2 + $0xda] sm:$0xff] }
 0x11f   : > { %1804 = vst.msk [vmem:[#allocation3 + $0x298] sm:$0xff] %vm333_vm0, %v10487_v52  ;;  %1150 = vst.msk [vmem:[#allocation3 + $0x158] sm:$0xff] %vm333_vm0, %v1118_v51  ;;  %v9499_v51 = vld [vmem:[#allocation2 + $0xe4] sm:$0xff] }
 0x120   : > { %v980_v2 = vpop.permute.xlu0 %979  ;;  %v982_v33 = vpop.permute.xlu1 %981 }
 0x121   : > { %1074 = vst.msk [vmem:[#allocation3 + $0x30] sm:$0xff] %vm1071_vm5, %v980_v2  ;;  %1075 = vst.msk [vmem:[#allocation3 + $0x48] sm:$0xff] %vm1071_vm5, %v982_v33 }
 0x122   : > { %1443 = vrot.lane.b32.xlu0 %v9864_v3, %s9526_s17  ;;  %1635 = vrot.lane.b32.xlu1 %v9492_v40, %s9527_s18  ;;  %v1844_v3 = vld [vmem:[#allocation3 + $0x118] sm:$0xff]  ;;  %v1850_v40 = vld [vmem:[#allocation3 + $0x148] sm:$0xff] }
 0x123   : > { %9210 = vmatmul.mubr.msk.f32.gmra.mxu1 %vm333_vm0, %v1844_v3  ;;  %v9496_v3 = vld [vmem:[#allocation2 + $0xcc] sm:$0xff] }
 0x124   : > { %v984_v26 = vpop.permute.xlu0 %983  ;;  %v986_v61 = vpop.permute.xlu1 %985 }
 0x125   : > { %1076 = vst.msk [vmem:[#allocation3 + $0x60] sm:$0xff] %vm1071_vm5, %v984_v26  ;;  %1077 = vst.msk [vmem:[#allocation3 + $0x78] sm:$0xff] %vm1071_vm5, %v986_v61  ;;  %v1847_v33 = vld [vmem:[#allocation3 + $0x130] sm:$0xff]  ;;  %v1119_v61 = vld [vmem:[#allocation2 + $0xe2] sm:$0xff] }
 0x126   : > { %1252 = vrot.lane.b32.xlu0 %v9992_v57, %s9525_s16  ;;  %1445 = vrot.lane.b32.xlu1 %v9866_v4, %s9526_s17  ;;  %v1759_v26 = vld [vmem:[#allocation2 + $0x10c] sm:$0xff]  ;;  %1151 = vst.msk [vmem:[#allocation3 + $0x170] sm:$0xff] %vm333_vm0, %v1119_v61 }
 0x127   : > { %9212 = vmatprep.mubr.msk.f32.mxu1 %vm333_vm0, %v1847_v33  ;;  %1791 = vst.msk [vmem:[#allocation3 + $0x160] sm:$0xff] %vm333_vm0, %v1759_v26 }
 0x128   : > { %v988_v39 = vpop.permute.xlu0 %987  ;;  %v990_v1 = vpop.permute.xlu1 %989  ;;  %9213 = vmatmul.mubr.msk.f32.gmra.mxu1 %vm333_vm0, %v1850_v40  ;;  %v1862_v40 = vld [vmem:[#allocation3 + $0x1a8] sm:$0xff] }
 0x129   : > { %1078 = vst.msk [vmem:[#allocation3 + $0x90] sm:$0xff] %vm1071_vm5, %v988_v39  ;;  %1079 = vst.msk [vmem:[#allocation3 + $0xa8] sm:$0xff] %vm1071_vm5, %v990_v1  ;;  %v9497_v39 = vld [vmem:[#allocation2 + $0xfa] sm:$0xff]  ;;  %v1120_v1 = vld [vmem:[#allocation2 + $0xf2] sm:$0xff] }
 0x12a   : > { %1637 = vrot.lane.b32.xlu0 %v9493_v62, %s9527_s18  ;;  %1254 = vrot.lane.b32.xlu1 %v9994_v58, %s9525_s16  ;;  %1152 = vst.msk [vmem:[#allocation3 + $0x188] sm:$0xff] %vm333_vm0, %v1120_v1  ;;  %v1856_v62 = vld [vmem:[#allocation3 + $0x178] sm:$0xff] }
 0x12c   : > { %v992_v4 = vpop.permute.xlu0 %991  ;;  %v994_v57 = vpop.permute.xlu1 %993 }
 0x12d   : > { %1080 = vst.msk [vmem:[#allocation3 + $0xc0] sm:$0xff] %vm1071_vm5, %v992_v4  ;;  %1081 = vst.msk [vmem:[#allocation3 + $0xd8] sm:$0xff] %vm1071_vm5, %v994_v57  ;;  %v9498_v4 = vld [vmem:[#allocation2 + $0xdc] sm:$0xff] }
 0x12e   : > { %1447 = vrot.lane.b32.xlu0 %v9874_v5, %s9526_s17  ;;  %1639 = vrot.lane.b32.xlu1 %v9494_v60, %s9527_s18  ;;  %v1853_v50 = vld [vmem:[#allocation3 + $0x160] sm:$0xff] }
 0x12f   : > { %9215 = vmatprep.mubr.msk.f32.mxu1 %vm333_vm0, %v1853_v50  ;;  %v1121_v60 = vld [vmem:[#allocation2 + $0xfa] sm:$0xff] }
 0x130   : > { %v996_v58 = vpop.permute.xlu0 %995  ;;  %v998_v2 = vpop.permute.xlu1 %997  ;;  %9216 = vmatmul.mubr.msk.f32.gmra.mxu1 %vm333_vm0, %v1856_v62  ;;  %1153 = vst.msk [vmem:[#allocation3 + $0x1a0] sm:$0xff] %vm333_vm0, %v1121_v60  ;;  %v1877_v50 = vld [vmem:[#allocation3 + $0x220] sm:$0xff] }
 0x131   : > { %1082 = vst.msk [vmem:[#allocation3 + $0xf0] sm:$0xff] %vm1071_vm5, %v996_v58  ;;  %1083 = vst.msk [vmem:[#allocation3 + $0x108] sm:$0xff] %vm1071_vm5, %v998_v2 }
 0x132   : > { %1256 = vrot.lane.b32.xlu0 %v10000_v13, %s9525_s16  ;;  %1449 = vrot.lane.b32.xlu1 %v9876_v6, %s9526_s17 }
 0x134   : > { %v1000_v5 = vpop.permute.xlu0 %999  ;;  %v1002_v63 = vpop.permute.xlu1 %1001 }
 0x135   : > { %1084 = vst.msk [vmem:[#allocation3 + $0x120] sm:$0xff] %vm1071_vm5, %v1000_v5  ;;  %1085 = vst.msk [vmem:[#allocation3 + $0x138] sm:$0xff] %vm1071_vm5, %v1002_v63  ;;  %v9500_v5 = vld [vmem:[#allocation2 + $0xf4] sm:$0xff]  ;;  %v9501_v63 = vld [vmem:[#allocation2 + $0xfc] sm:$0xff] }
 0x136   : > { %1641 = vrot.lane.b32.xlu0 %v9495_v59, %s9527_s18  ;;  %1258 = vrot.lane.b32.xlu1 %v9496_v3, %s9525_s16  ;;  %v1865_v3 = vld [vmem:[#allocation3 + $0x1c0] sm:$0xff] }
 0x138   : > { %v1004_v6 = vpop.permute.xlu0 %1003  ;;  %v1006_v13 = vpop.permute.xlu1 %1005 }
 0x139   : > { %1086 = vst.msk [vmem:[#allocation3 + $0x150] sm:$0xff] %vm1071_vm5, %v1004_v6  ;;  %1087 = vst.msk [vmem:[#allocation3 + $0x168] sm:$0xff] %vm1071_vm5, %v1006_v13  ;;  %v9502_v6 = vld [vmem:[#allocation2 + $0x10c] sm:$0xff] }
 0x13a   : > { %1451 = vrot.lane.b32.xlu0 %v9878_v7, %s9526_s17  ;;  %1643 = vrot.lane.b32.xlu1 %v9497_v39, %s9527_s18 }
 0x13c   : > { %v1008_v55 = vpop.permute.xlu0 %1007  ;;  %v1010_v32 = vpop.permute.xlu1 %1009 }
 0x13d   : > { %1088 = vst.msk [vmem:[#allocation3 + $0x180] sm:$0xff] %vm1071_vm5, %v1008_v55  ;;  %1089 = vst.msk [vmem:[#allocation3 + $0x198] sm:$0xff] %vm1071_vm5, %v1010_v32  ;;  %v1871_v55 = vld [vmem:[#allocation3 + $0x1f0] sm:$0xff] }
 0x13e   : > { %1260 = vrot.lane.b32.xlu0 %v9498_v4, %s9525_s16  ;;  %1453 = vrot.lane.b32.xlu1 %v9886_v8, %s9526_s17 }
 0x140   : > { %v1012_v7 = vpop.permute.xlu0 %1011  ;;  %v1014_v57 = vpop.permute.xlu1 %1013 }
 0x141   : > { %1090 = vst.msk [vmem:[#allocation3 + $0x1b0] sm:$0xff] %vm1071_vm5, %v1012_v7  ;;  %1091 = vst.msk [vmem:[#allocation3 + $0x1c8] sm:$0xff] %vm1071_vm5, %v1014_v57  ;;  %v1883_v7 = vld [vmem:[#allocation3 + $0x250] sm:$0xff]  ;;  %v1886_v57 = vld [vmem:[#allocation3 + $0x268] sm:$0xff] }
 0x142   : > { %1645 = vrot.lane.b32.xlu0 %v10082_v38, %s9527_s18  ;;  %1262 = vrot.lane.b32.xlu1 %v9499_v51, %s9525_s16  ;;  %v1859_v38 = vld [vmem:[#allocation3 + $0x190] sm:$0xff] }
 0x143   : > { %9218 = vmatprep.mubr.msk.f32.mxu1 %vm333_vm0, %v1859_v38 }
 0x144   : > { %v1016_v58 = vpop.permute.xlu0 %1015  ;;  %v1018_v2 = vpop.permute.xlu1 %1017  ;;  %9219 = vmatmul.mubr.msk.f32.gmra.mxu1 %vm333_vm0, %v1862_v40 }
 0x145   : > { %1092 = vst.msk [vmem:[#allocation3 + $0x1e0] sm:$0xff] %vm1071_vm5, %v1016_v58  ;;  %1093 = vst.msk [vmem:[#allocation3 + $0x1f8] sm:$0xff] %vm1071_vm5, %v1018_v2  ;;  %9221 = vmatprep.mubr.msk.f32.mxu1 %vm333_vm0, %v1865_v3 }
 0x146   : > { %1455 = vrot.lane.b32.xlu0 %v9888_v9, %s9526_s17  ;;  %1647 = vrot.lane.b32.xlu1 %v10103_v21, %s9527_s18 }
 0x148   : > { %v1020_v8 = vpop.permute.xlu0 %1019  ;;  %v1022_v33 = vpop.permute.xlu1 %1021 }
 0x149   : > { %1094 = vst.msk [vmem:[#allocation3 + $0x210] sm:$0xff] %vm1071_vm5, %v1020_v8  ;;  %1095 = vst.msk [vmem:[#allocation3 + $0x228] sm:$0xff] %vm1071_vm5, %v1022_v33  ;;  %v1818_v8 = vld [vmem:[#allocation3 + $0x48] sm:$0xff]  ;;  %v1889_v33 = vld [vmem:[#allocation3 + $0x280] sm:$0xff] }
 0x14a   : > { %1264 = vrot.lane.b32.xlu0 %v9500_v5, %s9525_s16  ;;  %1457 = vrot.lane.b32.xlu1 %v9890_v10, %s9526_s17 }
 0x14c   : > { %v1024_v9 = vpop.permute.xlu0 %1023  ;;  %v1026_v21 = vpop.permute.xlu1 %1025 }
 0x14d   : > { %1096 = vst.msk [vmem:[#allocation3 + $0x240] sm:$0xff] %vm1071_vm5, %v1024_v9  ;;  %1097 = vst.msk [vmem:[#allocation3 + $0x258] sm:$0xff] %vm1071_vm5, %v1026_v21  ;;  %v1773_v9 = vld [vmem:[#allocation2 + $0x1b4] sm:$0xff] }
 0x14e   : > { %1649 = vrot.lane.b32.xlu0 %v10127_v54, %s9527_s18  ;;  %1266 = vrot.lane.b32.xlu1 %v9501_v63, %s9525_s16  ;;  %v1868_v54 = vld [vmem:[#allocation3 + $0x1d8] sm:$0xff]  ;;  %1805 = vst.msk [vmem:[#allocation3 + $0x2b0] sm:$0xff] %vm333_vm0, %v1773_v9 }
 0x14f   : > { %9222 = vmatmul.mubr.msk.f32.gmra.mxu1 %vm333_vm0, %v1868_v54  ;;  %v1774_v63 = vld [vmem:[#allocation2 + $0x1bc] sm:$0xff] }
 0x150   : > { %v1028_v26 = vpop.permute.xlu0 %1027  ;;  %v1030_v61 = vpop.permute.xlu1 %1029  ;;  %9224 = vmatprep.mubr.msk.f32.mxu1 %vm333_vm0, %v1871_v55  ;;  %1806 = vst.msk [vmem:[#allocation3 + $0x2c8] sm:$0xff] %vm333_vm0, %v1774_v63 }
 0x151   : > { %1098 = vst.msk [vmem:[#allocation3 + $0x270] sm:$0xff] %vm1071_vm5, %v1028_v26  ;;  %1099 = vst.msk [vmem:[#allocation3 + $0x288] sm:$0xff] %vm1071_vm5, %v1030_v61 }
 0x152   : > { %1459 = vrot.lane.b32.xlu0 %v9900_v11, %s9526_s17  ;;  %1651 = vrot.lane.b32.xlu1 %v10149_v31, %s9527_s18 }
 0x154   : > { %v1032_v10 = vpop.permute.xlu0 %1031  ;;  %v1034_v59 = vpop.permute.xlu1 %1033 }
 0x155   : > { %1100 = vst.msk [vmem:[#allocation3 + $0x2a0] sm:$0xff] %vm1071_vm5, %v1032_v10  ;;  %1101 = vst.msk [vmem:[#allocation3 + $0x2b8] sm:$0xff] %vm1071_vm5, %v1034_v59  ;;  %v1895_v54 = vld [vmem:[#allocation3 + $0x2b0] sm:$0xff] }
 0x156   : > { %1268 = vrot.lane.b32.xlu0 %v9502_v6, %s9525_s16  ;;  %1461 = vrot.lane.b32.xlu1 %v9902_v12, %s9526_s17  ;;  %3898 = vst.msk [vmem:[#allocation3 + $0x2b0] sm:$0xff] %vm333_vm0, %v1773_v9  ;;  %v2622_v9 = vld [vmem:[#allocation2 + $0x2] sm:$0xff] }
 0x158   : > { %v1036_v11 = vpop.permute.xlu0 %1035  ;;  %v1038_v31 = vpop.permute.xlu1 %1037 }
 0x159   : > { %1102 = vst.msk [vmem:[#allocation3 + $0x2d0] sm:$0xff] %vm1071_vm5, %v1036_v11  ;;  %1103 = vst.msk [vmem:[#allocation3 + $0x2e8] sm:$0xff] %vm1071_vm5, %v1038_v31  ;;  %v1898_v11 = vld [vmem:[#allocation3 + $0x2c8] sm:$0xff]  ;;  %v1581_v31 = vld [vmem:[#allocation2 + $0x1b2] sm:$0xff] }
 0x15a   : > { %1653 = vrot.lane.b32.xlu0 %v10170_v17, %s9527_s18  ;;  %1270 = vrot.lane.b32.xlu1 %v10179_v22, %s9525_s16  ;;  %v1874_v17 = vld [vmem:[#allocation3 + $0x208] sm:$0xff]  ;;  %3899 = vst.msk [vmem:[#allocation3 + $0x2c8] sm:$0xff] %vm333_vm0, %v1774_v63 }
 0x15b   : > { %9225 = vmatmul.mubr.msk.f32.gmra.mxu1 %vm333_vm0, %v1874_v17 }
 0x15c   : > { %v1233_v13 = vpop.permute.xlu0 %1232  ;;  %v1235_v39 = vpop.permute.xlu1 %1234  ;;  %9227 = vmatprep.mubr.msk.f32.mxu1 %vm333_vm0, %v1877_v50 }
 0x15d   : > { %1328 = vst.msk [vmem:[#allocation3 + $0x8] sm:$0xff] %vm685_vm3, %v1233_v13  ;;  %1329 = vst.msk [vmem:[#allocation3 + $0x20] sm:$0xff] %vm685_vm3, %v1235_v39 }
 0x15e   : > { %1463 = vrot.lane.b32.xlu0 %v9908_v15, %s9526_s17  ;;  %1655 = vrot.lane.b32.xlu1 %v10197_v53, %s9527_s18 }
 0x160   : > { %v1237_v12 = vpop.permute.xlu0 %1236  ;;  %v1239_v1 = vpop.permute.xlu1 %1238 }
 0x161   : > { %1330 = vst.msk [vmem:[#allocation3 + $0x38] sm:$0xff] %vm685_vm3, %v1237_v12  ;;  %1331 = vst.msk [vmem:[#allocation3 + $0x50] sm:$0xff] %vm685_vm3, %v1239_v1  ;;  %v1775_v12 = vld [vmem:[#allocation2 + $0x1cc] sm:$0xff]  ;;  %v1776_v1 = vld [vmem:[#allocation2 + $0x1d4] sm:$0xff] }
 0x162   : > { %1272 = vrot.lane.b32.xlu0 %v10213_v37, %s9525_s16  ;;  %1465 = vrot.lane.b32.xlu1 %v9914_v16, %s9526_s17  ;;  %1807 = vst.msk [vmem:[#allocation3 + $0x2e0] sm:$0xff] %vm333_vm0, %v1775_v12  ;;  %1808 = vst.msk [vmem:[#allocation3 + $0x2f8] sm:$0xff] %vm333_vm0, %v1776_v1 }
 0x164   : > { %v1241_v15 = vpop.permute.xlu0 %1240  ;;  %v1243_v22 = vpop.permute.xlu1 %1242 }
 0x165   : > { %1332 = vst.msk [vmem:[#allocation3 + $0x68] sm:$0xff] %vm685_vm3, %v1241_v15  ;;  %1333 = vst.msk [vmem:[#allocation3 + $0x80] sm:$0xff] %vm685_vm3, %v1243_v22  ;;  %v1582_v22 = vld [vmem:[#allocation2 + $0x1ba] sm:$0xff] }
 0x166   : > { %1657 = vrot.lane.b32.xlu0 %v10234_v27, %s9527_s18  ;;  %1274 = vrot.lane.b32.xlu1 %v10240_v30, %s9525_s16  ;;  %v1880_v27 = vld [vmem:[#allocation3 + $0x238] sm:$0xff] }
 0x167   : > { %9228 = vmatmul.mubr.msk.f32.gmra.mxu1 %vm333_vm0, %v1880_v27 }
 0x168   : > { %v1245_v53 = vpop.permute.xlu0 %1244  ;;  %v1247_v32 = vpop.permute.xlu1 %1246  ;;  %9230 = vmatprep.mubr.msk.f32.mxu1 %vm333_vm0, %v1883_v7  ;;  %v1839_v7 = vld [vmem:[#allocation3 + $0xf0] sm:$0xff] }
 0x169   : > { %1334 = vst.msk [vmem:[#allocation3 + $0x98] sm:$0xff] %vm685_vm3, %v1245_v53  ;;  %1335 = vst.msk [vmem:[#allocation3 + $0xb0] sm:$0xff] %vm685_vm3, %v1247_v32  ;;  %v1833_v53 = vld [vmem:[#allocation3 + $0xc0] sm:$0xff]  ;;  %v1904_v27 = vld [vmem:[#allocation3 + $0x2f8] sm:$0xff] }
 0x16a   : > { %1467 = vrot.lane.b32.xlu0 %v9918_v19, %s9526_s17  ;;  %1659 = vrot.lane.b32.xlu1 %v10262_v25, %s9527_s18  ;;  %3901 = vst.msk [vmem:[#allocation3 + $0x2f8] sm:$0xff] %vm333_vm0, %v1776_v1 }
 0x16b   : > { %9231 = vmatmul.mubr.msk.f32.gmra.mxu1 %vm333_vm0, %v1886_v57 }
 0x16c   : > { %v1426_v16 = vpop.permute.xlu0 %1425  ;;  %v1618_v37 = vpop.permute.xlu1 %1617  ;;  %9233 = vmatprep.mubr.msk.f32.mxu1 %vm333_vm0, %v1889_v33 }
 0x16d   : > { %1521 = vst.msk [vmem:[#allocation3 + $0x8] sm:$0xff] %vm878_vm4, %v1426_v16 }
 0x16e   : > { %1713 = vst.msk [vmem:[#allocation3 + $0x8] sm:$0xff] %vm1071_vm5, %v1618_v37  ;;  %1276 = vrot.lane.b32.xlu0 %v10272_v42, %s9525_s16  ;;  %1469 = vrot.lane.b32.xlu1 %v9924_v20, %s9526_s17  ;;  %v1809_v20 = vld [vmem:[#allocation3] sm:$0xff]  ;;  %v1391_v37 = vld [vmem:[#allocation2 + $0x1c8] sm:$0xff] }
 0x170   : > { %v1428_v19 = vpop.permute.xlu0 %1427  ;;  %v1620_v30 = vpop.permute.xlu1 %1619 }
 0x171   : > { %1522 = vst.msk [vmem:[#allocation3 + $0x20] sm:$0xff] %vm878_vm4, %v1428_v19  ;;  %v1836_v19 = vld [vmem:[#allocation3 + $0xd8] sm:$0xff] }
 0x172   : > { %1714 = vst.msk [vmem:[#allocation3 + $0x20] sm:$0xff] %vm1071_vm5, %v1620_v30  ;;  %1661 = vrot.lane.b32.xlu0 %v10295_v14, %s9527_s18  ;;  %1278 = vrot.lane.b32.xlu1 %v10307_v49, %s9525_s16  ;;  %v1583_v30 = vld [vmem:[#allocation2 + $0x1ca] sm:$0xff] }
 0x174   : > { %v1430_v25 = vpop.permute.xlu0 %1429  ;;  %v1622_v62 = vpop.permute.xlu1 %1621 }
 0x175   : > { %1523 = vst.msk [vmem:[#allocation3 + $0x38] sm:$0xff] %vm878_vm4, %v1430_v25  ;;  %v1810_v42 = vld [vmem:[#allocation3 + $0x8] sm:$0xff] }
 0x176   : > { %1715 = vst.msk [vmem:[#allocation3 + $0x38] sm:$0xff] %vm1071_vm5, %v1622_v62  ;;  %1471 = vrot.lane.b32.xlu0 %v9928_v23, %s9526_s17  ;;  %2108 = vmatprep.mubr.f32.mxu0 %v1810_v42  ;;  %v1812_v23 = vld [vmem:[#allocation3 + $0x18] sm:$0xff] }
 0x177   : > { %1663 = vrot.lane.b32.xlu1 %v10326_v36, %s9527_s18  ;;  %2109 = vmatmul.mubr.f32.vlgmr.msra.gmra.mxu0 %v1809_v20 }
 0x178   : > { %v1432_v14 = vpop.permute.xlu0 %1431  ;;  %v1624_v4 = vpop.permute.xlu1 %1623 }
 0x179   : > { %1524 = vst.msk [vmem:[#allocation3 + $0x50] sm:$0xff] %vm878_vm4, %v1432_v14  ;;  %v1813_v49 = vld [vmem:[#allocation3 + $0x20] sm:$0xff] }
 0x17a   : > { %1716 = vst.msk [vmem:[#allocation3 + $0x50] sm:$0xff] %vm1071_vm5, %v1624_v4  ;;  %1280 = vrot.lane.b32.xlu0 %v10340_v24, %s9525_s16  ;;  %2113 = vmatprep.mubr.f32.mxu0 %v1813_v49  ;;  %v1815_v24 = vld [vmem:[#allocation3 + $0x30] sm:$0xff] }
 0x17b   : > { %1473 = vrot.lane.b32.xlu1 %v10199_v28, %s9526_s17  ;;  %2114 = vmatmul.mubr.f32.gmra.mxu0 %v1812_v23  ;;  %v1584_v4 = vld [vmem:[#allocation2 + $0x1d2] sm:$0xff]  ;;  %v1842_v23 = vld [vmem:[#allocation3 + $0x108] sm:$0xff] }
 0x17c   : > { %v1434_v36 = vpop.permute.xlu0 %1433  ;;  %v1626_v60 = vpop.permute.xlu1 %1625 }
 0x17d   : > { %1525 = vst.msk [vmem:[#allocation3 + $0x68] sm:$0xff] %vm878_vm4, %v1434_v36  ;;  %v1816_v51 = vld [vmem:[#allocation3 + $0x38] sm:$0xff] }
 0x17e   : > { %1717 = vst.msk [vmem:[#allocation3 + $0x68] sm:$0xff] %vm1071_vm5, %v1626_v60  ;;  %1665 = vrot.lane.b32.xlu0 %v10359_v41, %s9527_s18  ;;  %2118 = vmatprep.mubr.f32.mxu0 %v1816_v51  ;;  %v1892_v41 = vld [vmem:[#allocation3 + $0x298] sm:$0xff] }
 0x17f   : > { %1282 = vrot.lane.b32.xlu1 %v10365_v35, %s9525_s16  ;;  %2119 = vmatmul.mubr.f32.gmra.mxu0 %v1815_v24 }
 0x180   : > { %v1436_v28 = vpop.permute.xlu0 %1435  ;;  %v1628_v58 = vpop.permute.xlu1 %1627  ;;  %9234 = vmatmul.mubr.msk.f32.gmra.mxu1 %vm333_vm0, %v1892_v41  ;;  %v1848_v41 = vld [vmem:[#allocation3 + $0x138] sm:$0xff] }
 0x181   : > { %1526 = vst.msk [vmem:[#allocation3 + $0x80] sm:$0xff] %vm878_vm4, %v1436_v28  ;;  %v1819_v2 = vld [vmem:[#allocation3 + $0x50] sm:$0xff]  ;;  %9236 = vmatprep.mubr.msk.f32.mxu1 %vm333_vm0, %v1895_v54 }
 0x182   : > { %1718 = vst.msk [vmem:[#allocation3 + $0x80] sm:$0xff] %vm1071_vm5, %v1628_v58  ;;  %1475 = vrot.lane.b32.xlu0 %v10201_v29, %s9526_s17  ;;  %2123 = vmatprep.mubr.f32.mxu0 %v1819_v2  ;;  %v1821_v29 = vld [vmem:[#allocation3 + $0x60] sm:$0xff] }
 0x183   : > { %1667 = vrot.lane.b32.xlu1 %v10389_v47, %s9527_s18  ;;  %2124 = vmatmul.mubr.f32.gmra.mxu0 %v1818_v8  ;;  %v1845_v58 = vld [vmem:[#allocation3 + $0x120] sm:$0xff] }
 0x184   : > { %v1438_v35 = vpop.permute.xlu0 %1437  ;;  %v1630_v38 = vpop.permute.xlu1 %1629  ;;  %9237 = vmatmul.mubr.msk.f32.gmra.mxu1 %vm333_vm0, %v1898_v11 }
 0x185   : > { %1527 = vst.msk [vmem:[#allocation3 + $0x98] sm:$0xff] %vm878_vm4, %v1438_v35  ;;  %v1822_v40 = vld [vmem:[#allocation3 + $0x68] sm:$0xff] }
 0x186   : > { %1719 = vst.msk [vmem:[#allocation3 + $0x98] sm:$0xff] %vm1071_vm5, %v1630_v38  ;;  %1284 = vrot.lane.b32.xlu0 %v10399_v45, %s9525_s16  ;;  %2128 = vmatprep.mubr.f32.mxu0 %v1822_v40  ;;  %v1824_v45 = vld [vmem:[#allocation3 + $0x78] sm:$0xff] }
 0x187   : > { %1477 = vrot.lane.b32.xlu1 %v10225_v18, %s9526_s17  ;;  %2129 = vmatmul.mubr.f32.gmra.mxu0 %v1821_v29  ;;  %v1388_v18 = vld [vmem:[#allocation2 + $0x1a0] sm:$0xff] }
 0x188   : > { %v1440_v47 = vpop.permute.xlu0 %1439  ;;  %v1632_v5 = vpop.permute.xlu1 %1631 }
 0x189   : > { %1528 = vst.msk [vmem:[#allocation3 + $0xb0] sm:$0xff] %vm878_vm4, %v1440_v47  ;;  %v1825_v21 = vld [vmem:[#allocation3 + $0x80] sm:$0xff] }
 0x18a   : > { %1720 = vst.msk [vmem:[#allocation3 + $0xb0] sm:$0xff] %vm1071_vm5, %v1632_v5  ;;  %1669 = vrot.lane.b32.xlu0 %v10417_v56, %s9527_s18  ;;  %2133 = vmatprep.mubr.f32.mxu0 %v1825_v21  ;;  %v1827_v56 = vld [vmem:[#allocation3 + $0x90] sm:$0xff] }
 0x18b   : > { %1286 = vrot.lane.b32.xlu1 %v10422_v44, %s9525_s16  ;;  %2134 = vmatmul.mubr.f32.gmra.mxu0 %v1824_v45  ;;  %v1389_v44 = vld [vmem:[#allocation2 + $0x1b0] sm:$0xff] }
 0x18c   : > { %v1249_v26 = vpop.permute.xlu0 %1248  ;;  %v1442_v61 = vpop.permute.xlu1 %1441  ;;  %v1851_v5 = vld [vmem:[#allocation3 + $0x150] sm:$0xff] }
 0x18d   : > { %1336 = vst.msk [vmem:[#allocation3 + $0xc8] sm:$0xff] %vm685_vm3, %v1249_v26  ;;  %v1828_v10 = vld [vmem:[#allocation3 + $0x98] sm:$0xff] }
 0x18e   : > { %1529 = vst.msk [vmem:[#allocation3 + $0xc8] sm:$0xff] %vm878_vm4, %v1442_v61  ;;  %1479 = vrot.lane.b32.xlu0 %v1388_v18, %s9526_s17  ;;  %2138 = vmatprep.mubr.f32.mxu0 %v1828_v10  ;;  %v2623_v18 = vld [vmem:[#allocation2 + $0xa] sm:$0xff]  ;;  %v2624_v26 = vld [vmem:[#allocation2 + $0x1a] sm:$0xff] }
 0x18f   : > { %1671 = vrot.lane.b32.xlu1 %v10434_v46, %s9527_s18  ;;  %2139 = vmatmul.mubr.f32.gmra.mxu0 %v1827_v56  ;;  %v1830_v46 = vld [vmem:[#allocation3 + $0xa8] sm:$0xff] }
 0x190   : > { %v1634_v59 = vpop.permute.xlu0 %1633  ;;  %v1251_v3 = vpop.permute.xlu1 %1250  ;;  %v1854_v61 = vld [vmem:[#allocation3 + $0x168] sm:$0xff] }
 0x191   : > { %1721 = vst.msk [vmem:[#allocation3 + $0xc8] sm:$0xff] %vm1071_vm5, %v1634_v59  ;;  %v1831_v6 = vld [vmem:[#allocation3 + $0xb0] sm:$0xff]  ;;  %v2625_v59 = vld [vmem:[#allocation2 + $0x22] sm:$0xff] }
 0x192   : > { %1337 = vst.msk [vmem:[#allocation3 + $0xe0] sm:$0xff] %vm685_vm3, %v1251_v3  ;;  %1288 = vrot.lane.b32.xlu0 %v10442_v34, %s9525_s16  ;;  %2143 = vmatprep.mubr.f32.mxu0 %v1831_v6  ;;  %v1390_v34 = vld [vmem:[#allocation2 + $0x1b8] sm:$0xff]  ;;  %v1857_v6 = vld [vmem:[#allocation3 + $0x180] sm:$0xff] }
 0x193   : > { %1481 = vrot.lane.b32.xlu1 %v1389_v44, %s9526_s17  ;;  %2144 = vmatmul.mubr.f32.gmra.mxu0 %v1830_v46 }
 0x194   : > { %v1444_v13 = vpop.permute.xlu0 %1443  ;;  %v1636_v39 = vpop.permute.xlu1 %1635 }
 0x195   : > { %1530 = vst.msk [vmem:[#allocation3 + $0xe0] sm:$0xff] %vm878_vm4, %v1444_v13  ;;  %v1860_v13 = vld [vmem:[#allocation3 + $0x198] sm:$0xff] }
 0x196   : > { %1722 = vst.msk [vmem:[#allocation3 + $0xe0] sm:$0xff] %vm1071_vm5, %v1636_v39  ;;  %1673 = vrot.lane.b32.xlu0 %v1581_v31, %s9527_s18 }
 0x197   : > { %1290 = vrot.lane.b32.xlu1 %v10457_v48, %s9525_s16  ;;  %v1901_v48 = vld [vmem:[#allocation3 + $0x2e0] sm:$0xff] }
 0x198   : > { %v1253_v55 = vpop.permute.xlu0 %1252  ;;  %v1446_v17 = vpop.permute.xlu1 %1445  ;;  %v1834_v15 = vld [vmem:[#allocation3 + $0xc8] sm:$0xff]  ;;  %9239 = vmatprep.mubr.msk.f32.mxu1 %vm333_vm0, %v1901_v48  ;;  %3900 = vst.msk [vmem:[#allocation3 + $0x2e0] sm:$0xff] %vm333_vm0, %v1775_v12 }
 0x199   : > { %1338 = vst.msk [vmem:[#allocation3 + $0xf8] sm:$0xff] %vm685_vm3, %v1253_v55  ;;  %2148 = vmatprep.mubr.f32.mxu0 %v1834_v15  ;;  %9240 = vmatmul.mubr.msk.f32.gmra.mxu1 %vm333_vm0, %v1904_v27  ;;  %v4031_v27 = vld [vmem:[%s14420_s3 + $0x108] sm:$0xff] }
 0x19a   : > { %1531 = vst.msk [vmem:[#allocation3 + $0xf8] sm:$0xff] %vm878_vm4, %v1446_v17  ;;  %1483 = vrot.lane.b32.xlu0 %v1390_v34, %s9526_s17  ;;  %2149 = vmatmul.mubr.f32.gmra.mxu0 %v1833_v53  ;;  %v1863_v17 = vld [vmem:[#allocation3 + $0x1b0] sm:$0xff] }
 0x19b   : > { %1675 = vrot.lane.b32.xlu1 %v1582_v22, %s9527_s18 }
 0x19c   : > { %v1638_v32 = vpop.permute.xlu0 %1637  ;;  %v1255_v16 = vpop.permute.xlu1 %1254 }
 0x19d   : > { %1723 = vst.msk [vmem:[#allocation3 + $0xf8] sm:$0xff] %vm1071_vm5, %v1638_v32  ;;  %v1837_v50 = vld [vmem:[#allocation3 + $0xe0] sm:$0xff]  ;;  %v1866_v32 = vld [vmem:[#allocation3 + $0x1c8] sm:$0xff] }
 0x19e   : > { %1339 = vst.msk [vmem:[#allocation3 + $0x110] sm:$0xff] %vm685_vm3, %v1255_v16  ;;  %1292 = vrot.lane.b32.xlu0 %v10472_v43, %s9525_s16  ;;  %2153 = vmatprep.mubr.f32.mxu0 %v1837_v50  ;;  %v1392_v43 = vld [vmem:[#allocation2 + $0x1d0] sm:$0xff]  ;;  %v4033_v16 = vld [vmem:[%s14420_s3 + $0x118] sm:$0xff] }
 0x19f   : > { %1485 = vrot.lane.b32.xlu1 %v1391_v37, %s9526_s17  ;;  %2154 = vmatmul.mubr.f32.gmra.mxu0 %v1836_v19  ;;  %v4032_v50 = vld [vmem:[%s14420_s3 + $0x110] sm:$0xff] }
 0x1a0   : > { %v1448_v25 = vpop.permute.xlu0 %1447  ;;  %v1640_v62 = vpop.permute.xlu1 %1639  ;;  %9242 = vmatprep.subr.mxu0 %v4033_v16 }
 0x1a1   : > { %1532 = vst.msk [vmem:[#allocation3 + $0x110] sm:$0xff] %vm878_vm4, %v1448_v25  ;;  %9243 = vmatpush3.msra.mxu0 %v4033_v16  ;;  %v2558_v16 = vld [vmem:[#allocation2] sm:$0xff] }
 0x1a2   : > { %1724 = vst.msk [vmem:[#allocation3 + $0x110] sm:$0xff] %vm1071_vm5, %v1640_v62  ;;  %1677 = vrot.lane.b32.xlu0 %v1583_v30, %s9527_s18  ;;  %9244 = vmatprep.subr.mxu0 %v4032_v50  ;;  %v4030_v62 = vld [vmem:[%s14420_s3 + $0x100] sm:$0xff] }
 0x1a3   : > { %1294 = vrot.lane.b32.xlu1 %v10487_v52, %s9525_s16  ;;  %9245 = vmatpush3.msra.mxu0 %v4032_v50  ;;  %2590 = vst.msk [vmem:[#allocation3] sm:$0xff] %vm333_vm0, %v2558_v16 }
 0x1a4   : > { %v1257_v42 = vpop.permute.xlu0 %1256  ;;  %v1450_v20 = vpop.permute.xlu1 %1449  ;;  %v1840_v14 = vld [vmem:[#allocation3 + $0xf8] sm:$0xff]  ;;  %9246 = vmatprep.subr.mxu0 %v4031_v27 }
 0x1a5   : > { %1340 = vst.msk [vmem:[#allocation3 + $0x128] sm:$0xff] %vm685_vm3, %v1257_v42  ;;  %2158 = vmatprep.mubr.f32.mxu0 %v1840_v14  ;;  %9247 = vmatpush3.msra.mxu0 %v4031_v27 }
 0x1a6   : > { %1533 = vst.msk [vmem:[#allocation3 + $0x128] sm:$0xff] %vm878_vm4, %v1450_v20  ;;  %1487 = vrot.lane.b32.xlu0 %v1392_v43, %s9526_s17  ;;  %2159 = vmatmul.mubr.f32.gmra.mxu0 %v1839_v7  ;;  %v1869_v43 = vld [vmem:[#allocation3 + $0x1e0] sm:$0xff] }
 0x1a7   : > { %1679 = vrot.lane.b32.xlu1 %v1584_v4, %s9527_s18  ;;  %9248 = vmatprep.subr.mxu0 %v4030_v62  ;;  %v1872_v4 = vld [vmem:[#allocation3 + $0x1f8] sm:$0xff] }
 0x1a8   : > { %v1642_v49 = vpop.permute.xlu0 %1641  ;;  %v1259_v57 = vpop.permute.xlu1 %1258  ;;  %9249 = vmatpush3.msra.mxu0 %v4030_v62  ;;  %v2559_v62 = vld [vmem:[#allocation2 + $0x8] sm:$0xff] }
 0x1a9   : > { %1725 = vst.msk [vmem:[#allocation3 + $0x128] sm:$0xff] %vm1071_vm5, %v1642_v49  ;;  %v1843_v52 = vld [vmem:[#allocation3 + $0x110] sm:$0xff] }
 0x1aa   : > { %1341 = vst.msk [vmem:[#allocation3 + $0x140] sm:$0xff] %vm685_vm3, %v1259_v57  ;;  %2163 = vmatprep.mubr.f32.mxu0 %v1843_v52  ;;  %2686 = vrot.lane.b32.xlu0 %v2622_v9, %s9525_s16 }
 0x1ab   : > { %2164 = vmatmul.mubr.f32.gmra.mxu0 %v1842_v23  ;;  %2688 = vrot.lane.b32.xlu1 %v2623_v18, %s9525_s16  ;;  %v1887_v18 = vld [vmem:[#allocation3 + $0x270] sm:$0xff]  ;;  %2591 = vst.msk [vmem:[#allocation3 + $0x18] sm:$0xff] %vm333_vm0, %v2559_v62 }
 0x1ac   : > { %v1452_v36 = vpop.permute.xlu0 %1451  ;;  %v1644_v60 = vpop.permute.xlu1 %1643 }
 0x1ad   : > { %1534 = vst.msk [vmem:[#allocation3 + $0x140] sm:$0xff] %vm878_vm4, %v1452_v36  ;;  %v1875_v36 = vld [vmem:[#allocation3 + $0x210] sm:$0xff] }
 0x1ae   : > { %1726 = vst.msk [vmem:[#allocation3 + $0x140] sm:$0xff] %vm1071_vm5, %v1644_v60  ;;  %2690 = vrot.lane.b32.xlu0 %v2624_v26, %s9525_s16 }
 0x1af   : > { %2692 = vrot.lane.b32.xlu1 %v2625_v59, %s9525_s16 }
 0x1b0   : > { %v1261_v51 = vpop.permute.xlu0 %1260  ;;  %v1454_v24 = vpop.permute.xlu1 %1453  ;;  %v1846_v28 = vld [vmem:[#allocation3 + $0x128] sm:$0xff] }
 0x1b1   : > { %1342 = vst.msk [vmem:[#allocation3 + $0x158] sm:$0xff] %vm685_vm3, %v1261_v51  ;;  %2168 = vmatprep.mubr.f32.mxu0 %v1846_v28  ;;  %v1878_v28 = vld [vmem:[#allocation3 + $0x228] sm:$0xff] }
 0x1b2   : > { %1535 = vst.msk [vmem:[#allocation3 + $0x158] sm:$0xff] %vm878_vm4, %v1454_v24  ;;  %2169 = vmatmul.mubr.f32.gmra.mxu0 %v1845_v58 }
 0x1b4   : > { %v1646_v2 = vpop.permute.xlu0 %1645  ;;  %v1263_v8 = vpop.permute.xlu1 %1262 }
 0x1b5   : > { %1727 = vst.msk [vmem:[#allocation3 + $0x158] sm:$0xff] %vm1071_vm5, %v1646_v2  ;;  %v1849_v33 = vld [vmem:[#allocation3 + $0x140] sm:$0xff] }
 0x1b6   : > { %1343 = vst.msk [vmem:[#allocation3 + $0x170] sm:$0xff] %vm685_vm3, %v1263_v8  ;;  %2173 = vmatprep.mubr.f32.mxu0 %v1849_v33 }
 0x1b7   : > { %2174 = vmatmul.mubr.f32.gmra.mxu0 %v1848_v41 }
 0x1b8   : > { %v1456_v35 = vpop.permute.xlu0 %1455  ;;  %v1648_v38 = vpop.permute.xlu1 %1647 }
 0x1b9   : > { %1536 = vst.msk [vmem:[#allocation3 + $0x170] sm:$0xff] %vm878_vm4, %v1456_v35  ;;  %v1881_v35 = vld [vmem:[#allocation3 + $0x240] sm:$0xff] }
 0x1ba   : > { %1728 = vst.msk [vmem:[#allocation3 + $0x170] sm:$0xff] %vm1071_vm5, %v1648_v38 }
 0x1bc   : > { %v1265_v40 = vpop.permute.xlu0 %1264  ;;  %v1458_v29 = vpop.permute.xlu1 %1457  ;;  %v1852_v47 = vld [vmem:[#allocation3 + $0x158] sm:$0xff] }
 0x1bd   : > { %1344 = vst.msk [vmem:[#allocation3 + $0x188] sm:$0xff] %vm685_vm3, %v1265_v40  ;;  %2178 = vmatprep.mubr.f32.mxu0 %v1852_v47  ;;  %v1884_v47 = vld [vmem:[#allocation3 + $0x258] sm:$0xff] }
 0x1be   : > { %1537 = vst.msk [vmem:[#allocation3 + $0x188] sm:$0xff] %vm878_vm4, %v1458_v29  ;;  %2179 = vmatmul.mubr.f32.gmra.mxu0 %v1851_v5 }
 0x1c0   : > { %v1650_v21 = vpop.permute.xlu0 %1649  ;;  %v1267_v63 = vpop.permute.xlu1 %1266 }
 0x1c1   : > { %1729 = vst.msk [vmem:[#allocation3 + $0x188] sm:$0xff] %vm1071_vm5, %v1650_v21  ;;  %v1855_v45 = vld [vmem:[#allocation3 + $0x170] sm:$0xff] }
 0x1c2   : > { %1345 = vst.msk [vmem:[#allocation3 + $0x1a0] sm:$0xff] %vm685_vm3, %v1267_v63  ;;  %2183 = vmatprep.mubr.f32.mxu0 %v1855_v45 }
 0x1c3   : > { %2184 = vmatmul.mubr.f32.gmra.mxu0 %v1854_v61 }
 0x1c4   : > { %v1460_v10 = vpop.permute.xlu0 %1459  ;;  %v1652_v56 = vpop.permute.xlu1 %1651 }
 0x1c5   : > { %1538 = vst.msk [vmem:[#allocation3 + $0x1a0] sm:$0xff] %vm878_vm4, %v1460_v10 }
 0x1c6   : > { %1730 = vst.msk [vmem:[#allocation3 + $0x1a0] sm:$0xff] %vm1071_vm5, %v1652_v56  ;;  %v1890_v56 = vld [vmem:[#allocation3 + $0x288] sm:$0xff] }
 0x1c8   : > { %v1269_v3 = vpop.permute.xlu0 %1268  ;;  %v1462_v44 = vpop.permute.xlu1 %1461  ;;  %v1858_v54 = vld [vmem:[#allocation3 + $0x188] sm:$0xff] }
 0x1c9   : > { %1346 = vst.msk [vmem:[#allocation3 + $0x1b8] sm:$0xff] %vm685_vm3, %v1269_v3  ;;  %2188 = vmatprep.mubr.f32.mxu0 %v1858_v54 }
 0x1ca   : > { %1539 = vst.msk [vmem:[#allocation3 + $0x1b8] sm:$0xff] %vm878_vm4, %v1462_v44  ;;  %2189 = vmatmul.mubr.f32.gmra.mxu0 %v1857_v6 }
 0x1cc   : > { %v1654_v11 = vpop.permute.xlu0 %1653  ;;  %v1271_v46 = vpop.permute.xlu1 %1270 }
 0x1cd   : > { %1731 = vst.msk [vmem:[#allocation3 + $0x1b8] sm:$0xff] %vm1071_vm5, %v1654_v11  ;;  %v1861_v31 = vld [vmem:[#allocation3 + $0x1a0] sm:$0xff] }
 0x1ce   : > { %1347 = vst.msk [vmem:[#allocation3 + $0x1d0] sm:$0xff] %vm685_vm3, %v1271_v46  ;;  %2193 = vmatprep.mubr.f32.mxu0 %v1861_v31  ;;  %v1893_v11 = vld [vmem:[#allocation3 + $0x2a0] sm:$0xff] }
 0x1cf   : > { %2194 = vmatmul.mubr.f32.gmra.mxu0 %v1860_v13 }
 0x1d0   : > { %v1464_v39 = vpop.permute.xlu0 %1463  ;;  %v1656_v12 = vpop.permute.xlu1 %1655 }
 0x1d1   : > { %1540 = vst.msk [vmem:[#allocation3 + $0x1d0] sm:$0xff] %vm878_vm4, %v1464_v39  ;;  %v1896_v39 = vld [vmem:[#allocation3 + $0x2b8] sm:$0xff] }
 0x1d2   : > { %1732 = vst.msk [vmem:[#allocation3 + $0x1d0] sm:$0xff] %vm1071_vm5, %v1656_v12 }
 0x1d4   : > { %v1273_v1 = vpop.permute.xlu0 %1272  ;;  %v1466_v34 = vpop.permute.xlu1 %1465  ;;  %v1864_v55 = vld [vmem:[#allocation3 + $0x1b8] sm:$0xff] }
 0x1d5   : > { %1348 = vst.msk [vmem:[#allocation3 + $0x1e8] sm:$0xff] %vm685_vm3, %v1273_v1  ;;  %2198 = vmatprep.mubr.f32.mxu0 %v1864_v55  ;;  %v1899_v55 = vld [vmem:[#allocation3 + $0x2d0] sm:$0xff] }
 0x1d6   : > { %1541 = vst.msk [vmem:[#allocation3 + $0x1e8] sm:$0xff] %vm878_vm4, %v1466_v34  ;;  %2199 = vmatmul.mubr.f32.gmra.mxu0 %v1863_v17 }
 0x1d8   : > { %v1658_v15 = vpop.permute.xlu0 %1657  ;;  %v1275_v22 = vpop.permute.xlu1 %1274 }
 0x1d9   : > { %1733 = vst.msk [vmem:[#allocation3 + $0x1e8] sm:$0xff] %vm1071_vm5, %v1658_v15  ;;  %v1867_v53 = vld [vmem:[#allocation3 + $0x1d0] sm:$0xff]  ;;  %v1902_v15 = vld [vmem:[#allocation3 + $0x2e8] sm:$0xff] }
 0x1da   : > { %1349 = vst.msk [vmem:[#allocation3 + $0x200] sm:$0xff] %vm685_vm3, %v1275_v22  ;;  %2203 = vmatprep.mubr.f32.mxu0 %v1867_v53  ;;  %v9196_v22 = vpop.f32.mrf.mxu1 }
 0x1db   : > { %2204 = vmatmul.mubr.f32.gmra.mxu0 %v1866_v32  ;;  %v10786_v32 = vld [vmem:[%s14419_s2] ss:$0 sm:$0xff] }
 0x1dc   : > { %v1468_v37 = vpop.permute.xlu0 %1467  ;;  %v1660_v48 = vpop.permute.xlu1 %1659 }
 0x1dd   : > { %1542 = vst.msk [vmem:[#allocation3 + $0x200] sm:$0xff] %vm878_vm4, %v1468_v37  ;;  %v2335_v50 = vpop.f32.mrf.mxu1 }
 0x1de   : > { %1734 = vst.msk [vmem:[#allocation3 + $0x200] sm:$0xff] %vm1071_vm5, %v1660_v48 }
 0x1e0   : > { %v1277_v19 = vpop.permute.xlu0 %1276  ;;  %v1470_v30 = vpop.permute.xlu1 %1469  ;;  %v1870_v25 = vld [vmem:[#allocation3 + $0x1e8] sm:$0xff] }
 0x1e1   : > { %1350 = vst.msk [vmem:[#allocation3 + $0x218] sm:$0xff] %vm685_vm3, %v1277_v19  ;;  %2208 = vmatprep.mubr.f32.mxu0 %v1870_v25  ;;  %v9199_v25 = vpop.f32.mrf.mxu1 }
 0x1e2   : > { %1543 = vst.msk [vmem:[#allocation3 + $0x218] sm:$0xff] %vm878_vm4, %v1470_v30  ;;  %2209 = vmatmul.mubr.f32.gmra.mxu0 %v1869_v43  ;;  %v2560_v43 = vld [vmem:[#allocation2 + $0x18] sm:$0xff] }
 0x1e3   : > { %2592 = vst.msk [vmem:[#allocation3 + $0x30] sm:$0xff] %vm333_vm0, %v2560_v43 }
 0x1e4   : > { %v1662_v42 = vpop.permute.xlu0 %1661  ;;  %v1279_v20 = vpop.permute.xlu1 %1278 }
 0x1e5   : > { %1735 = vst.msk [vmem:[#allocation3 + $0x218] sm:$0xff] %vm1071_vm5, %v1662_v42  ;;  %v1873_v14 = vld [vmem:[#allocation3 + $0x200] sm:$0xff] }
 0x1e6   : > { %1351 = vst.msk [vmem:[#allocation3 + $0x230] sm:$0xff] %vm685_vm3, %v1279_v20  ;;  %2213 = vmatprep.mubr.f32.mxu0 %v1873_v14  ;;  %v2561_v20 = vld [vmem:[#allocation2 + $0x20] sm:$0xff] }
 0x1e7   : > { %2214 = vmatmul.mubr.f32.gmra.mxu0 %v1872_v4  ;;  %2593 = vst.msk [vmem:[#allocation3 + $0x48] sm:$0xff] %vm333_vm0, %v2561_v20 }
 0x1e8   : > { %v1472_v7 = vpop.permute.xlu0 %1471 }
 0x1e9   : > { %1544 = vst.msk [vmem:[#allocation3 + $0x230] sm:$0xff] %vm878_vm4, %v1472_v7  ;;  %v1664_v49 = vpop.permute.xlu1 %1663 }
 0x1ea   : > { %1736 = vst.msk [vmem:[#allocation3 + $0x230] sm:$0xff] %vm1071_vm5, %v1664_v49 }
 0x1ec   : > { %v1281_v57 = vpop.permute.xlu0 %1280  ;;  %v1876_v52 = vld [vmem:[#allocation3 + $0x218] sm:$0xff] }
 0x1ed   : > { %1352 = vst.msk [vmem:[#allocation3 + $0x248] sm:$0xff] %vm685_vm3, %v1281_v57  ;;  %v1474_v23 = vpop.permute.xlu1 %1473  ;;  %2218 = vmatprep.mubr.f32.mxu0 %v1876_v52 }
 0x1ee   : > { %1545 = vst.msk [vmem:[#allocation3 + $0x248] sm:$0xff] %vm878_vm4, %v1474_v23  ;;  %2219 = vmatmul.mubr.f32.gmra.mxu0 %v1875_v36  ;;  %v2345_v36 = vpop.f32.mrf.mxu1 }
 0x1f0   : > { %v1666_v60 = vpop.permute.xlu0 %1665 }
 0x1f1   : > { %1737 = vst.msk [vmem:[#allocation3 + $0x248] sm:$0xff] %vm1071_vm5, %v1666_v60  ;;  %v1283_v51 = vpop.permute.xlu1 %1282  ;;  %v1879_v24 = vld [vmem:[#allocation3 + $0x230] sm:$0xff] }
 0x1f2   : > { %1353 = vst.msk [vmem:[#allocation3 + $0x260] sm:$0xff] %vm685_vm3, %v1283_v51  ;;  %2223 = vmatprep.mubr.f32.mxu0 %v1879_v24 }
 0x1f3   : > { %2224 = vmatmul.mubr.f32.gmra.mxu0 %v1878_v28 }
 0x1f4   : > { %v1476_v58 = vpop.permute.xlu0 %1475 }
 0x1f5   : > { %1546 = vst.msk [vmem:[#allocation3 + $0x260] sm:$0xff] %vm878_vm4, %v1476_v58  ;;  %v1668_v2 = vpop.permute.xlu1 %1667 }
 0x1f6   : > { %1738 = vst.msk [vmem:[#allocation3 + $0x260] sm:$0xff] %vm1071_vm5, %v1668_v2  ;;  %v9202_v2 = vpop.f32.mrf.mxu1 }
 0x1f8   : > { %v1285_v8 = vpop.permute.xlu0 %1284  ;;  %v1882_v33 = vld [vmem:[#allocation3 + $0x248] sm:$0xff] }
 0x1f9   : > { %1354 = vst.msk [vmem:[#allocation3 + $0x278] sm:$0xff] %vm685_vm3, %v1285_v8  ;;  %v1478_v41 = vpop.permute.xlu1 %1477  ;;  %2228 = vmatprep.mubr.f32.mxu0 %v1882_v33 }
 0x1fa   : > { %1547 = vst.msk [vmem:[#allocation3 + $0x278] sm:$0xff] %vm878_vm4, %v1478_v41  ;;  %2229 = vmatmul.mubr.f32.gmra.mxu0 %v1881_v35 }
 0x1fc   : > { %v1670_v38 = vpop.permute.xlu0 %1669 }
 0x1fd   : > { %1739 = vst.msk [vmem:[#allocation3 + $0x278] sm:$0xff] %vm1071_vm5, %v1670_v38  ;;  %v1287_v40 = vpop.permute.xlu1 %1286  ;;  %v1885_v29 = vld [vmem:[#allocation3 + $0x260] sm:$0xff] }
 0x1fe   : > { %1355 = vst.msk [vmem:[#allocation3 + $0x290] sm:$0xff] %vm685_vm3, %v1287_v40  ;;  %2233 = vmatprep.mubr.f32.mxu0 %v1885_v29 }
 0x1ff   : > { %2234 = vmatmul.mubr.f32.gmra.mxu0 %v1884_v47 }
 0x200   : > { %v1480_v5 = vpop.permute.xlu0 %1479 }
 0x201   : > { %1548 = vst.msk [vmem:[#allocation3 + $0x290] sm:$0xff] %vm878_vm4, %v1480_v5  ;;  %v1672_v9 = vpop.permute.xlu1 %1671  ;;  %v2355_v5 = vpop.f32.mrf.mxu1 }
 0x202   : > { %1740 = vst.msk [vmem:[#allocation3 + $0x290] sm:$0xff] %vm1071_vm5, %v1672_v9 }
 0x204   : > { %v1289_v21 = vpop.permute.xlu0 %1288  ;;  %v1888_v63 = vld [vmem:[#allocation3 + $0x278] sm:$0xff] }
 0x205   : > { %1356 = vst.msk [vmem:[#allocation3 + $0x2a8] sm:$0xff] %vm685_vm3, %v1289_v21  ;;  %v1482_v45 = vpop.permute.xlu1 %1481  ;;  %2238 = vmatprep.mubr.f32.mxu0 %v1888_v63 }
 0x206   : > { %1549 = vst.msk [vmem:[#allocation3 + $0x2a8] sm:$0xff] %vm878_vm4, %v1482_v45  ;;  %2239 = vmatmul.mubr.f32.gmra.mxu0 %v1887_v18 }
 0x208   : > { %v1674_v26 = vpop.permute.xlu0 %1673 }
 0x209   : > { %1741 = vst.msk [vmem:[#allocation3 + $0x2a8] sm:$0xff] %vm1071_vm5, %v1674_v26  ;;  %v1291_v61 = vpop.permute.xlu1 %1290  ;;  %v1891_v10 = vld [vmem:[#allocation3 + $0x290] sm:$0xff] }
 0x20a   : > { %1357 = vst.msk [vmem:[#allocation3 + $0x2c0] sm:$0xff] %vm685_vm3, %v1291_v61  ;;  %2243 = vmatprep.mubr.f32.mxu0 %v1891_v10 }
 0x20b   : > { %2244 = vmatmul.mubr.f32.gmra.mxu0 %v1890_v56  ;;  %v9205_v56 = vpop.f32.mrf.mxu1 }
 0x20c   : > { %v1484_v59 = vpop.permute.xlu0 %1483 }
 0x20d   : > { %1550 = vst.msk [vmem:[#allocation3 + $0x2c0] sm:$0xff] %vm878_vm4, %v1484_v59  ;;  %v1676_v3 = vpop.permute.xlu1 %1675 }
 0x20e   : > { %1742 = vst.msk [vmem:[#allocation3 + $0x2c0] sm:$0xff] %vm1071_vm5, %v1676_v3 }
 0x210   : > { %v1293_v44 = vpop.permute.xlu0 %1292  ;;  %v1894_v54 = vld [vmem:[#allocation3 + $0x2a8] sm:$0xff] }
 0x211   : > { %1358 = vst.msk [vmem:[#allocation3 + $0x2d8] sm:$0xff] %vm685_vm3, %v1293_v44  ;;  %v1486_v6 = vpop.permute.xlu1 %1485  ;;  %2248 = vmatprep.mubr.f32.mxu0 %v1894_v54 }
 0x212   : > { %1551 = vst.msk [vmem:[#allocation3 + $0x2d8] sm:$0xff] %vm878_vm4, %v1486_v6  ;;  %2249 = vmatmul.mubr.f32.gmra.mxu0 %v1893_v11 }
 0x214   : > { %v1678_v46 = vpop.permute.xlu0 %1677 }
 0x215   : > { %1743 = vst.msk [vmem:[#allocation3 + $0x2d8] sm:$0xff] %vm1071_vm5, %v1678_v46  ;;  %v1295_v31 = vpop.permute.xlu1 %1294  ;;  %v1897_v13 = vld [vmem:[#allocation3 + $0x2c0] sm:$0xff] }
 0x216   : > { %1359 = vst.msk [vmem:[#allocation3 + $0x2f0] sm:$0xff] %vm685_vm3, %v1295_v31  ;;  %2253 = vmatprep.mubr.f32.mxu0 %v1897_v13  ;;  %v2365_v13 = vpop.f32.mrf.mxu1 }
 0x217   : > { %2254 = vmatmul.mubr.f32.gmra.mxu0 %v1896_v39 }
 0x218   : > { %v1488_v12 = vpop.permute.xlu0 %1487 }
 0x219   : > { %1552 = vst.msk [vmem:[#allocation3 + $0x2f0] sm:$0xff] %vm878_vm4, %v1488_v12  ;;  %v1680_v1 = vpop.permute.xlu1 %1679 }
 0x21a   : > { %1744 = vst.msk [vmem:[#allocation3 + $0x2f0] sm:$0xff] %vm1071_vm5, %v1680_v1 }
 0x21c   : > { %v1900_v34 = vld [vmem:[#allocation3 + $0x2d8] sm:$0xff]  ;;  %v2687_v53 = vpop.permute.xlu0 %2686 }
 0x21d   : > { %2258 = vmatprep.mubr.f32.mxu0 %v1900_v34  ;;  %v2689_v37 = vpop.permute.xlu1 %2688  ;;  %2782 = vst.msk [vmem:[#allocation3] sm:$0xff] %vm685_vm3, %v2687_v53 }
 0x21e   : > { %2259 = vmatmul.mubr.f32.gmra.mxu0 %v1899_v55  ;;  %2783 = vst.msk [vmem:[#allocation3 + $0x18] sm:$0xff] %vm685_vm3, %v2689_v37 }
 0x220   : > { %v2691_v42 = vpop.permute.xlu0 %2690 }
 0x221   : > { %v1903_v17 = vld [vmem:[#allocation3 + $0x2f0] sm:$0xff]  ;;  %v2693_v4 = vpop.permute.xlu1 %2692  ;;  %2784 = vst.msk [vmem:[#allocation3 + $0x30] sm:$0xff] %vm685_vm3, %v2691_v42 }
 0x222   : > { %2263 = vmatprep.mubr.f32.mxu0 %v1903_v17  ;;  %2785 = vst.msk [vmem:[#allocation3 + $0x48] sm:$0xff] %vm685_vm3, %v2693_v4 }
 0x223   : > { %2264 = vmatmul.mubr.f32.gmra.mxu0 %v1902_v15 }
 0x237   : > { %v2110_v48 = vpop.f32.mrf.mxu0 }
 0x238   : > { %v2111_v27 = vadd.f32 %v10786_v32, %v2110_v48 }
 0x239   : > { %v2112_v19 = vpop.f32.mrf.mxu0 }
 0x23a   : > { %v2336_v30 = vadd.f32 %v2335_v50, %v2111_v27 }
 0x23b   : > { %v2115_v14 = vpop.f32.mrf.mxu0 }
 0x23c   : > { %v2494_v7 = vmax.f32 %v2336_v30, 0.0  ;;  %v2116_v49 = vadd.f32 %v10786_v32, %v2115_v14  ;;  %v9208_v30 = vpop.f32.mrf.mxu1 }
 0x23d   : > { %v2117_v57 = vpop.f32.mrf.mxu0 }
 0x23e   : > { %2526 = vst.msk [vmem:[#allocation2 + $0x32] sm:$0xff] %vm333_vm0, %v2494_v7  ;;  %v2341_v52 = vadd.f32 %v9196_v22, %v2116_v49  ;;  %v2375_v14 = vpop.f32.mrf.mxu1 }
 0x23f   : > { %v2120_v23 = vpop.f32.mrf.mxu0 }
 0x240   : > { %v2495_v60 = vmax.f32 %v2341_v52, 0.0  ;;  %v2121_v51 = vadd.f32 %v10786_v32, %v2120_v23 }
 0x241   : > { %v2122_v24 = vpop.f32.mrf.mxu0 }
 0x242   : > { %2527 = vst.msk [vmem:[#allocation2 + $0x3a] sm:$0xff] %vm333_vm0, %v2495_v60  ;;  %v2346_v28 = vadd.f32 %v2345_v36, %v2121_v51 }
 0x243   : > { %v2125_v58 = vpop.f32.mrf.mxu0 }
 0x244   : > { %v2496_v8 = vmax.f32 %v2346_v28, 0.0  ;;  %v2126_v33 = vadd.f32 %v10786_v32, %v2125_v58 }
 0x245   : > { %v2127_v41 = vpop.f32.mrf.mxu0  ;;  %v2626_v35 = vld [vmem:[#allocation2 + $0x32] sm:$0xff] }
 0x246   : > { %v10802_v38 = vld [vmem:[#allocation2 + $0x30] sm:$0xff]  ;;  %2528 = vst.msk [vmem:[#allocation2 + $0x4a] sm:$0xff] %vm333_vm0, %v2496_v8  ;;  %v2351_v40 = vadd.f32 %v9199_v25, %v2126_v33  ;;  %2694 = vrot.lane.b32.xlu0 %v2626_v35, %s9525_s16  ;;  %v9211_v35 = vpop.f32.mrf.mxu1 }
 0x247   : > { %2594 = vst.msk [vmem:[#allocation3 + $0x60] sm:$0xff] %vm333_vm0, %v10802_v38  ;;  %v3198_v29 = vld [vmem:[#allocation2 + $0x32] sm:$0xff]  ;;  %v2130_v47 = vpop.f32.mrf.mxu0 }
 0x248   : > { %3230 = vst.msk [vmem:[#allocation3 + $0x8] sm:$0xff] %vm333_vm0, %v3198_v29  ;;  %v2497_v9 = vmax.f32 %v2351_v40, 0.0  ;;  %v2131_v21 = vadd.f32 %v10786_v32, %v2130_v47 }
 0x249   : > { %v2132_v63 = vpop.f32.mrf.mxu0  ;;  %v2627_v45 = vld [vmem:[#allocation2 + $0x3a] sm:$0xff] }
 0x24a   : > { %v10810_v18 = vld [vmem:[#allocation2 + $0x38] sm:$0xff]  ;;  %2529 = vst.msk [vmem:[#allocation2 + $0x52] sm:$0xff] %vm333_vm0, %v2497_v9  ;;  %v2356_v26 = vadd.f32 %v2355_v5, %v2131_v21  ;;  %2696 = vrot.lane.b32.xlu1 %v2627_v45, %s9525_s16  ;;  %v2385_v63 = vpop.f32.mrf.mxu1 }
 0x24b   : > { %2595 = vst.msk [vmem:[#allocation3 + $0x78] sm:$0xff] %vm333_vm0, %v10810_v18  ;;  %v3199_v61 = vld [vmem:[#allocation2 + $0x3a] sm:$0xff]  ;;  %v2135_v10 = vpop.f32.mrf.mxu0 }
 0x24c   : > { %3231 = vst.msk [vmem:[#allocation3 + $0x20] sm:$0xff] %vm333_vm0, %v3199_v61  ;;  %v2498_v59 = vmax.f32 %v2356_v26, 0.0  ;;  %v2136_v3 = vadd.f32 %v10786_v32, %v2135_v10 }
 0x24d   : > { %v2137_v44 = vpop.f32.mrf.mxu0  ;;  %v2628_v54 = vld [vmem:[#allocation2 + $0x4a] sm:$0xff] }
 0x24e   : > { %v10818_v6 = vld [vmem:[#allocation2 + $0x48] sm:$0xff]  ;;  %2530 = vst.msk [vmem:[#allocation2 + $0x62] sm:$0xff] %vm333_vm0, %v2498_v59  ;;  %v2361_v46 = vadd.f32 %v9202_v2, %v2136_v3  ;;  %2698 = vrot.lane.b32.xlu0 %v2628_v54, %s9525_s16 }
 0x24f   : > { %v3200_v11 = vld [vmem:[#allocation2 + $0x4a] sm:$0xff]  ;;  %2596 = vst.msk [vmem:[#allocation3 + $0x90] sm:$0xff] %vm333_vm0, %v10818_v6  ;;  %v2140_v31 = vpop.f32.mrf.mxu0 }
 0x250   : > { %3232 = vst.msk [vmem:[#allocation3 + $0x38] sm:$0xff] %vm333_vm0, %v3200_v11  ;;  %v2499_v39 = vmax.f32 %v2361_v46, 0.0  ;;  %v2141_v12 = vadd.f32 %v10786_v32, %v2140_v31 }
 0x251   : > { %v2142_v1 = vpop.f32.mrf.mxu0  ;;  %v2629_v34 = vld [vmem:[#allocation2 + $0x52] sm:$0xff] }
 0x252   : > { %v10826_v55 = vld [vmem:[#allocation2 + $0x50] sm:$0xff]  ;;  %2531 = vst.msk [vmem:[#allocation2 + $0x6a] sm:$0xff] %vm333_vm0, %v2499_v39  ;;  %v2366_v17 = vadd.f32 %v2365_v13, %v2141_v12  ;;  %2700 = vrot.lane.b32.xlu1 %v2629_v34, %s9525_s16  ;;  %v9214_v34 = vpop.f32.mrf.mxu1 }
 0x253   : > { %2597 = vst.msk [vmem:[#allocation3 + $0xa8] sm:$0xff] %vm333_vm0, %v10826_v55  ;;  %v3201_v15 = vld [vmem:[#allocation2 + $0x52] sm:$0xff]  ;;  %v2145_v22 = vpop.f32.mrf.mxu0 }
 0x254   : > { %3233 = vst.msk [vmem:[#allocation3 + $0x50] sm:$0xff] %vm333_vm0, %v3201_v15  ;;  %v2500_v53 = vmax.f32 %v2366_v17, 0.0  ;;  %v2146_v16 = vadd.f32 %v10786_v32, %v2145_v22 }
 0x255   : > { %v2147_v37 = vpop.f32.mrf.mxu0  ;;  %v2630_v48 = vld [vmem:[#allocation2 + $0x62] sm:$0xff] }
 0x256   : > { %v10834_v50 = vld [vmem:[#allocation2 + $0x60] sm:$0xff]  ;;  %2532 = vst.msk [vmem:[#allocation2 + $0x7a] sm:$0xff] %vm333_vm0, %v2500_v53  ;;  %v2371_v19 = vadd.f32 %v9205_v56, %v2146_v16  ;;  %2702 = vrot.lane.b32.xlu0 %v2630_v48, %s9525_s16  ;;  %v2395_v16 = vpop.f32.mrf.mxu1 }
 0x257   : > { %v3202_v27 = vld [vmem:[#allocation2 + $0x62] sm:$0xff]  ;;  %2598 = vst.msk [vmem:[#allocation3 + $0xc0] sm:$0xff] %vm333_vm0, %v10834_v50 }
 0x258   : > { %3234 = vst.msk [vmem:[#allocation3 + $0x68] sm:$0xff] %vm333_vm0, %v3202_v27  ;;  %v2501_v25 = vmax.f32 %v2371_v19, 0.0 }
 0x259   : > { %v2631_v62 = vld [vmem:[#allocation2 + $0x6a] sm:$0xff] }
 0x25a   : > { %v10841_v43 = vld [vmem:[#allocation2 + $0x64] sm:$0xff]  ;;  %v10843_v42 = vld [vmem:[#allocation2 + $0x6c] sm:$0xff]  ;;  %2533 = vst.msk [vmem:[#allocation2 + $0x82] sm:$0xff] %vm333_vm0, %v2501_v25  ;;  %v2150_v20 = vpop.f32.mrf.mxu0  ;;  %2704 = vrot.lane.b32.xlu1 %v2631_v62, %s9525_s16 }
 0x25b   : > { %3870 = vst.msk [vmem:[#allocation3 + $0x10] sm:$0xff] %vm333_vm0, %v10841_v43  ;;  %3871 = vst.msk [vmem:[#allocation3 + $0x28] sm:$0xff] %vm333_vm0, %v10843_v42  ;;  %v10851_v4 = vld [vmem:[#allocation2 + $0x68] sm:$0xff]  ;;  %v2151_v49 = vadd.f32 %v10786_v32, %v2150_v20 }
 0x25c   : > { %v3203_v7 = vld [vmem:[#allocation2 + $0x6a] sm:$0xff]  ;;  %2599 = vst.msk [vmem:[#allocation3 + $0xd8] sm:$0xff] %vm333_vm0, %v10851_v4  ;;  %v2152_v57 = vpop.f32.mrf.mxu0 }
 0x25d   : > { %3235 = vst.msk [vmem:[#allocation3 + $0x80] sm:$0xff] %vm333_vm0, %v3203_v7  ;;  %v2376_v52 = vadd.f32 %v2375_v14, %v2151_v49  ;;  %v2632_v23 = vld [vmem:[#allocation2 + $0x7a] sm:$0xff] }
 0x25e   : > { %v10857_v36 = vld [vmem:[#allocation2 + $0x78] sm:$0xff]  ;;  %2706 = vrot.lane.b32.xlu0 %v2632_v23, %s9525_s16 }
 0x25f   : > { %v3204_v60 = vld [vmem:[#allocation2 + $0x7a] sm:$0xff]  ;;  %2600 = vst.msk [vmem:[#allocation3 + $0xf0] sm:$0xff] %vm333_vm0, %v10857_v36  ;;  %v2502_v51 = vmax.f32 %v2376_v52, 0.0  ;;  %v2155_v24 = vpop.f32.mrf.mxu0 }
 0x260   : > { %3236 = vst.msk [vmem:[#allocation3 + $0x98] sm:$0xff] %vm333_vm0, %v3204_v60  ;;  %v2156_v28 = vadd.f32 %v10786_v32, %v2155_v24  ;;  %v9217_v24 = vpop.f32.mrf.mxu1 }
 0x261   : > { %2534 = vst.msk [vmem:[#allocation2 + $0x92] sm:$0xff] %vm333_vm0, %v2502_v51  ;;  %v2157_v58 = vpop.f32.mrf.mxu0  ;;  %v2633_v2 = vld [vmem:[#allocation2 + $0x82] sm:$0xff] }
 0x262   : > { %v3904_v8 = vld [vmem:[#allocation3 + $0x10] sm:$0xff]  ;;  %v3907_v33 = vld [vmem:[#allocation3 + $0x28] sm:$0xff]  ;;  %v2381_v41 = vadd.f32 %v9208_v30, %v2156_v28  ;;  %2708 = vrot.lane.b32.xlu1 %v2633_v2, %s9525_s16  ;;  %v10867_v40 = vld [vmem:[#allocation2 + $0x7c] sm:$0xff] }
 0x263   : > { %9250 = vmatprep.mubr.msk.f32.mxu0 %vm333_vm0, %v3904_v8  ;;  %v10869_v29 = vld [vmem:[#allocation2 + $0x84] sm:$0xff]  ;;  %3872 = vst.msk [vmem:[#allocation3 + $0x40] sm:$0xff] %vm333_vm0, %v10867_v40 }
 0x264   : > { %v10871_v47 = vld [vmem:[#allocation2 + $0x80] sm:$0xff]  ;;  %9251 = vmatmul.mubr.msk.f32.vlgmr.msra.gmra.mxu0 %vm333_vm0, %v3907_v33  ;;  %3873 = vst.msk [vmem:[#allocation3 + $0x58] sm:$0xff] %vm333_vm0, %v10869_v29  ;;  %v2503_v9 = vmax.f32 %v2381_v41, 0.0  ;;  %v2405_v33 = vpop.f32.mrf.mxu1 }
 0x265   : > { %2601 = vst.msk [vmem:[#allocation3 + $0x108] sm:$0xff] %vm333_vm0, %v10871_v47  ;;  %v3205_v5 = vld [vmem:[#allocation2 + $0x82] sm:$0xff] }
 0x266   : > { %3237 = vst.msk [vmem:[#allocation3 + $0xb0] sm:$0xff] %vm333_vm0, %v3205_v5  ;;  %2535 = vst.msk [vmem:[#allocation2 + $0x9a] sm:$0xff] %vm333_vm0, %v2503_v9  ;;  %v2160_v21 = vpop.f32.mrf.mxu0 }
 0x267   : > { %v2161_v45 = vadd.f32 %v10786_v32, %v2160_v21 }
 0x268   : > { %v2162_v26 = vpop.f32.mrf.mxu0  ;;  %v2634_v61 = vld [vmem:[#allocation2 + $0x92] sm:$0xff] }
 0x269   : > { %v10883_v10 = vld [vmem:[#allocation2 + $0x90] sm:$0xff]  ;;  %v2386_v59 = vadd.f32 %v2385_v63, %v2161_v45  ;;  %2710 = vrot.lane.b32.xlu0 %v2634_v61, %s9525_s16 }
 0x26a   : > { %v3206_v56 = vld [vmem:[#allocation2 + $0x92] sm:$0xff]  ;;  %2602 = vst.msk [vmem:[#allocation3 + $0x120] sm:$0xff] %vm333_vm0, %v10883_v10  ;;  %v3910_v3 = vld [vmem:[#allocation3 + $0x40] sm:$0xff] }
 0x26b   : > { %3238 = vst.msk [vmem:[#allocation3 + $0xc8] sm:$0xff] %vm333_vm0, %v3206_v56  ;;  %v3913_v44 = vld [vmem:[#allocation3 + $0x58] sm:$0xff]  ;;  %v2504_v54 = vmax.f32 %v2386_v59, 0.0  ;;  %9253 = vmatprep.mubr.msk.f32.mxu0 %vm333_vm0, %v3910_v3  ;;  %v2165_v11 = vpop.f32.mrf.mxu0 }
 0x26c   : > { %v2166_v46 = vadd.f32 %v10786_v32, %v2165_v11  ;;  %9254 = vmatmul.mubr.msk.f32.gmra.mxu0 %vm333_vm0, %v3913_v44 }
 0x26d   : > { %2536 = vst.msk [vmem:[#allocation2 + $0xaa] sm:$0xff] %vm333_vm0, %v2504_v54  ;;  %v2167_v31 = vpop.f32.mrf.mxu0  ;;  %v2635_v13 = vld [vmem:[#allocation2 + $0x9a] sm:$0xff] }
 0x26e   : > { %v10893_v39 = vld [vmem:[#allocation2 + $0x94] sm:$0xff]  ;;  %v10895_v12 = vld [vmem:[#allocation2 + $0x9c] sm:$0xff]  ;;  %v2391_v1 = vadd.f32 %v9211_v35, %v2166_v46  ;;  %2712 = vrot.lane.b32.xlu1 %v2635_v13, %s9525_s16  ;;  %v9220_v31 = vpop.f32.mrf.mxu1 }
 0x26f   : > { %3874 = vst.msk [vmem:[#allocation3 + $0x70] sm:$0xff] %vm333_vm0, %v10893_v39  ;;  %3875 = vst.msk [vmem:[#allocation3 + $0x88] sm:$0xff] %vm333_vm0, %v10895_v12  ;;  %v10902_v17 = vld [vmem:[#allocation2 + $0x98] sm:$0xff] }
 0x270   : > { %v3207_v15 = vld [vmem:[#allocation2 + $0x9a] sm:$0xff]  ;;  %2603 = vst.msk [vmem:[#allocation3 + $0x138] sm:$0xff] %vm333_vm0, %v10902_v17  ;;  %v2505_v22 = vmax.f32 %v2391_v1, 0.0 }
 0x271   : > { %3239 = vst.msk [vmem:[#allocation3 + $0xe0] sm:$0xff] %vm333_vm0, %v3207_v15 }
 0x272   : > { %2537 = vst.msk [vmem:[#allocation2 + $0xb2] sm:$0xff] %vm333_vm0, %v2505_v22  ;;  %v2170_v53 = vpop.f32.mrf.mxu0  ;;  %v2415_v22 = vpop.f32.mrf.mxu1 }
 0x273   : > { %v2171_v37 = vadd.f32 %v10786_v32, %v2170_v53 }
 0x274   : > { %v2172_v48 = vpop.f32.mrf.mxu0  ;;  %v2636_v27 = vld [vmem:[#allocation2 + $0xaa] sm:$0xff] }
 0x275   : > { %v10909_v19 = vld [vmem:[#allocation2 + $0xa8] sm:$0xff]  ;;  %v2396_v25 = vadd.f32 %v2395_v16, %v2171_v37  ;;  %2714 = vrot.lane.b32.xlu0 %v2636_v27, %s9525_s16 }
 0x276   : > { %v3208_v30 = vld [vmem:[#allocation2 + $0xaa] sm:$0xff]  ;;  %2604 = vst.msk [vmem:[#allocation3 + $0x150] sm:$0xff] %vm333_vm0, %v10909_v19 }
 0x277   : > { %v3916_v62 = vld [vmem:[#allocation3 + $0x70] sm:$0xff]  ;;  %v3919_v20 = vld [vmem:[#allocation3 + $0x88] sm:$0xff]  ;;  %3240 = vst.msk [vmem:[#allocation3 + $0xf8] sm:$0xff] %vm333_vm0, %v3208_v30  ;;  %v2506_v14 = vmax.f32 %v2396_v25, 0.0  ;;  %v2175_v7 = vpop.f32.mrf.mxu0 }
 0x278   : > { %9256 = vmatprep.mubr.msk.f32.mxu0 %vm333_vm0, %v3916_v62  ;;  %v2176_v49 = vadd.f32 %v10786_v32, %v2175_v7 }
 0x279   : > { %9257 = vmatmul.mubr.msk.f32.gmra.mxu0 %vm333_vm0, %v3919_v20  ;;  %2538 = vst.msk [vmem:[#allocation2 + $0xc2] sm:$0xff] %vm333_vm0, %v2506_v14  ;;  %v2177_v57 = vpop.f32.mrf.mxu0  ;;  %v2637_v52 = vld [vmem:[#allocation2 + $0xb2] sm:$0xff] }
 0x27a   : > { %v10919_v23 = vld [vmem:[#allocation2 + $0xac] sm:$0xff]  ;;  %v10921_v60 = vld [vmem:[#allocation2 + $0xb4] sm:$0xff]  ;;  %v2401_v51 = vadd.f32 %v9214_v34, %v2176_v49  ;;  %2716 = vrot.lane.b32.xlu1 %v2637_v52, %s9525_s16 }
 0x27b   : > { %3876 = vst.msk [vmem:[#allocation3 + $0xa0] sm:$0xff] %vm333_vm0, %v10919_v23  ;;  %3877 = vst.msk [vmem:[#allocation3 + $0xb8] sm:$0xff] %vm333_vm0, %v10921_v60  ;;  %v10928_v28 = vld [vmem:[#allocation2 + $0xb0] sm:$0xff] }
 0x27c   : > { %2605 = vst.msk [vmem:[#allocation3 + $0x168] sm:$0xff] %vm333_vm0, %v10928_v28  ;;  %v3209_v58 = vld [vmem:[#allocation2 + $0xb2] sm:$0xff]  ;;  %v2507_v2 = vmax.f32 %v2401_v51, 0.0 }
 0x27d   : > { %3241 = vst.msk [vmem:[#allocation3 + $0x110] sm:$0xff] %vm333_vm0, %v3209_v58  ;;  %v9223_v58 = vpop.f32.mrf.mxu1 }
 0x27e   : > { %2539 = vst.msk [vmem:[#allocation2 + $0xca] sm:$0xff] %vm333_vm0, %v2507_v2  ;;  %v2180_v8 = vpop.f32.mrf.mxu0 }
 0x27f   : > { %v2181_v41 = vadd.f32 %v10786_v32, %v2180_v8 }
 0x280   : > { %v2182_v35 = vpop.f32.mrf.mxu0  ;;  %v2638_v5 = vld [vmem:[#allocation2 + $0xc2] sm:$0xff] }
 0x281   : > { %v10935_v9 = vld [vmem:[#allocation2 + $0xc0] sm:$0xff]  ;;  %v2406_v63 = vadd.f32 %v2405_v33, %v2181_v41  ;;  %2718 = vrot.lane.b32.xlu0 %v2638_v5, %s9525_s16  ;;  %v2425_v35 = vpop.f32.mrf.mxu1 }
 0x282   : > { %v3210_v21 = vld [vmem:[#allocation2 + $0xc2] sm:$0xff]  ;;  %v3925_v26 = vld [vmem:[#allocation3 + $0xb8] sm:$0xff]  ;;  %2606 = vst.msk [vmem:[#allocation3 + $0x180] sm:$0xff] %vm333_vm0, %v10935_v9 }
 0x283   : > { %v3922_v45 = vld [vmem:[#allocation3 + $0xa0] sm:$0xff]  ;;  %3242 = vst.msk [vmem:[#allocation3 + $0x128] sm:$0xff] %vm333_vm0, %v3210_v21  ;;  %v2508_v61 = vmax.f32 %v2406_v63, 0.0  ;;  %v2185_v56 = vpop.f32.mrf.mxu0 }
 0x284   : > { %9259 = vmatprep.mubr.msk.f32.mxu0 %vm333_vm0, %v3922_v45  ;;  %v2186_v59 = vadd.f32 %v10786_v32, %v2185_v56 }
 0x285   : > { %9260 = vmatmul.mubr.msk.f32.gmra.mxu0 %vm333_vm0, %v3925_v26  ;;  %2540 = vst.msk [vmem:[#allocation2 + $0xda] sm:$0xff] %vm333_vm0, %v2508_v61  ;;  %v2187_v3 = vpop.f32.mrf.mxu0  ;;  %v2639_v44 = vld [vmem:[#allocation2 + $0xca] sm:$0xff] }
 0x286   : > { %v10945_v54 = vld [vmem:[#allocation2 + $0xc4] sm:$0xff]  ;;  %v10947_v11 = vld [vmem:[#allocation2 + $0xcc] sm:$0xff]  ;;  %v2411_v46 = vadd.f32 %v9217_v24, %v2186_v59  ;;  %2720 = vrot.lane.b32.xlu1 %v2639_v44, %s9525_s16 }
 0x287   : > { %3878 = vst.msk [vmem:[#allocation3 + $0xd0] sm:$0xff] %vm333_vm0, %v10945_v54  ;;  %3879 = vst.msk [vmem:[#allocation3 + $0xe8] sm:$0xff] %vm333_vm0, %v10947_v11  ;;  %v10954_v13 = vld [vmem:[#allocation2 + $0xc8] sm:$0xff] }
 0x288   : > { %2607 = vst.msk [vmem:[#allocation3 + $0x198] sm:$0xff] %vm333_vm0, %v10954_v13  ;;  %v3211_v1 = vld [vmem:[#allocation2 + $0xca] sm:$0xff]  ;;  %v2509_v34 = vmax.f32 %v2411_v46, 0.0 }
 0x289   : > { %3243 = vst.msk [vmem:[#allocation3 + $0x140] sm:$0xff] %vm333_vm0, %v3211_v1 }
 0x28a   : > { %2541 = vst.msk [vmem:[#allocation2 + $0xe2] sm:$0xff] %vm333_vm0, %v2509_v34  ;;  %v2190_v15 = vpop.f32.mrf.mxu0 }
 0x28b   : > { %v2191_v53 = vadd.f32 %v10786_v32, %v2190_v15 }
 0x28c   : > { %v2192_v16 = vpop.f32.mrf.mxu0  ;;  %v2640_v37 = vld [vmem:[#allocation2 + $0xda] sm:$0xff] }
 0x28d   : > { %v10961_v48 = vld [vmem:[#allocation2 + $0xd8] sm:$0xff]  ;;  %v2416_v30 = vadd.f32 %v2415_v22, %v2191_v53  ;;  %2722 = vrot.lane.b32.xlu0 %v2640_v37, %s9525_s16  ;;  %v9226_v53 = vpop.f32.mrf.mxu1 }
 0x28e   : > { %v10963_v27 = vld [vmem:[#allocation2 + $0xda] sm:$0xff]  ;;  %v3928_v25 = vld [vmem:[#allocation3 + $0xd0] sm:$0xff]  ;;  %v3931_v62 = vld [vmem:[#allocation3 + $0xe8] sm:$0xff]  ;;  %2608 = vst.msk [vmem:[#allocation3 + $0x1b0] sm:$0xff] %vm333_vm0, %v10961_v48 }
 0x28f   : > { %3244 = vst.msk [vmem:[#allocation3 + $0x158] sm:$0xff] %vm333_vm0, %v10963_v27  ;;  %9262 = vmatprep.mubr.msk.f32.mxu0 %vm333_vm0, %v3928_v25  ;;  %v2510_v20 = vmax.f32 %v2416_v30, 0.0  ;;  %v2195_v14 = vpop.f32.mrf.mxu0 }
 0x290   : > { %9263 = vmatmul.mubr.msk.f32.gmra.mxu0 %vm333_vm0, %v3931_v62  ;;  %v2196_v7 = vadd.f32 %v10786_v32, %v2195_v14  ;;  %v2435_v62 = vpop.f32.mrf.mxu1 }
 0x291   : > { %2542 = vst.msk [vmem:[#allocation2 + $0xf2] sm:$0xff] %vm333_vm0, %v2510_v20  ;;  %v2197_v49 = vpop.f32.mrf.mxu0  ;;  %v2641_v57 = vld [vmem:[#allocation2 + $0xe2] sm:$0xff] }
 0x292   : > { %v10974_v52 = vld [vmem:[#allocation2 + $0xdc] sm:$0xff]  ;;  %v10976_v51 = vld [vmem:[#allocation2 + $0xe4] sm:$0xff]  ;;  %v2421_v24 = vadd.f32 %v9220_v31, %v2196_v7  ;;  %2724 = vrot.lane.b32.xlu1 %v2641_v57, %s9525_s16 }
 0x293   : > { %3880 = vst.msk [vmem:[#allocation3 + $0x100] sm:$0xff] %vm333_vm0, %v10974_v52  ;;  %3881 = vst.msk [vmem:[#allocation3 + $0x118] sm:$0xff] %vm333_vm0, %v10976_v51  ;;  %v10983_v2 = vld [vmem:[#allocation2 + $0xe0] sm:$0xff] }
 0x294   : > { %v10985_v8 = vld [vmem:[#allocation2 + $0xe2] sm:$0xff]  ;;  %2609 = vst.msk [vmem:[#allocation3 + $0x1c8] sm:$0xff] %vm333_vm0, %v10983_v2  ;;  %v2511_v33 = vmax.f32 %v2421_v24, 0.0 }
 0x295   : > { %3245 = vst.msk [vmem:[#allocation3 + $0x170] sm:$0xff] %vm333_vm0, %v10985_v8 }
 0x296   : > { %2543 = vst.msk [vmem:[#allocation2 + $0xfa] sm:$0xff] %vm333_vm0, %v2511_v33  ;;  %v2200_v41 = vpop.f32.mrf.mxu0 }
 0x297   : > { %v2201_v5 = vadd.f32 %v10786_v32, %v2200_v41 }
 0x298   : > { %v2202_v21 = vpop.f32.mrf.mxu0  ;;  %v2642_v63 = vld [vmem:[#allocation2 + $0xf2] sm:$0xff] }
 0x299   : > { %v10993_v45 = vld [vmem:[#allocation2 + $0xf0] sm:$0xff]  ;;  %v2426_v61 = vadd.f32 %v2425_v35, %v2201_v5  ;;  %2726 = vrot.lane.b32.xlu0 %v2642_v63, %s9525_s16 }
 0x29a   : > { %v10995_v26 = vld [vmem:[#allocation2 + $0xf2] sm:$0xff]  ;;  %v3934_v56 = vld [vmem:[#allocation3 + $0x100] sm:$0xff]  ;;  %2610 = vst.msk [vmem:[#allocation3 + $0x1e0] sm:$0xff] %vm333_vm0, %v10993_v45 }
 0x29b   : > { %v3937_v59 = vld [vmem:[#allocation3 + $0x118] sm:$0xff]  ;;  %3246 = vst.msk [vmem:[#allocation3 + $0x188] sm:$0xff] %vm333_vm0, %v10995_v26  ;;  %9265 = vmatprep.mubr.msk.f32.mxu0 %vm333_vm0, %v3934_v56  ;;  %v2512_v3 = vmax.f32 %v2426_v61, 0.0  ;;  %v2205_v44 = vpop.f32.mrf.mxu0 }
 0x29c   : > { %9266 = vmatmul.mubr.msk.f32.gmra.mxu0 %vm333_vm0, %v3937_v59  ;;  %v2206_v46 = vadd.f32 %v10786_v32, %v2205_v44 }
 0x29d   : > { %2544 = vst.msk [vmem:[#allocation2 + $0x10a] sm:$0xff] %vm333_vm0, %v2512_v3  ;;  %v2207_v31 = vpop.f32.mrf.mxu0  ;;  %v2643_v1 = vld [vmem:[#allocation2 + $0xfa] sm:$0xff]  ;;  %v9229_v3 = vpop.f32.mrf.mxu1 }
 0x29e   : > { %v11006_v34 = vld [vmem:[#allocation2 + $0xf4] sm:$0xff]  ;;  %v11008_v15 = vld [vmem:[#allocation2 + $0xfc] sm:$0xff]  ;;  %v2431_v22 = vadd.f32 %v9223_v58, %v2206_v46  ;;  %2728 = vrot.lane.b32.xlu1 %v2643_v1, %s9525_s16 }
 0x29f   : > { %3882 = vst.msk [vmem:[#allocation3 + $0x130] sm:$0xff] %vm333_vm0, %v11006_v34  ;;  %3883 = vst.msk [vmem:[#allocation3 + $0x148] sm:$0xff] %vm333_vm0, %v11008_v15  ;;  %v11015_v16 = vld [vmem:[#allocation2 + $0xf8] sm:$0xff] }
 0x2a0   : > { %v11017_v37 = vld [vmem:[#allocation2 + $0xfa] sm:$0xff]  ;;  %2611 = vst.msk [vmem:[#allocation3 + $0x1f8] sm:$0xff] %vm333_vm0, %v11015_v16  ;;  %v2513_v30 = vmax.f32 %v2431_v22, 0.0  ;;  %v2445_v22 = vpop.f32.mrf.mxu1 }
 0x2a1   : > { %3247 = vst.msk [vmem:[#allocation3 + $0x1a0] sm:$0xff] %vm333_vm0, %v11017_v37 }
 0x2a2   : > { %2545 = vst.msk [vmem:[#allocation2 + $0x112] sm:$0xff] %vm333_vm0, %v2513_v30  ;;  %v2210_v25 = vpop.f32.mrf.mxu0 }
 0x2a3   : > { %v2211_v20 = vadd.f32 %v10786_v32, %v2210_v25 }
 0x2a4   : > { %v2212_v14 = vpop.f32.mrf.mxu0  ;;  %v2644_v7 = vld [vmem:[#allocation2 + $0x10a] sm:$0xff] }
 0x2a5   : > { %v11025_v49 = vld [vmem:[#allocation2 + $0x108] sm:$0xff]  ;;  %v2436_v24 = vadd.f32 %v2435_v62, %v2211_v20  ;;  %2730 = vrot.lane.b32.xlu0 %v2644_v7, %s9525_s16 }
 0x2a6   : > { %v11027_v57 = vld [vmem:[#allocation2 + $0x10a] sm:$0xff]  ;;  %2612 = vst.msk [vmem:[#allocation3 + $0x210] sm:$0xff] %vm333_vm0, %v11025_v49 }
 0x2a7   : > { %v3940_v58 = vld [vmem:[#allocation3 + $0x130] sm:$0xff]  ;;  %v3943_v33 = vld [vmem:[#allocation3 + $0x148] sm:$0xff]  ;;  %3248 = vst.msk [vmem:[#allocation3 + $0x1b8] sm:$0xff] %vm333_vm0, %v11027_v57  ;;  %v2514_v41 = vmax.f32 %v2436_v24, 0.0  ;;  %v2215_v35 = vpop.f32.mrf.mxu0 }
 0x2a8   : > { %9268 = vmatprep.mubr.msk.f32.mxu0 %vm333_vm0, %v3940_v58  ;;  %v2216_v5 = vadd.f32 %v10786_v32, %v2215_v35 }
 0x2a9   : > { %9269 = vmatmul.mubr.msk.f32.gmra.mxu0 %vm333_vm0, %v3943_v33  ;;  %2546 = vst.msk [vmem:[#allocation2 + $0x122] sm:$0xff] %vm333_vm0, %v2514_v41  ;;  %v2217_v21 = vpop.f32.mrf.mxu0  ;;  %v2645_v63 = vld [vmem:[#allocation2 + $0x112] sm:$0xff] }
 0x2aa   : > { %v11038_v61 = vld [vmem:[#allocation2 + $0x10c] sm:$0xff]  ;;  %v11040_v56 = vld [vmem:[#allocation2 + $0x114] sm:$0xff]  ;;  %v2441_v59 = vadd.f32 %v9226_v53, %v2216_v5  ;;  %2732 = vrot.lane.b32.xlu1 %v2645_v63, %s9525_s16 }
 0x2ab   : > { %3884 = vst.msk [vmem:[#allocation3 + $0x160] sm:$0xff] %vm333_vm0, %v11038_v61  ;;  %3885 = vst.msk [vmem:[#allocation3 + $0x178] sm:$0xff] %vm333_vm0, %v11040_v56  ;;  %v11047_v44 = vld [vmem:[#allocation2 + $0x110] sm:$0xff] }
 0x2ac   : > { %v11049_v46 = vld [vmem:[#allocation2 + $0x112] sm:$0xff]  ;;  %2613 = vst.msk [vmem:[#allocation3 + $0x228] sm:$0xff] %vm333_vm0, %v11047_v44  ;;  %v2515_v31 = vmax.f32 %v2441_v59, 0.0 }
 0x2ad   : > { %3249 = vst.msk [vmem:[#allocation3 + $0x1d0] sm:$0xff] %vm333_vm0, %v11049_v46 }
 0x2ae   : > { %2547 = vst.msk [vmem:[#allocation2 + $0x12a] sm:$0xff] %vm333_vm0, %v2515_v31  ;;  %v2220_v1 = vpop.f32.mrf.mxu0  ;;  %v9232_v31 = vpop.f32.mrf.mxu1 }
 0x2af   : > { %v2221_v53 = vadd.f32 %v10786_v32, %v2220_v1 }
 0x2b0   : > { %v2222_v30 = vpop.f32.mrf.mxu0  ;;  %v2646_v25 = vld [vmem:[#allocation2 + $0x122] sm:$0xff] }
 0x2b1   : > { %v11057_v62 = vld [vmem:[#allocation2 + $0x120] sm:$0xff]  ;;  %v2446_v14 = vadd.f32 %v2445_v22, %v2221_v53  ;;  %2734 = vrot.lane.b32.xlu0 %v2646_v25, %s9525_s16  ;;  %v2815_v53 = vld [vmem:[#allocation2 + $0xc] sm:$0xff] }
 0x2b2   : > { %v11059_v20 = vld [vmem:[#allocation2 + $0x122] sm:$0xff]  ;;  %v3949_v24 = vld [vmem:[#allocation3 + $0x178] sm:$0xff]  ;;  %2614 = vst.msk [vmem:[#allocation3 + $0x240] sm:$0xff] %vm333_vm0, %v11057_v62 }
 0x2b3   : > { %v3946_v7 = vld [vmem:[#allocation3 + $0x160] sm:$0xff]  ;;  %3250 = vst.msk [vmem:[#allocation3 + $0x1e8] sm:$0xff] %vm333_vm0, %v11059_v20  ;;  %v2516_v58 = vmax.f32 %v2446_v14, 0.0  ;;  %v2225_v33 = vpop.f32.mrf.mxu0  ;;  %v2455_v14 = vpop.f32.mrf.mxu1 }
 0x2b4   : > { %9271 = vmatprep.mubr.msk.f32.mxu0 %vm333_vm0, %v3946_v7  ;;  %v2226_v41 = vadd.f32 %v10786_v32, %v2225_v33 }
 0x2b5   : > { %9272 = vmatmul.mubr.msk.f32.gmra.mxu0 %vm333_vm0, %v3949_v24  ;;  %2548 = vst.msk [vmem:[#allocation2 + $0x13a] sm:$0xff] %vm333_vm0, %v2516_v58  ;;  %v2227_v35 = vpop.f32.mrf.mxu0  ;;  %v2647_v5 = vld [vmem:[#allocation2 + $0x12a] sm:$0xff] }
 0x2b6   : > { %v11070_v21 = vld [vmem:[#allocation2 + $0x124] sm:$0xff]  ;;  %v3855_v63 = vld [vmem:[#allocation2 + $0x12c] sm:$0xff]  ;;  %v2451_v59 = vadd.f32 %v9229_v3, %v2226_v41  ;;  %2736 = vrot.lane.b32.xlu1 %v2647_v5, %s9525_s16 }
 0x2b7   : > { %3886 = vst.msk [vmem:[#allocation3 + $0x190] sm:$0xff] %vm333_vm0, %v11070_v21  ;;  %3887 = vst.msk [vmem:[#allocation3 + $0x1a8] sm:$0xff] %vm333_vm0, %v3855_v63  ;;  %v11076_v1 = vld [vmem:[#allocation2 + $0x128] sm:$0xff] }
 0x2b8   : > { %v11078_v22 = vld [vmem:[#allocation2 + $0x12a] sm:$0xff]  ;;  %2615 = vst.msk [vmem:[#allocation3 + $0x258] sm:$0xff] %vm333_vm0, %v11076_v1  ;;  %v2517_v3 = vmax.f32 %v2451_v59, 0.0  ;;  %v2695_v30 = vpop.permute.xlu0 %2694 }
 0x2b9   : > { %14454 = vst [vmem:[#allocation4_spill] sm:$0xff] %v11078_v22  ;;  %3251 = vst.msk [vmem:[#allocation3 + $0x200] sm:$0xff] %vm333_vm0, %v11078_v22 }
 0x2ba   : > { %2786 = vst.msk [vmem:[#allocation3 + $0x60] sm:$0xff] %vm685_vm3, %v2695_v30  ;;  %v2230_v25 = vpop.f32.mrf.mxu0  ;;  %2880 = vrot.lane.b32.xlu1 %v2815_v53, %s9526_s17  ;;  %v2814_v53 = vld [vmem:[#allocation2 + $0x4] sm:$0xff] }
 0x2bb   : > { %2549 = vst.msk [vmem:[#allocation2 + $0x142] sm:$0xff] %vm333_vm0, %v2517_v3  ;;  %v2231_v7 = vadd.f32 %v10786_v32, %v2230_v25 }
 0x2bc   : > { %v2697_v24 = vpop.permute.xlu1 %2696  ;;  %v2232_v58 = vpop.f32.mrf.mxu0  ;;  %v2648_v33 = vld [vmem:[#allocation2 + $0x13a] sm:$0xff] }
 0x2bd   : > { %v11088_v41 = vld [vmem:[#allocation2 + $0x138] sm:$0xff]  ;;  %v2456_v5 = vadd.f32 %v2455_v14, %v2231_v7  ;;  %2787 = vst.msk [vmem:[#allocation3 + $0x78] sm:$0xff] %vm685_vm3, %v2697_v24  ;;  %2738 = vrot.lane.b32.xlu0 %v2648_v33, %s9525_s16 }
 0x2be   : > { %14455 = vst [vmem:[#allocation5_spill] sm:$0xff] %v11088_v41  ;;  %v11090_v35 = vld [vmem:[#allocation2 + $0x13a] sm:$0xff]  ;;  %v3952_v63 = vld [vmem:[#allocation3 + $0x190] sm:$0xff]  ;;  %v3955_v59 = vld [vmem:[#allocation3 + $0x1a8] sm:$0xff] }
 0x2bf   : > { %14456 = vst [vmem:[#allocation6_spill] sm:$0xff] %v11090_v35  ;;  %2616 = vst.msk [vmem:[#allocation3 + $0x270] sm:$0xff] %vm333_vm0, %v11088_v41  ;;  %9274 = vmatprep.mubr.msk.f32.mxu0 %vm333_vm0, %v3952_v63  ;;  %v2518_v3 = vmax.f32 %v2456_v5, 0.0  ;;  %v2235_v30 = vpop.f32.mrf.mxu0 }
 0x2c0   : > { %3252 = vst.msk [vmem:[#allocation3 + $0x218] sm:$0xff] %vm333_vm0, %v11090_v35  ;;  %9275 = vmatmul.mubr.msk.f32.gmra.mxu0 %vm333_vm0, %v3955_v59  ;;  %v2236_v25 = vadd.f32 %v10786_v32, %v2235_v30  ;;  %v2699_v14 = vpop.permute.xlu0 %2698  ;;  %v9235_v59 = vpop.f32.mrf.mxu1  ;;  %v4013_v30 = vld [vmem:[%s14420_s3 + $0x78] sm:$0xff] }
 0x2c1   : > { %2550 = vst.msk [vmem:[#allocation2 + $0x152] sm:$0xff] %vm333_vm0, %v2518_v3  ;;  %v2237_v7 = vpop.f32.mrf.mxu0  ;;  %2878 = vrot.lane.b32.xlu0 %v2814_v53, %s9526_s17  ;;  %v2817_v3 = vld [vmem:[#allocation2 + $0x24] sm:$0xff]  ;;  %4138 = vmatpush1.msra.mxu1 %v4013_v30 }
 0x2c2   : > { %2788 = vst.msk [vmem:[#allocation3 + $0x90] sm:$0xff] %vm685_vm3, %v2699_v14  ;;  %v2649_v24 = vld [vmem:[#allocation2 + $0x142] sm:$0xff]  ;;  %v2461_v0 = vadd.f32 %v9232_v31, %v2236_v25  ;;  %v4012_v14 = vld [vmem:[%s14420_s3 + $0x70] sm:$0xff] }
 0x2c3   : > { %v3856_v58 = vld [vmem:[#allocation2 + $0x13c] sm:$0xff]  ;;  %v3857_v33 = vld [vmem:[#allocation2 + $0x144] sm:$0xff]  ;;  %2740 = vrot.lane.b32.xlu1 %v2649_v24, %s9525_s16  ;;  %v14459_v24 = vmov 0.0  }
 0x2c4   : > { %3888 = vst.msk [vmem:[#allocation3 + $0x1c0] sm:$0xff] %vm333_vm0, %v3856_v58  ;;  %3889 = vst.msk [vmem:[#allocation3 + $0x1d8] sm:$0xff] %vm333_vm0, %v3857_v33  ;;  %v11107_v5 = vld [vmem:[#allocation2 + $0x140] sm:$0xff]  ;;  %v2519_v53 = vmax.f32 %v2461_v0, 0.0  ;;  %v2701_v31 = vpop.permute.xlu1 %2700  ;;  %v2465_v0 = vpop.f32.mrf.mxu1  ;;  %4139 = vmatprep.subr.mxu1 %v14459_v24 }
 0x2c5   : > { %14457 = vst [vmem:[#allocation7_spill] sm:$0xff] %v11107_v5  ;;  %v11109_v63 = vld [vmem:[#allocation2 + $0x142] sm:$0xff]  ;;  %2617 = vst.msk [vmem:[#allocation3 + $0x288] sm:$0xff] %vm333_vm0, %v11107_v5  ;;  %4140 = vmatpush1.msra.mxu1 %v4012_v14 }
 0x2c6   : > { %14458 = vst [vmem:[#allocation8_spill] sm:$0xff] %v11109_v63  ;;  %3253 = vst.msk [vmem:[#allocation3 + $0x230] sm:$0xff] %vm333_vm0, %v11109_v63  ;;  %v2240_v25 = vpop.f32.mrf.mxu0  ;;  %4141 = vmatprep.subr.mxu1 %v14459_v24  ;;  %v2816_v14 = vld [vmem:[#allocation2 + $0x1c] sm:$0xff] }
 0x2c7   : > { %2789 = vst.msk [vmem:[#allocation3 + $0xa8] sm:$0xff] %vm685_vm3, %v2701_v31  ;;  %2884 = vrot.lane.b32.xlu1 %v2817_v3, %s9526_s17  ;;  %v2241_v7 = vadd.f32 %v10786_v32, %v2240_v25  ;;  %v4011_v3 = vld [vmem:[%s14420_s3 + $0x68] sm:$0xff] }
 0x2c8   : > { %2551 = vst.msk [vmem:[#allocation2 + $0x15a] sm:$0xff] %vm333_vm0, %v2519_v53  ;;  %v2242_v58 = vpop.f32.mrf.mxu0  ;;  %v2703_v33 = vpop.permute.xlu0 %2702  ;;  %v2650_v31 = vld [vmem:[#allocation2 + $0x152] sm:$0xff]  ;;  %4142 = vmatpush1.msra.mxu1 %v4011_v3 }
 0x2c9   : > { %v11126_v63 = vld [vmem:[#allocation2 + $0x150] sm:$0xff]  ;;  %v2466_v53 = vadd.f32 %v2465_v0, %v2241_v7  ;;  %2790 = vst.msk [vmem:[#allocation3 + $0xc0] sm:$0xff] %vm685_vm3, %v2703_v33  ;;  %2742 = vrot.lane.b32.xlu0 %v2650_v31, %s9525_s16  ;;  %v4010_v7 = vld [vmem:[%s14420_s3 + $0x60] sm:$0xff]  ;;  %4143 = vmatprep.subr.mxu1 %v14459_v24 }
 0x2ca   : > { %14460 = vst [vmem:[#allocation9_spill] sm:$0xff] %v11126_v63  ;;  %2618 = vst.msk [vmem:[#allocation3 + $0x2a0] sm:$0xff] %vm333_vm0, %v11126_v63  ;;  %v11136_v58 = vld [vmem:[#allocation2 + $0x152] sm:$0xff]  ;;  %4144 = vmatpush1.msra.mxu1 %v4010_v7 }
 0x2cb   : > { %v3958_v30 = vld [vmem:[#allocation3 + $0x1c0] sm:$0xff]  ;;  %v3961_v25 = vld [vmem:[#allocation3 + $0x1d8] sm:$0xff]  ;;  %14461 = vst [vmem:[#allocation10_spill] sm:$0xff] %v11136_v58  ;;  %3254 = vst.msk [vmem:[#allocation3 + $0x248] sm:$0xff] %vm333_vm0, %v11136_v58  ;;  %v2520_v0 = vmax.f32 %v2466_v53, 0.0  ;;  %v2245_v33 = vpop.f32.mrf.mxu0  ;;  %4145 = vmatprep.subr.mxu1 %v14459_v24 }
 0x2cc   : > { %9277 = vmatprep.mubr.msk.f32.mxu0 %vm333_vm0, %v3958_v30  ;;  %v2246_v31 = vadd.f32 %v10786_v32, %v2245_v33  ;;  %v2705_v63 = vpop.permute.xlu1 %2704  ;;  %v4007_v33 = vld [vmem:[%s14420_s3 + $0x48] sm:$0xff] }
 0x2cd   : > { %9278 = vmatmul.mubr.msk.f32.gmra.mxu0 %vm333_vm0, %v3961_v25  ;;  %2552 = vst.msk [vmem:[#allocation2 + $0x16a] sm:$0xff] %vm333_vm0, %v2520_v0  ;;  %v2247_v3 = vpop.f32.mrf.mxu0  ;;  %2882 = vrot.lane.b32.xlu0 %v2816_v14, %s9526_s17  ;;  %v9238_v25 = vpop.f32.mrf.mxu1  ;;  %v4008_v14 = vld [vmem:[%s14420_s3 + $0x50] sm:$0xff] }
 0x2ce   : > { %2791 = vst.msk [vmem:[#allocation3 + $0xd8] sm:$0xff] %vm685_vm3, %v2705_v63  ;;  %v2471_v53 = vadd.f32 %v9235_v59, %v2246_v31  ;;  %v4009_v63 = vld [vmem:[%s14420_s3 + $0x58] sm:$0xff] }
 0x2cf   : > { %v2651_v30 = vld [vmem:[#allocation2 + $0x15a] sm:$0xff]  ;;  %4146 = vmatpush1.msra.mxu1 %v4009_v63  ;;  %v2475_v3 = vpop.f32.mrf.mxu1 }
 0x2d0   : > { %v3858_v5 = vld [vmem:[#allocation2 + $0x154] sm:$0xff]  ;;  %v3859_v58 = vld [vmem:[#allocation2 + $0x15c] sm:$0xff]  ;;  %2744 = vrot.lane.b32.xlu1 %v2651_v30, %s9525_s16  ;;  %v2521_v0 = vmax.f32 %v2471_v53, 0.0  ;;  %4147 = vmatprep.subr.mxu1 %v14459_v24 }
 0x2d1   : > { %3890 = vst.msk [vmem:[#allocation3 + $0x1f0] sm:$0xff] %vm333_vm0, %v3858_v5  ;;  %3891 = vst.msk [vmem:[#allocation3 + $0x208] sm:$0xff] %vm333_vm0, %v3859_v58  ;;  %v11154_v7 = vld [vmem:[#allocation2 + $0x158] sm:$0xff]  ;;  %v2707_v5 = vpop.permute.xlu0 %2706  ;;  %4148 = vmatpush1.msra.mxu1 %v4008_v14  ;;  %v4006_v30 = vld [vmem:[%s14420_s3 + $0x40] sm:$0xff] }
 0x2d2   : > { %14462 = vst [vmem:[#allocation11_spill] sm:$0xff] %v11154_v7  ;;  %2619 = vst.msk [vmem:[#allocation3 + $0x2b8] sm:$0xff] %vm333_vm0, %v11154_v7  ;;  %v11164_v59 = vld [vmem:[#allocation2 + $0x15a] sm:$0xff]  ;;  %v2250_v31 = vpop.f32.mrf.mxu0  ;;  %4149 = vmatprep.subr.mxu1 %v14459_v24 }
 0x2d3   : > { %14463 = vst [vmem:[#allocation12_spill] sm:$0xff] %v11164_v59  ;;  %3255 = vst.msk [vmem:[#allocation3 + $0x260] sm:$0xff] %vm333_vm0, %v11164_v59  ;;  %v11170_v58 = vld [vmem:[#allocation2 + $0x3c] sm:$0xff]  ;;  %v2251_v53 = vadd.f32 %v10786_v32, %v2250_v31  ;;  %4150 = vmatpush1.msra.mxu1 %v4007_v33  ;;  %v4004_v33 = vld [vmem:[%s14420_s3 + $0x30] sm:$0xff] }
 0x2d4   : > { %2792 = vst.msk [vmem:[#allocation3 + $0xf0] sm:$0xff] %vm685_vm3, %v2707_v5  ;;  %2888 = vrot.lane.b32.xlu1 %v11170_v58, %s9526_s17  ;;  %v2252_v63 = vpop.f32.mrf.mxu0  ;;  %v2709_v14 = vpop.permute.xlu1 %2708  ;;  %v2652_v5 = vld [vmem:[#allocation2 + $0x16a] sm:$0xff]  ;;  %4151 = vmatprep.subr.mxu1 %v14459_v24  ;;  %v4005_v32 = vld [vmem:[%s14420_s3 + $0x38] sm:$0xff] }
 0x2d5   : > { %2553 = vst.msk [vmem:[#allocation2 + $0x172] sm:$0xff] %vm333_vm0, %v2521_v0  ;;  %v11183_v59 = vld [vmem:[#allocation2 + $0x168] sm:$0xff]  ;;  %v2476_v7 = vadd.f32 %v2475_v3, %v2251_v53  ;;  %2746 = vrot.lane.b32.xlu0 %v2652_v5, %s9525_s16  ;;  %4152 = vmatpush1.msra.mxu1 %v4006_v30  ;;  %v9503_v30 = vld [vmem:[%s14419_s2] ss:$0 sm:$0xff]  ;;  %v11206_v63 = vld [vmem:[#allocation2 + $0x34] sm:$0xff] }
 0x2d6   : > { %14464 = vst [vmem:[#allocation13_spill] sm:$0xff] %v11183_v59  ;;  %v11186_v0 = vld [vmem:[#allocation2 + $0x16a] sm:$0xff]  ;;  %2793 = vst.msk [vmem:[#allocation3 + $0x108] sm:$0xff] %vm685_vm3, %v2709_v14  ;;  %4153 = vmatprep.subr.mxu1 %v14459_v24 }
 0x2d7   : > { %14465 = vst [vmem:[#allocation14_spill] sm:$0xff] %v11186_v0  ;;  %2620 = vst.msk [vmem:[#allocation3 + $0x2d0] sm:$0xff] %vm333_vm0, %v11183_v59  ;;  %v2522_v31 = vmax.f32 %v2476_v7, 0.0  ;;  %v2255_v3 = vpop.f32.mrf.mxu0  ;;  %4154 = vmatpush1.msra.mxu1 %v4005_v32  ;;  %v9241_v32 = vpop.f32.mrf.mxu1 }
 0x2d8   : > { %v3964_v35 = vld [vmem:[#allocation3 + $0x1f0] sm:$0xff]  ;;  %v3967_v41 = vld [vmem:[#allocation3 + $0x208] sm:$0xff]  ;;  %3256 = vst.msk [vmem:[#allocation3 + $0x278] sm:$0xff] %vm333_vm0, %v11186_v0  ;;  %v2256_v53 = vadd.f32 %v9503_v30, %v2255_v3  ;;  %4155 = vmatprep.subr.mxu1 %v14459_v24 }
 0x2d9   : > { %9280 = vmatprep.mubr.msk.f32.mxu0 %vm333_vm0, %v3964_v35  ;;  %2554 = vst.msk [vmem:[#allocation2 + $0x182] sm:$0xff] %vm333_vm0, %v2522_v31  ;;  %v2257_v35 = vpop.f32.mrf.mxu0  ;;  %2886 = vrot.lane.b32.xlu0 %v11206_v63, %s9526_s17  ;;  %v4003_v31 = vld [vmem:[%s14420_s3 + $0x28] sm:$0xff] }
 0x2da   : > { %9281 = vmatmul.mubr.msk.f32.gmra.mxu0 %vm333_vm0, %v3967_v41  ;;  %4156 = vmatpush1.msra.mxu1 %v4004_v33  ;;  %v2481_v41 = vadd.f32 %v9238_v25, %v2256_v53  ;;  %v4002_v33 = vld [vmem:[%s14420_s3 + $0x20] sm:$0xff] }
 0x2db   : > { %4157 = vmatprep.subr.mxu1 %v14459_v24  ;;  %v2711_v25 = vpop.permute.xlu0 %2710 }
 0x2dc   : > { %v2653_v7 = vld [vmem:[#allocation2 + $0x172] sm:$0xff]  ;;  %4158 = vmatpush1.msra.mxu1 %v4003_v31  ;;  %v2523_v35 = vmax.f32 %v2481_v41, 0.0  ;;  %2794 = vst.msk [vmem:[#allocation3 + $0x120] sm:$0xff] %vm685_vm3, %v2711_v25  ;;  %v2485_v31 = vpop.f32.mrf.mxu1 }
 0x2dd   : > { %v3860_v14 = vld [vmem:[#allocation2 + $0x16c] sm:$0xff]  ;;  %v3861_v5 = vld [vmem:[#allocation2 + $0x174] sm:$0xff]  ;;  %2748 = vrot.lane.b32.xlu1 %v2653_v7, %s9525_s16  ;;  %4159 = vmatprep.subr.mxu1 %v14459_v24 }
 0x2de   : > { %3892 = vst.msk [vmem:[#allocation3 + $0x220] sm:$0xff] %vm333_vm0, %v3860_v14  ;;  %3893 = vst.msk [vmem:[#allocation3 + $0x238] sm:$0xff] %vm333_vm0, %v3861_v5  ;;  %v11215_v3 = vld [vmem:[#allocation2 + $0x170] sm:$0xff]  ;;  %4160 = vmatpush1.msra.mxu1 %v4002_v33  ;;  %v4001_v5 = vld [vmem:[%s14420_s3 + $0x18] sm:$0xff]  ;;  %v2260_v41 = vpop.f32.mrf.mxu0 }
 0x2df   : > { %14466 = vst [vmem:[#allocation15_spill] sm:$0xff] %v11215_v3  ;;  %2621 = vst.msk [vmem:[#allocation3 + $0x2e8] sm:$0xff] %vm333_vm0, %v11215_v3  ;;  %v11226_v53 = vld [vmem:[#allocation2 + $0x172] sm:$0xff]  ;;  %4161 = vmatprep.subr.mxu1 %v14459_v24 }
 0x2e0   : > { %14467 = vst [vmem:[#allocation16_spill] sm:$0xff] %v11226_v53  ;;  %v11229_v7 = vld [vmem:[#allocation2 + $0x4c] sm:$0xff]  ;;  %3257 = vst.msk [vmem:[#allocation3 + $0x290] sm:$0xff] %vm333_vm0, %v11226_v53  ;;  %v11236_v14 = vld [vmem:[#allocation2 + $0x54] sm:$0xff]  ;;  %v2261_v53 = vadd.f32 %v9503_v30, %v2260_v41  ;;  %4162 = vmatpush1.msra.mxu1 %v4001_v5  ;;  %v2262_v33 = vpop.f32.mrf.mxu0  ;;  %v2713_v3 = vpop.permute.xlu1 %2712 }
 0x2e1   : > { %2890 = vrot.lane.b32.xlu0 %v11229_v7, %s9526_s17  ;;  %2555 = vst.msk [vmem:[#allocation2 + $0x18a] sm:$0xff] %vm333_vm0, %v2523_v35  ;;  %2892 = vrot.lane.b32.xlu1 %v11236_v14, %s9526_s17  ;;  %v4000_v25 = vld [vmem:[%s14420_s3 + $0x10] sm:$0xff]  ;;  %v11249_v0 = vld [vmem:[#allocation2 + $0x182] sm:$0xff] }
 0x2e2   : > { %4163 = vmatprep.subr.mxu1 %v14459_v24  ;;  %v2486_v35 = vadd.f32 %v2485_v31, %v2261_v53  ;;  %2795 = vst.msk [vmem:[#allocation3 + $0x138] sm:$0xff] %vm685_vm3, %v2713_v3  ;;  %v3999_v41 = vld [vmem:[%s14420_s3 + $0x8] sm:$0xff]  ;;  %v3998_v5 = vld [vmem:[%s14420_s3] sm:$0xff] }
 0x2e3   : > { %4164 = vmatpush1.msra.mxu1 %v4000_v25  ;;  %3258 = vst.msk [vmem:[#allocation3 + $0x2a8] sm:$0xff] %vm333_vm0, %v11249_v0  ;;  %v2265_v3 = vpop.f32.mrf.mxu0 }
 0x2e4   : > { %v2524_v53 = vmax.f32 %v2486_v35, 0.0  ;;  %4165 = vmatprep.subr.mxu1 %v14459_v24  ;;  %v2266_v31 = vadd.f32 %v9503_v30, %v2265_v3  ;;  %v4027_v3 = vld [vmem:[%s14420_s3 + $0xe8] sm:$0xff] }
 0x2e5   : > { %2894 = vrot.lane.b32.xlu0 %v10841_v43, %s9526_s17  ;;  %v3970_v59 = vld [vmem:[#allocation3 + $0x220] sm:$0xff]  ;;  %v3973_v22 = vld [vmem:[#allocation3 + $0x238] sm:$0xff]  ;;  %2896 = vrot.lane.b32.xlu1 %v10843_v42, %s9526_s17  ;;  %v2267_v25 = vpop.f32.mrf.mxu0 }
 0x2e6   : > { %9283 = vmatprep.mubr.msk.f32.mxu0 %vm333_vm0, %v3970_v59  ;;  %4166 = vmatpush1.msra.mxu1 %v3999_v41  ;;  %2556 = vst.msk [vmem:[#allocation2 + $0x19a] sm:$0xff] %vm333_vm0, %v2524_v53  ;;  %v2491_v35 = vadd.f32 %v9241_v32, %v2266_v31  ;;  %v4028_v53 = vld [vmem:[%s14420_s3 + $0xf0] sm:$0xff]  ;;  %v4026_v31 = vld [vmem:[%s14420_s3 + $0xe0] sm:$0xff] }
 0x2e7   : > { %9284 = vmatmul.mubr.msk.f32.gmra.mxu0 %vm333_vm0, %v3973_v22  ;;  %4167 = vmatprep.subr.mxu1 %v14459_v24  ;;  %v4029_v22 = vld [vmem:[%s14420_s3 + $0xf8] sm:$0xff]  ;;  %v2715_v41 = vpop.permute.xlu0 %2714 }
 0x2e8   : > { %v3862_v33 = vld [vmem:[#allocation2 + $0x184] sm:$0xff]  ;;  %v3863_v59 = vld [vmem:[#allocation2 + $0x18c] sm:$0xff]  ;;  %4168 = vmatpush1.msra.mxu1 %v3998_v5  ;;  %v2525_v32 = vmax.f32 %v2491_v35, 0.0  ;;  %2796 = vst.msk [vmem:[#allocation3 + $0x150] sm:$0xff] %vm685_vm3, %v2715_v41 }
 0x2e9   : > { %2898 = vrot.lane.b32.xlu0 %v10867_v40, %s9526_s17  ;;  %2900 = vrot.lane.b32.xlu1 %v10869_v29, %s9526_s17  ;;  %3894 = vst.msk [vmem:[#allocation3 + $0x250] sm:$0xff] %vm333_vm0, %v3862_v33  ;;  %3895 = vst.msk [vmem:[#allocation3 + $0x268] sm:$0xff] %vm333_vm0, %v3863_v59  ;;  %v11278_v30 = vld [vmem:[#allocation2 + $0x18a] sm:$0xff] }
 0x2ea   : > { %4169 = vmatprep.subr.mxu1 %v14459_v24  ;;  %3259 = vst.msk [vmem:[#allocation3 + $0x2c0] sm:$0xff] %vm333_vm0, %v11278_v30  ;;  %2557 = vst.msk [vmem:[#allocation2 + $0x1a2] sm:$0xff] %vm333_vm0, %v2525_v32  ;;  %v4023_v35 = vld [vmem:[%s14420_s3 + $0xc8] sm:$0xff] }
 0x2eb   : > { %4170 = vmatpush2.msra.mxu1 %v4029_v22 }
 0x2ec   : > { %4171 = vmatprep.subr.mxu1 %v14459_v24  ;;  %v2717_v5 = vpop.permute.xlu1 %2716 }
 0x2ed   : > { %2902 = vrot.lane.b32.xlu0 %v10893_v39, %s9526_s17  ;;  %2904 = vrot.lane.b32.xlu1 %v10895_v12, %s9526_s17  ;;  %v11300_v25 = vld [vmem:[#allocation2 + $0x19a] sm:$0xff]  ;;  %2797 = vst.msk [vmem:[#allocation3 + $0x168] sm:$0xff] %vm685_vm3, %v2717_v5 }
 0x2ee   : > { %4172 = vmatpush2.msra.mxu1 %v4028_v53  ;;  %3260 = vst.msk [vmem:[#allocation3 + $0x2d8] sm:$0xff] %vm333_vm0, %v11300_v25  ;;  %v4025_v12 = vld [vmem:[%s14420_s3 + $0xd8] sm:$0xff] }
 0x2ef   : > { %4173 = vmatprep.subr.mxu1 %v14459_v24 }
 0x2f0   : > { %4174 = vmatpush2.msra.mxu1 %v4027_v3  ;;  %v3976_v33 = vld [vmem:[#allocation3 + $0x250] sm:$0xff]  ;;  %v3979_v59 = vld [vmem:[#allocation3 + $0x268] sm:$0xff] }
 0x2f1   : > { %2906 = vrot.lane.b32.xlu0 %v10919_v23, %s9526_s17  ;;  %4175 = vmatprep.subr.mxu1 %v14459_v24  ;;  %v4024_v23 = vld [vmem:[%s14420_s3 + $0xd0] sm:$0xff]  ;;  %v3864_v22 = vld [vmem:[#allocation2 + $0x19c] sm:$0xff] }
 0x2f2   : > { %2908 = vrot.lane.b32.xlu1 %v10921_v60, %s9526_s17  ;;  %9286 = vmatprep.mubr.msk.f32.mxu0 %vm333_vm0, %v3976_v33  ;;  %v3865_v60 = vld [vmem:[#allocation2 + $0x1a4] sm:$0xff]  ;;  %3896 = vst.msk [vmem:[#allocation3 + $0x280] sm:$0xff] %vm333_vm0, %v3864_v22 }
 0x2f3   : > { %9287 = vmatmul.mubr.msk.f32.gmra.mxu0 %vm333_vm0, %v3979_v59  ;;  %4176 = vmatpush2.msra.mxu1 %v4026_v31  ;;  %3897 = vst.msk [vmem:[#allocation3 + $0x298] sm:$0xff] %vm333_vm0, %v3865_v60  ;;  %v11329_v41 = vld [vmem:[#allocation2 + $0x1a2] sm:$0xff]  ;;  %v2719_v53 = vpop.permute.xlu0 %2718  ;;  %v4017_v31 = vld [vmem:[%s14420_s3 + $0x98] sm:$0xff] }
 0x2f4   : > { %4177 = vmatprep.subr.mxu1 %v14459_v24  ;;  %3261 = vst.msk [vmem:[#allocation3 + $0x2f0] sm:$0xff] %vm333_vm0, %v11329_v41 }
 0x2f5   : > { %2910 = vrot.lane.b32.xlu0 %v10945_v54, %s9526_s17  ;;  %4178 = vmatpush2.msra.mxu1 %v4025_v12  ;;  %2798 = vst.msk [vmem:[#allocation3 + $0x180] sm:$0xff] %vm685_vm3, %v2719_v53  ;;  %v4022_v54 = vld [vmem:[%s14420_s3 + $0xc0] sm:$0xff]  ;;  %v9505_v12 = vld [vmem:[#allocation2 + $0x6a] sm:$0xff] }
 0x2f6   : > { %2912 = vrot.lane.b32.xlu1 %v10947_v11, %s9526_s17  ;;  %4179 = vmatprep.subr.mxu1 %v14459_v24  ;;  %v4021_v11 = vld [vmem:[%s14420_s3 + $0xb8] sm:$0xff] }
 0x2f7   : > { %4180 = vmatpush2.msra.mxu1 %v4024_v23 }
 0x2f8   : > { %4181 = vmatprep.subr.mxu1 %v14459_v24  ;;  %v2721_v32 = vpop.permute.xlu1 %2720 }
 0x2f9   : > { %2914 = vrot.lane.b32.xlu0 %v10974_v52, %s9526_s17  ;;  %4182 = vmatpush2.msra.mxu1 %v4023_v35  ;;  %2799 = vst.msk [vmem:[#allocation3 + $0x198] sm:$0xff] %vm685_vm3, %v2721_v32  ;;  %v3982_v52 = vld [vmem:[#allocation3 + $0x280] sm:$0xff]  ;;  %v9510_v35 = vld [vmem:[#allocation2 + $0xaa] sm:$0xff] }
 0x2fa   : > { %2916 = vrot.lane.b32.xlu1 %v10976_v51, %s9526_s17  ;;  %4183 = vmatprep.subr.mxu1 %v14459_v24  ;;  %v3985_v3 = vld [vmem:[#allocation3 + $0x298] sm:$0xff]  ;;  %v4020_v51 = vld [vmem:[%s14420_s3 + $0xb0] sm:$0xff] }
 0x2fb   : > { %4184 = vmatpush2.msra.mxu1 %v4022_v54  ;;  %9289 = vmatprep.mubr.msk.f32.mxu0 %vm333_vm0, %v3982_v52  ;;  %v3271_v52 = vld [vmem:[#allocation2 + $0x9c] sm:$0xff] }
 0x2fc   : > { %4185 = vmatprep.subr.mxu1 %v14459_v24  ;;  %9290 = vmatmul.mubr.msk.f32.gmra.mxu0 %vm333_vm0, %v3985_v3  ;;  %v9513_v3 = vld [vmem:[#allocation2 + $0xca] sm:$0xff] }
 0x2fd   : > { %2918 = vrot.lane.b32.xlu0 %v11006_v34, %s9526_s17  ;;  %4186 = vmatpush2.msra.mxu1 %v4021_v11  ;;  %v4019_v34 = vld [vmem:[%s14420_s3 + $0xa8] sm:$0xff] }
 0x2fe   : > { %2920 = vrot.lane.b32.xlu1 %v11008_v15, %s9526_s17  ;;  %4187 = vmatprep.subr.mxu1 %v14459_v24  ;;  %v4018_v15 = vld [vmem:[%s14420_s3 + $0xa0] sm:$0xff] }
 0x2ff   : > { %4188 = vmatpush2.msra.mxu1 %v4020_v51  ;;  %v2723_v5 = vpop.permute.xlu0 %2722 }
 0x300   : > { %4189 = vmatprep.subr.mxu1 %v14459_v24  ;;  %2800 = vst.msk [vmem:[#allocation3 + $0x1b0] sm:$0xff] %vm685_vm3, %v2723_v5 }
 0x301   : > { %2922 = vrot.lane.b32.xlu0 %v11038_v61, %s9526_s17  ;;  %4190 = vmatpush2.msra.mxu1 %v4019_v34  ;;  %v4016_v61 = vld [vmem:[%s14420_s3 + $0x90] sm:$0xff] }
 0x302   : > { %2924 = vrot.lane.b32.xlu1 %v11040_v56, %s9526_s17  ;;  %4191 = vmatprep.subr.mxu1 %v14459_v24  ;;  %v4015_v56 = vld [vmem:[%s14420_s3 + $0x88] sm:$0xff] }
 0x303   : > { %4192 = vmatpush2.msra.mxu1 %v4018_v15 }
 0x304   : > { %4193 = vmatprep.subr.mxu1 %v14459_v24  ;;  %v2725_v33 = vpop.permute.xlu1 %2724 }
 0x305   : > { %2926 = vrot.lane.b32.xlu0 %v11070_v21, %s9526_s17  ;;  %4194 = vmatpush2.msra.mxu1 %v4017_v31  ;;  %2801 = vst.msk [vmem:[#allocation3 + $0x1c8] sm:$0xff] %vm685_vm3, %v2725_v33  ;;  %v4014_v21 = vld [vmem:[%s14420_s3 + $0x80] sm:$0xff] }
 0x306   : > { %3326 = vrot.lane.b32.xlu1 %v11206_v63, %s9525_s16  ;;  %4195 = vmatprep.subr.mxu1 %v14459_v24  ;;  %v9504_v63 = vld [vmem:[#allocation2 + $0x62] sm:$0xff] }
 0x307   : > { %4196 = vmatpush2.msra.mxu1 %v4016_v61 }
 0x308   : > { %4197 = vmatprep.subr.mxu1 %v14459_v24 }
 0x309   : > { %3518 = vrot.lane.b32.xlu0 %v10834_v50, %s9526_s17  ;;  %4198 = vmatpush2.msra.mxu1 %v4015_v56 }
 0x30a   : > { %3710 = vrot.lane.b32.xlu1 %v9504_v63, %s9527_s18  ;;  %4199 = vmatprep.subr.mxu1 %v14459_v24 }
 0x30b   : > { %4200 = vmatpush2.msra.mxu1 %v4014_v21  ;;  %v2727_v59 = vpop.permute.xlu0 %2726 }
 0x30c   : > { %6230 = vmatprep.subr.mxu1 %v14459_v24  ;;  %2802 = vst.msk [vmem:[#allocation3 + $0x1e0] sm:$0xff] %vm685_vm3, %v2727_v59 }
 0x30d   : > { %3070 = vrot.lane.b32.xlu0 %v10802_v38, %s9527_s18  ;;  %v9506_v38 = vld [vmem:[#allocation2 + $0x7a] sm:$0xff] }
 0x30e   : > { %3328 = vrot.lane.b32.xlu1 %v11170_v58, %s9525_s16 }
 0x310   : > { %v2729_v23 = vpop.permute.xlu1 %2728 }
 0x311   : > { %3520 = vrot.lane.b32.xlu0 %v10851_v4, %s9526_s17  ;;  %2803 = vst.msk [vmem:[#allocation3 + $0x1f8] sm:$0xff] %vm685_vm3, %v2729_v23 }
 0x312   : > { %3712 = vrot.lane.b32.xlu1 %v9505_v12, %s9527_s18 }
 0x315   : > { %3072 = vrot.lane.b32.xlu0 %v10810_v18, %s9527_s18  ;;  %v9507_v18 = vld [vmem:[#allocation2 + $0x82] sm:$0xff] }
 0x316   : > { %3330 = vrot.lane.b32.xlu1 %v11229_v7, %s9525_s16 }
 0x317   : > { %v2731_v58 = vpop.permute.xlu0 %2730 }
 0x318   : > { %2804 = vst.msk [vmem:[#allocation3 + $0x210] sm:$0xff] %vm685_vm3, %v2731_v58 }
 0x319   : > { %3522 = vrot.lane.b32.xlu0 %v10857_v36, %s9526_s17 }
 0x31a   : > { %3714 = vrot.lane.b32.xlu1 %v9506_v38, %s9527_s18 }
 0x31c   : > { %v2733_v22 = vpop.permute.xlu1 %2732 }
 0x31d   : > { %3074 = vrot.lane.b32.xlu0 %v10818_v6, %s9527_s18  ;;  %2805 = vst.msk [vmem:[#allocation3 + $0x228] sm:$0xff] %vm685_vm3, %v2733_v22  ;;  %v9508_v6 = vld [vmem:[#allocation2 + $0x92] sm:$0xff] }
 0x31e   : > { %3332 = vrot.lane.b32.xlu1 %v11236_v14, %s9525_s16 }
 0x321   : > { %3524 = vrot.lane.b32.xlu0 %v10871_v47, %s9526_s17 }
 0x322   : > { %3716 = vrot.lane.b32.xlu1 %v9507_v18, %s9527_s18 }
 0x323   : > { %v2735_v7 = vpop.permute.xlu0 %2734 }
 0x324   : > { %2806 = vst.msk [vmem:[#allocation3 + $0x240] sm:$0xff] %vm685_vm3, %v2735_v7 }
 0x325   : > { %3076 = vrot.lane.b32.xlu0 %v10826_v55, %s9527_s18 }
 0x326   : > { %3334 = vrot.lane.b32.xlu1 %v10841_v43, %s9525_s16  ;;  %v9509_v43 = vld [vmem:[#allocation2 + $0x9a] sm:$0xff] }
 0x328   : > { %v2737_v14 = vpop.permute.xlu1 %2736 }
 0x329   : > { %3526 = vrot.lane.b32.xlu0 %v10883_v10, %s9526_s17  ;;  %2807 = vst.msk [vmem:[#allocation3 + $0x258] sm:$0xff] %vm685_vm3, %v2737_v14 }
 0x32a   : > { %3718 = vrot.lane.b32.xlu1 %v9508_v6, %s9527_s18 }
 0x32c   : > { %v2881_v55 = vpop.permute.xlu1 %2880 }
 0x32d   : > { %3078 = vrot.lane.b32.xlu0 %v10834_v50, %s9527_s18  ;;  %2975 = vst.msk [vmem:[#allocation3 + $0x18] sm:$0xff] %vm878_vm4, %v2881_v55 }
 0x32e   : > { %3336 = vrot.lane.b32.xlu1 %v10843_v42, %s9525_s16 }
 0x32f   : > { %v2739_v60 = vpop.permute.xlu0 %2738 }
 0x330   : > { %2808 = vst.msk [vmem:[#allocation3 + $0x270] sm:$0xff] %vm685_vm3, %v2739_v60 }
 0x331   : > { %3528 = vrot.lane.b32.xlu0 %v10902_v17, %s9526_s17 }
 0x332   : > { %3720 = vrot.lane.b32.xlu1 %v9509_v43, %s9527_s18  ;;  %v3278_v43 = vld [vmem:[#allocation2 + $0xf4] sm:$0xff] }
 0x333   : > { %v2879_v50 = vpop.permute.xlu0 %2878 }
 0x334   : > { %2974 = vst.msk [vmem:[#allocation3] sm:$0xff] %vm878_vm4, %v2879_v50 }
 0x335   : > { %3080 = vrot.lane.b32.xlu0 %v10851_v4, %s9527_s18  ;;  %v2741_v42 = vpop.permute.xlu1 %2740 }
 0x336   : > { %3338 = vrot.lane.b32.xlu1 %v10867_v40, %s9525_s16  ;;  %2809 = vst.msk [vmem:[#allocation3 + $0x288] sm:$0xff] %vm685_vm3, %v2741_v42  ;;  %v9511_v40 = vld [vmem:[#allocation2 + $0xb2] sm:$0xff] }
 0x339   : > { %3530 = vrot.lane.b32.xlu0 %v10909_v19, %s9526_s17  ;;  %v2885_v53 = vpop.permute.xlu1 %2884 }
 0x33a   : > { %3722 = vrot.lane.b32.xlu1 %v9510_v35, %s9527_s18  ;;  %2977 = vst.msk [vmem:[#allocation3 + $0x48] sm:$0xff] %vm878_vm4, %v2885_v53  ;;  %v3279_v53 = vld [vmem:[#allocation2 + $0xfc] sm:$0xff] }
 0x33b   : > { %v2743_v4 = vpop.permute.xlu0 %2742 }
 0x33c   : > { %2810 = vst.msk [vmem:[#allocation3 + $0x2a0] sm:$0xff] %vm685_vm3, %v2743_v4 }
 0x33d   : > { %3082 = vrot.lane.b32.xlu0 %v10857_v36, %s9527_s18 }
 0x33e   : > { %3340 = vrot.lane.b32.xlu1 %v10869_v29, %s9525_s16  ;;  %v9512_v29 = vld [vmem:[#allocation2 + $0xc2] sm:$0xff] }
 0x33f   : > { %v2883_v54 = vpop.permute.xlu0 %2882 }
 0x340   : > { %2976 = vst.msk [vmem:[#allocation3 + $0x30] sm:$0xff] %vm878_vm4, %v2883_v54 }
 0x341   : > { %3532 = vrot.lane.b32.xlu0 %v10928_v28, %s9526_s17 }
 0x342   : > { %3724 = vrot.lane.b32.xlu1 %v9511_v40, %s9527_s18  ;;  %v2745_v11 = vpop.permute.xlu1 %2744 }
 0x343   : > { %2811 = vst.msk [vmem:[#allocation3 + $0x2b8] sm:$0xff] %vm685_vm3, %v2745_v11 }
 0x345   : > { %3084 = vrot.lane.b32.xlu0 %v10871_v47, %s9527_s18 }
 0x346   : > { %3342 = vrot.lane.b32.xlu1 %v10893_v39, %s9525_s16  ;;  %v2889_v36 = vpop.permute.xlu1 %2888 }
 0x347   : > { %2979 = vst.msk [vmem:[#allocation3 + $0x78] sm:$0xff] %vm878_vm4, %v2889_v36  ;;  %v2747_v32 = vpop.permute.xlu0 %2746 }
 0x348   : > { %2812 = vst.msk [vmem:[#allocation3 + $0x2d0] sm:$0xff] %vm685_vm3, %v2747_v32 }
 0x349   : > { %3534 = vrot.lane.b32.xlu0 %v10935_v9, %s9526_s17 }
 0x34a   : > { %3726 = vrot.lane.b32.xlu1 %v9512_v29, %s9527_s18  ;;  %v3280_v29 = vld [vmem:[#allocation2 + $0x10c] sm:$0xff] }
 0x34b   : > { %v2887_v47 = vpop.permute.xlu0 %2886 }
 0x34c   : > { %2978 = vst.msk [vmem:[#allocation3 + $0x60] sm:$0xff] %vm878_vm4, %v2887_v47 }
 0x34d   : > { %3086 = vrot.lane.b32.xlu0 %v10883_v10, %s9527_s18  ;;  %v3272_v10 = vld [vmem:[#allocation2 + $0xac] sm:$0xff] }
 0x34e   : > { %3344 = vrot.lane.b32.xlu1 %v3271_v52, %s9525_s16 }
 0x34f   : > { %v2749_v39 = vpop.permute.xlu1 %2748 }
 0x350   : > { %2813 = vst.msk [vmem:[#allocation3 + $0x2e8] sm:$0xff] %vm685_vm3, %v2749_v39  ;;  %v14469_v39 = vld [vmem:[#allocation5_spill] sm:$0xff] }
 0x351   : > { %3536 = vrot.lane.b32.xlu0 %v10954_v13, %s9526_s17 }
 0x352   : > { %3728 = vrot.lane.b32.xlu1 %v9513_v3, %s9527_s18  ;;  %v14470_v3 = vld [vmem:[#allocation6_spill] sm:$0xff] }
 0x353   : > { %v2891_v51 = vpop.permute.xlu0 %2890  ;;  %v2893_v34 = vpop.permute.xlu1 %2892 }
 0x354   : > { %2980 = vst.msk [vmem:[#allocation3 + $0x90] sm:$0xff] %vm878_vm4, %v2891_v51  ;;  %2981 = vst.msk [vmem:[#allocation3 + $0xa8] sm:$0xff] %vm878_vm4, %v2893_v34 }
 0x355   : > { %3088 = vrot.lane.b32.xlu0 %v10902_v17, %s9527_s18  ;;  %v3273_v17 = vld [vmem:[#allocation2 + $0xb4] sm:$0xff] }
 0x356   : > { %3346 = vrot.lane.b32.xlu1 %v3272_v10, %s9525_s16  ;;  %v3281_v10 = vld [vmem:[#allocation2 + $0x114] sm:$0xff] }
 0x357   : > { %v2895_v15 = vpop.permute.xlu0 %2894  ;;  %v2897_v5 = vpop.permute.xlu1 %2896 }
 0x358   : > { %2982 = vst.msk [vmem:[#allocation3 + $0xc0] sm:$0xff] %vm878_vm4, %v2895_v15  ;;  %2983 = vst.msk [vmem:[#allocation3 + $0xd8] sm:$0xff] %vm878_vm4, %v2897_v5 }
 0x359   : > { %3538 = vrot.lane.b32.xlu0 %v10961_v48, %s9526_s17 }
 0x35a   : > { %3730 = vrot.lane.b32.xlu1 %v10963_v27, %s9527_s18 }
 0x35b   : > { %v2899_v31 = vpop.permute.xlu0 %2898  ;;  %v2901_v61 = vpop.permute.xlu1 %2900 }
 0x35c   : > { %2984 = vst.msk [vmem:[#allocation3 + $0xf0] sm:$0xff] %vm878_vm4, %v2899_v31  ;;  %2985 = vst.msk [vmem:[#allocation3 + $0x108] sm:$0xff] %vm878_vm4, %v2901_v61  ;;  %v14471_v61 = vld [vmem:[#allocation7_spill] sm:$0xff] }
 0x35d   : > { %3090 = vrot.lane.b32.xlu0 %v10909_v19, %s9527_s18  ;;  %v3274_v19 = vld [vmem:[#allocation2 + $0xc4] sm:$0xff] }
 0x35e   : > { %3348 = vrot.lane.b32.xlu1 %v3273_v17, %s9525_s16  ;;  %v14472_v17 = vld [vmem:[#allocation8_spill] sm:$0xff] }
 0x35f   : > { %v2903_v56 = vpop.permute.xlu0 %2902  ;;  %v2905_v33 = vpop.permute.xlu1 %2904 }
 0x360   : > { %2986 = vst.msk [vmem:[#allocation3 + $0x120] sm:$0xff] %vm878_vm4, %v2903_v56  ;;  %2987 = vst.msk [vmem:[#allocation3 + $0x138] sm:$0xff] %vm878_vm4, %v2905_v33 }
 0x361   : > { %3540 = vrot.lane.b32.xlu0 %v10983_v2, %s9526_s17 }
 0x362   : > { %3732 = vrot.lane.b32.xlu1 %v10985_v8, %s9527_s18 }
 0x363   : > { %v2907_v27 = vpop.permute.xlu0 %2906 }
 0x364   : > { %2988 = vst.msk [vmem:[#allocation3 + $0x150] sm:$0xff] %vm878_vm4, %v2907_v27  ;;  %v2909_v21 = vpop.permute.xlu1 %2908  ;;  %v3282_v27 = vld [vmem:[#allocation2 + $0x124] sm:$0xff] }
 0x365   : > { %2989 = vst.msk [vmem:[#allocation3 + $0x168] sm:$0xff] %vm878_vm4, %v2909_v21  ;;  %3092 = vrot.lane.b32.xlu0 %v10928_v28, %s9527_s18  ;;  %v3275_v28 = vld [vmem:[#allocation2 + $0xcc] sm:$0xff] }
 0x366   : > { %3350 = vrot.lane.b32.xlu1 %v3274_v19, %s9525_s16 }
 0x367   : > { %v2911_v63 = vpop.permute.xlu0 %2910 }
 0x368   : > { %2990 = vst.msk [vmem:[#allocation3 + $0x180] sm:$0xff] %vm878_vm4, %v2911_v63  ;;  %v2913_v59 = vpop.permute.xlu1 %2912 }
 0x369   : > { %2991 = vst.msk [vmem:[#allocation3 + $0x198] sm:$0xff] %vm878_vm4, %v2913_v59  ;;  %3542 = vrot.lane.b32.xlu0 %v10993_v45, %s9526_s17  ;;  %v14473_v59 = vld [vmem:[#allocation9_spill] sm:$0xff] }
 0x36a   : > { %3734 = vrot.lane.b32.xlu1 %v10995_v26, %s9527_s18 }
 0x36b   : > { %v2915_v8 = vpop.permute.xlu0 %2914 }
 0x36c   : > { %2992 = vst.msk [vmem:[#allocation3 + $0x1b0] sm:$0xff] %vm878_vm4, %v2915_v8  ;;  %v2917_v12 = vpop.permute.xlu1 %2916  ;;  %v14474_v8 = vld [vmem:[#allocation10_spill] sm:$0xff] }
 0x36d   : > { %2993 = vst.msk [vmem:[#allocation3 + $0x1c8] sm:$0xff] %vm878_vm4, %v2917_v12  ;;  %3094 = vrot.lane.b32.xlu0 %v10935_v9, %s9527_s18  ;;  %v3276_v9 = vld [vmem:[#allocation2 + $0xdc] sm:$0xff] }
 0x36e   : > { %3352 = vrot.lane.b32.xlu1 %v3275_v28, %s9525_s16 }
 0x36f   : > { %v2919_v23 = vpop.permute.xlu0 %2918 }
 0x370   : > { %2994 = vst.msk [vmem:[#allocation3 + $0x1e0] sm:$0xff] %vm878_vm4, %v2919_v23  ;;  %v2921_v38 = vpop.permute.xlu1 %2920  ;;  %v11601_v23 = vld [vmem:[#allocation2 + $0x12c] sm:$0xff] }
 0x371   : > { %2995 = vst.msk [vmem:[#allocation3 + $0x1f8] sm:$0xff] %vm878_vm4, %v2921_v38  ;;  %3544 = vrot.lane.b32.xlu0 %v11015_v16, %s9526_s17 }
 0x372   : > { %3736 = vrot.lane.b32.xlu1 %v11017_v37, %s9527_s18 }
 0x373   : > { %v2923_v26 = vpop.permute.xlu0 %2922 }
 0x374   : > { %2996 = vst.msk [vmem:[#allocation3 + $0x210] sm:$0xff] %vm878_vm4, %v2923_v26  ;;  %v2925_v58 = vpop.permute.xlu1 %2924 }
 0x375   : > { %2997 = vst.msk [vmem:[#allocation3 + $0x228] sm:$0xff] %vm878_vm4, %v2925_v58  ;;  %3096 = vrot.lane.b32.xlu0 %v10954_v13, %s9527_s18  ;;  %v3277_v13 = vld [vmem:[#allocation2 + $0xe4] sm:$0xff] }
 0x376   : > { %3354 = vrot.lane.b32.xlu1 %v3276_v9, %s9525_s16  ;;  %v14475_v9 = vld [vmem:[#allocation11_spill] sm:$0xff] }
 0x377   : > { %v2927_v22 = vpop.permute.xlu0 %2926 }
 0x378   : > { %2998 = vst.msk [vmem:[#allocation3 + $0x240] sm:$0xff] %vm878_vm4, %v2927_v22  ;;  %v3327_v18 = vpop.permute.xlu1 %3326  ;;  %v14476_v22 = vld [vmem:[#allocation12_spill] sm:$0xff] }
 0x379   : > { %3422 = vst.msk [vmem:[#allocation3 + $0x8] sm:$0xff] %vm685_vm3, %v3327_v18  ;;  %3546 = vrot.lane.b32.xlu0 %v11025_v49, %s9526_s17 }
 0x37a   : > { %3738 = vrot.lane.b32.xlu1 %v11027_v57, %s9527_s18 }
 0x37b   : > { %v3519_v37 = vpop.permute.xlu0 %3518 }
 0x37c   : > { %3614 = vst.msk [vmem:[#allocation3 + $0x8] sm:$0xff] %vm878_vm4, %v3519_v37  ;;  %v3711_v7 = vpop.permute.xlu1 %3710 }
 0x37d   : > { %3806 = vst.msk [vmem:[#allocation3 + $0x8] sm:$0xff] %vm1071_vm5, %v3711_v7  ;;  %3098 = vrot.lane.b32.xlu0 %v10961_v48, %s9527_s18  ;;  %v11615_v7 = vld [vmem:[#allocation2 + $0x13c] sm:$0xff] }
 0x37e   : > { %3356 = vrot.lane.b32.xlu1 %v3277_v13, %s9525_s16 }
 0x37f   : > { %v3071_v6 = vpop.permute.xlu0 %3070 }
 0x380   : > { %3166 = vst.msk [vmem:[#allocation3] sm:$0xff] %vm1071_vm5, %v3071_v6  ;;  %v3329_v14 = vpop.permute.xlu1 %3328 }
 0x381   : > { %3423 = vst.msk [vmem:[#allocation3 + $0x20] sm:$0xff] %vm685_vm3, %v3329_v14  ;;  %3548 = vrot.lane.b32.xlu0 %v11047_v44, %s9526_s17 }
 0x382   : > { %3740 = vrot.lane.b32.xlu1 %v11049_v46, %s9527_s18 }
 0x383   : > { %v3521_v57 = vpop.permute.xlu0 %3520 }
 0x384   : > { %3615 = vst.msk [vmem:[#allocation3 + $0x20] sm:$0xff] %vm878_vm4, %v3521_v57  ;;  %v3713_v55 = vpop.permute.xlu1 %3712  ;;  %v3903_v48 = vld [vmem:[#allocation3 + $0x8] sm:$0xff] }
 0x385   : > { %3807 = vst.msk [vmem:[#allocation3 + $0x20] sm:$0xff] %vm1071_vm5, %v3713_v55  ;;  %3100 = vrot.lane.b32.xlu0 %v10983_v2, %s9527_s18  ;;  %4201 = vmatprep.mubr.f32.mxu1 %v3903_v48  ;;  %v14477_v57 = vld [vmem:[#allocation13_spill] sm:$0xff]  ;;  %v14478_v55 = vld [vmem:[#allocation14_spill] sm:$0xff] }
 0x386   : > { %3358 = vrot.lane.b32.xlu1 %v3278_v43, %s9525_s16 }
 0x387   : > { %v3073_v60 = vpop.permute.xlu0 %3072  ;;  %v3902_v50 = vld [vmem:[#allocation3] sm:$0xff] }
 0x388   : > { %3167 = vst.msk [vmem:[#allocation3 + $0x18] sm:$0xff] %vm1071_vm5, %v3073_v60  ;;  %v3331_v42 = vpop.permute.xlu1 %3330  ;;  %4202 = vmatmul.mubr.f32.vlgmr.msra.gmra.mxu1 %v3902_v50  ;;  %v11629_v60 = vld [vmem:[#allocation2 + $0x144] sm:$0xff] }
 0x389   : > { %3424 = vst.msk [vmem:[#allocation3 + $0x38] sm:$0xff] %vm685_vm3, %v3331_v42  ;;  %3550 = vrot.lane.b32.xlu0 %v11057_v62, %s9526_s17 }
 0x38a   : > { %3742 = vrot.lane.b32.xlu1 %v11059_v20, %s9527_s18  ;;  %v14468_v20 = vld [vmem:[#allocation4_spill] sm:$0xff] }
 0x38b   : > { %v3523_v46 = vpop.permute.xlu0 %3522 }
 0x38c   : > { %3616 = vst.msk [vmem:[#allocation3 + $0x38] sm:$0xff] %vm878_vm4, %v3523_v46  ;;  %v3715_v2 = vpop.permute.xlu1 %3714  ;;  %v3906_v35 = vld [vmem:[#allocation3 + $0x20] sm:$0xff] }
 0x38d   : > { %3808 = vst.msk [vmem:[#allocation3 + $0x38] sm:$0xff] %vm1071_vm5, %v3715_v2  ;;  %3102 = vrot.lane.b32.xlu0 %v10993_v45, %s9527_s18  ;;  %4206 = vmatprep.mubr.f32.mxu1 %v3906_v35  ;;  %v14479_v2 = vld [vmem:[#allocation15_spill] sm:$0xff]  ;;  %v14480_v35 = vld [vmem:[#allocation16_spill] sm:$0xff] }
 0x38e   : > { %3360 = vrot.lane.b32.xlu1 %v3279_v53, %s9525_s16 }
 0x38f   : > { %v3075_v4 = vpop.permute.xlu0 %3074  ;;  %v3905_v40 = vld [vmem:[#allocation3 + $0x18] sm:$0xff] }
 0x390   : > { %3168 = vst.msk [vmem:[#allocation3 + $0x30] sm:$0xff] %vm1071_vm5, %v3075_v4  ;;  %v3333_v54 = vpop.permute.xlu1 %3332  ;;  %4207 = vmatmul.mubr.f32.gmra.mxu1 %v3905_v40 }
 0x391   : > { %3425 = vst.msk [vmem:[#allocation3 + $0x50] sm:$0xff] %vm685_vm3, %v3333_v54  ;;  %3552 = vrot.lane.b32.xlu0 %v11076_v1, %s9526_s17  ;;  %v11643_v54 = vld [vmem:[#allocation2 + $0x154] sm:$0xff] }
 0x392   : > { %3744 = vrot.lane.b32.xlu1 %v14468_v20, %s9527_s18 }
 0x393   : > { %v3525_v11 = vpop.permute.xlu0 %3524 }
 0x394   : > { %3617 = vst.msk [vmem:[#allocation3 + $0x50] sm:$0xff] %vm878_vm4, %v3525_v11  ;;  %v3717_v45 = vpop.permute.xlu1 %3716  ;;  %v3909_v36 = vld [vmem:[#allocation3 + $0x38] sm:$0xff] }
 0x395   : > { %3809 = vst.msk [vmem:[#allocation3 + $0x50] sm:$0xff] %vm1071_vm5, %v3717_v45  ;;  %3104 = vrot.lane.b32.xlu0 %v11015_v16, %s9527_s18  ;;  %4211 = vmatprep.mubr.f32.mxu1 %v3909_v36  ;;  %v11648_v36 = vld [vmem:[#allocation2 + $0x180] sm:$0xff] }
 0x396   : > { %3362 = vrot.lane.b32.xlu1 %v3280_v29, %s9525_s16 }
 0x397   : > { %v3077_v32 = vpop.permute.xlu0 %3076  ;;  %v3908_v52 = vld [vmem:[#allocation3 + $0x30] sm:$0xff] }
 0x398   : > { %3169 = vst.msk [vmem:[#allocation3 + $0x48] sm:$0xff] %vm1071_vm5, %v3077_v32  ;;  %v3335_v47 = vpop.permute.xlu1 %3334  ;;  %4212 = vmatmul.mubr.f32.gmra.mxu1 %v3908_v52 }
 0x399   : > { %3426 = vst.msk [vmem:[#allocation3 + $0x68] sm:$0xff] %vm685_vm3, %v3335_v47  ;;  %3554 = vrot.lane.b32.xlu0 %v14469_v39, %s9526_s17  ;;  %v11659_v47 = vld [vmem:[#allocation2 + $0x15c] sm:$0xff] }
 0x39a   : > { %3746 = vrot.lane.b32.xlu1 %v14470_v3, %s9527_s18 }
 0x39b   : > { %v3527_v51 = vpop.permute.xlu0 %3526 }
 0x39c   : > { %3618 = vst.msk [vmem:[#allocation3 + $0x68] sm:$0xff] %vm878_vm4, %v3527_v51  ;;  %v3719_v16 = vpop.permute.xlu1 %3718  ;;  %v3912_v34 = vld [vmem:[#allocation3 + $0x50] sm:$0xff]  ;;  %v11664_v51 = vld [vmem:[#allocation2 + $0x188] sm:$0xff] }
 0x39d   : > { %3810 = vst.msk [vmem:[#allocation3 + $0x68] sm:$0xff] %vm1071_vm5, %v3719_v16  ;;  %3106 = vrot.lane.b32.xlu0 %v11025_v49, %s9527_s18  ;;  %4216 = vmatprep.mubr.f32.mxu1 %v3912_v34 }
 0x39e   : > { %3364 = vrot.lane.b32.xlu1 %v3281_v10, %s9525_s16 }
 0x39f   : > { %v3079_v15 = vpop.permute.xlu0 %3078  ;;  %v3911_v5 = vld [vmem:[#allocation3 + $0x48] sm:$0xff] }
 0x3a0   : > { %3170 = vst.msk [vmem:[#allocation3 + $0x60] sm:$0xff] %vm1071_vm5, %v3079_v15  ;;  %v3337_v31 = vpop.permute.xlu1 %3336  ;;  %4217 = vmatmul.mubr.f32.gmra.mxu1 %v3911_v5 }
 0x3a1   : > { %3427 = vst.msk [vmem:[#allocation3 + $0x80] sm:$0xff] %vm685_vm3, %v3337_v31  ;;  %3556 = vrot.lane.b32.xlu0 %v14471_v61, %s9526_s17 }
 0x3a2   : > { %3748 = vrot.lane.b32.xlu1 %v14472_v17, %s9527_s18  ;;  %v11683_v17 = vld [vmem:[#allocation2 + $0x198] sm:$0xff] }
 0x3a3   : > { %v3529_v56 = vpop.permute.xlu0 %3528 }
 0x3a4   : > { %3619 = vst.msk [vmem:[#allocation3 + $0x80] sm:$0xff] %vm878_vm4, %v3529_v56  ;;  %v3721_v49 = vpop.permute.xlu1 %3720  ;;  %v3915_v33 = vld [vmem:[#allocation3 + $0x68] sm:$0xff] }
 0x3a5   : > { %3811 = vst.msk [vmem:[#allocation3 + $0x80] sm:$0xff] %vm1071_vm5, %v3721_v49  ;;  %3108 = vrot.lane.b32.xlu0 %v11047_v44, %s9527_s18  ;;  %4221 = vmatprep.mubr.f32.mxu1 %v3915_v33 }
 0x3a6   : > { %3366 = vrot.lane.b32.xlu1 %v3282_v27, %s9525_s16 }
 0x3a7   : > { %v3081_v21 = vpop.permute.xlu0 %3080  ;;  %v3914_v19 = vld [vmem:[#allocation3 + $0x60] sm:$0xff] }
 0x3a8   : > { %3171 = vst.msk [vmem:[#allocation3 + $0x78] sm:$0xff] %vm1071_vm5, %v3081_v21  ;;  %v3339_v63 = vpop.permute.xlu1 %3338  ;;  %4222 = vmatmul.mubr.f32.gmra.mxu1 %v3914_v19  ;;  %v11697_v19 = vld [vmem:[#allocation2 + $0x174] sm:$0xff] }
 0x3a9   : > { %3428 = vst.msk [vmem:[#allocation3 + $0x98] sm:$0xff] %vm685_vm3, %v3339_v63  ;;  %3558 = vrot.lane.b32.xlu0 %v14473_v59, %s9526_s17 }
 0x3aa   : > { %3750 = vrot.lane.b32.xlu1 %v14474_v8, %s9527_s18 }
 0x3ab   : > { %v3531_v12 = vpop.permute.xlu0 %3530 }
 0x3ac   : > { %3620 = vst.msk [vmem:[#allocation3 + $0x98] sm:$0xff] %vm878_vm4, %v3531_v12  ;;  %v3723_v44 = vpop.permute.xlu1 %3722  ;;  %v3918_v28 = vld [vmem:[#allocation3 + $0x80] sm:$0xff] }
 0x3ad   : > { %3812 = vst.msk [vmem:[#allocation3 + $0x98] sm:$0xff] %vm1071_vm5, %v3723_v44  ;;  %3110 = vrot.lane.b32.xlu0 %v11057_v62, %s9527_s18  ;;  %4226 = vmatprep.mubr.f32.mxu1 %v3918_v28 }
 0x3ae   : > { %3368 = vrot.lane.b32.xlu1 %v11601_v23, %s9525_s16 }
 0x3af   : > { %v3083_v38 = vpop.permute.xlu0 %3082  ;;  %v3917_v26 = vld [vmem:[#allocation3 + $0x78] sm:$0xff] }
 0x3b0   : > { %3172 = vst.msk [vmem:[#allocation3 + $0x90] sm:$0xff] %vm1071_vm5, %v3083_v38  ;;  %v3341_v58 = vpop.permute.xlu1 %3340  ;;  %4227 = vmatmul.mubr.f32.gmra.mxu1 %v3917_v26  ;;  %v3482_v38 = vld [vmem:[#allocation2 + $0x1b0] sm:$0xff] }
 0x3b1   : > { %3429 = vst.msk [vmem:[#allocation3 + $0xb0] sm:$0xff] %vm685_vm3, %v3341_v58  ;;  %3560 = vrot.lane.b32.xlu0 %v14475_v9, %s9526_s17  ;;  %v3290_v58 = vld [vmem:[#allocation2 + $0x184] sm:$0xff] }
 0x3b2   : > { %3752 = vrot.lane.b32.xlu1 %v14476_v22, %s9527_s18  ;;  %v3674_v22 = vld [vmem:[#allocation2 + $0x1b2] sm:$0xff] }
 0x3b3   : > { %v3533_v62 = vpop.permute.xlu0 %3532 }
 0x3b4   : > { %3621 = vst.msk [vmem:[#allocation3 + $0xb0] sm:$0xff] %vm878_vm4, %v3533_v62  ;;  %v3725_v18 = vpop.permute.xlu1 %3724  ;;  %v3921_v37 = vld [vmem:[#allocation3 + $0x98] sm:$0xff] }
 0x3b5   : > { %3813 = vst.msk [vmem:[#allocation3 + $0xb0] sm:$0xff] %vm1071_vm5, %v3725_v18  ;;  %3112 = vrot.lane.b32.xlu0 %v11076_v1, %s9527_s18  ;;  %4231 = vmatprep.mubr.f32.mxu1 %v3921_v37  ;;  %v3988_v18 = vld [vmem:[#allocation3 + $0x2b0] sm:$0xff] }
 0x3b6   : > { %3370 = vrot.lane.b32.xlu1 %v11615_v7, %s9525_s16  ;;  %v5959_v37 = vld [vmem:[#allocation2 + $0x1b4] sm:$0xff]  ;;  %9292 = vmatprep.mubr.msk.f32.mxu0 %vm333_vm0, %v3988_v18 }
 0x3b7   : > { %v3085_v13 = vpop.permute.xlu0 %3084  ;;  %v3920_v6 = vld [vmem:[#allocation3 + $0x90] sm:$0xff]  ;;  %5991 = vst.msk [vmem:[#allocation3 + $0x2b0] sm:$0xff] %vm333_vm0, %v5959_v37 }
 0x3b8   : > { %3173 = vst.msk [vmem:[#allocation3 + $0xa8] sm:$0xff] %vm1071_vm5, %v3085_v13  ;;  %v3343_v14 = vpop.permute.xlu1 %3342  ;;  %4232 = vmatmul.mubr.f32.gmra.mxu1 %v3920_v6  ;;  %v3991_v13 = vld [vmem:[#allocation3 + $0x2c8] sm:$0xff]  ;;  %v5960_v6 = vld [vmem:[#allocation2 + $0x1bc] sm:$0xff] }
 0x3b9   : > { %3430 = vst.msk [vmem:[#allocation3 + $0xc8] sm:$0xff] %vm685_vm3, %v3343_v14  ;;  %3562 = vrot.lane.b32.xlu0 %v14477_v57, %s9526_s17  ;;  %9293 = vmatmul.mubr.msk.f32.gmra.mxu0 %vm333_vm0, %v3991_v13 }
 0x3ba   : > { %3754 = vrot.lane.b32.xlu1 %v14478_v55, %s9527_s18  ;;  %5992 = vst.msk [vmem:[#allocation3 + $0x2c8] sm:$0xff] %vm333_vm0, %v5960_v6 }
 0x3bb   : > { %v3535_v1 = vpop.permute.xlu0 %3534 }
 0x3bc   : > { %3622 = vst.msk [vmem:[#allocation3 + $0xc8] sm:$0xff] %vm878_vm4, %v3535_v1  ;;  %v3727_v48 = vpop.permute.xlu1 %3726  ;;  %v3924_v43 = vld [vmem:[#allocation3 + $0xb0] sm:$0xff] }
 0x3bd   : > { %3814 = vst.msk [vmem:[#allocation3 + $0xc8] sm:$0xff] %vm1071_vm5, %v3727_v48  ;;  %3114 = vrot.lane.b32.xlu0 %v14469_v39, %s9527_s18  ;;  %4236 = vmatprep.mubr.f32.mxu1 %v3924_v43  ;;  %v3291_v1 = vld [vmem:[#allocation2 + $0x18c] sm:$0xff]  ;;  %v3483_v48 = vld [vmem:[#allocation2 + $0x1b8] sm:$0xff] }
 0x3be   : > { %3372 = vrot.lane.b32.xlu1 %v11629_v60, %s9525_s16 }
 0x3bf   : > { %v3087_v50 = vpop.permute.xlu0 %3086  ;;  %v3923_v42 = vld [vmem:[#allocation3 + $0xa8] sm:$0xff] }
 0x3c0   : > { %3174 = vst.msk [vmem:[#allocation3 + $0xc0] sm:$0xff] %vm1071_vm5, %v3087_v50  ;;  %v3345_v46 = vpop.permute.xlu1 %3344  ;;  %4237 = vmatmul.mubr.f32.gmra.mxu1 %v3923_v42  ;;  %v3675_v42 = vld [vmem:[#allocation2 + $0x1ba] sm:$0xff] }
 0x3c1   : > { %3431 = vst.msk [vmem:[#allocation3 + $0xe0] sm:$0xff] %vm685_vm3, %v3345_v46  ;;  %3564 = vrot.lane.b32.xlu0 %v14479_v2, %s9526_s17 }
 0x3c2   : > { %3756 = vrot.lane.b32.xlu1 %v14480_v35, %s9527_s18 }
 0x3c3   : > { %v3537_v53 = vpop.permute.xlu0 %3536 }
 0x3c4   : > { %3623 = vst.msk [vmem:[#allocation3 + $0xe0] sm:$0xff] %vm878_vm4, %v3537_v53  ;;  %v3729_v4 = vpop.permute.xlu1 %3728  ;;  %v3927_v40 = vld [vmem:[#allocation3 + $0xc8] sm:$0xff] }
 0x3c5   : > { %3815 = vst.msk [vmem:[#allocation3 + $0xe0] sm:$0xff] %vm1071_vm5, %v3729_v4  ;;  %3116 = vrot.lane.b32.xlu0 %v14471_v61, %s9527_s18  ;;  %4241 = vmatprep.mubr.f32.mxu1 %v3927_v40  ;;  %v11678_v61 = vld [vmem:[#allocation2 + $0x16c] sm:$0xff] }
 0x3c6   : > { %3374 = vrot.lane.b32.xlu1 %v11643_v54, %s9525_s16  ;;  %v3484_v40 = vld [vmem:[#allocation2 + $0x1c8] sm:$0xff] }
 0x3c7   : > { %v3089_v20 = vpop.permute.xlu0 %3088  ;;  %v3926_v11 = vld [vmem:[#allocation3 + $0xc0] sm:$0xff] }
 0x3c8   : > { %3175 = vst.msk [vmem:[#allocation3 + $0xd8] sm:$0xff] %vm1071_vm5, %v3089_v20  ;;  %v3347_v45 = vpop.permute.xlu1 %3346  ;;  %4242 = vmatmul.mubr.f32.gmra.mxu1 %v3926_v11  ;;  %v3292_v20 = vld [vmem:[#allocation2 + $0x19c] sm:$0xff] }
 0x3c9   : > { %3432 = vst.msk [vmem:[#allocation3 + $0xf8] sm:$0xff] %vm685_vm3, %v3347_v45  ;;  %3566 = vrot.lane.b32.xlu0 %v11648_v36, %s9526_s17  ;;  %v6126_v11 = vld [vmem:[%s14422_s5 + $0x118] sm:$0xff] }
 0x3ca   : > { %3758 = vrot.lane.b32.xlu1 %v11249_v0, %s9527_s18  ;;  %9298 = vmatprep.subr.mxu0 %v6126_v11 }
 0x3cb   : > { %v3539_v29 = vpop.permute.xlu0 %3538  ;;  %9299 = vmatpush3.msra.mxu0 %v6126_v11 }
 0x3cc   : > { %3624 = vst.msk [vmem:[#allocation3 + $0xf8] sm:$0xff] %vm878_vm4, %v3539_v29  ;;  %v3731_v32 = vpop.permute.xlu1 %3730  ;;  %v3930_v52 = vld [vmem:[#allocation3 + $0xe0] sm:$0xff]  ;;  %v6125_v29 = vld [vmem:[%s14422_s5 + $0x110] sm:$0xff] }
 0x3cd   : > { %3816 = vst.msk [vmem:[#allocation3 + $0xf8] sm:$0xff] %vm1071_vm5, %v3731_v32  ;;  %3118 = vrot.lane.b32.xlu0 %v14473_v59, %s9527_s18  ;;  %4246 = vmatprep.mubr.f32.mxu1 %v3930_v52  ;;  %v11702_v59 = vld [vmem:[#allocation2 + $0x1a0] sm:$0xff] }
 0x3ce   : > { %3376 = vrot.lane.b32.xlu1 %v11659_v47, %s9525_s16  ;;  %9300 = vmatprep.subr.mxu0 %v6125_v29 }
 0x3cf   : > { %v3091_v39 = vpop.permute.xlu0 %3090  ;;  %v3929_v3 = vld [vmem:[#allocation3 + $0xd8] sm:$0xff]  ;;  %9301 = vmatpush3.msra.mxu0 %v6125_v29 }
 0x3d0   : > { %3176 = vst.msk [vmem:[#allocation3 + $0xf0] sm:$0xff] %vm1071_vm5, %v3091_v39  ;;  %v3349_v0 = vpop.permute.xlu1 %3348  ;;  %4247 = vmatmul.mubr.f32.gmra.mxu1 %v3929_v3  ;;  %v3997_v39 = vld [vmem:[#allocation3 + $0x2f8] sm:$0xff]  ;;  %v6124_v3 = vld [vmem:[%s14422_s5 + $0x108] sm:$0xff] }
 0x3d1   : > { %3433 = vst.msk [vmem:[#allocation3 + $0x110] sm:$0xff] %vm685_vm3, %v3349_v0  ;;  %3568 = vrot.lane.b32.xlu0 %v11664_v51, %s9526_s17  ;;  %9302 = vmatprep.subr.mxu0 %v6124_v3 }
 0x3d2   : > { %2928 = vrot.lane.b32.xlu1 %v11601_v23, %s9526_s17  ;;  %9303 = vmatpush3.msra.mxu0 %v6124_v3  ;;  %v4651_v3 = vld [vmem:[#allocation2] sm:$0xff] }
 0x3d3   : > { %v3541_v16 = vpop.permute.xlu0 %3540  ;;  %4683 = vst.msk [vmem:[#allocation3] sm:$0xff] %vm333_vm0, %v4651_v3 }
 0x3d4   : > { %3625 = vst.msk [vmem:[#allocation3 + $0x110] sm:$0xff] %vm878_vm4, %v3541_v16  ;;  %v3733_v34 = vpop.permute.xlu1 %3732  ;;  %v3933_v10 = vld [vmem:[#allocation3 + $0xf8] sm:$0xff]  ;;  %v5961_v16 = vld [vmem:[#allocation2 + $0x1cc] sm:$0xff] }
 0x3d5   : > { %3817 = vst.msk [vmem:[#allocation3 + $0x110] sm:$0xff] %vm1071_vm5, %v3733_v34  ;;  %3760 = vrot.lane.b32.xlu0 %v11278_v30, %s9527_s18  ;;  %4251 = vmatprep.mubr.f32.mxu1 %v3933_v10  ;;  %v5962_v34 = vld [vmem:[#allocation2 + $0x1d4] sm:$0xff] }
 0x3d6   : > { %3120 = vrot.lane.b32.xlu1 %v14475_v9, %s9527_s18  ;;  %5994 = vst.msk [vmem:[#allocation3 + $0x2f8] sm:$0xff] %vm333_vm0, %v5962_v34 }
 0x3d7   : > { %v3093_v15 = vpop.permute.xlu0 %3092  ;;  %v3932_v5 = vld [vmem:[#allocation3 + $0xf0] sm:$0xff] }
 0x3d8   : > { %3177 = vst.msk [vmem:[#allocation3 + $0x108] sm:$0xff] %vm1071_vm5, %v3093_v15  ;;  %v3351_v31 = vpop.permute.xlu1 %3350  ;;  %4252 = vmatmul.mubr.f32.gmra.mxu1 %v3932_v5  ;;  %v6123_v15 = vld [vmem:[%s14422_s5 + $0x100] sm:$0xff] }
 0x3d9   : > { %3434 = vst.msk [vmem:[#allocation3 + $0x128] sm:$0xff] %vm685_vm3, %v3351_v31  ;;  %3378 = vrot.lane.b32.xlu0 %v11678_v61, %s9525_s16  ;;  %v3293_v5 = vld [vmem:[#allocation2 + $0x1a4] sm:$0xff]  ;;  %v3485_v31 = vld [vmem:[#allocation2 + $0x1d0] sm:$0xff]  ;;  %9304 = vmatprep.subr.mxu0 %v6123_v15 }
 0x3da   : > { %3570 = vrot.lane.b32.xlu1 %v11683_v17, %s9526_s17  ;;  %9305 = vmatpush3.msra.mxu0 %v6123_v15 }
 0x3db   : > { %v3543_v30 = vpop.permute.xlu0 %3542  ;;  %8359 = vmatprep.subr.mxu0 %v14459_v24 }
 0x3dc   : > { %3626 = vst.msk [vmem:[#allocation3 + $0x128] sm:$0xff] %vm878_vm4, %v3543_v30  ;;  %v3735_v56 = vpop.permute.xlu1 %3734  ;;  %v3936_v49 = vld [vmem:[#allocation3 + $0x110] sm:$0xff] }
 0x3dd   : > { %3818 = vst.msk [vmem:[#allocation3 + $0x128] sm:$0xff] %vm1071_vm5, %v3735_v56  ;;  %2930 = vrot.lane.b32.xlu0 %v11615_v7, %s9526_s17  ;;  %4256 = vmatprep.mubr.f32.mxu1 %v3936_v49 }
 0x3de   : > { %3762 = vrot.lane.b32.xlu1 %v11300_v25, %s9527_s18 }
 0x3df   : > { %v3095_v33 = vpop.permute.xlu0 %3094  ;;  %v3935_v27 = vld [vmem:[#allocation3 + $0x108] sm:$0xff] }
 0x3e0   : > { %3178 = vst.msk [vmem:[#allocation3 + $0x120] sm:$0xff] %vm1071_vm5, %v3095_v33  ;;  %v3353_v21 = vpop.permute.xlu1 %3352  ;;  %4257 = vmatmul.mubr.f32.gmra.mxu1 %v3935_v27 }
 0x3e1   : > { %3435 = vst.msk [vmem:[#allocation3 + $0x140] sm:$0xff] %vm685_vm3, %v3353_v21  ;;  %3122 = vrot.lane.b32.xlu0 %v14477_v57, %s9527_s18  ;;  %v4715_v21 = vld [vmem:[#allocation2 + $0x2] sm:$0xff] }
 0x3e2   : > { %3380 = vrot.lane.b32.xlu1 %v11697_v19, %s9525_s16 }
 0x3e3   : > { %v3545_v63 = vpop.permute.xlu0 %3544 }
 0x3e4   : > { %3627 = vst.msk [vmem:[#allocation3 + $0x140] sm:$0xff] %vm878_vm4, %v3545_v63  ;;  %v3737_v25 = vpop.permute.xlu1 %3736  ;;  %v3939_v8 = vld [vmem:[#allocation3 + $0x128] sm:$0xff] }
 0x3e5   : > { %3819 = vst.msk [vmem:[#allocation3 + $0x140] sm:$0xff] %vm1071_vm5, %v3737_v25  ;;  %3572 = vrot.lane.b32.xlu0 %v11702_v59, %s9526_s17  ;;  %4261 = vmatprep.mubr.f32.mxu1 %v3939_v8  ;;  %v4716_v25 = vld [vmem:[#allocation2 + $0xa] sm:$0xff] }
 0x3e6   : > { %2932 = vrot.lane.b32.xlu1 %v11629_v60, %s9526_s17 }
 0x3e7   : > { %v3097_v12 = vpop.permute.xlu0 %3096  ;;  %v3938_v44 = vld [vmem:[#allocation3 + $0x120] sm:$0xff] }
 0x3e8   : > { %3179 = vst.msk [vmem:[#allocation3 + $0x138] sm:$0xff] %vm1071_vm5, %v3097_v12  ;;  %v3355_v28 = vpop.permute.xlu1 %3354  ;;  %4262 = vmatmul.mubr.f32.gmra.mxu1 %v3938_v44  ;;  %v4717_v12 = vld [vmem:[#allocation2 + $0x1a] sm:$0xff] }
 0x3e9   : > { %3436 = vst.msk [vmem:[#allocation3 + $0x158] sm:$0xff] %vm685_vm3, %v3355_v28  ;;  %3764 = vrot.lane.b32.xlu0 %v11329_v41, %s9527_s18 }
 0x3ea   : > { %3124 = vrot.lane.b32.xlu1 %v14479_v2, %s9527_s18 }
 0x3eb   : > { %v3547_v23 = vpop.permute.xlu0 %3546 }
 0x3ec   : > { %3628 = vst.msk [vmem:[#allocation3 + $0x158] sm:$0xff] %vm878_vm4, %v3547_v23  ;;  %v3739_v26 = vpop.permute.xlu1 %3738  ;;  %v3942_v9 = vld [vmem:[#allocation3 + $0x140] sm:$0xff] }
 0x3ed   : > { %3820 = vst.msk [vmem:[#allocation3 + $0x158] sm:$0xff] %vm1071_vm5, %v3739_v26  ;;  %3382 = vrot.lane.b32.xlu0 %v3290_v58, %s9525_s16  ;;  %4266 = vmatprep.mubr.f32.mxu1 %v3942_v9  ;;  %v4718_v23 = vld [vmem:[#allocation2 + $0x22] sm:$0xff] }
 0x3ee   : > { %3574 = vrot.lane.b32.xlu1 %v3482_v38, %s9526_s17 }
 0x3ef   : > { %v3099_v62 = vpop.permute.xlu0 %3098  ;;  %v3941_v41 = vld [vmem:[#allocation3 + $0x138] sm:$0xff] }
 0x3f0   : > { %3180 = vst.msk [vmem:[#allocation3 + $0x150] sm:$0xff] %vm1071_vm5, %v3099_v62  ;;  %v3357_v7 = vpop.permute.xlu1 %3356  ;;  %4267 = vmatmul.mubr.f32.gmra.mxu1 %v3941_v41 }
 0x3f1   : > { %3437 = vst.msk [vmem:[#allocation3 + $0x170] sm:$0xff] %vm685_vm3, %v3357_v7  ;;  %2934 = vrot.lane.b32.xlu0 %v11643_v54, %s9526_s17 }
 0x3f2   : > { %3766 = vrot.lane.b32.xlu1 %v3674_v22, %s9527_s18 }
 0x3f3   : > { %v3549_v14 = vpop.permute.xlu0 %3548 }
 0x3f4   : > { %3629 = vst.msk [vmem:[#allocation3 + $0x170] sm:$0xff] %vm878_vm4, %v3549_v14  ;;  %v3741_v57 = vpop.permute.xlu1 %3740  ;;  %v3945_v55 = vld [vmem:[#allocation3 + $0x158] sm:$0xff] }
 0x3f5   : > { %3821 = vst.msk [vmem:[#allocation3 + $0x170] sm:$0xff] %vm1071_vm5, %v3741_v57  ;;  %3126 = vrot.lane.b32.xlu0 %v11648_v36, %s9527_s18  ;;  %4271 = vmatprep.mubr.f32.mxu1 %v3945_v55  ;;  %v3676_v36 = vld [vmem:[#allocation2 + $0x1ca] sm:$0xff] }
 0x3f6   : > { %3384 = vrot.lane.b32.xlu1 %v3291_v1, %s9525_s16 }
 0x3f7   : > { %v3101_v43 = vpop.permute.xlu0 %3100  ;;  %v3944_v60 = vld [vmem:[#allocation3 + $0x150] sm:$0xff] }
 0x3f8   : > { %3181 = vst.msk [vmem:[#allocation3 + $0x168] sm:$0xff] %vm1071_vm5, %v3101_v43  ;;  %v3359_v50 = vpop.permute.xlu1 %3358  ;;  %4272 = vmatmul.mubr.f32.gmra.mxu1 %v3944_v60 }
 0x3f9   : > { %3438 = vst.msk [vmem:[#allocation3 + $0x188] sm:$0xff] %vm685_vm3, %v3359_v50  ;;  %3576 = vrot.lane.b32.xlu0 %v3483_v48, %s9526_s17 }
 0x3fa   : > { %2936 = vrot.lane.b32.xlu1 %v11659_v47, %s9526_s17  ;;  %v3994_v47 = vld [vmem:[#allocation3 + $0x2e0] sm:$0xff] }
 0x3fb   : > { %v3551_v46 = vpop.permute.xlu0 %3550  ;;  %9295 = vmatprep.mubr.msk.f32.mxu0 %vm333_vm0, %v3994_v47  ;;  %5993 = vst.msk [vmem:[#allocation3 + $0x2e0] sm:$0xff] %vm333_vm0, %v5961_v16 }
 0x3fc   : > { %3630 = vst.msk [vmem:[#allocation3 + $0x188] sm:$0xff] %vm878_vm4, %v3551_v46  ;;  %v3743_v2 = vpop.permute.xlu1 %3742  ;;  %v3948_v35 = vld [vmem:[#allocation3 + $0x170] sm:$0xff]  ;;  %9296 = vmatmul.mubr.msk.f32.gmra.mxu0 %vm333_vm0, %v3997_v39 }
 0x3fd   : > { %3822 = vst.msk [vmem:[#allocation3 + $0x188] sm:$0xff] %vm1071_vm5, %v3743_v2  ;;  %3768 = vrot.lane.b32.xlu0 %v3675_v42, %s9527_s18  ;;  %4276 = vmatprep.mubr.f32.mxu1 %v3948_v35 }
 0x3fe   : > { %3128 = vrot.lane.b32.xlu1 %v11664_v51, %s9527_s18 }
 0x3ff   : > { %v3103_v53 = vpop.permute.xlu0 %3102  ;;  %v3947_v4 = vld [vmem:[#allocation3 + $0x168] sm:$0xff] }
 0x400   : > { %3182 = vst.msk [vmem:[#allocation3 + $0x180] sm:$0xff] %vm1071_vm5, %v3103_v53  ;;  %v3361_v54 = vpop.permute.xlu1 %3360  ;;  %4277 = vmatmul.mubr.f32.gmra.mxu1 %v3947_v4 }
 0x401   : > { %3439 = vst.msk [vmem:[#allocation3 + $0x1a0] sm:$0xff] %vm685_vm3, %v3361_v54  ;;  %3386 = vrot.lane.b32.xlu0 %v3292_v20, %s9525_s16 }
 0x402   : > { %3578 = vrot.lane.b32.xlu1 %v3484_v40, %s9526_s17 }
 0x403   : > { %v3553_v45 = vpop.permute.xlu0 %3552 }
 0x404   : > { %3631 = vst.msk [vmem:[#allocation3 + $0x1a0] sm:$0xff] %vm878_vm4, %v3553_v45  ;;  %v3745_v32 = vpop.permute.xlu1 %3744  ;;  %v3951_v52 = vld [vmem:[#allocation3 + $0x188] sm:$0xff] }
 0x405   : > { %3823 = vst.msk [vmem:[#allocation3 + $0x1a0] sm:$0xff] %vm1071_vm5, %v3745_v32  ;;  %2938 = vrot.lane.b32.xlu0 %v11678_v61, %s9526_s17  ;;  %4281 = vmatprep.mubr.f32.mxu1 %v3951_v52  ;;  %v9252_v32 = vpop.f32.mrf.mxu0  ;;  %v11817_v52 = vld [vmem:[%s14421_s4] ss:$0 sm:$0xff] }
 0x406   : > { %3770 = vrot.lane.b32.xlu1 %v3676_v36, %s9527_s18 }
 0x407   : > { %v3105_v0 = vpop.permute.xlu0 %3104  ;;  %v3950_v51 = vld [vmem:[#allocation3 + $0x180] sm:$0xff] }
 0x408   : > { %3183 = vst.msk [vmem:[#allocation3 + $0x198] sm:$0xff] %vm1071_vm5, %v3105_v0  ;;  %v3363_v10 = vpop.permute.xlu1 %3362  ;;  %4282 = vmatmul.mubr.f32.gmra.mxu1 %v3950_v51  ;;  %v4653_v0 = vld [vmem:[#allocation2 + $0x18] sm:$0xff] }
 0x409   : > { %3440 = vst.msk [vmem:[#allocation3 + $0x1b8] sm:$0xff] %vm685_vm3, %v3363_v10  ;;  %3130 = vrot.lane.b32.xlu0 %v11683_v17, %s9527_s18  ;;  %v3677_v17 = vld [vmem:[#allocation2 + $0x1d2] sm:$0xff]  ;;  %v4428_v10 = vpop.f32.mrf.mxu0 }
 0x40a   : > { %3388 = vrot.lane.b32.xlu1 %v3293_v5, %s9525_s16  ;;  %4685 = vst.msk [vmem:[#allocation3 + $0x30] sm:$0xff] %vm333_vm0, %v4653_v0 }
 0x40b   : > { %v3555_v61 = vpop.permute.xlu0 %3554 }
 0x40c   : > { %3632 = vst.msk [vmem:[#allocation3 + $0x1b8] sm:$0xff] %vm878_vm4, %v3555_v61  ;;  %v3747_v30 = vpop.permute.xlu1 %3746  ;;  %v3954_v56 = vld [vmem:[#allocation3 + $0x1a0] sm:$0xff] }
 0x40d   : > { %3824 = vst.msk [vmem:[#allocation3 + $0x1b8] sm:$0xff] %vm1071_vm5, %v3747_v30  ;;  %3580 = vrot.lane.b32.xlu0 %v3485_v31, %s9526_s17  ;;  %4286 = vmatprep.mubr.f32.mxu1 %v3954_v56  ;;  %v6106_v56 = vld [vmem:[%s14422_s5 + $0x78] sm:$0xff] }
 0x40e   : > { %2940 = vrot.lane.b32.xlu1 %v11697_v19, %s9526_s17  ;;  %6231 = vmatpush1.msra.mxu1 %v6106_v56 }
 0x40f   : > { %v3107_v49 = vpop.permute.xlu0 %3106  ;;  %v3953_v33 = vld [vmem:[#allocation3 + $0x198] sm:$0xff]  ;;  %6232 = vmatprep.subr.mxu1 %v14459_v24 }
 0x410   : > { %3184 = vst.msk [vmem:[#allocation3 + $0x1b0] sm:$0xff] %vm1071_vm5, %v3107_v49  ;;  %v3365_v27 = vpop.permute.xlu1 %3364  ;;  %4287 = vmatmul.mubr.f32.gmra.mxu1 %v3953_v33  ;;  %v4652_v33 = vld [vmem:[#allocation2 + $0x8] sm:$0xff] }
 0x411   : > { %3441 = vst.msk [vmem:[#allocation3 + $0x1d0] sm:$0xff] %vm685_vm3, %v3365_v27  ;;  %3772 = vrot.lane.b32.xlu0 %v3677_v17, %s9527_s18  ;;  %v4654_v27 = vld [vmem:[#allocation2 + $0x20] sm:$0xff] }
 0x412   : > { %3132 = vrot.lane.b32.xlu1 %v11702_v59, %s9527_s18  ;;  %4684 = vst.msk [vmem:[#allocation3 + $0x18] sm:$0xff] %vm333_vm0, %v4652_v33  ;;  %4686 = vst.msk [vmem:[#allocation3 + $0x48] sm:$0xff] %vm333_vm0, %v4654_v27 }
 0x413   : > { %v3557_v63 = vpop.permute.xlu0 %3556 }
 0x414   : > { %3633 = vst.msk [vmem:[#allocation3 + $0x1d0] sm:$0xff] %vm878_vm4, %v3557_v63  ;;  %v3749_v19 = vpop.permute.xlu1 %3748  ;;  %v3957_v8 = vld [vmem:[#allocation3 + $0x1b8] sm:$0xff] }
 0x415   : > { %3825 = vst.msk [vmem:[#allocation3 + $0x1d0] sm:$0xff] %vm1071_vm5, %v3749_v19  ;;  %4291 = vmatprep.mubr.f32.mxu1 %v3957_v8  ;;  %4779 = vrot.lane.b32.xlu0 %v4715_v21, %s9525_s16  ;;  %v6105_v19 = vld [vmem:[%s14422_s5 + $0x70] sm:$0xff] }
 0x416   : > { %4781 = vrot.lane.b32.xlu1 %v4716_v25, %s9525_s16  ;;  %6233 = vmatpush1.msra.mxu1 %v6105_v19 }
 0x417   : > { %v3109_v44 = vpop.permute.xlu0 %3108  ;;  %v3956_v28 = vld [vmem:[#allocation3 + $0x1b0] sm:$0xff]  ;;  %6234 = vmatprep.subr.mxu1 %v14459_v24 }
 0x418   : > { %3185 = vst.msk [vmem:[#allocation3 + $0x1c8] sm:$0xff] %vm1071_vm5, %v3109_v44  ;;  %v3367_v59 = vpop.permute.xlu1 %3366  ;;  %4292 = vmatmul.mubr.f32.gmra.mxu1 %v3956_v28 }
 0x419   : > { %3442 = vst.msk [vmem:[#allocation3 + $0x1e8] sm:$0xff] %vm685_vm3, %v3367_v59  ;;  %4783 = vrot.lane.b32.xlu0 %v4717_v12, %s9525_s16  ;;  %v6104_v12 = vld [vmem:[%s14422_s5 + $0x68] sm:$0xff]  ;;  %v6103_v59 = vld [vmem:[%s14422_s5 + $0x60] sm:$0xff] }
 0x41a   : > { %4785 = vrot.lane.b32.xlu1 %v4718_v23, %s9525_s16  ;;  %6235 = vmatpush1.msra.mxu1 %v6104_v12 }
 0x41b   : > { %v3559_v38 = vpop.permute.xlu0 %3558  ;;  %6236 = vmatprep.subr.mxu1 %v14459_v24 }
 0x41c   : > { %3634 = vst.msk [vmem:[#allocation3 + $0x1e8] sm:$0xff] %vm878_vm4, %v3559_v38  ;;  %v3751_v26 = vpop.permute.xlu1 %3750  ;;  %v3960_v58 = vld [vmem:[#allocation3 + $0x1d0] sm:$0xff]  ;;  %6237 = vmatpush1.msra.mxu1 %v6103_v59 }
 0x41d   : > { %3826 = vst.msk [vmem:[#allocation3 + $0x1e8] sm:$0xff] %vm1071_vm5, %v3751_v26  ;;  %4296 = vmatprep.mubr.f32.mxu1 %v3960_v58  ;;  %v6102_v58 = vld [vmem:[%s14422_s5 + $0x58] sm:$0xff]  ;;  %6238 = vmatprep.subr.mxu1 %v14459_v24 }
 0x41e   : > { %6239 = vmatpush1.msra.mxu1 %v6102_v58 }
 0x41f   : > { %v3111_v9 = vpop.permute.xlu0 %3110  ;;  %v3959_v22 = vld [vmem:[#allocation3 + $0x1c8] sm:$0xff]  ;;  %6240 = vmatprep.subr.mxu1 %v14459_v24 }
 0x420   : > { %3186 = vst.msk [vmem:[#allocation3 + $0x1e0] sm:$0xff] %vm1071_vm5, %v3111_v9  ;;  %v3369_v62 = vpop.permute.xlu1 %3368  ;;  %4297 = vmatmul.mubr.f32.gmra.mxu1 %v3959_v22  ;;  %v9255_v9 = vpop.f32.mrf.mxu0 }
 0x421   : > { %3443 = vst.msk [vmem:[#allocation3 + $0x200] sm:$0xff] %vm685_vm3, %v3369_v62 }
 0x423   : > { %v3561_v41 = vpop.permute.xlu0 %3560 }
 0x424   : > { %3635 = vst.msk [vmem:[#allocation3 + $0x200] sm:$0xff] %vm878_vm4, %v3561_v41  ;;  %v3753_v18 = vpop.permute.xlu1 %3752  ;;  %v3963_v37 = vld [vmem:[#allocation3 + $0x1e8] sm:$0xff] }
 0x425   : > { %3827 = vst.msk [vmem:[#allocation3 + $0x200] sm:$0xff] %vm1071_vm5, %v3753_v18  ;;  %4301 = vmatprep.mubr.f32.mxu1 %v3963_v37  ;;  %v6101_v37 = vld [vmem:[%s14422_s5 + $0x50] sm:$0xff] }
 0x426   : > { %6241 = vmatpush1.msra.mxu1 %v6101_v37  ;;  %v6121_v37 = vld [vmem:[%s14422_s5 + $0xf0] sm:$0xff] }
 0x427   : > { %v3113_v7 = vpop.permute.xlu0 %3112  ;;  %v3962_v13 = vld [vmem:[#allocation3 + $0x1e0] sm:$0xff]  ;;  %6242 = vmatprep.subr.mxu1 %v14459_v24 }
 0x428   : > { %3187 = vst.msk [vmem:[#allocation3 + $0x1f8] sm:$0xff] %vm1071_vm5, %v3113_v7  ;;  %v3371_v6 = vpop.permute.xlu1 %3370  ;;  %4302 = vmatmul.mubr.f32.gmra.mxu1 %v3962_v13 }
 0x429   : > { %3444 = vst.msk [vmem:[#allocation3 + $0x218] sm:$0xff] %vm685_vm3, %v3371_v6 }
 0x42b   : > { %v3563_v14 = vpop.permute.xlu0 %3562 }
 0x42c   : > { %3636 = vst.msk [vmem:[#allocation3 + $0x218] sm:$0xff] %vm878_vm4, %v3563_v14  ;;  %v3755_v57 = vpop.permute.xlu1 %3754  ;;  %v3966_v55 = vld [vmem:[#allocation3 + $0x200] sm:$0xff] }
 0x42d   : > { %3828 = vst.msk [vmem:[#allocation3 + $0x218] sm:$0xff] %vm1071_vm5, %v3755_v57  ;;  %4306 = vmatprep.mubr.f32.mxu1 %v3966_v55  ;;  %v4438_v57 = vpop.f32.mrf.mxu0 }
 0x42f   : > { %v3115_v1 = vpop.permute.xlu0 %3114  ;;  %v3965_v48 = vld [vmem:[#allocation3 + $0x1f8] sm:$0xff] }
 0x430   : > { %3188 = vst.msk [vmem:[#allocation3 + $0x210] sm:$0xff] %vm1071_vm5, %v3115_v1  ;;  %v3373_v43 = vpop.permute.xlu1 %3372  ;;  %4307 = vmatmul.mubr.f32.gmra.mxu1 %v3965_v48  ;;  %v6100_v1 = vld [vmem:[%s14422_s5 + $0x48] sm:$0xff] }
 0x431   : > { %3445 = vst.msk [vmem:[#allocation3 + $0x230] sm:$0xff] %vm685_vm3, %v3373_v43  ;;  %6243 = vmatpush1.msra.mxu1 %v6100_v1 }
 0x432   : > { %6244 = vmatprep.subr.mxu1 %v14459_v24 }
 0x433   : > { %v3565_v60 = vpop.permute.xlu0 %3564 }
 0x434   : > { %3637 = vst.msk [vmem:[#allocation3 + $0x230] sm:$0xff] %vm878_vm4, %v3565_v60  ;;  %v3757_v50 = vpop.permute.xlu1 %3756  ;;  %v3969_v42 = vld [vmem:[#allocation3 + $0x218] sm:$0xff] }
 0x435   : > { %3829 = vst.msk [vmem:[#allocation3 + $0x230] sm:$0xff] %vm1071_vm5, %v3757_v50  ;;  %4311 = vmatprep.mubr.f32.mxu1 %v3969_v42  ;;  %v6099_v42 = vld [vmem:[%s14422_s5 + $0x40] sm:$0xff] }
 0x436   : > { %6245 = vmatpush1.msra.mxu1 %v6099_v42  ;;  %v6119_v42 = vld [vmem:[%s14422_s5 + $0xe0] sm:$0xff] }
 0x437   : > { %v3117_v46 = vpop.permute.xlu0 %3116  ;;  %v3968_v2 = vld [vmem:[#allocation3 + $0x210] sm:$0xff]  ;;  %6246 = vmatprep.subr.mxu1 %v14459_v24 }
 0x438   : > { %3189 = vst.msk [vmem:[#allocation3 + $0x228] sm:$0xff] %vm1071_vm5, %v3117_v46  ;;  %v3375_v35 = vpop.permute.xlu1 %3374  ;;  %4312 = vmatmul.mubr.f32.gmra.mxu1 %v3968_v2 }
 0x439   : > { %3446 = vst.msk [vmem:[#allocation3 + $0x248] sm:$0xff] %vm685_vm3, %v3375_v35  ;;  %v6098_v35 = vld [vmem:[%s14422_s5 + $0x38] sm:$0xff] }
 0x43a   : > { %6247 = vmatpush1.msra.mxu1 %v6098_v35 }
 0x43b   : > { %v3567_v53 = vpop.permute.xlu0 %3566  ;;  %6248 = vmatprep.subr.mxu1 %v14459_v24 }
 0x43c   : > { %3638 = vst.msk [vmem:[#allocation3 + $0x248] sm:$0xff] %vm878_vm4, %v3567_v53  ;;  %v3759_v4 = vpop.permute.xlu1 %3758  ;;  %v3972_v40 = vld [vmem:[#allocation3 + $0x230] sm:$0xff] }
 0x43d   : > { %3830 = vst.msk [vmem:[#allocation3 + $0x248] sm:$0xff] %vm1071_vm5, %v3759_v4  ;;  %4316 = vmatprep.mubr.f32.mxu1 %v3972_v40 }
 0x43f   : > { %v3119_v54 = vpop.permute.xlu0 %3118  ;;  %v3971_v20 = vld [vmem:[#allocation3 + $0x228] sm:$0xff] }
 0x440   : > { %3190 = vst.msk [vmem:[#allocation3 + $0x240] sm:$0xff] %vm1071_vm5, %v3119_v54  ;;  %v3377_v11 = vpop.permute.xlu1 %3376  ;;  %4317 = vmatmul.mubr.f32.gmra.mxu1 %v3971_v20 }
 0x441   : > { %3447 = vst.msk [vmem:[#allocation3 + $0x260] sm:$0xff] %vm685_vm3, %v3377_v11  ;;  %v6097_v11 = vld [vmem:[%s14422_s5 + $0x30] sm:$0xff] }
 0x442   : > { %6249 = vmatpush1.msra.mxu1 %v6097_v11 }
 0x443   : > { %v3569_v45 = vpop.permute.xlu0 %3568  ;;  %6250 = vmatprep.subr.mxu1 %v14459_v24 }
 0x444   : > { %3639 = vst.msk [vmem:[#allocation3 + $0x260] sm:$0xff] %vm878_vm4, %v3569_v45  ;;  %v2929_v36 = vpop.permute.xlu1 %2928  ;;  %v3975_v29 = vld [vmem:[#allocation3 + $0x248] sm:$0xff] }
 0x445   : > { %2999 = vst.msk [vmem:[#allocation3 + $0x258] sm:$0xff] %vm878_vm4, %v2929_v36  ;;  %4321 = vmatprep.mubr.f32.mxu1 %v3975_v29 }
 0x447   : > { %v3761_v47 = vpop.permute.xlu0 %3760  ;;  %v3974_v39 = vld [vmem:[#allocation3 + $0x240] sm:$0xff] }
 0x448   : > { %3831 = vst.msk [vmem:[#allocation3 + $0x260] sm:$0xff] %vm1071_vm5, %v3761_v47  ;;  %v3121_v51 = vpop.permute.xlu1 %3120  ;;  %v4203_v16 = vpop.f32.mrf.mxu1  ;;  %4322 = vmatmul.mubr.f32.gmra.mxu1 %v3974_v39  ;;  %v6096_v39 = vld [vmem:[%s14422_s5 + $0x28] sm:$0xff] }
 0x449   : > { %3191 = vst.msk [vmem:[#allocation3 + $0x258] sm:$0xff] %vm1071_vm5, %v3121_v51  ;;  %v4204_v34 = vadd.f32 %v11817_v52, %v4203_v16  ;;  %v6095_v16 = vld [vmem:[%s14422_s5 + $0x20] sm:$0xff]  ;;  %6251 = vmatpush1.msra.mxu1 %v6096_v39 }
 0x44a   : > { %v4205_v15 = vpop.f32.mrf.mxu1  ;;  %6252 = vmatprep.subr.mxu1 %v14459_v24 }
 0x44b   : > { %v4429_v5 = vadd.f32 %v4428_v10, %v4204_v34  ;;  %v3379_v31 = vpop.permute.xlu0 %3378  ;;  %v9258_v34 = vpop.f32.mrf.mxu0  ;;  %6253 = vmatpush1.msra.mxu1 %v6095_v16 }
 0x44c   : > { %3448 = vst.msk [vmem:[#allocation3 + $0x278] sm:$0xff] %vm685_vm3, %v3379_v31  ;;  %v3571_v61 = vpop.permute.xlu1 %3570  ;;  %6254 = vmatprep.subr.mxu1 %v14459_v24 }
 0x44d   : > { %v4587_v30 = vmax.f32 %v4429_v5, 0.0  ;;  %3640 = vst.msk [vmem:[#allocation3 + $0x278] sm:$0xff] %vm878_vm4, %v3571_v61  ;;  %v6094_v61 = vld [vmem:[%s14422_s5 + $0x18] sm:$0xff]  ;;  %v4448_v33 = vpop.f32.mrf.mxu0 }
 0x44e   : > { %6255 = vmatpush1.msra.mxu1 %v6094_v61 }
 0x44f   : > { %4619 = vst.msk [vmem:[#allocation2 + $0x32] sm:$0xff] %vm333_vm0, %v4587_v30  ;;  %v2931_v17 = vpop.permute.xlu0 %2930  ;;  %v3978_v49 = vld [vmem:[#allocation3 + $0x260] sm:$0xff]  ;;  %6256 = vmatprep.subr.mxu1 %v14459_v24 }
 0x450   : > { %3000 = vst.msk [vmem:[#allocation3 + $0x270] sm:$0xff] %vm878_vm4, %v2931_v17  ;;  %v3763_v21 = vpop.permute.xlu1 %3762  ;;  %v4208_v63 = vpop.f32.mrf.mxu1  ;;  %4326 = vmatprep.mubr.f32.mxu1 %v3978_v49  ;;  %v3977_v25 = vld [vmem:[#allocation3 + $0x258] sm:$0xff]  ;;  %v6093_v49 = vld [vmem:[%s14422_s5 + $0x10] sm:$0xff] }
 0x451   : > { %3832 = vst.msk [vmem:[#allocation3 + $0x278] sm:$0xff] %vm1071_vm5, %v3763_v21  ;;  %v4209_v8 = vadd.f32 %v11817_v52, %v4208_v63  ;;  %4327 = vmatmul.mubr.f32.gmra.mxu1 %v3977_v25  ;;  %v6092_v25 = vld [vmem:[%s14422_s5 + $0x8] sm:$0xff] }
 0x452   : > { %v4210_v44 = vpop.f32.mrf.mxu1  ;;  %6257 = vmatpush1.msra.mxu1 %v6093_v49  ;;  %v6114_v49 = vld [vmem:[%s14422_s5 + $0xb8] sm:$0xff] }
 0x453   : > { %v4434_v28 = vadd.f32 %v9252_v32, %v4209_v8  ;;  %v3123_v23 = vpop.permute.xlu0 %3122  ;;  %6258 = vmatprep.subr.mxu1 %v14459_v24 }
 0x454   : > { %3192 = vst.msk [vmem:[#allocation3 + $0x270] sm:$0xff] %vm1071_vm5, %v3123_v23  ;;  %v3381_v38 = vpop.permute.xlu1 %3380  ;;  %6259 = vmatpush1.msra.mxu1 %v6092_v25  ;;  %v4907_v25 = vld [vmem:[#allocation2 + $0x4] sm:$0xff] }
 0x455   : > { %v4588_v26 = vmax.f32 %v4434_v28, 0.0  ;;  %3449 = vst.msk [vmem:[#allocation3 + $0x290] sm:$0xff] %vm685_vm3, %v3381_v38  ;;  %v6091_v28 = vld [vmem:[%s14422_s5] sm:$0xff]  ;;  %6260 = vmatprep.subr.mxu1 %v14459_v24 }
 0x456   : > { %v4719_v22 = vld [vmem:[#allocation2 + $0x32] sm:$0xff]  ;;  %6261 = vmatpush1.msra.mxu1 %v6091_v28 }
 0x457   : > { %v11852_v62 = vld [vmem:[#allocation2 + $0x30] sm:$0xff]  ;;  %4620 = vst.msk [vmem:[#allocation2 + $0x3a] sm:$0xff] %vm333_vm0, %v4588_v26  ;;  %4787 = vrot.lane.b32.xlu0 %v4719_v22, %s9525_s16  ;;  %v3573_v18 = vpop.permute.xlu0 %3572  ;;  %6262 = vmatprep.subr.mxu1 %v14459_v24 }
 0x458   : > { %v5291_v41 = vld [vmem:[#allocation2 + $0x32] sm:$0xff]  ;;  %4687 = vst.msk [vmem:[#allocation3 + $0x60] sm:$0xff] %vm333_vm0, %v11852_v62  ;;  %v2933_v7 = vpop.permute.xlu1 %2932  ;;  %v4213_v13 = vpop.f32.mrf.mxu1 }
 0x459   : > { %5323 = vst.msk [vmem:[#allocation3 + $0x8] sm:$0xff] %vm333_vm0, %v5291_v41  ;;  %v3981_v6 = vld [vmem:[#allocation3 + $0x278] sm:$0xff]  ;;  %v4214_v14 = vadd.f32 %v11817_v52, %v4213_v13 }
 0x45a   : > { %3641 = vst.msk [vmem:[#allocation3 + $0x290] sm:$0xff] %vm878_vm4, %v3573_v18  ;;  %3001 = vst.msk [vmem:[#allocation3 + $0x288] sm:$0xff] %vm878_vm4, %v2933_v7  ;;  %4331 = vmatprep.mubr.f32.mxu1 %v3981_v6  ;;  %v4215_v55 = vpop.f32.mrf.mxu1 }
 0x45b   : > { %v4439_v48 = vadd.f32 %v4438_v57, %v4214_v14  ;;  %v3765_v43 = vpop.permute.xlu0 %3764  ;;  %v3980_v60 = vld [vmem:[#allocation3 + $0x270] sm:$0xff]  ;;  %v6120_v14 = vld [vmem:[%s14422_s5 + $0xe8] sm:$0xff]  ;;  %v11956_v55 = vpop.f32.mrf.mxu0 }
 0x45c   : > { %3833 = vst.msk [vmem:[#allocation3 + $0x290] sm:$0xff] %vm1071_vm5, %v3765_v43  ;;  %v3125_v50 = vpop.permute.xlu1 %3124  ;;  %4332 = vmatmul.mubr.f32.gmra.mxu1 %v3980_v60 }
 0x45d   : > { %v4589_v46 = vmax.f32 %v4439_v48, 0.0  ;;  %3193 = vst.msk [vmem:[#allocation3 + $0x288] sm:$0xff] %vm1071_vm5, %v3125_v50 }
 0x45e   : > { %v4720_v2 = vld [vmem:[#allocation2 + $0x3a] sm:$0xff] }
 0x45f   : > { %4621 = vst.msk [vmem:[#allocation2 + $0x4a] sm:$0xff] %vm333_vm0, %v4589_v46  ;;  %4789 = vrot.lane.b32.xlu1 %v4720_v2, %s9525_s16  ;;  %v3383_v53 = vpop.permute.xlu0 %3382  ;;  %v11882_v4 = vld [vmem:[#allocation2 + $0x38] sm:$0xff] }
 0x460   : > { %v5292_v40 = vld [vmem:[#allocation2 + $0x3a] sm:$0xff]  ;;  %3450 = vst.msk [vmem:[#allocation3 + $0x2a8] sm:$0xff] %vm685_vm3, %v3383_v53  ;;  %v3575_v54 = vpop.permute.xlu1 %3574  ;;  %v4218_v20 = vpop.f32.mrf.mxu1 }
 0x461   : > { %4688 = vst.msk [vmem:[#allocation3 + $0x78] sm:$0xff] %vm333_vm0, %v11882_v4  ;;  %5324 = vst.msk [vmem:[#allocation3 + $0x20] sm:$0xff] %vm333_vm0, %v5292_v40  ;;  %v4219_v45 = vadd.f32 %v11817_v52, %v4218_v20  ;;  %v6118_v40 = vld [vmem:[%s14422_s5 + $0xd8] sm:$0xff] }
 0x462   : > { %3642 = vst.msk [vmem:[#allocation3 + $0x2a8] sm:$0xff] %vm878_vm4, %v3575_v54  ;;  %v4220_v36 = vpop.f32.mrf.mxu1  ;;  %v4458_v54 = vpop.f32.mrf.mxu0 }
 0x463   : > { %v4444_v29 = vadd.f32 %v9255_v9, %v4219_v45  ;;  %v2935_v32 = vpop.permute.xlu0 %2934  ;;  %v3984_v47 = vld [vmem:[#allocation3 + $0x290] sm:$0xff]  ;;  %v6122_v9 = vld [vmem:[%s14422_s5 + $0xf8] sm:$0xff] }
 0x464   : > { %3002 = vst.msk [vmem:[#allocation3 + $0x2a0] sm:$0xff] %vm878_vm4, %v2935_v32  ;;  %v3767_v3 = vpop.permute.xlu1 %3766  ;;  %4336 = vmatprep.mubr.f32.mxu1 %v3984_v47  ;;  %v3983_v0 = vld [vmem:[#allocation3 + $0x288] sm:$0xff]  ;;  %6263 = vmatpush2.msra.mxu1 %v6122_v9  ;;  %v6117_v36 = vld [vmem:[%s14422_s5 + $0xd0] sm:$0xff] }
 0x465   : > { %v4590_v51 = vmax.f32 %v4444_v29, 0.0  ;;  %3834 = vst.msk [vmem:[#allocation3 + $0x2a8] sm:$0xff] %vm1071_vm5, %v3767_v3  ;;  %4337 = vmatmul.mubr.f32.gmra.mxu1 %v3983_v0  ;;  %6264 = vmatprep.subr.mxu1 %v14459_v24  ;;  %v6116_v47 = vld [vmem:[%s14422_s5 + $0xc8] sm:$0xff] }
 0x466   : > { %v4721_v10 = vld [vmem:[#allocation2 + $0x4a] sm:$0xff]  ;;  %6265 = vmatpush2.msra.mxu1 %v6121_v37 }
 0x467   : > { %v11904_v15 = vld [vmem:[#allocation2 + $0x48] sm:$0xff]  ;;  %4622 = vst.msk [vmem:[#allocation2 + $0x52] sm:$0xff] %vm333_vm0, %v4590_v51  ;;  %4791 = vrot.lane.b32.xlu0 %v4721_v10, %s9525_s16  ;;  %v3127_v31 = vpop.permute.xlu0 %3126  ;;  %6266 = vmatprep.subr.mxu1 %v14459_v24 }
 0x468   : > { %v5293_v5 = vld [vmem:[#allocation2 + $0x4a] sm:$0xff]  ;;  %4689 = vst.msk [vmem:[#allocation3 + $0x90] sm:$0xff] %vm333_vm0, %v11904_v15  ;;  %v3385_v30 = vpop.permute.xlu1 %3384  ;;  %v4223_v56 = vpop.f32.mrf.mxu1  ;;  %6267 = vmatpush2.msra.mxu1 %v6120_v14 }
 0x469   : > { %5325 = vst.msk [vmem:[#allocation3 + $0x38] sm:$0xff] %vm333_vm0, %v5293_v5  ;;  %v4224_v17 = vadd.f32 %v11817_v52, %v4223_v56  ;;  %6268 = vmatprep.subr.mxu1 %v14459_v24 }
 0x46a   : > { %3194 = vst.msk [vmem:[#allocation3 + $0x2a0] sm:$0xff] %vm1071_vm5, %v3127_v31  ;;  %v4225_v27 = vpop.f32.mrf.mxu1  ;;  %6269 = vmatpush2.msra.mxu1 %v6119_v42 }
 0x46b   : > { %3451 = vst.msk [vmem:[#allocation3 + $0x2c0] sm:$0xff] %vm685_vm3, %v3385_v30  ;;  %v4449_v21 = vadd.f32 %v4448_v33, %v4224_v17  ;;  %v3577_v63 = vpop.permute.xlu0 %3576  ;;  %6270 = vmatprep.subr.mxu1 %v14459_v24  ;;  %v12015_v17 = vld [vmem:[#allocation2 + $0x34] sm:$0xff] }
 0x46c   : > { %3643 = vst.msk [vmem:[#allocation3 + $0x2c0] sm:$0xff] %vm878_vm4, %v3577_v63  ;;  %v2937_v19 = vpop.permute.xlu1 %2936  ;;  %v3987_v8 = vld [vmem:[#allocation3 + $0x2a8] sm:$0xff]  ;;  %6271 = vmatpush2.msra.mxu1 %v6118_v40 }
 0x46d   : > { %v4591_v12 = vmax.f32 %v4449_v21, 0.0  ;;  %3003 = vst.msk [vmem:[#allocation3 + $0x2b8] sm:$0xff] %vm878_vm4, %v2937_v19  ;;  %4341 = vmatprep.mubr.f32.mxu1 %v3987_v8  ;;  %6272 = vmatprep.subr.mxu1 %v14459_v24  ;;  %v6113_v8 = vld [vmem:[%s14422_s5 + $0xb0] sm:$0xff] }
 0x46e   : > { %v4722_v44 = vld [vmem:[#allocation2 + $0x52] sm:$0xff]  ;;  %6273 = vmatpush2.msra.mxu1 %v6117_v36 }
 0x46f   : > { %4623 = vst.msk [vmem:[#allocation2 + $0x62] sm:$0xff] %vm333_vm0, %v4591_v12  ;;  %4793 = vrot.lane.b32.xlu1 %v4722_v44, %s9525_s16  ;;  %v3769_v23 = vpop.permute.xlu0 %3768  ;;  %v11934_v38 = vld [vmem:[#allocation2 + $0x50] sm:$0xff]  ;;  %6274 = vmatprep.subr.mxu1 %v14459_v24  ;;  %v9264_v12 = vpop.f32.mrf.mxu0 }
 0x470   : > { %3835 = vst.msk [vmem:[#allocation3 + $0x2c0] sm:$0xff] %vm1071_vm5, %v3769_v23  ;;  %v3129_v26 = vpop.permute.xlu1 %3128  ;;  %v4228_v58 = vpop.f32.mrf.mxu1  ;;  %v5294_v22 = vld [vmem:[#allocation2 + $0x52] sm:$0xff]  ;;  %6275 = vmatpush2.msra.mxu1 %v6116_v47 }
 0x471   : > { %v3986_v59 = vld [vmem:[#allocation3 + $0x2a0] sm:$0xff]  ;;  %4690 = vst.msk [vmem:[#allocation3 + $0xa8] sm:$0xff] %vm333_vm0, %v11934_v38  ;;  %v4229_v41 = vadd.f32 %v11817_v52, %v4228_v58  ;;  %5326 = vst.msk [vmem:[#allocation3 + $0x50] sm:$0xff] %vm333_vm0, %v5294_v22  ;;  %6276 = vmatprep.subr.mxu1 %v14459_v24  ;;  %v4468_v37 = vpop.f32.mrf.mxu0 }
 0x472   : > { %4342 = vmatmul.mubr.f32.gmra.mxu1 %v3986_v59  ;;  %3195 = vst.msk [vmem:[#allocation3 + $0x2b8] sm:$0xff] %vm1071_vm5, %v3129_v26  ;;  %v4230_v18 = vpop.f32.mrf.mxu1 }
 0x473   : > { %v4454_v7 = vadd.f32 %v9258_v34, %v4229_v41  ;;  %v3387_v13 = vpop.permute.xlu0 %3386  ;;  %v6115_v34 = vld [vmem:[%s14422_s5 + $0xc0] sm:$0xff]  ;;  %v6112_v41 = vld [vmem:[%s14422_s5 + $0xa8] sm:$0xff] }
 0x474   : > { %3452 = vst.msk [vmem:[#allocation3 + $0x2d8] sm:$0xff] %vm685_vm3, %v3387_v13  ;;  %v3579_v6 = vpop.permute.xlu1 %3578  ;;  %6277 = vmatpush2.msra.mxu1 %v6115_v34 }
 0x475   : > { %v4592_v57 = vmax.f32 %v4454_v7, 0.0  ;;  %3644 = vst.msk [vmem:[#allocation3 + $0x2d8] sm:$0xff] %vm878_vm4, %v3579_v6  ;;  %6278 = vmatprep.subr.mxu1 %v14459_v24 }
 0x476   : > { %v11958_v1 = vld [vmem:[#allocation2 + $0x62] sm:$0xff]  ;;  %6279 = vmatpush2.msra.mxu1 %v6114_v49 }
 0x477   : > { %v11960_v48 = vld [vmem:[#allocation2 + $0x60] sm:$0xff]  ;;  %4624 = vst.msk [vmem:[#allocation2 + $0x6a] sm:$0xff] %vm333_vm0, %v4592_v57  ;;  %v2939_v60 = vpop.permute.xlu0 %2938  ;;  %4795 = vrot.lane.b32.xlu0 %v11958_v1, %s9525_s16  ;;  %6280 = vmatprep.subr.mxu1 %v14459_v24 }
 0x478   : > { %v5295_v43 = vld [vmem:[#allocation2 + $0x62] sm:$0xff]  ;;  %4691 = vst.msk [vmem:[#allocation3 + $0xc0] sm:$0xff] %vm333_vm0, %v11960_v48  ;;  %v3771_v46 = vpop.permute.xlu1 %3770  ;;  %v4233_v2 = vpop.f32.mrf.mxu1  ;;  %6281 = vmatpush2.msra.mxu1 %v6113_v8 }
 0x479   : > { %v3990_v50 = vld [vmem:[#allocation3 + $0x2c0] sm:$0xff]  ;;  %5327 = vst.msk [vmem:[#allocation3 + $0x68] sm:$0xff] %vm333_vm0, %v5295_v43  ;;  %v3989_v35 = vld [vmem:[#allocation3 + $0x2b8] sm:$0xff]  ;;  %v4234_v53 = vadd.f32 %v11817_v52, %v4233_v2  ;;  %6282 = vmatprep.subr.mxu1 %v14459_v24 }
 0x47a   : > { %3004 = vst.msk [vmem:[#allocation3 + $0x2d0] sm:$0xff] %vm878_vm4, %v2939_v60  ;;  %4346 = vmatprep.mubr.f32.mxu1 %v3990_v50  ;;  %v4235_v20 = vpop.f32.mrf.mxu1  ;;  %6283 = vmatpush2.msra.mxu1 %v6112_v41  ;;  %v6111_v57 = vld [vmem:[%s14422_s5 + $0xa0] sm:$0xff] }
 0x47b   : > { %3836 = vst.msk [vmem:[#allocation3 + $0x2d8] sm:$0xff] %vm1071_vm5, %v3771_v46  ;;  %4347 = vmatmul.mubr.f32.gmra.mxu1 %v3989_v35  ;;  %v4459_v11 = vadd.f32 %v4458_v54, %v4234_v53  ;;  %v3131_v45 = vpop.permute.xlu0 %3130  ;;  %6284 = vmatprep.subr.mxu1 %v14459_v24  ;;  %v6109_v46 = vld [vmem:[%s14422_s5 + $0x90] sm:$0xff]  ;;  %v6108_v54 = vld [vmem:[%s14422_s5 + $0x88] sm:$0xff] }
 0x47c   : > { %3196 = vst.msk [vmem:[#allocation3 + $0x2d0] sm:$0xff] %vm1071_vm5, %v3131_v45  ;;  %v3389_v29 = vpop.permute.xlu1 %3388  ;;  %6285 = vmatpush2.msra.mxu1 %v6111_v57  ;;  %v6107_v45 = vld [vmem:[%s14422_s5 + $0x80] sm:$0xff] }
 0x47d   : > { %v4593_v32 = vmax.f32 %v4459_v11, 0.0  ;;  %3453 = vst.msk [vmem:[#allocation3 + $0x2f0] sm:$0xff] %vm685_vm3, %v3389_v29  ;;  %6286 = vmatprep.subr.mxu1 %v14459_v24  ;;  %v4908_v29 = vld [vmem:[#allocation2 + $0xc] sm:$0xff] }
 0x47e   : > { %v11989_v39 = vld [vmem:[#allocation2 + $0x6a] sm:$0xff] }
 0x47f   : > { %v11991_v3 = vld [vmem:[#allocation2 + $0x64] sm:$0xff]  ;;  %v11993_v0 = vld [vmem:[#allocation2 + $0x6c] sm:$0xff]  ;;  %4625 = vst.msk [vmem:[#allocation2 + $0x7a] sm:$0xff] %vm333_vm0, %v4593_v32  ;;  %v3581_v51 = vpop.permute.xlu0 %3580  ;;  %4797 = vrot.lane.b32.xlu1 %v11989_v39, %s9525_s16  ;;  %v9267_v32 = vpop.f32.mrf.mxu0 }
 0x480   : > { %5963 = vst.msk [vmem:[#allocation3 + $0x10] sm:$0xff] %vm333_vm0, %v11991_v3  ;;  %5964 = vst.msk [vmem:[#allocation3 + $0x28] sm:$0xff] %vm333_vm0, %v11993_v0  ;;  %v12002_v16 = vld [vmem:[#allocation2 + $0x68] sm:$0xff]  ;;  %v2941_v5 = vpop.permute.xlu1 %2940  ;;  %v4238_v31 = vpop.f32.mrf.mxu1 }
 0x481   : > { %v5296_v10 = vld [vmem:[#allocation2 + $0x6a] sm:$0xff]  ;;  %3645 = vst.msk [vmem:[#allocation3 + $0x2f0] sm:$0xff] %vm878_vm4, %v3581_v51  ;;  %3005 = vst.msk [vmem:[#allocation3 + $0x2e8] sm:$0xff] %vm878_vm4, %v2941_v5  ;;  %v4239_v30 = vadd.f32 %v11817_v52, %v4238_v31  ;;  %v4909_v31 = vld [vmem:[#allocation2 + $0x1c] sm:$0xff] }
 0x482   : > { %v3993_v61 = vld [vmem:[#allocation3 + $0x2d8] sm:$0xff]  ;;  %4692 = vst.msk [vmem:[#allocation3 + $0xd8] sm:$0xff] %vm333_vm0, %v12002_v16  ;;  %5328 = vst.msk [vmem:[#allocation3 + $0x80] sm:$0xff] %vm333_vm0, %v5296_v10  ;;  %v4240_v56 = vpop.f32.mrf.mxu1  ;;  %v12098_v51 = vld [vmem:[#allocation2 + $0x4c] sm:$0xff] }
 0x483   : > { %4351 = vmatprep.mubr.f32.mxu1 %v3993_v61  ;;  %v4464_v33 = vadd.f32 %v11956_v55, %v4239_v30  ;;  %v3773_v27 = vpop.permute.xlu0 %3772  ;;  %5419 = vrot.lane.b32.xlu1 %v12015_v17, %s9525_s16  ;;  %v3992_v21 = vld [vmem:[#allocation3 + $0x2d0] sm:$0xff]  ;;  %v4478_v30 = vpop.f32.mrf.mxu0 }
 0x484   : > { %3837 = vst.msk [vmem:[#allocation3 + $0x2f0] sm:$0xff] %vm1071_vm5, %v3773_v27  ;;  %v3133_v63 = vpop.permute.xlu1 %3132  ;;  %4352 = vmatmul.mubr.f32.gmra.mxu1 %v3992_v21 }
 0x485   : > { %v4594_v19 = vmax.f32 %v4464_v33, 0.0  ;;  %3197 = vst.msk [vmem:[#allocation3 + $0x2e8] sm:$0xff] %vm1071_vm5, %v3133_v63 }
 0x486   : > { %v12029_v28 = vld [vmem:[#allocation2 + $0x7a] sm:$0xff] }
 0x487   : > { %v5997_v44 = vld [vmem:[#allocation3 + $0x10] sm:$0xff]  ;;  %v6000_v23 = vld [vmem:[#allocation3 + $0x28] sm:$0xff]  ;;  %4626 = vst.msk [vmem:[#allocation2 + $0x82] sm:$0xff] %vm333_vm0, %v4594_v19  ;;  %4971 = vrot.lane.b32.xlu1 %v4907_v25, %s9526_s17  ;;  %v12035_v59 = vld [vmem:[#allocation2 + $0x78] sm:$0xff]  ;;  %v4780_v26 = vpop.permute.xlu0 %4779  ;;  %4799 = vrot.lane.b32.xlu0 %v12029_v28, %s9525_s16 }
 0x488   : > { %9306 = vmatprep.mubr.msk.f32.mxu0 %vm333_vm0, %v5997_v44  ;;  %v5297_v58 = vld [vmem:[#allocation2 + $0x7a] sm:$0xff]  ;;  %v4243_v9 = vpop.f32.mrf.mxu1  ;;  %4875 = vst.msk [vmem:[#allocation3] sm:$0xff] %vm685_vm3, %v4780_v26  ;;  %v4782_v22 = vpop.permute.xlu1 %4781 }
 0x489   : > { %9307 = vmatmul.mubr.msk.f32.vlgmr.msra.gmra.mxu0 %vm333_vm0, %v6000_v23  ;;  %4693 = vst.msk [vmem:[#allocation3 + $0xf0] sm:$0xff] %vm333_vm0, %v12035_v59  ;;  %5329 = vst.msk [vmem:[#allocation3 + $0x98] sm:$0xff] %vm333_vm0, %v5297_v58  ;;  %v4244_v18 = vadd.f32 %v11817_v52, %v4243_v9  ;;  %v9270_v23 = vpop.f32.mrf.mxu0 }
 0x48a   : > { %4876 = vst.msk [vmem:[#allocation3 + $0x18] sm:$0xff] %vm685_vm3, %v4782_v22  ;;  %v4245_v7 = vpop.f32.mrf.mxu1  ;;  %v12140_v22 = vld [vmem:[#allocation2 + $0x54] sm:$0xff] }
 0x48b   : > { %v4469_v13 = vadd.f32 %v4468_v37, %v4244_v18  ;;  %5163 = vrot.lane.b32.xlu1 %v11852_v62, %s9527_s18  ;;  %v3996_v6 = vld [vmem:[#allocation3 + $0x2f0] sm:$0xff]  ;;  %v4784_v14 = vpop.permute.xlu0 %4783  ;;  %5611 = vrot.lane.b32.xlu0 %v11960_v48, %s9526_s17  ;;  %v6110_v62 = vld [vmem:[%s14422_s5 + $0x98] sm:$0xff]  ;;  %v4910_v7 = vld [vmem:[#allocation2 + $0x24] sm:$0xff] }
 0x48c   : > { %4356 = vmatprep.mubr.f32.mxu1 %v3996_v6  ;;  %v3995_v55 = vld [vmem:[#allocation3 + $0x2e8] sm:$0xff]  ;;  %4877 = vst.msk [vmem:[#allocation3 + $0x30] sm:$0xff] %vm685_vm3, %v4784_v14  ;;  %v4786_v43 = vpop.permute.xlu1 %4785  ;;  %6287 = vmatpush2.msra.mxu1 %v6110_v62 }
 0x48d   : > { %v4595_v60 = vmax.f32 %v4469_v13, 0.0  ;;  %4357 = vmatmul.mubr.f32.gmra.mxu1 %v3995_v55  ;;  %4878 = vst.msk [vmem:[#allocation3 + $0x48] sm:$0xff] %vm685_vm3, %v4786_v43  ;;  %6288 = vmatprep.subr.mxu1 %v14459_v24  ;;  %v4488_v13 = vpop.f32.mrf.mxu0 }
 0x48e   : > { %v12063_v50 = vld [vmem:[#allocation2 + $0x7c] sm:$0xff]  ;;  %v12065_v42 = vld [vmem:[#allocation2 + $0x84] sm:$0xff]  ;;  %6289 = vmatpush2.msra.mxu1 %v6109_v46 }
 0x48f   : > { %4627 = vst.msk [vmem:[#allocation2 + $0x92] sm:$0xff] %vm333_vm0, %v4595_v60  ;;  %5613 = vrot.lane.b32.xlu1 %v12002_v16, %s9526_s17  ;;  %5965 = vst.msk [vmem:[#allocation3 + $0x40] sm:$0xff] %vm333_vm0, %v12063_v50  ;;  %v5298_v2 = vld [vmem:[#allocation2 + $0x82] sm:$0xff]  ;;  %5803 = vrot.lane.b32.xlu0 %v11958_v1, %s9527_s18 }
 0x490   : > { %5966 = vst.msk [vmem:[#allocation3 + $0x58] sm:$0xff] %vm333_vm0, %v12065_v42  ;;  %v4662_v35 = vld [vmem:[#allocation2 + $0x80] sm:$0xff]  ;;  %v4248_v53 = vpop.f32.mrf.mxu1  ;;  %5330 = vst.msk [vmem:[#allocation3 + $0xb0] sm:$0xff] %vm333_vm0, %v5298_v2  ;;  %6290 = vmatprep.subr.mxu1 %v14459_v24 }
 0x491   : > { %4694 = vst.msk [vmem:[#allocation3 + $0x108] sm:$0xff] %vm333_vm0, %v4662_v35  ;;  %v4249_v40 = vadd.f32 %v11817_v52, %v4248_v53  ;;  %v12089_v1 = vld [vmem:[#allocation2 + $0x3c] sm:$0xff]  ;;  %6291 = vmatpush2.msra.mxu1 %v6108_v54  ;;  %v9273_v54 = vpop.f32.mrf.mxu0 }
 0x492   : > { %v4250_v20 = vpop.f32.mrf.mxu1  ;;  %6292 = vmatprep.subr.mxu1 %v14459_v24  ;;  %v12135_v26 = vld [vmem:[#allocation2 + $0x82] sm:$0xff] }
 0x493   : > { %v4474_v11 = vadd.f32 %v9264_v12, %v4249_v40  ;;  %5805 = vrot.lane.b32.xlu1 %v11989_v39, %s9527_s18  ;;  %5421 = vrot.lane.b32.xlu0 %v12089_v1, %s9525_s16 }
 0x494   : > { %6293 = vmatpush2.msra.mxu1 %v6107_v45 }
 0x495   : > { %v4596_v36 = vmax.f32 %v4474_v11, 0.0  ;;  %9410 = vmatprep.subr.mxu1 %v14459_v24 }
 0x496   : > { %v6003_v47 = vld [vmem:[#allocation3 + $0x40] sm:$0xff]  ;;  %v5299_v34 = vld [vmem:[#allocation2 + $0x92] sm:$0xff] }
 0x497   : > { %v6006_v39 = vld [vmem:[#allocation3 + $0x58] sm:$0xff]  ;;  %4628 = vst.msk [vmem:[#allocation2 + $0x9a] sm:$0xff] %vm333_vm0, %v4596_v36  ;;  %9309 = vmatprep.mubr.msk.f32.mxu0 %vm333_vm0, %v6003_v47  ;;  %5423 = vrot.lane.b32.xlu1 %v12098_v51, %s9525_s16  ;;  %v4663_v10 = vld [vmem:[#allocation2 + $0x90] sm:$0xff]  ;;  %5331 = vst.msk [vmem:[#allocation3 + $0xc8] sm:$0xff] %vm333_vm0, %v5299_v34  ;;  %v4498_v47 = vpop.f32.mrf.mxu0 }
 0x498   : > { %4973 = vrot.lane.b32.xlu0 %v4908_v29, %s9526_s17  ;;  %v4253_v5 = vpop.f32.mrf.mxu1  ;;  %9310 = vmatmul.mubr.msk.f32.gmra.mxu0 %vm333_vm0, %v6006_v39  ;;  %4695 = vst.msk [vmem:[#allocation3 + $0x120] sm:$0xff] %vm333_vm0, %v4663_v10  ;;  %v12170_v53 = vld [vmem:[#allocation2 + $0x90] sm:$0xff] }
 0x499   : > { %v4254_v61 = vadd.f32 %v11817_v52, %v4253_v5  ;;  %v12180_v45 = vld [vmem:[#allocation2 + $0x92] sm:$0xff] }
 0x49a   : > { %v4255_v56 = vpop.f32.mrf.mxu1 }
 0x49b   : > { %v4479_v49 = vadd.f32 %v4478_v30, %v4254_v61  ;;  %4975 = vrot.lane.b32.xlu1 %v4909_v31, %s9526_s17 }
 0x49c   : > { %5165 = vrot.lane.b32.xlu0 %v11882_v4, %s9527_s18 }
 0x49d   : > { %v4597_v33 = vmax.f32 %v4479_v49, 0.0 }
 0x49e   : > { %v12113_v27 = vld [vmem:[#allocation2 + $0x94] sm:$0xff]  ;;  %v12115_v21 = vld [vmem:[#allocation2 + $0x9c] sm:$0xff] }
 0x49f   : > { %4629 = vst.msk [vmem:[#allocation2 + $0xaa] sm:$0xff] %vm333_vm0, %v4597_v33  ;;  %5167 = vrot.lane.b32.xlu1 %v11904_v15, %s9527_s18  ;;  %5967 = vst.msk [vmem:[#allocation3 + $0x70] sm:$0xff] %vm333_vm0, %v12113_v27  ;;  %v5300_v63 = vld [vmem:[#allocation2 + $0x9a] sm:$0xff] }
 0x4a0   : > { %5968 = vst.msk [vmem:[#allocation3 + $0x88] sm:$0xff] %vm333_vm0, %v12115_v21  ;;  %v4664_v25 = vld [vmem:[#allocation2 + $0x98] sm:$0xff]  ;;  %5615 = vrot.lane.b32.xlu0 %v12035_v59, %s9526_s17  ;;  %v4258_v4 = vpop.f32.mrf.mxu1  ;;  %5332 = vst.msk [vmem:[#allocation3 + $0xe0] sm:$0xff] %vm333_vm0, %v5300_v63  ;;  %v12129_v15 = vld [vmem:[#allocation2 + $0x80] sm:$0xff] }
 0x4a1   : > { %4696 = vst.msk [vmem:[#allocation3 + $0x138] sm:$0xff] %vm333_vm0, %v4664_v25  ;;  %v4259_v19 = vadd.f32 %v11817_v52, %v4258_v4  ;;  %v12174_v20 = vld [vmem:[#allocation2 + $0x98] sm:$0xff] }
 0x4a2   : > { %v4260_v8 = vpop.f32.mrf.mxu1  ;;  %v12188_v34 = vld [vmem:[#allocation2 + $0x9a] sm:$0xff] }
 0x4a3   : > { %v4484_v12 = vadd.f32 %v9267_v32, %v4259_v19  ;;  %5617 = vrot.lane.b32.xlu1 %v12129_v15, %s9526_s17  ;;  %v9276_v19 = vpop.f32.mrf.mxu0 }
 0x4a4   : > { %5807 = vrot.lane.b32.xlu0 %v12029_v28, %s9527_s18 }
 0x4a5   : > { %v4598_v44 = vmax.f32 %v4484_v12, 0.0 }
 0x4a6   : > { %v6009_v58 = vld [vmem:[#allocation3 + $0x70] sm:$0xff]  ;;  %v4665_v18 = vld [vmem:[#allocation2 + $0xa8] sm:$0xff] }
 0x4a7   : > { %v6012_v9 = vld [vmem:[#allocation3 + $0x88] sm:$0xff]  ;;  %4630 = vst.msk [vmem:[#allocation2 + $0xb2] sm:$0xff] %vm333_vm0, %v4598_v44  ;;  %5809 = vrot.lane.b32.xlu1 %v12135_v26, %s9527_s18  ;;  %9312 = vmatprep.mubr.msk.f32.mxu0 %vm333_vm0, %v6009_v58  ;;  %4697 = vst.msk [vmem:[#allocation3 + $0x150] sm:$0xff] %vm333_vm0, %v4665_v18 }
 0x4a8   : > { %v5301_v41 = vld [vmem:[#allocation2 + $0xaa] sm:$0xff]  ;;  %5425 = vrot.lane.b32.xlu0 %v12140_v22, %s9525_s16  ;;  %v4263_v28 = vpop.f32.mrf.mxu1  ;;  %9313 = vmatmul.mubr.msk.f32.gmra.mxu0 %vm333_vm0, %v6012_v9  ;;  %v4508_v9 = vpop.f32.mrf.mxu0 }
 0x4a9   : > { %5333 = vst.msk [vmem:[#allocation3 + $0xf8] sm:$0xff] %vm333_vm0, %v5301_v41  ;;  %v4264_v37 = vadd.f32 %v11817_v52, %v4263_v28  ;;  %v12231_v28 = vld [vmem:[#allocation2 + $0xaa] sm:$0xff] }
 0x4aa   : > { %v4265_v6 = vpop.f32.mrf.mxu1 }
 0x4ab   : > { %v4489_v14 = vadd.f32 %v4488_v13, %v4264_v37  ;;  %5427 = vrot.lane.b32.xlu1 %v11991_v3, %s9525_s16 }
 0x4ac   : > { %4977 = vrot.lane.b32.xlu0 %v4910_v7, %s9526_s17 }
 0x4ad   : > { %v4599_v57 = vmax.f32 %v4489_v14, 0.0 }
 0x4ae   : > { %v12152_v55 = vld [vmem:[#allocation2 + $0xac] sm:$0xff]  ;;  %v12154_v43 = vld [vmem:[#allocation2 + $0xb4] sm:$0xff] }
 0x4af   : > { %4631 = vst.msk [vmem:[#allocation2 + $0xc2] sm:$0xff] %vm333_vm0, %v4599_v57  ;;  %4979 = vrot.lane.b32.xlu1 %v12015_v17, %s9526_s17  ;;  %5969 = vst.msk [vmem:[#allocation3 + $0xa0] sm:$0xff] %vm333_vm0, %v12152_v55  ;;  %v5302_v60 = vld [vmem:[#allocation2 + $0xb2] sm:$0xff] }
 0x4b0   : > { %5970 = vst.msk [vmem:[#allocation3 + $0xb8] sm:$0xff] %vm333_vm0, %v12154_v43  ;;  %v4666_v62 = vld [vmem:[#allocation2 + $0xb0] sm:$0xff]  ;;  %5169 = vrot.lane.b32.xlu0 %v11934_v38, %s9527_s18  ;;  %v4268_v46 = vpop.f32.mrf.mxu1  ;;  %5334 = vst.msk [vmem:[#allocation3 + $0x110] sm:$0xff] %vm333_vm0, %v5302_v60 }
 0x4b1   : > { %4698 = vst.msk [vmem:[#allocation3 + $0x168] sm:$0xff] %vm333_vm0, %v4666_v62  ;;  %v4269_v2 = vadd.f32 %v11817_v52, %v4268_v46  ;;  %v12227_v41 = vld [vmem:[#allocation2 + $0xb0] sm:$0xff] }
 0x4b2   : > { %v4270_v35 = vpop.f32.mrf.mxu1  ;;  %v12235_v7 = vld [vmem:[#allocation2 + $0xb2] sm:$0xff] }
 0x4b3   : > { %v4494_v17 = vadd.f32 %v9270_v23, %v4269_v2  ;;  %5171 = vrot.lane.b32.xlu1 %v11960_v48, %s9527_s18 }
 0x4b4   : > { %5619 = vrot.lane.b32.xlu0 %v12170_v53, %s9526_s17 }
 0x4b5   : > { %v4600_v40 = vmax.f32 %v4494_v17, 0.0 }
 0x4b6   : > { %v6015_v38 = vld [vmem:[#allocation3 + $0xa0] sm:$0xff] }
 0x4b7   : > { %v6018_v11 = vld [vmem:[#allocation3 + $0xb8] sm:$0xff]  ;;  %4632 = vst.msk [vmem:[#allocation2 + $0xca] sm:$0xff] %vm333_vm0, %v4600_v40  ;;  %9315 = vmatprep.mubr.msk.f32.mxu0 %vm333_vm0, %v6015_v38  ;;  %5621 = vrot.lane.b32.xlu1 %v12174_v20, %s9526_s17  ;;  %v5303_v48 = vld [vmem:[#allocation2 + $0xc2] sm:$0xff]  ;;  %v9279_v40 = vpop.f32.mrf.mxu0 }
 0x4b8   : > { %v4667_v36 = vld [vmem:[#allocation2 + $0xc0] sm:$0xff]  ;;  %5811 = vrot.lane.b32.xlu0 %v12180_v45, %s9527_s18  ;;  %v4273_v29 = vpop.f32.mrf.mxu1  ;;  %9316 = vmatmul.mubr.msk.f32.gmra.mxu0 %vm333_vm0, %v6018_v11  ;;  %5335 = vst.msk [vmem:[#allocation3 + $0x128] sm:$0xff] %vm333_vm0, %v5303_v48 }
 0x4b9   : > { %4699 = vst.msk [vmem:[#allocation3 + $0x180] sm:$0xff] %vm333_vm0, %v4667_v36  ;;  %v4274_v32 = vadd.f32 %v11817_v52, %v4273_v29  ;;  %v4518_v29 = vpop.f32.mrf.mxu0 }
 0x4ba   : > { %v4275_v39 = vpop.f32.mrf.mxu1 }
 0x4bb   : > { %v4499_v10 = vadd.f32 %v4498_v47, %v4274_v32  ;;  %5813 = vrot.lane.b32.xlu1 %v12188_v34, %s9527_s18  ;;  %v12277_v47 = vld [vmem:[#allocation2 + $0xc0] sm:$0xff] }
 0x4bc   : > { %5429 = vrot.lane.b32.xlu0 %v11993_v0, %s9525_s16 }
 0x4bd   : > { %v4601_v5 = vmax.f32 %v4499_v10, 0.0 }
 0x4be   : > { %v12194_v31 = vld [vmem:[#allocation2 + $0xc4] sm:$0xff]  ;;  %v12196_v61 = vld [vmem:[#allocation2 + $0xcc] sm:$0xff] }
 0x4bf   : > { %4633 = vst.msk [vmem:[#allocation2 + $0xda] sm:$0xff] %vm333_vm0, %v4601_v5  ;;  %5431 = vrot.lane.b32.xlu1 %v12063_v50, %s9525_s16  ;;  %5971 = vst.msk [vmem:[#allocation3 + $0xd0] sm:$0xff] %vm333_vm0, %v12194_v31  ;;  %v5304_v30 = vld [vmem:[#allocation2 + $0xca] sm:$0xff] }
 0x4c0   : > { %5972 = vst.msk [vmem:[#allocation3 + $0xe8] sm:$0xff] %vm333_vm0, %v12196_v61  ;;  %v4668_v56 = vld [vmem:[#allocation2 + $0xc8] sm:$0xff]  ;;  %4981 = vrot.lane.b32.xlu0 %v12089_v1, %s9526_s17  ;;  %v4278_v49 = vpop.f32.mrf.mxu1  ;;  %5336 = vst.msk [vmem:[#allocation3 + $0x140] sm:$0xff] %vm333_vm0, %v5304_v30 }
 0x4c1   : > { %4700 = vst.msk [vmem:[#allocation3 + $0x198] sm:$0xff] %vm333_vm0, %v4668_v56  ;;  %v4279_v33 = vadd.f32 %v11817_v52, %v4278_v49  ;;  %v12218_v1 = vld [vmem:[#allocation2 + $0xa8] sm:$0xff] }
 0x4c2   : > { %v4280_v63 = vpop.f32.mrf.mxu1  ;;  %v12283_v10 = vld [vmem:[#allocation2 + $0xc8] sm:$0xff] }
 0x4c3   : > { %v4504_v25 = vadd.f32 %v9273_v54, %v4279_v33  ;;  %4983 = vrot.lane.b32.xlu1 %v12098_v51, %s9526_s17  ;;  %v12290_v56 = vld [vmem:[#allocation2 + $0xc2] sm:$0xff] }
 0x4c4   : > { %5173 = vrot.lane.b32.xlu0 %v12002_v16, %s9527_s18 }
 0x4c5   : > { %v4602_v4 = vmax.f32 %v4504_v25, 0.0 }
 0x4c6   : > { %v6021_v8 = vld [vmem:[#allocation3 + $0xd0] sm:$0xff]  ;;  %v5305_v44 = vld [vmem:[#allocation2 + $0xda] sm:$0xff] }
 0x4c7   : > { %v6024_v12 = vld [vmem:[#allocation3 + $0xe8] sm:$0xff]  ;;  %4634 = vst.msk [vmem:[#allocation2 + $0xe2] sm:$0xff] %vm333_vm0, %v4602_v4  ;;  %9318 = vmatprep.mubr.msk.f32.mxu0 %vm333_vm0, %v6021_v8  ;;  %5175 = vrot.lane.b32.xlu1 %v12035_v59, %s9527_s18  ;;  %v4669_v23 = vld [vmem:[#allocation2 + $0xd8] sm:$0xff]  ;;  %5337 = vst.msk [vmem:[#allocation3 + $0x158] sm:$0xff] %vm333_vm0, %v5305_v44  ;;  %v9282_v44 = vpop.f32.mrf.mxu0 }
 0x4c8   : > { %5623 = vrot.lane.b32.xlu0 %v12218_v1, %s9526_s17  ;;  %v4283_v51 = vpop.f32.mrf.mxu1  ;;  %9319 = vmatmul.mubr.msk.f32.gmra.mxu0 %vm333_vm0, %v6024_v12  ;;  %4701 = vst.msk [vmem:[#allocation3 + $0x1b0] sm:$0xff] %vm333_vm0, %v4669_v23 }
 0x4c9   : > { %v4284_v16 = vadd.f32 %v11817_v52, %v4283_v51  ;;  %v4788_v58 = vpop.permute.xlu0 %4787 }
 0x4ca   : > { %4879 = vst.msk [vmem:[#allocation3 + $0x60] sm:$0xff] %vm685_vm3, %v4788_v58  ;;  %v4285_v59 = vpop.f32.mrf.mxu1 }
 0x4cb   : > { %v4509_v18 = vadd.f32 %v4508_v9, %v4284_v16  ;;  %5625 = vrot.lane.b32.xlu1 %v12227_v41, %s9526_s17 }
 0x4cc   : > { %5815 = vrot.lane.b32.xlu0 %v12231_v28, %s9527_s18 }
 0x4cd   : > { %v4603_v37 = vmax.f32 %v4509_v18, 0.0 }
 0x4ce   : > { %v12237_v13 = vld [vmem:[#allocation2 + $0xdc] sm:$0xff]  ;;  %v12239_v6 = vld [vmem:[#allocation2 + $0xe4] sm:$0xff] }
 0x4cf   : > { %4635 = vst.msk [vmem:[#allocation2 + $0xf2] sm:$0xff] %vm333_vm0, %v4603_v37  ;;  %5817 = vrot.lane.b32.xlu1 %v12235_v7, %s9527_s18  ;;  %5973 = vst.msk [vmem:[#allocation3 + $0x100] sm:$0xff] %vm333_vm0, %v12237_v13  ;;  %v5306_v14 = vld [vmem:[#allocation2 + $0xe2] sm:$0xff]  ;;  %v4528_v37 = vpop.f32.mrf.mxu0 }
 0x4d0   : > { %5974 = vst.msk [vmem:[#allocation3 + $0x118] sm:$0xff] %vm333_vm0, %v12239_v6  ;;  %5433 = vrot.lane.b32.xlu0 %v12065_v42, %s9525_s16  ;;  %v4288_v57 = vpop.f32.mrf.mxu1  ;;  %5338 = vst.msk [vmem:[#allocation3 + $0x170] sm:$0xff] %vm333_vm0, %v5306_v14  ;;  %v4670_v60 = vld [vmem:[#allocation2 + $0xe0] sm:$0xff] }
 0x4d1   : > { %v4289_v62 = vadd.f32 %v11817_v52, %v4288_v57  ;;  %v4790_v46 = vpop.permute.xlu1 %4789  ;;  %4702 = vst.msk [vmem:[#allocation3 + $0x1c8] sm:$0xff] %vm333_vm0, %v4670_v60 }
 0x4d2   : > { %4880 = vst.msk [vmem:[#allocation3 + $0x78] sm:$0xff] %vm685_vm3, %v4790_v46  ;;  %v4290_v2 = vpop.f32.mrf.mxu1  ;;  %v12336_v46 = vld [vmem:[#allocation2 + $0xd8] sm:$0xff] }
 0x4d3   : > { %v4514_v35 = vadd.f32 %v9276_v19, %v4289_v62  ;;  %5435 = vrot.lane.b32.xlu1 %v12113_v27, %s9525_s16  ;;  %v12307_v19 = vld [vmem:[#allocation2 + $0xca] sm:$0xff] }
 0x4d4   : > { %4985 = vrot.lane.b32.xlu0 %v12140_v22, %s9526_s17  ;;  %v12273_v22 = vld [vmem:[%s14421_s4] ss:$0 sm:$0xff] }
 0x4d5   : > { %v4604_v17 = vmax.f32 %v4514_v35, 0.0 }
 0x4d6   : > { %v6027_v54 = vld [vmem:[#allocation3 + $0x100] sm:$0xff]  ;;  %v12262_v52 = vld [vmem:[#allocation2 + $0xf2] sm:$0xff] }
 0x4d7   : > { %v6030_v38 = vld [vmem:[#allocation3 + $0x118] sm:$0xff]  ;;  %4636 = vst.msk [vmem:[#allocation2 + $0xfa] sm:$0xff] %vm333_vm0, %v4604_v17  ;;  %9321 = vmatprep.mubr.msk.f32.mxu0 %vm333_vm0, %v6027_v54  ;;  %4987 = vrot.lane.b32.xlu1 %v11991_v3, %s9526_s17  ;;  %v4671_v11 = vld [vmem:[#allocation2 + $0xf0] sm:$0xff]  ;;  %5339 = vst.msk [vmem:[#allocation3 + $0x188] sm:$0xff] %vm333_vm0, %v12262_v52 }
 0x4d8   : > { %5177 = vrot.lane.b32.xlu0 %v12129_v15, %s9527_s18  ;;  %v4293_v48 = vpop.f32.mrf.mxu1  ;;  %9322 = vmatmul.mubr.msk.f32.gmra.mxu0 %vm333_vm0, %v6030_v38  ;;  %4703 = vst.msk [vmem:[#allocation3 + $0x1e0] sm:$0xff] %vm333_vm0, %v4671_v11  ;;  %v12353_v54 = vld [vmem:[#allocation2 + $0xda] sm:$0xff]  ;;  %v9285_v38 = vpop.f32.mrf.mxu0 }
 0x4d9   : > { %v4294_v3 = vadd.f32 %v12273_v22, %v4293_v48  ;;  %v4792_v36 = vpop.permute.xlu0 %4791 }
 0x4da   : > { %4881 = vst.msk [vmem:[#allocation3 + $0x90] sm:$0xff] %vm685_vm3, %v4792_v36  ;;  %v4295_v15 = vpop.f32.mrf.mxu1 }
 0x4db   : > { %v4519_v32 = vadd.f32 %v4518_v29, %v4294_v3  ;;  %5179 = vrot.lane.b32.xlu1 %v12170_v53, %s9527_s18 }
 0x4dc   : > { %5627 = vrot.lane.b32.xlu0 %v12277_v47, %s9526_s17 }
 0x4dd   : > { %v4605_v39 = vmax.f32 %v4519_v32, 0.0  ;;  %v4538_v32 = vpop.f32.mrf.mxu0 }
 0x4de   : > { %v12285_v5 = vld [vmem:[#allocation2 + $0xf4] sm:$0xff]  ;;  %v12287_v30 = vld [vmem:[#allocation2 + $0xfc] sm:$0xff] }
 0x4df   : > { %4637 = vst.msk [vmem:[#allocation2 + $0x10a] sm:$0xff] %vm333_vm0, %v4605_v39  ;;  %5629 = vrot.lane.b32.xlu1 %v12283_v10, %s9526_s17  ;;  %5975 = vst.msk [vmem:[#allocation3 + $0x130] sm:$0xff] %vm333_vm0, %v12285_v5  ;;  %v12298_v53 = vld [vmem:[#allocation2 + $0xfa] sm:$0xff] }
 0x4e0   : > { %5976 = vst.msk [vmem:[#allocation3 + $0x148] sm:$0xff] %vm333_vm0, %v12287_v30  ;;  %v4672_v49 = vld [vmem:[#allocation2 + $0xf8] sm:$0xff]  ;;  %5819 = vrot.lane.b32.xlu0 %v12290_v56, %s9527_s18  ;;  %v4298_v33 = vpop.f32.mrf.mxu1  ;;  %5340 = vst.msk [vmem:[#allocation3 + $0x1a0] sm:$0xff] %vm333_vm0, %v12298_v53 }
 0x4e1   : > { %4704 = vst.msk [vmem:[#allocation3 + $0x1f8] sm:$0xff] %vm333_vm0, %v4672_v49  ;;  %v4299_v63 = vadd.f32 %v12273_v22, %v4298_v33  ;;  %v4794_v25 = vpop.permute.xlu1 %4793 }
 0x4e2   : > { %4882 = vst.msk [vmem:[#allocation3 + $0xa8] sm:$0xff] %vm685_vm3, %v4794_v25  ;;  %v4300_v4 = vpop.f32.mrf.mxu1  ;;  %v12375_v25 = vld [vmem:[#allocation2 + $0xe0] sm:$0xff] }
 0x4e3   : > { %v4524_v8 = vadd.f32 %v9279_v40, %v4299_v63  ;;  %5821 = vrot.lane.b32.xlu1 %v12307_v19, %s9527_s18 }
 0x4e4   : > { %5437 = vrot.lane.b32.xlu0 %v12115_v21, %s9525_s16 }
 0x4e5   : > { %v4606_v12 = vmax.f32 %v4524_v8, 0.0 }
 0x4e6   : > { %v6033_v23 = vld [vmem:[#allocation3 + $0x130] sm:$0xff]  ;;  %v4673_v58 = vld [vmem:[#allocation2 + $0x108] sm:$0xff] }
 0x4e7   : > { %v6036_v51 = vld [vmem:[#allocation3 + $0x148] sm:$0xff]  ;;  %4638 = vst.msk [vmem:[#allocation2 + $0x112] sm:$0xff] %vm333_vm0, %v4606_v12  ;;  %9324 = vmatprep.mubr.msk.f32.mxu0 %vm333_vm0, %v6033_v23  ;;  %5439 = vrot.lane.b32.xlu1 %v12152_v55, %s9525_s16  ;;  %4705 = vst.msk [vmem:[#allocation3 + $0x210] sm:$0xff] %vm333_vm0, %v4673_v58 }
 0x4e8   : > { %v12317_v16 = vld [vmem:[#allocation2 + $0x10a] sm:$0xff]  ;;  %4989 = vrot.lane.b32.xlu0 %v11993_v0, %s9526_s17  ;;  %v4303_v9 = vpop.f32.mrf.mxu1  ;;  %9325 = vmatmul.mubr.msk.f32.gmra.mxu0 %vm333_vm0, %v6036_v51  ;;  %v12388_v51 = vld [vmem:[#allocation2 + $0xe2] sm:$0xff] }
 0x4e9   : > { %5341 = vst.msk [vmem:[#allocation3 + $0x1b8] sm:$0xff] %vm333_vm0, %v12317_v16  ;;  %v4304_v59 = vadd.f32 %v12273_v22, %v4303_v9  ;;  %v4796_v18 = vpop.permute.xlu0 %4795 }
 0x4ea   : > { %4883 = vst.msk [vmem:[#allocation3 + $0xc0] sm:$0xff] %vm685_vm3, %v4796_v18  ;;  %v4305_v14 = vpop.f32.mrf.mxu1 }
 0x4eb   : > { %v4529_v57 = vadd.f32 %v4528_v37, %v4304_v59  ;;  %4991 = vrot.lane.b32.xlu1 %v12063_v50, %s9526_s17 }
 0x4ec   : > { %5181 = vrot.lane.b32.xlu0 %v12174_v20, %s9527_s18 }
 0x4ed   : > { %v4607_v0 = vmax.f32 %v4529_v57, 0.0  ;;  %v9288_v57 = vpop.f32.mrf.mxu0 }
 0x4ee   : > { %v12331_v60 = vld [vmem:[#allocation2 + $0x10c] sm:$0xff]  ;;  %v12333_v62 = vld [vmem:[#allocation2 + $0x114] sm:$0xff] }
 0x4ef   : > { %4639 = vst.msk [vmem:[#allocation2 + $0x122] sm:$0xff] %vm333_vm0, %v4607_v0  ;;  %5183 = vrot.lane.b32.xlu1 %v12218_v1, %s9527_s18  ;;  %5977 = vst.msk [vmem:[#allocation3 + $0x160] sm:$0xff] %vm333_vm0, %v12331_v60  ;;  %v12344_v50 = vld [vmem:[#allocation2 + $0x112] sm:$0xff] }
 0x4f0   : > { %5978 = vst.msk [vmem:[#allocation3 + $0x178] sm:$0xff] %vm333_vm0, %v12333_v62  ;;  %v4674_v20 = vld [vmem:[#allocation2 + $0x110] sm:$0xff]  ;;  %5631 = vrot.lane.b32.xlu0 %v12336_v46, %s9526_s17  ;;  %v4308_v2 = vpop.f32.mrf.mxu1  ;;  %5342 = vst.msk [vmem:[#allocation3 + $0x1d0] sm:$0xff] %vm333_vm0, %v12344_v50 }
 0x4f1   : > { %4706 = vst.msk [vmem:[#allocation3 + $0x228] sm:$0xff] %vm333_vm0, %v4674_v20  ;;  %v4309_v1 = vadd.f32 %v12273_v22, %v4308_v2  ;;  %v4798_v35 = vpop.permute.xlu1 %4797 }
 0x4f2   : > { %4884 = vst.msk [vmem:[#allocation3 + $0xd8] sm:$0xff] %vm685_vm3, %v4798_v35  ;;  %v4310_v17 = vpop.f32.mrf.mxu1 }
 0x4f3   : > { %v4534_v40 = vadd.f32 %v9282_v44, %v4309_v1  ;;  %4801 = vrot.lane.b32.xlu1 %v12135_v26, %s9525_s16  ;;  %v12412_v17 = vld [vmem:[#allocation2 + $0xf0] sm:$0xff] }
 0x4f4   : > { %5823 = vrot.lane.b32.xlu0 %v12353_v54, %s9527_s18 }
 0x4f5   : > { %v4608_v11 = vmax.f32 %v4534_v40, 0.0  ;;  %v5420_v48 = vpop.permute.xlu1 %5419 }
 0x4f6   : > { %5515 = vst.msk [vmem:[#allocation3 + $0x8] sm:$0xff] %vm685_vm3, %v5420_v48  ;;  %v6039_v3 = vld [vmem:[#allocation3 + $0x160] sm:$0xff] }
 0x4f7   : > { %v6042_v36 = vld [vmem:[#allocation3 + $0x178] sm:$0xff]  ;;  %4640 = vst.msk [vmem:[#allocation2 + $0x12a] sm:$0xff] %vm333_vm0, %v4608_v11  ;;  %9327 = vmatprep.mubr.msk.f32.mxu0 %vm333_vm0, %v6039_v3  ;;  %4993 = vrot.lane.b32.xlu1 %v12065_v42, %s9526_s17  ;;  %v12364_v29 = vld [vmem:[#allocation2 + $0x122] sm:$0xff]  ;;  %v4548_v11 = vpop.f32.mrf.mxu0 }
 0x4f8   : > { %v4675_v26 = vld [vmem:[#allocation2 + $0x120] sm:$0xff]  ;;  %5441 = vrot.lane.b32.xlu0 %v12154_v43, %s9525_s16  ;;  %v4313_v15 = vpop.f32.mrf.mxu1  ;;  %9328 = vmatmul.mubr.msk.f32.gmra.mxu0 %vm333_vm0, %v6042_v36  ;;  %5343 = vst.msk [vmem:[#allocation3 + $0x1e8] sm:$0xff] %vm333_vm0, %v12364_v29 }
 0x4f9   : > { %4707 = vst.msk [vmem:[#allocation3 + $0x240] sm:$0xff] %vm333_vm0, %v4675_v26  ;;  %v4314_v39 = vadd.f32 %v12273_v22, %v4313_v15  ;;  %v4972_v49 = vpop.permute.xlu1 %4971  ;;  %v4800_v42 = vpop.permute.xlu0 %4799 }
 0x4fa   : > { %5067 = vst.msk [vmem:[#allocation3] sm:$0xff] %vm878_vm4, %v4972_v49  ;;  %v4315_v33 = vpop.f32.mrf.mxu1 }
 0x4fb   : > { %v4539_v63 = vadd.f32 %v4538_v32, %v4314_v39  ;;  %4885 = vst.msk [vmem:[#allocation3 + $0xf0] sm:$0xff] %vm685_vm3, %v4800_v42  ;;  %5185 = vrot.lane.b32.xlu1 %v12227_v41, %s9527_s18 }
 0x4fc   : > { %5633 = vrot.lane.b32.xlu0 %v12375_v25, %s9526_s17 }
 0x4fd   : > { %v4609_v4 = vmax.f32 %v4539_v63, 0.0  ;;  %v5164_v8 = vpop.permute.xlu1 %5163  ;;  %v5612_v12 = vpop.permute.xlu0 %5611 }
 0x4fe   : > { %5259 = vst.msk [vmem:[#allocation3] sm:$0xff] %vm1071_vm5, %v5164_v8  ;;  %v12382_v44 = vld [vmem:[#allocation2 + $0x124] sm:$0xff]  ;;  %v12384_v23 = vld [vmem:[#allocation2 + $0x12c] sm:$0xff] }
 0x4ff   : > { %4641 = vst.msk [vmem:[#allocation2 + $0x13a] sm:$0xff] %vm333_vm0, %v4609_v4  ;;  %4803 = vrot.lane.b32.xlu1 %v12180_v45, %s9525_s16  ;;  %5979 = vst.msk [vmem:[#allocation3 + $0x190] sm:$0xff] %vm333_vm0, %v12382_v44  ;;  %v12396_v41 = vld [vmem:[#allocation2 + $0x12a] sm:$0xff] }
 0x500   : > { %5707 = vst.msk [vmem:[#allocation3 + $0x8] sm:$0xff] %vm878_vm4, %v5612_v12  ;;  %v4676_v58 = vld [vmem:[#allocation2 + $0x128] sm:$0xff]  ;;  %5825 = vrot.lane.b32.xlu0 %v12388_v51, %s9527_s18  ;;  %v4318_v9 = vpop.f32.mrf.mxu1 }
 0x501   : > { %5980 = vst.msk [vmem:[#allocation3 + $0x1a8] sm:$0xff] %vm333_vm0, %v12384_v23  ;;  %5344 = vst.msk [vmem:[#allocation3 + $0x200] sm:$0xff] %vm333_vm0, %v12396_v41  ;;  %v4319_v45 = vadd.f32 %v12273_v22, %v4318_v9  ;;  %v5614_v59 = vpop.permute.xlu1 %5613  ;;  %v5804_v18 = vpop.permute.xlu0 %5803 }
 0x502   : > { %4708 = vst.msk [vmem:[#allocation3 + $0x258] sm:$0xff] %vm333_vm0, %v4676_v58  ;;  %v4320_v37 = vpop.f32.mrf.mxu1 }
 0x503   : > { %v4544_v14 = vadd.f32 %v9285_v38, %v4319_v45  ;;  %5899 = vst.msk [vmem:[#allocation3 + $0x8] sm:$0xff] %vm1071_vm5, %v5804_v18  ;;  %4995 = vrot.lane.b32.xlu1 %v12113_v27, %s9526_s17 }
 0x504   : > { %5443 = vrot.lane.b32.xlu0 %v12194_v31, %s9525_s16 }
 0x505   : > { %v4610_v0 = vmax.f32 %v4544_v14, 0.0  ;;  %v5806_v20 = vpop.permute.xlu1 %5805  ;;  %v5422_v2 = vpop.permute.xlu0 %5421  ;;  %v5995_v32 = vld [vmem:[#allocation3] sm:$0xff] }
 0x506   : > { %v6045_v1 = vld [vmem:[#allocation3 + $0x190] sm:$0xff]  ;;  %5516 = vst.msk [vmem:[#allocation3 + $0x20] sm:$0xff] %vm685_vm3, %v5422_v2  ;;  %v12416_v27 = vld [vmem:[#allocation2 + $0x13a] sm:$0xff] }
 0x507   : > { %4642 = vst.msk [vmem:[#allocation2 + $0x142] sm:$0xff] %vm333_vm0, %v4610_v0  ;;  %9330 = vmatprep.mubr.msk.f32.mxu0 %vm333_vm0, %v6045_v1  ;;  %5187 = vrot.lane.b32.xlu1 %v12277_v47, %s9527_s18  ;;  %v4677_v40 = vld [vmem:[#allocation2 + $0x138] sm:$0xff]  ;;  %5345 = vst.msk [vmem:[#allocation3 + $0x218] sm:$0xff] %vm333_vm0, %v12416_v27 }
 0x508   : > { %v6048_v35 = vld [vmem:[#allocation3 + $0x1a8] sm:$0xff]  ;;  %5708 = vst.msk [vmem:[#allocation3 + $0x20] sm:$0xff] %vm878_vm4, %v5614_v59  ;;  %5635 = vrot.lane.b32.xlu0 %v12412_v17, %s9526_s17  ;;  %v4323_v38 = vpop.f32.mrf.mxu1  ;;  %v12456_v59 = vld [vmem:[#allocation2 + $0xf8] sm:$0xff] }
 0x509   : > { %9331 = vmatmul.mubr.msk.f32.gmra.mxu0 %vm333_vm0, %v6048_v35  ;;  %4709 = vst.msk [vmem:[#allocation3 + $0x270] sm:$0xff] %vm333_vm0, %v4677_v40  ;;  %v4324_v47 = vadd.f32 %v12273_v22, %v4323_v38  ;;  %v5424_v48 = vpop.permute.xlu1 %5423 }
 0x50a   : > { %5900 = vst.msk [vmem:[#allocation3 + $0x20] sm:$0xff] %vm1071_vm5, %v5806_v20  ;;  %v4974_v3 = vpop.permute.xlu0 %4973  ;;  %v4325_v36 = vpop.f32.mrf.mxu1  ;;  %v5996_v26 = vld [vmem:[#allocation3 + $0x8] sm:$0xff] }
 0x50b   : > { %5517 = vst.msk [vmem:[#allocation3 + $0x38] sm:$0xff] %vm685_vm3, %v5424_v48  ;;  %v4549_v15 = vadd.f32 %v4548_v11, %v4324_v47  ;;  %6294 = vmatprep.mubr.f32.mxu1 %v5996_v26  ;;  %4805 = vrot.lane.b32.xlu1 %v12188_v34, %s9525_s16 }
 0x50c   : > { %5068 = vst.msk [vmem:[#allocation3 + $0x18] sm:$0xff] %vm878_vm4, %v4974_v3  ;;  %6295 = vmatmul.mubr.f32.vlgmr.msra.gmra.mxu1 %v5995_v32  ;;  %5827 = vrot.lane.b32.xlu0 %v12262_v52, %s9527_s18 }
 0x50d   : > { %v4611_v39 = vmax.f32 %v4549_v15, 0.0  ;;  %v4976_v49 = vpop.permute.xlu1 %4975  ;;  %v12484_v15 = vld [vmem:[#allocation2 + $0x108] sm:$0xff] }
 0x50e   : > { %5069 = vst.msk [vmem:[#allocation3 + $0x30] sm:$0xff] %vm878_vm4, %v4976_v49  ;;  %v5166_v42 = vpop.permute.xlu0 %5165  ;;  %v12434_v33 = vld [vmem:[#allocation2 + $0x13c] sm:$0xff]  ;;  %v12436_v63 = vld [vmem:[#allocation2 + $0x144] sm:$0xff] }
 0x50f   : > { %4643 = vst.msk [vmem:[#allocation2 + $0x152] sm:$0xff] %vm333_vm0, %v4611_v39  ;;  %4997 = vrot.lane.b32.xlu1 %v12115_v21, %s9526_s17  ;;  %5981 = vst.msk [vmem:[#allocation3 + $0x1c0] sm:$0xff] %vm333_vm0, %v12434_v33  ;;  %v12446_v34 = vld [vmem:[#allocation2 + $0x142] sm:$0xff] }
 0x510   : > { %5260 = vst.msk [vmem:[#allocation3 + $0x18] sm:$0xff] %vm1071_vm5, %v5166_v42  ;;  %v4678_v4 = vld [vmem:[#allocation2 + $0x140] sm:$0xff]  ;;  %5445 = vrot.lane.b32.xlu0 %v12196_v61, %s9525_s16 }
 0x511   : > { %5982 = vst.msk [vmem:[#allocation3 + $0x1d8] sm:$0xff] %vm333_vm0, %v12436_v63  ;;  %v5999_v8 = vld [vmem:[#allocation3 + $0x20] sm:$0xff]  ;;  %5346 = vst.msk [vmem:[#allocation3 + $0x230] sm:$0xff] %vm333_vm0, %v12446_v34  ;;  %v5168_v21 = vpop.permute.xlu1 %5167  ;;  %v4328_v12 = vpop.f32.mrf.mxu1 }
 0x512   : > { %4710 = vst.msk [vmem:[#allocation3 + $0x288] sm:$0xff] %vm333_vm0, %v4678_v4  ;;  %6299 = vmatprep.mubr.f32.mxu1 %v5999_v8  ;;  %v5616_v58 = vpop.permute.xlu0 %5615  ;;  %v4329_v9 = vadd.f32 %v12273_v22, %v4328_v12 }
 0x513   : > { %5261 = vst.msk [vmem:[#allocation3 + $0x30] sm:$0xff] %vm1071_vm5, %v5168_v21  ;;  %v4330_v45 = vpop.f32.mrf.mxu1  ;;  %5189 = vrot.lane.b32.xlu1 %v12283_v10, %s9527_s18  ;;  %v9291_v10 = vpop.f32.mrf.mxu0 }
 0x514   : > { %5709 = vst.msk [vmem:[#allocation3 + $0x38] sm:$0xff] %vm878_vm4, %v5616_v58  ;;  %v4554_v18 = vadd.f32 %v9288_v57, %v4329_v9  ;;  %5637 = vrot.lane.b32.xlu0 %v12456_v59, %s9526_s17 }
 0x515   : > { %v5618_v37 = vpop.permute.xlu1 %5617  ;;  %v4558_v11 = vpop.f32.mrf.mxu0 }
 0x516   : > { %v4612_v14 = vmax.f32 %v4554_v18, 0.0  ;;  %v5808_v0 = vpop.permute.xlu0 %5807  ;;  %v6051_v2 = vld [vmem:[#allocation3 + $0x1c0] sm:$0xff]  ;;  %v12464_v35 = vld [vmem:[#allocation2 + $0x152] sm:$0xff] }
 0x517   : > { %v5998_v20 = vld [vmem:[#allocation3 + $0x18] sm:$0xff]  ;;  %5901 = vst.msk [vmem:[#allocation3 + $0x38] sm:$0xff] %vm1071_vm5, %v5808_v0  ;;  %9333 = vmatprep.mubr.msk.f32.mxu0 %vm333_vm0, %v6051_v2  ;;  %v4679_v40 = vld [vmem:[#allocation2 + $0x150] sm:$0xff]  ;;  %4807 = vrot.lane.b32.xlu1 %v12231_v28, %s9525_s16 }
 0x518   : > { %v6054_v1 = vld [vmem:[#allocation3 + $0x1d8] sm:$0xff]  ;;  %6300 = vmatmul.mubr.f32.gmra.mxu1 %v5998_v20  ;;  %4644 = vst.msk [vmem:[#allocation2 + $0x15a] sm:$0xff] %vm333_vm0, %v4612_v14  ;;  %5829 = vrot.lane.b32.xlu0 %v12298_v53, %s9527_s18  ;;  %5347 = vst.msk [vmem:[#allocation3 + $0x248] sm:$0xff] %vm333_vm0, %v12464_v35 }
 0x519   : > { %4711 = vst.msk [vmem:[#allocation3 + $0x2a0] sm:$0xff] %vm333_vm0, %v4679_v40  ;;  %9334 = vmatmul.mubr.msk.f32.gmra.mxu0 %vm333_vm0, %v6054_v1  ;;  %v5810_v57 = vpop.permute.xlu1 %5809 }
 0x51a   : > { %v5426_v38 = vpop.permute.xlu0 %5425  ;;  %v6001_v39 = vld [vmem:[#allocation3 + $0x30] sm:$0xff] }
 0x51b   : > { %5518 = vst.msk [vmem:[#allocation3 + $0x50] sm:$0xff] %vm685_vm3, %v5426_v38  ;;  %4999 = vrot.lane.b32.xlu1 %v12152_v55, %s9526_s17 }
 0x51c   : > { %5710 = vst.msk [vmem:[#allocation3 + $0x50] sm:$0xff] %vm878_vm4, %v5618_v37  ;;  %5447 = vrot.lane.b32.xlu0 %v12237_v13, %s9525_s16  ;;  %v4333_v28 = vpop.f32.mrf.mxu1 }
 0x51d   : > { %5902 = vst.msk [vmem:[#allocation3 + $0x50] sm:$0xff] %vm1071_vm5, %v5810_v57  ;;  %v4334_v47 = vadd.f32 %v12273_v22, %v4333_v28  ;;  %v5428_v48 = vpop.permute.xlu1 %5427 }
 0x51e   : > { %5519 = vst.msk [vmem:[#allocation3 + $0x68] sm:$0xff] %vm685_vm3, %v5428_v48  ;;  %v4978_v3 = vpop.permute.xlu0 %4977  ;;  %v4335_v36 = vpop.f32.mrf.mxu1  ;;  %v6002_v26 = vld [vmem:[#allocation3 + $0x38] sm:$0xff] }
 0x51f   : > { %v4559_v32 = vadd.f32 %v4558_v11, %v4334_v47  ;;  %5070 = vst.msk [vmem:[#allocation3 + $0x48] sm:$0xff] %vm878_vm4, %v4978_v3  ;;  %6304 = vmatprep.mubr.f32.mxu1 %v6002_v26  ;;  %v12487_v55 = vld [vmem:[#allocation2 + $0x154] sm:$0xff]  ;;  %v12489_v49 = vld [vmem:[#allocation2 + $0x15c] sm:$0xff]  ;;  %5191 = vrot.lane.b32.xlu1 %v12336_v46, %s9527_s18 }
 0x520   : > { %6305 = vmatmul.mubr.f32.gmra.mxu1 %v6001_v39  ;;  %5639 = vrot.lane.b32.xlu0 %v12484_v15, %s9526_s17  ;;  %5983 = vst.msk [vmem:[#allocation3 + $0x1f0] sm:$0xff] %vm333_vm0, %v12487_v55  ;;  %5984 = vst.msk [vmem:[#allocation3 + $0x208] sm:$0xff] %vm333_vm0, %v12489_v49  ;;  %v12497_v42 = vld [vmem:[#allocation2 + $0x15a] sm:$0xff] }
 0x521   : > { %v4680_v4 = vld [vmem:[#allocation2 + $0x158] sm:$0xff]  ;;  %v4613_v8 = vmax.f32 %v4559_v32, 0.0  ;;  %v4980_v21 = vpop.permute.xlu1 %4979  ;;  %5348 = vst.msk [vmem:[#allocation3 + $0x260] sm:$0xff] %vm333_vm0, %v12497_v42 }
 0x522   : > { %4712 = vst.msk [vmem:[#allocation3 + $0x2b8] sm:$0xff] %vm333_vm0, %v4680_v4  ;;  %v5170_v12 = vpop.permute.xlu0 %5169 }
 0x523   : > { %5071 = vst.msk [vmem:[#allocation3 + $0x60] sm:$0xff] %vm878_vm4, %v4980_v21  ;;  %4809 = vrot.lane.b32.xlu1 %v12235_v7, %s9525_s16 }
 0x524   : > { %4645 = vst.msk [vmem:[#allocation2 + $0x16a] sm:$0xff] %vm333_vm0, %v4613_v8  ;;  %5831 = vrot.lane.b32.xlu0 %v12317_v16, %s9527_s18  ;;  %v6005_v58 = vld [vmem:[#allocation3 + $0x50] sm:$0xff] }
 0x525   : > { %5262 = vst.msk [vmem:[#allocation3 + $0x48] sm:$0xff] %vm1071_vm5, %v5170_v12  ;;  %6309 = vmatprep.mubr.f32.mxu1 %v6005_v58  ;;  %v5172_v46 = vpop.permute.xlu1 %5171  ;;  %v4338_v9 = vpop.f32.mrf.mxu1 }
 0x526   : > { %5263 = vst.msk [vmem:[#allocation3 + $0x60] sm:$0xff] %vm1071_vm5, %v5172_v46  ;;  %v4339_v45 = vadd.f32 %v12273_v22, %v4338_v9  ;;  %v5620_v18 = vpop.permute.xlu0 %5619  ;;  %v12563_v9 = vld [vmem:[#allocation2 + $0x120] sm:$0xff] }
 0x527   : > { %5711 = vst.msk [vmem:[#allocation3 + $0x68] sm:$0xff] %vm878_vm4, %v5620_v18  ;;  %v4340_v37 = vpop.f32.mrf.mxu1  ;;  %v6057_v14 = vld [vmem:[#allocation3 + $0x1f0] sm:$0xff]  ;;  %v6060_v0 = vld [vmem:[#allocation3 + $0x208] sm:$0xff]  ;;  %5001 = vrot.lane.b32.xlu1 %v12154_v43, %s9526_s17  ;;  %v9294_v43 = vpop.f32.mrf.mxu0 }
 0x528   : > { %v4564_v20 = vadd.f32 %v9291_v10, %v4339_v45  ;;  %5449 = vrot.lane.b32.xlu0 %v12239_v6, %s9525_s16  ;;  %9336 = vmatprep.mubr.msk.f32.mxu0 %vm333_vm0, %v6057_v14  ;;  %v12523_v10 = vld [vmem:[#allocation2 + $0x110] sm:$0xff] }
 0x529   : > { %9337 = vmatmul.mubr.msk.f32.gmra.mxu0 %vm333_vm0, %v6060_v0  ;;  %v5622_v7 = vpop.permute.xlu1 %5621  ;;  %v4568_v47 = vpop.f32.mrf.mxu0 }
 0x52a   : > { %v4614_v2 = vmax.f32 %v4564_v20, 0.0  ;;  %v5812_v1 = vpop.permute.xlu0 %5811 }
 0x52b   : > { %v12520_v57 = vld [vmem:[#allocation2 + $0x16a] sm:$0xff]  ;;  %5903 = vst.msk [vmem:[#allocation3 + $0x68] sm:$0xff] %vm1071_vm5, %v5812_v1  ;;  %5193 = vrot.lane.b32.xlu1 %v12375_v25, %s9527_s18 }
 0x52c   : > { %v6004_v40 = vld [vmem:[#allocation3 + $0x48] sm:$0xff]  ;;  %5349 = vst.msk [vmem:[#allocation3 + $0x278] sm:$0xff] %vm333_vm0, %v12520_v57  ;;  %4646 = vst.msk [vmem:[#allocation2 + $0x172] sm:$0xff] %vm333_vm0, %v4614_v2  ;;  %5641 = vrot.lane.b32.xlu0 %v12523_v10, %s9526_s17 }
 0x52d   : > { %6310 = vmatmul.mubr.f32.gmra.mxu1 %v6004_v40  ;;  %v4681_v6 = vld [vmem:[#allocation2 + $0x168] sm:$0xff]  ;;  %v5814_v38 = vpop.permute.xlu1 %5813  ;;  %v6007_v39 = vld [vmem:[#allocation3 + $0x60] sm:$0xff] }
 0x52e   : > { %4713 = vst.msk [vmem:[#allocation3 + $0x2d0] sm:$0xff] %vm333_vm0, %v4681_v6  ;;  %v5430_v28 = vpop.permute.xlu0 %5429 }
 0x52f   : > { %5520 = vst.msk [vmem:[#allocation3 + $0x80] sm:$0xff] %vm685_vm3, %v5430_v28  ;;  %4811 = vrot.lane.b32.xlu1 %v12290_v56, %s9525_s16 }
 0x530   : > { %5712 = vst.msk [vmem:[#allocation3 + $0x80] sm:$0xff] %vm878_vm4, %v5622_v7  ;;  %5833 = vrot.lane.b32.xlu0 %v12344_v50, %s9527_s18 }
 0x531   : > { %5904 = vst.msk [vmem:[#allocation3 + $0x80] sm:$0xff] %vm1071_vm5, %v5814_v38  ;;  %v5432_v3 = vpop.permute.xlu1 %5431 }
 0x532   : > { %v4343_v11 = vpop.f32.mrf.mxu1  ;;  %5521 = vst.msk [vmem:[#allocation3 + $0x98] sm:$0xff] %vm685_vm3, %v5432_v3  ;;  %v4982_v25 = vpop.permute.xlu0 %4981  ;;  %v6008_v26 = vld [vmem:[#allocation3 + $0x68] sm:$0xff] }
 0x533   : > { %v4344_v48 = vadd.f32 %v12273_v22, %v4343_v11  ;;  %5072 = vst.msk [vmem:[#allocation3 + $0x78] sm:$0xff] %vm878_vm4, %v4982_v25  ;;  %6314 = vmatprep.mubr.f32.mxu1 %v6008_v26  ;;  %v12543_v4 = vld [vmem:[#allocation2 + $0x16c] sm:$0xff]  ;;  %v12545_v8 = vld [vmem:[#allocation2 + $0x174] sm:$0xff]  ;;  %5003 = vrot.lane.b32.xlu1 %v12194_v31, %s9526_s17 }
 0x534   : > { %v4345_v36 = vpop.f32.mrf.mxu1  ;;  %6315 = vmatmul.mubr.f32.gmra.mxu1 %v6007_v39  ;;  %5451 = vrot.lane.b32.xlu0 %v12285_v5, %s9525_s16  ;;  %5985 = vst.msk [vmem:[#allocation3 + $0x220] sm:$0xff] %vm333_vm0, %v12543_v4  ;;  %5986 = vst.msk [vmem:[#allocation3 + $0x238] sm:$0xff] %vm333_vm0, %v12545_v8  ;;  %v12553_v56 = vld [vmem:[#allocation2 + $0x172] sm:$0xff]  ;;  %v12589_v11 = vld [vmem:[#allocation2 + $0x128] sm:$0xff] }
 0x535   : > { %v4569_v32 = vadd.f32 %v4568_v47, %v4344_v48  ;;  %v4682_v21 = vld [vmem:[#allocation2 + $0x170] sm:$0xff]  ;;  %v4984_v58 = vpop.permute.xlu1 %4983  ;;  %5350 = vst.msk [vmem:[#allocation3 + $0x290] sm:$0xff] %vm333_vm0, %v12553_v56 }
 0x536   : > { %4714 = vst.msk [vmem:[#allocation3 + $0x2e8] sm:$0xff] %vm333_vm0, %v4682_v21  ;;  %v5174_v46 = vpop.permute.xlu0 %5173 }
 0x537   : > { %v4615_v12 = vmax.f32 %v4569_v32, 0.0  ;;  %5073 = vst.msk [vmem:[#allocation3 + $0x90] sm:$0xff] %vm878_vm4, %v4984_v58  ;;  %5195 = vrot.lane.b32.xlu1 %v12412_v17, %s9527_s18 }
 0x538   : > { %5264 = vst.msk [vmem:[#allocation3 + $0x78] sm:$0xff] %vm1071_vm5, %v5174_v46  ;;  %5643 = vrot.lane.b32.xlu0 %v12563_v9, %s9526_s17  ;;  %v6011_v45 = vld [vmem:[#allocation3 + $0x80] sm:$0xff] }
 0x539   : > { %4647 = vst.msk [vmem:[#allocation2 + $0x182] sm:$0xff] %vm333_vm0, %v4615_v12  ;;  %6319 = vmatprep.mubr.f32.mxu1 %v6011_v45  ;;  %v5176_v18 = vpop.permute.xlu1 %5175 }
 0x53a   : > { %5265 = vst.msk [vmem:[#allocation3 + $0x90] sm:$0xff] %vm1071_vm5, %v5176_v18  ;;  %v5624_v14 = vpop.permute.xlu0 %5623 }
 0x53b   : > { %v4348_v31 = vpop.f32.mrf.mxu1  ;;  %5713 = vst.msk [vmem:[#allocation3 + $0x98] sm:$0xff] %vm878_vm4, %v5624_v14  ;;  %v6063_v20 = vld [vmem:[#allocation3 + $0x220] sm:$0xff]  ;;  %v6066_v7 = vld [vmem:[#allocation3 + $0x238] sm:$0xff]  ;;  %4813 = vrot.lane.b32.xlu1 %v12307_v19, %s9525_s16  ;;  %v9297_v19 = vpop.f32.mrf.mxu0 }
 0x53c   : > { %v4349_v37 = vadd.f32 %v12273_v22, %v4348_v31  ;;  %5835 = vrot.lane.b32.xlu0 %v12364_v29, %s9527_s18  ;;  %9339 = vmatprep.mubr.msk.f32.mxu0 %vm333_vm0, %v6063_v20 }
 0x53d   : > { %v4350_v0 = vpop.f32.mrf.mxu1  ;;  %9340 = vmatmul.mubr.msk.f32.gmra.mxu0 %vm333_vm0, %v6066_v7  ;;  %v5626_v17 = vpop.permute.xlu1 %5625 }
 0x53e   : > { %v4574_v2 = vadd.f32 %v9294_v43, %v4349_v37  ;;  %v5816_v40 = vpop.permute.xlu0 %5815  ;;  %v4578_v48 = vpop.f32.mrf.mxu0  ;;  %v12626_v0 = vld [vmem:[#allocation2 + $0x138] sm:$0xff] }
 0x53f   : > { %v6010_v6 = vld [vmem:[#allocation3 + $0x78] sm:$0xff]  ;;  %5905 = vst.msk [vmem:[#allocation3 + $0x98] sm:$0xff] %vm1071_vm5, %v5816_v40  ;;  %5005 = vrot.lane.b32.xlu1 %v12196_v61, %s9526_s17 }
 0x540   : > { %v4616_v1 = vmax.f32 %v4574_v2, 0.0  ;;  %v12578_v38 = vld [vmem:[#allocation2 + $0x182] sm:$0xff]  ;;  %6320 = vmatmul.mubr.f32.gmra.mxu1 %v6010_v6  ;;  %5453 = vrot.lane.b32.xlu0 %v12287_v30, %s9525_s16 }
 0x541   : > { %5351 = vst.msk [vmem:[#allocation3 + $0x2a8] sm:$0xff] %vm333_vm0, %v12578_v38  ;;  %v5818_v43 = vpop.permute.xlu1 %5817  ;;  %v6013_v32 = vld [vmem:[#allocation3 + $0x90] sm:$0xff] }
 0x542   : > { %4648 = vst.msk [vmem:[#allocation2 + $0x18a] sm:$0xff] %vm333_vm0, %v4616_v1  ;;  %v5434_v28 = vpop.permute.xlu0 %5433 }
 0x543   : > { %5522 = vst.msk [vmem:[#allocation3 + $0xb0] sm:$0xff] %vm685_vm3, %v5434_v28  ;;  %5197 = vrot.lane.b32.xlu1 %v12456_v59, %s9527_s18 }
 0x544   : > { %5714 = vst.msk [vmem:[#allocation3 + $0xb0] sm:$0xff] %vm878_vm4, %v5626_v17  ;;  %5645 = vrot.lane.b32.xlu0 %v12589_v11, %s9526_s17  ;;  %v4353_v47 = vpop.f32.mrf.mxu1 }
 0x545   : > { %5906 = vst.msk [vmem:[#allocation3 + $0xb0] sm:$0xff] %vm1071_vm5, %v5818_v43  ;;  %v4354_v61 = vadd.f32 %v12273_v22, %v4353_v47  ;;  %v5436_v30 = vpop.permute.xlu1 %5435 }
 0x546   : > { %v4986_v3 = vpop.permute.xlu0 %4985  ;;  %5523 = vst.msk [vmem:[#allocation3 + $0xc8] sm:$0xff] %vm685_vm3, %v5436_v30  ;;  %v4355_v25 = vpop.f32.mrf.mxu1  ;;  %v6014_v36 = vld [vmem:[#allocation3 + $0x98] sm:$0xff] }
 0x547   : > { %5074 = vst.msk [vmem:[#allocation3 + $0xa8] sm:$0xff] %vm878_vm4, %v4986_v3  ;;  %v4579_v26 = vadd.f32 %v4578_v48, %v4354_v61  ;;  %6324 = vmatprep.mubr.f32.mxu1 %v6014_v36  ;;  %4815 = vrot.lane.b32.xlu1 %v12353_v54, %s9525_s16 }
 0x548   : > { %6325 = vmatmul.mubr.f32.gmra.mxu1 %v6013_v32  ;;  %5837 = vrot.lane.b32.xlu0 %v12396_v41, %s9527_s18 }
 0x549   : > { %v12600_v39 = vld [vmem:[#allocation2 + $0x184] sm:$0xff]  ;;  %v12602_v21 = vld [vmem:[#allocation2 + $0x18c] sm:$0xff]  ;;  %v4617_v12 = vmax.f32 %v4579_v26, 0.0  ;;  %v4988_v58 = vpop.permute.xlu1 %4987 }
 0x54a   : > { %5987 = vst.msk [vmem:[#allocation3 + $0x250] sm:$0xff] %vm333_vm0, %v12600_v39  ;;  %5988 = vst.msk [vmem:[#allocation3 + $0x268] sm:$0xff] %vm333_vm0, %v12602_v21  ;;  %v12610_v59 = vld [vmem:[#allocation2 + $0x18a] sm:$0xff]  ;;  %v5178_v46 = vpop.permute.xlu0 %5177 }
 0x54b   : > { %5352 = vst.msk [vmem:[#allocation3 + $0x2c0] sm:$0xff] %vm333_vm0, %v12610_v59  ;;  %4649 = vst.msk [vmem:[#allocation2 + $0x19a] sm:$0xff] %vm333_vm0, %v4617_v12  ;;  %5007 = vrot.lane.b32.xlu1 %v12237_v13, %s9526_s17 }
 0x54c   : > { %5075 = vst.msk [vmem:[#allocation3 + $0xc0] sm:$0xff] %vm878_vm4, %v4988_v58  ;;  %5455 = vrot.lane.b32.xlu0 %v12331_v60, %s9525_s16  ;;  %v6017_v45 = vld [vmem:[#allocation3 + $0xb0] sm:$0xff] }
 0x54d   : > { %5266 = vst.msk [vmem:[#allocation3 + $0xa8] sm:$0xff] %vm1071_vm5, %v5178_v46  ;;  %6329 = vmatprep.mubr.f32.mxu1 %v6017_v45  ;;  %v4358_v54 = vpop.f32.mrf.mxu1  ;;  %v5180_v31 = vpop.permute.xlu1 %5179  ;;  %v12686_v45 = vld [vmem:[#allocation2 + $0x150] sm:$0xff] }
 0x54e   : > { %v4359_v18 = vadd.f32 %v12273_v22, %v4358_v54  ;;  %v5628_v37 = vpop.permute.xlu0 %5627  ;;  %5267 = vst.msk [vmem:[#allocation3 + $0xc0] sm:$0xff] %vm1071_vm5, %v5180_v31 }
 0x54f   : > { %5715 = vst.msk [vmem:[#allocation3 + $0xc8] sm:$0xff] %vm878_vm4, %v5628_v37  ;;  %v4360_v14 = vpop.f32.mrf.mxu1  ;;  %5199 = vrot.lane.b32.xlu1 %v12484_v15, %s9527_s18 }
 0x550   : > { %v4584_v2 = vadd.f32 %v9297_v19, %v4359_v18  ;;  %5647 = vrot.lane.b32.xlu0 %v12626_v0, %s9526_s17  ;;  %v4926_v19 = vld [vmem:[#allocation2 + $0xe4] sm:$0xff]  ;;  %v4928_v14 = vld [vmem:[#allocation2 + $0xfc] sm:$0xff] }
 0x551   : > { %v6069_v20 = vld [vmem:[#allocation3 + $0x250] sm:$0xff]  ;;  %v6072_v7 = vld [vmem:[#allocation3 + $0x268] sm:$0xff]  ;;  %v5630_v13 = vpop.permute.xlu1 %5629 }
 0x552   : > { %9342 = vmatprep.mubr.msk.f32.mxu0 %vm333_vm0, %v6069_v20  ;;  %v4618_v22 = vmax.f32 %v4584_v2, 0.0  ;;  %v5820_v17 = vpop.permute.xlu0 %5819  ;;  %v12634_v40 = vld [vmem:[#allocation2 + $0x19a] sm:$0xff] }
 0x553   : > { %9343 = vmatmul.mubr.msk.f32.gmra.mxu0 %vm333_vm0, %v6072_v7  ;;  %5907 = vst.msk [vmem:[#allocation3 + $0xc8] sm:$0xff] %vm1071_vm5, %v5820_v17  ;;  %4817 = vrot.lane.b32.xlu1 %v12388_v51, %s9525_s16  ;;  %v12651_v51 = vld [vmem:[#allocation2 + $0x140] sm:$0xff] }
 0x554   : > { %v6016_v1 = vld [vmem:[#allocation3 + $0xa8] sm:$0xff]  ;;  %5353 = vst.msk [vmem:[#allocation3 + $0x2d8] sm:$0xff] %vm333_vm0, %v12634_v40  ;;  %4650 = vst.msk [vmem:[#allocation2 + $0x1a2] sm:$0xff] %vm333_vm0, %v4618_v22  ;;  %5839 = vrot.lane.b32.xlu0 %v12416_v27, %s9527_s18 }
 0x555   : > { %6330 = vmatmul.mubr.f32.gmra.mxu1 %v6016_v1  ;;  %v5822_v15 = vpop.permute.xlu1 %5821  ;;  %v6019_v48 = vld [vmem:[#allocation3 + $0xc0] sm:$0xff] }
 0x556   : > { %v5438_v6 = vpop.permute.xlu0 %5437 }
 0x557   : > { %5524 = vst.msk [vmem:[#allocation3 + $0xe0] sm:$0xff] %vm685_vm3, %v5438_v6  ;;  %5009 = vrot.lane.b32.xlu1 %v4926_v19, %s9526_s17 }
 0x558   : > { %5716 = vst.msk [vmem:[#allocation3 + $0xe0] sm:$0xff] %vm878_vm4, %v5630_v13  ;;  %5457 = vrot.lane.b32.xlu0 %v12333_v62, %s9525_s16 }
 0x559   : > { %5908 = vst.msk [vmem:[#allocation3 + $0xe0] sm:$0xff] %vm1071_vm5, %v5822_v15  ;;  %v5440_v43 = vpop.permute.xlu1 %5439 }
 0x55a   : > { %v4990_v28 = vpop.permute.xlu0 %4989  ;;  %5525 = vst.msk [vmem:[#allocation3 + $0xf8] sm:$0xff] %vm685_vm3, %v5440_v43  ;;  %v6020_v47 = vld [vmem:[#allocation3 + $0xc8] sm:$0xff] }
 0x55b   : > { %5076 = vst.msk [vmem:[#allocation3 + $0xd8] sm:$0xff] %vm878_vm4, %v4990_v28  ;;  %6334 = vmatprep.mubr.f32.mxu1 %v6020_v47  ;;  %v12654_v61 = vld [vmem:[#allocation2 + $0x19c] sm:$0xff]  ;;  %v12656_v30 = vld [vmem:[#allocation2 + $0x1a4] sm:$0xff]  ;;  %5201 = vrot.lane.b32.xlu1 %v12523_v10, %s9527_s18 }
 0x55c   : > { %5649 = vrot.lane.b32.xlu0 %v12651_v51, %s9526_s17  ;;  %6335 = vmatmul.mubr.f32.gmra.mxu1 %v6019_v48  ;;  %5989 = vst.msk [vmem:[#allocation3 + $0x280] sm:$0xff] %vm333_vm0, %v12654_v61  ;;  %5990 = vst.msk [vmem:[#allocation3 + $0x298] sm:$0xff] %vm333_vm0, %v12656_v30  ;;  %v12664_v62 = vld [vmem:[#allocation2 + $0x1a2] sm:$0xff]  ;;  %v4930_v48 = vld [vmem:[#allocation2 + $0x114] sm:$0xff] }
 0x55d   : > { %v4992_v3 = vpop.permute.xlu1 %4991  ;;  %5354 = vst.msk [vmem:[#allocation3 + $0x2f0] sm:$0xff] %vm333_vm0, %v12664_v62 }
 0x55e   : > { %v5182_v25 = vpop.permute.xlu0 %5181  ;;  %5077 = vst.msk [vmem:[#allocation3 + $0xf0] sm:$0xff] %vm878_vm4, %v4992_v3 }
 0x55f   : > { %5268 = vst.msk [vmem:[#allocation3 + $0xd8] sm:$0xff] %vm1071_vm5, %v5182_v25  ;;  %4819 = vrot.lane.b32.xlu1 %v12262_v52, %s9525_s16 }
 0x560   : > { %5841 = vrot.lane.b32.xlu0 %v12446_v34, %s9527_s18  ;;  %v6023_v36 = vld [vmem:[#allocation3 + $0xe0] sm:$0xff] }
 0x561   : > { %6339 = vmatprep.mubr.f32.mxu1 %v6023_v36  ;;  %v5184_v26 = vpop.permute.xlu1 %5183 }
 0x562   : > { %v5632_v32 = vpop.permute.xlu0 %5631  ;;  %5269 = vst.msk [vmem:[#allocation3 + $0xf0] sm:$0xff] %vm1071_vm5, %v5184_v26 }
 0x563   : > { %5717 = vst.msk [vmem:[#allocation3 + $0xf8] sm:$0xff] %vm878_vm4, %v5632_v32  ;;  %v6075_v10 = vld [vmem:[#allocation3 + $0x280] sm:$0xff]  ;;  %v6078_v12 = vld [vmem:[#allocation3 + $0x298] sm:$0xff]  ;;  %5011 = vrot.lane.b32.xlu1 %v12285_v5, %s9526_s17 }
 0x564   : > { %5459 = vrot.lane.b32.xlu0 %v12382_v44, %s9525_s16  ;;  %9345 = vmatprep.mubr.msk.f32.mxu0 %vm333_vm0, %v6075_v10 }
 0x565   : > { %9346 = vmatmul.mubr.msk.f32.gmra.mxu0 %vm333_vm0, %v6078_v12  ;;  %v4802_v52 = vpop.permute.xlu1 %4801 }
 0x566   : > { %v5824_v58 = vpop.permute.xlu0 %5823  ;;  %4886 = vst.msk [vmem:[#allocation3 + $0x108] sm:$0xff] %vm685_vm3, %v4802_v52  ;;  %v6022_v46 = vld [vmem:[#allocation3 + $0xd8] sm:$0xff] }
 0x567   : > { %5909 = vst.msk [vmem:[#allocation3 + $0xf8] sm:$0xff] %vm1071_vm5, %v5824_v58  ;;  %6340 = vmatmul.mubr.f32.gmra.mxu1 %v6022_v46  ;;  %5203 = vrot.lane.b32.xlu1 %v12563_v9, %s9527_s18  ;;  %v12763_v58 = vld [vmem:[#allocation2 + $0x180] sm:$0xff] }
 0x568   : > { %5651 = vrot.lane.b32.xlu0 %v12686_v45, %s9526_s17 }
 0x569   : > { %v4994_v54 = vpop.permute.xlu1 %4993  ;;  %v6025_v9 = vld [vmem:[#allocation3 + $0xf0] sm:$0xff] }
 0x56a   : > { %v5442_v5 = vpop.permute.xlu0 %5441  ;;  %5078 = vst.msk [vmem:[#allocation3 + $0x108] sm:$0xff] %vm878_vm4, %v4994_v54 }
 0x56b   : > { %5526 = vst.msk [vmem:[#allocation3 + $0x110] sm:$0xff] %vm685_vm3, %v5442_v5  ;;  %4821 = vrot.lane.b32.xlu1 %v12298_v53, %s9525_s16  ;;  %v12705_v53 = vld [vmem:[#allocation2 + $0x158] sm:$0xff] }
 0x56c   : > { %5843 = vrot.lane.b32.xlu0 %v12464_v35, %s9527_s18 }
 0x56d   : > { %v5186_v31 = vpop.permute.xlu1 %5185 }
 0x56e   : > { %v5634_v18 = vpop.permute.xlu0 %5633  ;;  %5270 = vst.msk [vmem:[#allocation3 + $0x108] sm:$0xff] %vm1071_vm5, %v5186_v31  ;;  %v6026_v37 = vld [vmem:[#allocation3 + $0xf8] sm:$0xff] }
 0x56f   : > { %5718 = vst.msk [vmem:[#allocation3 + $0x110] sm:$0xff] %vm878_vm4, %v5634_v18  ;;  %6344 = vmatprep.mubr.f32.mxu1 %v6026_v37  ;;  %5013 = vrot.lane.b32.xlu1 %v4928_v14, %s9526_s17 }
 0x570   : > { %5461 = vrot.lane.b32.xlu0 %v12384_v23, %s9525_s16  ;;  %6345 = vmatmul.mubr.f32.gmra.mxu1 %v6025_v9 }
 0x571   : > { %v4804_v20 = vpop.permute.xlu1 %4803 }
 0x572   : > { %v5826_v7 = vpop.permute.xlu0 %5825  ;;  %4887 = vst.msk [vmem:[#allocation3 + $0x120] sm:$0xff] %vm685_vm3, %v4804_v20 }
 0x573   : > { %5910 = vst.msk [vmem:[#allocation3 + $0x110] sm:$0xff] %vm1071_vm5, %v5826_v7  ;;  %5205 = vrot.lane.b32.xlu1 %v12589_v11, %s9527_s18  ;;  %v12803_v7 = vld [vmem:[#allocation2 + $0x198] sm:$0xff] }
 0x574   : > { %5653 = vrot.lane.b32.xlu0 %v12705_v53, %s9526_s17 }
 0x575   : > { %v4996_v2 = vpop.permute.xlu1 %4995  ;;  %v6028_v11 = vld [vmem:[#allocation3 + $0x108] sm:$0xff] }
 0x576   : > { %v5444_v13 = vpop.permute.xlu0 %5443  ;;  %5079 = vst.msk [vmem:[#allocation3 + $0x120] sm:$0xff] %vm878_vm4, %v4996_v2 }
 0x577   : > { %5527 = vst.msk [vmem:[#allocation3 + $0x128] sm:$0xff] %vm685_vm3, %v5444_v13  ;;  %4823 = vrot.lane.b32.xlu1 %v12317_v16, %s9525_s16  ;;  %v12725_v16 = vld [vmem:[#allocation2 + $0x168] sm:$0xff] }
 0x578   : > { %5845 = vrot.lane.b32.xlu0 %v12497_v42, %s9527_s18 }
 0x579   : > { %v5188_v22 = vpop.permute.xlu1 %5187 }
 0x57a   : > { %v5636_v17 = vpop.permute.xlu0 %5635  ;;  %5271 = vst.msk [vmem:[#allocation3 + $0x120] sm:$0xff] %vm1071_vm5, %v5188_v22  ;;  %v6029_v1 = vld [vmem:[#allocation3 + $0x110] sm:$0xff] }
 0x57b   : > { %5719 = vst.msk [vmem:[#allocation3 + $0x128] sm:$0xff] %vm878_vm4, %v5636_v17  ;;  %6349 = vmatprep.mubr.f32.mxu1 %v6029_v1  ;;  %5015 = vrot.lane.b32.xlu1 %v12331_v60, %s9526_s17  ;;  %v12823_v1 = vld [vmem:[#allocation2 + $0x1a0] sm:$0xff] }
 0x57c   : > { %5463 = vrot.lane.b32.xlu0 %v12434_v33, %s9525_s16  ;;  %6350 = vmatmul.mubr.f32.gmra.mxu1 %v6028_v11 }
 0x57d   : > { %v4806_v15 = vpop.permute.xlu1 %4805 }
 0x57e   : > { %v5828_v6 = vpop.permute.xlu0 %5827  ;;  %4888 = vst.msk [vmem:[#allocation3 + $0x138] sm:$0xff] %vm685_vm3, %v4806_v15 }
 0x57f   : > { %5911 = vst.msk [vmem:[#allocation3 + $0x128] sm:$0xff] %vm1071_vm5, %v5828_v6  ;;  %5207 = vrot.lane.b32.xlu1 %v12626_v0, %s9527_s18 }
 0x580   : > { %5655 = vrot.lane.b32.xlu0 %v12725_v16, %s9526_s17 }
 0x581   : > { %v4998_v19 = vpop.permute.xlu1 %4997  ;;  %v6031_v0 = vld [vmem:[#allocation3 + $0x120] sm:$0xff] }
 0x582   : > { %v5446_v43 = vpop.permute.xlu0 %5445  ;;  %5080 = vst.msk [vmem:[#allocation3 + $0x138] sm:$0xff] %vm878_vm4, %v4998_v19 }
 0x583   : > { %5528 = vst.msk [vmem:[#allocation3 + $0x140] sm:$0xff] %vm685_vm3, %v5446_v43  ;;  %4825 = vrot.lane.b32.xlu1 %v12344_v50, %s9525_s16  ;;  %v12744_v50 = vld [vmem:[#allocation2 + $0x170] sm:$0xff] }
 0x584   : > { %5847 = vrot.lane.b32.xlu0 %v12520_v57, %s9527_s18  ;;  %v6081_v43 = vld [vmem:[#allocation3 + $0x2b0] sm:$0xff] }
 0x585   : > { %v5190_v60 = vpop.permute.xlu1 %5189  ;;  %9348 = vmatprep.mubr.msk.f32.mxu0 %vm333_vm0, %v6081_v43 }
 0x586   : > { %v5638_v28 = vpop.permute.xlu0 %5637  ;;  %5272 = vst.msk [vmem:[#allocation3 + $0x138] sm:$0xff] %vm1071_vm5, %v5190_v60  ;;  %v6032_v47 = vld [vmem:[#allocation3 + $0x128] sm:$0xff]  ;;  %v8088_v60 = vld [vmem:[#allocation2 + $0x1b4] sm:$0xff] }
 0x587   : > { %5720 = vst.msk [vmem:[#allocation3 + $0x140] sm:$0xff] %vm878_vm4, %v5638_v28  ;;  %6354 = vmatprep.mubr.f32.mxu1 %v6032_v47  ;;  %5017 = vrot.lane.b32.xlu1 %v4930_v48, %s9526_s17  ;;  %v6084_v28 = vld [vmem:[#allocation3 + $0x2c8] sm:$0xff] }
 0x588   : > { %5465 = vrot.lane.b32.xlu0 %v12436_v63, %s9525_s16  ;;  %6355 = vmatmul.mubr.f32.gmra.mxu1 %v6031_v0  ;;  %8120 = vst.msk [vmem:[#allocation3 + $0x2b0] sm:$0xff] %vm333_vm0, %v8088_v60  ;;  %v8089_v0 = vld [vmem:[#allocation2 + $0x1bc] sm:$0xff] }
 0x589   : > { %v4808_v25 = vpop.permute.xlu1 %4807  ;;  %9349 = vmatmul.mubr.msk.f32.gmra.mxu0 %vm333_vm0, %v6084_v28  ;;  %8121 = vst.msk [vmem:[#allocation3 + $0x2c8] sm:$0xff] %vm333_vm0, %v8089_v0 }
 0x58a   : > { %v5830_v3 = vpop.permute.xlu0 %5829  ;;  %4889 = vst.msk [vmem:[#allocation3 + $0x150] sm:$0xff] %vm685_vm3, %v4808_v25 }
 0x58b   : > { %5912 = vst.msk [vmem:[#allocation3 + $0x140] sm:$0xff] %vm1071_vm5, %v5830_v3  ;;  %5209 = vrot.lane.b32.xlu1 %v12651_v51, %s9527_s18 }
 0x58c   : > { %5657 = vrot.lane.b32.xlu0 %v12744_v50, %s9526_s17 }
 0x58d   : > { %v5000_v26 = vpop.permute.xlu1 %4999  ;;  %v6034_v52 = vld [vmem:[#allocation3 + $0x138] sm:$0xff] }
 0x58e   : > { %v5448_v36 = vpop.permute.xlu0 %5447  ;;  %5081 = vst.msk [vmem:[#allocation3 + $0x150] sm:$0xff] %vm878_vm4, %v5000_v26 }
 0x58f   : > { %5529 = vst.msk [vmem:[#allocation3 + $0x158] sm:$0xff] %vm685_vm3, %v5448_v36  ;;  %4827 = vrot.lane.b32.xlu1 %v12364_v29, %s9525_s16 }
 0x590   : > { %5849 = vrot.lane.b32.xlu0 %v12553_v56, %s9527_s18 }
 0x591   : > { %v5192_v12 = vpop.permute.xlu1 %5191 }
 0x592   : > { %v5640_v32 = vpop.permute.xlu0 %5639  ;;  %v6035_v10 = vld [vmem:[#allocation3 + $0x140] sm:$0xff]  ;;  %5273 = vst.msk [vmem:[#allocation3 + $0x150] sm:$0xff] %vm1071_vm5, %v5192_v12 }
 0x593   : > { %5721 = vst.msk [vmem:[#allocation3 + $0x158] sm:$0xff] %vm878_vm4, %v5640_v32  ;;  %6359 = vmatprep.mubr.f32.mxu1 %v6035_v10  ;;  %5019 = vrot.lane.b32.xlu1 %v12382_v44, %s9526_s17  ;;  %v4936_v32 = vld [vmem:[#allocation2 + $0x15c] sm:$0xff] }
 0x594   : > { %5467 = vrot.lane.b32.xlu0 %v12487_v55, %s9525_s16  ;;  %6360 = vmatmul.mubr.f32.gmra.mxu1 %v6034_v52  ;;  %v5576_v10 = vld [vmem:[#allocation2 + $0x1b8] sm:$0xff] }
 0x595   : > { %v4810_v29 = vpop.permute.xlu1 %4809  ;;  %v5768_v52 = vld [vmem:[#allocation2 + $0x1ba] sm:$0xff] }
 0x596   : > { %v5832_v51 = vpop.permute.xlu0 %5831  ;;  %4890 = vst.msk [vmem:[#allocation3 + $0x168] sm:$0xff] %vm685_vm3, %v4810_v29 }
 0x597   : > { %5913 = vst.msk [vmem:[#allocation3 + $0x158] sm:$0xff] %vm1071_vm5, %v5832_v51  ;;  %5211 = vrot.lane.b32.xlu1 %v12686_v45, %s9527_s18  ;;  %v12783_v45 = vld [vmem:[#allocation2 + $0x188] sm:$0xff] }
 0x598   : > { %5659 = vrot.lane.b32.xlu0 %v12763_v58, %s9526_s17 }
 0x599   : > { %v5002_v54 = vpop.permute.xlu1 %5001  ;;  %v6037_v18 = vld [vmem:[#allocation3 + $0x150] sm:$0xff] }
 0x59a   : > { %v5450_v46 = vpop.permute.xlu0 %5449  ;;  %5082 = vst.msk [vmem:[#allocation3 + $0x168] sm:$0xff] %vm878_vm4, %v5002_v54 }
 0x59b   : > { %5530 = vst.msk [vmem:[#allocation3 + $0x170] sm:$0xff] %vm685_vm3, %v5450_v46  ;;  %4829 = vrot.lane.b32.xlu1 %v12396_v41, %s9525_s16 }
 0x59c   : > { %5851 = vrot.lane.b32.xlu0 %v12578_v38, %s9527_s18 }
 0x59d   : > { %v5194_v31 = vpop.permute.xlu1 %5193 }
 0x59e   : > { %v5642_v44 = vpop.permute.xlu0 %5641  ;;  %v6038_v5 = vld [vmem:[#allocation3 + $0x158] sm:$0xff]  ;;  %5274 = vst.msk [vmem:[#allocation3 + $0x168] sm:$0xff] %vm1071_vm5, %v5194_v31  ;;  %v5577_v31 = vld [vmem:[#allocation2 + $0x1c8] sm:$0xff] }
 0x59f   : > { %5722 = vst.msk [vmem:[#allocation3 + $0x170] sm:$0xff] %vm878_vm4, %v5642_v44  ;;  %6364 = vmatprep.mubr.f32.mxu1 %v6038_v5  ;;  %5021 = vrot.lane.b32.xlu1 %v12384_v23, %s9526_s17 }
 0x5a0   : > { %5469 = vrot.lane.b32.xlu0 %v12489_v49, %s9525_s16  ;;  %6365 = vmatmul.mubr.f32.gmra.mxu1 %v6037_v18 }
 0x5a1   : > { %v4812_v41 = vpop.permute.xlu1 %4811 }
 0x5a2   : > { %v5834_v38 = vpop.permute.xlu0 %5833  ;;  %4891 = vst.msk [vmem:[#allocation3 + $0x180] sm:$0xff] %vm685_vm3, %v4812_v41 }
 0x5a3   : > { %5914 = vst.msk [vmem:[#allocation3 + $0x170] sm:$0xff] %vm1071_vm5, %v5834_v38  ;;  %5213 = vrot.lane.b32.xlu1 %v12705_v53, %s9527_s18  ;;  %v6087_v38 = vld [vmem:[#allocation3 + $0x2e0] sm:$0xff] }
 0x5a4   : > { %5661 = vrot.lane.b32.xlu0 %v12783_v45, %s9526_s17  ;;  %9351 = vmatprep.mubr.msk.f32.mxu0 %vm333_vm0, %v6087_v38 }
 0x5a5   : > { %v5004_v49 = vpop.permute.xlu1 %5003  ;;  %v6040_v20 = vld [vmem:[#allocation3 + $0x168] sm:$0xff] }
 0x5a6   : > { %v5452_v37 = vpop.permute.xlu0 %5451  ;;  %5083 = vst.msk [vmem:[#allocation3 + $0x180] sm:$0xff] %vm878_vm4, %v5004_v49 }
 0x5a7   : > { %5531 = vst.msk [vmem:[#allocation3 + $0x188] sm:$0xff] %vm685_vm3, %v5452_v37  ;;  %4831 = vrot.lane.b32.xlu1 %v12416_v27, %s9525_s16 }
 0x5a8   : > { %5853 = vrot.lane.b32.xlu0 %v12610_v59, %s9527_s18 }
 0x5a9   : > { %v5196_v14 = vpop.permute.xlu1 %5195 }
 0x5aa   : > { %v5644_v23 = vpop.permute.xlu0 %5643  ;;  %v6041_v9 = vld [vmem:[#allocation3 + $0x170] sm:$0xff]  ;;  %5275 = vst.msk [vmem:[#allocation3 + $0x180] sm:$0xff] %vm1071_vm5, %v5196_v14 }
 0x5ab   : > { %5723 = vst.msk [vmem:[#allocation3 + $0x188] sm:$0xff] %vm878_vm4, %v5644_v23  ;;  %6369 = vmatprep.mubr.f32.mxu1 %v6041_v9  ;;  %5023 = vrot.lane.b32.xlu1 %v12434_v33, %s9526_s17  ;;  %v8091_v9 = vld [vmem:[#allocation2 + $0x1d4] sm:$0xff] }
 0x5ac   : > { %5471 = vrot.lane.b32.xlu0 %v12543_v4, %s9525_s16  ;;  %6370 = vmatmul.mubr.f32.gmra.mxu1 %v6040_v20 }
 0x5ad   : > { %v4814_v27 = vpop.permute.xlu1 %4813 }
 0x5ae   : > { %v5836_v59 = vpop.permute.xlu0 %5835  ;;  %4892 = vst.msk [vmem:[#allocation3 + $0x198] sm:$0xff] %vm685_vm3, %v4814_v27 }
 0x5af   : > { %5915 = vst.msk [vmem:[#allocation3 + $0x188] sm:$0xff] %vm1071_vm5, %v5836_v59  ;;  %5215 = vrot.lane.b32.xlu1 %v12725_v16, %s9527_s18 }
 0x5b0   : > { %5663 = vrot.lane.b32.xlu0 %v12803_v7, %s9526_s17 }
 0x5b1   : > { %v5006_v2 = vpop.permute.xlu1 %5005  ;;  %v6043_v17 = vld [vmem:[#allocation3 + $0x180] sm:$0xff] }
 0x5b2   : > { %v5454_v53 = vpop.permute.xlu0 %5453  ;;  %5084 = vst.msk [vmem:[#allocation3 + $0x198] sm:$0xff] %vm878_vm4, %v5006_v2 }
 0x5b3   : > { %5532 = vst.msk [vmem:[#allocation3 + $0x1a0] sm:$0xff] %vm685_vm3, %v5454_v53  ;;  %4833 = vrot.lane.b32.xlu1 %v12446_v34, %s9525_s16  ;;  %v5578_v53 = vld [vmem:[#allocation2 + $0x1d0] sm:$0xff] }
 0x5b4   : > { %5855 = vrot.lane.b32.xlu0 %v12634_v40, %s9527_s18 }
 0x5b5   : > { %v5198_v22 = vpop.permute.xlu1 %5197 }
 0x5b6   : > { %v5646_v33 = vpop.permute.xlu0 %5645  ;;  %v6044_v13 = vld [vmem:[#allocation3 + $0x188] sm:$0xff]  ;;  %5276 = vst.msk [vmem:[#allocation3 + $0x198] sm:$0xff] %vm1071_vm5, %v5198_v22 }
 0x5b7   : > { %5724 = vst.msk [vmem:[#allocation3 + $0x1a0] sm:$0xff] %vm878_vm4, %v5646_v33  ;;  %6374 = vmatprep.mubr.f32.mxu1 %v6044_v13  ;;  %5025 = vrot.lane.b32.xlu1 %v12436_v63, %s9526_s17 }
 0x5b8   : > { %5473 = vrot.lane.b32.xlu0 %v12545_v8, %s9525_s16  ;;  %6375 = vmatmul.mubr.f32.gmra.mxu1 %v6043_v17 }
 0x5b9   : > { %v4816_v34 = vpop.permute.xlu1 %4815 }
 0x5ba   : > { %v5838_v40 = vpop.permute.xlu0 %5837  ;;  %4893 = vst.msk [vmem:[#allocation3 + $0x1b0] sm:$0xff] %vm685_vm3, %v4816_v34 }
 0x5bb   : > { %5916 = vst.msk [vmem:[#allocation3 + $0x1a0] sm:$0xff] %vm1071_vm5, %v5838_v40  ;;  %5217 = vrot.lane.b32.xlu1 %v12744_v50, %s9527_s18 }
 0x5bc   : > { %5665 = vrot.lane.b32.xlu0 %v12823_v1, %s9526_s17 }
 0x5bd   : > { %v5008_v8 = vpop.permute.xlu1 %5007  ;;  %v6046_v16 = vld [vmem:[#allocation3 + $0x198] sm:$0xff] }
 0x5be   : > { %v5456_v11 = vpop.permute.xlu0 %5455  ;;  %5085 = vst.msk [vmem:[#allocation3 + $0x1b0] sm:$0xff] %vm878_vm4, %v5008_v8 }
 0x5bf   : > { %5533 = vst.msk [vmem:[#allocation3 + $0x1b8] sm:$0xff] %vm685_vm3, %v5456_v11  ;;  %4835 = vrot.lane.b32.xlu1 %v12464_v35, %s9525_s16 }
 0x5c0   : > { %5857 = vrot.lane.b32.xlu0 %v12664_v62, %s9527_s18  ;;  %v5575_v62 = vld [vmem:[#allocation2 + $0x1b0] sm:$0xff] }
 0x5c1   : > { %v5200_v6 = vpop.permute.xlu1 %5199 }
 0x5c2   : > { %v5648_v63 = vpop.permute.xlu0 %5647  ;;  %v6047_v15 = vld [vmem:[#allocation3 + $0x1a0] sm:$0xff]  ;;  %5277 = vst.msk [vmem:[#allocation3 + $0x1b0] sm:$0xff] %vm1071_vm5, %v5200_v6 }
 0x5c3   : > { %5725 = vst.msk [vmem:[#allocation3 + $0x1b8] sm:$0xff] %vm878_vm4, %v5648_v63  ;;  %6379 = vmatprep.mubr.f32.mxu1 %v6047_v15  ;;  %5027 = vrot.lane.b32.xlu1 %v12487_v55, %s9526_s17 }
 0x5c4   : > { %5475 = vrot.lane.b32.xlu0 %v12600_v39, %s9525_s16  ;;  %6380 = vmatmul.mubr.f32.gmra.mxu1 %v6046_v16  ;;  %v5767_v39 = vld [vmem:[#allocation2 + $0x1b2] sm:$0xff] }
 0x5c5   : > { %v4818_v35 = vpop.permute.xlu1 %4817 }
 0x5c6   : > { %v5840_v19 = vpop.permute.xlu0 %5839  ;;  %4894 = vst.msk [vmem:[#allocation3 + $0x1c8] sm:$0xff] %vm685_vm3, %v4818_v35 }
 0x5c7   : > { %5917 = vst.msk [vmem:[#allocation3 + $0x1b8] sm:$0xff] %vm1071_vm5, %v5840_v19  ;;  %5219 = vrot.lane.b32.xlu1 %v12763_v58, %s9527_s18 }
 0x5c8   : > { %5667 = vrot.lane.b32.xlu0 %v5575_v62, %s9526_s17 }
 0x5c9   : > { %v5010_v47 = vpop.permute.xlu1 %5009  ;;  %v6049_v26 = vld [vmem:[#allocation3 + $0x1b0] sm:$0xff] }
 0x5ca   : > { %v5458_v55 = vpop.permute.xlu0 %5457  ;;  %5086 = vst.msk [vmem:[#allocation3 + $0x1c8] sm:$0xff] %vm878_vm4, %v5010_v47 }
 0x5cb   : > { %5534 = vst.msk [vmem:[#allocation3 + $0x1d0] sm:$0xff] %vm685_vm3, %v5458_v55  ;;  %4837 = vrot.lane.b32.xlu1 %v12497_v42, %s9525_s16 }
 0x5cc   : > { %v12852_v48 = vpop.f32.mrf.mxu1  ;;  %5859 = vrot.lane.b32.xlu0 %v5767_v39, %s9527_s18 }
 0x5cd   : > { %v5202_v36 = vpop.permute.xlu1 %5201 }
 0x5ce   : > { %v6298_v3 = vpop.f32.mrf.mxu1  ;;  %v5650_v25 = vpop.permute.xlu0 %5649  ;;  %v6050_v50 = vld [vmem:[#allocation3 + $0x1b8] sm:$0xff]  ;;  %5278 = vst.msk [vmem:[#allocation3 + $0x1c8] sm:$0xff] %vm1071_vm5, %v5202_v36 }
 0x5cf   : > { %5726 = vst.msk [vmem:[#allocation3 + $0x1d0] sm:$0xff] %vm878_vm4, %v5650_v25  ;;  %6384 = vmatprep.mubr.f32.mxu1 %v6050_v50  ;;  %5029 = vrot.lane.b32.xlu1 %v4936_v32, %s9526_s17 }
 0x5d0   : > { %5477 = vrot.lane.b32.xlu0 %v12602_v21, %s9525_s16  ;;  %6385 = vmatmul.mubr.f32.gmra.mxu1 %v6049_v26 }
 0x5d1   : > { %v4820_v42 = vpop.permute.xlu1 %4819 }
 0x5d2   : > { %v5842_v12 = vpop.permute.xlu0 %5841  ;;  %4895 = vst.msk [vmem:[#allocation3 + $0x1e0] sm:$0xff] %vm685_vm3, %v4820_v42 }
 0x5d3   : > { %5918 = vst.msk [vmem:[#allocation3 + $0x1d0] sm:$0xff] %vm1071_vm5, %v5842_v12  ;;  %5221 = vrot.lane.b32.xlu1 %v12783_v45, %s9527_s18  ;;  %v8090_v45 = vld [vmem:[#allocation2 + $0x1cc] sm:$0xff] }
 0x5d4   : > { %5669 = vrot.lane.b32.xlu0 %v5576_v10, %s9526_s17  ;;  %8122 = vst.msk [vmem:[#allocation3 + $0x2e0] sm:$0xff] %vm333_vm0, %v8090_v45 }
 0x5d5   : > { %v5012_v21 = vpop.permute.xlu1 %5011  ;;  %v6052_v5 = vld [vmem:[#allocation3 + $0x1c8] sm:$0xff] }
 0x5d6   : > { %v5460_v51 = vpop.permute.xlu0 %5459  ;;  %5087 = vst.msk [vmem:[#allocation3 + $0x1e0] sm:$0xff] %vm878_vm4, %v5012_v21 }
 0x5d7   : > { %5535 = vst.msk [vmem:[#allocation3 + $0x1e8] sm:$0xff] %vm685_vm3, %v5460_v51  ;;  %4839 = vrot.lane.b32.xlu1 %v12520_v57, %s9525_s16 }
 0x5d8   : > { %v12869_v29 = vpop.f32.mrf.mxu1  ;;  %5861 = vrot.lane.b32.xlu0 %v5768_v52, %s9527_s18 }
 0x5d9   : > { %v5204_v44 = vpop.permute.xlu1 %5203 }
 0x5da   : > { %v6303_v58 = vpop.f32.mrf.mxu1  ;;  %v5652_v46 = vpop.permute.xlu0 %5651  ;;  %v6053_v54 = vld [vmem:[#allocation3 + $0x1d0] sm:$0xff]  ;;  %5279 = vst.msk [vmem:[#allocation3 + $0x1e0] sm:$0xff] %vm1071_vm5, %v5204_v44 }
 0x5db   : > { %5727 = vst.msk [vmem:[#allocation3 + $0x1e8] sm:$0xff] %vm878_vm4, %v5652_v46  ;;  %6389 = vmatprep.mubr.f32.mxu1 %v6053_v54  ;;  %5031 = vrot.lane.b32.xlu1 %v12543_v4, %s9526_s17  ;;  %v5769_v4 = vld [vmem:[#allocation2 + $0x1ca] sm:$0xff] }
 0x5dc   : > { %5479 = vrot.lane.b32.xlu0 %v12654_v61, %s9525_s16  ;;  %6390 = vmatmul.mubr.f32.gmra.mxu1 %v6052_v5  ;;  %v6090_v61 = vld [vmem:[#allocation3 + $0x2f8] sm:$0xff] }
 0x5dd   : > { %v4822_v57 = vpop.permute.xlu1 %4821  ;;  %9352 = vmatmul.mubr.msk.f32.gmra.mxu0 %vm333_vm0, %v6090_v61  ;;  %8123 = vst.msk [vmem:[#allocation3 + $0x2f8] sm:$0xff] %vm333_vm0, %v8091_v9 }
 0x5de   : > { %v5844_v18 = vpop.permute.xlu0 %5843  ;;  %4896 = vst.msk [vmem:[#allocation3 + $0x1f8] sm:$0xff] %vm685_vm3, %v4822_v57 }
 0x5df   : > { %5919 = vst.msk [vmem:[#allocation3 + $0x1e8] sm:$0xff] %vm1071_vm5, %v5844_v18  ;;  %5223 = vrot.lane.b32.xlu1 %v12803_v7, %s9527_s18  ;;  %v4938_v7 = vld [vmem:[#allocation2 + $0x174] sm:$0xff] }
 0x5e0   : > { %v12883_v41 = vpop.f32.mrf.mxu1  ;;  %5671 = vrot.lane.b32.xlu0 %v5577_v31, %s9526_s17 }
 0x5e1   : > { %v5014_v23 = vpop.permute.xlu1 %5013  ;;  %v6055_v27 = vld [vmem:[#allocation3 + $0x1e0] sm:$0xff] }
 0x5e2   : > { %v6308_v37 = vpop.f32.mrf.mxu1  ;;  %v5462_v49 = vpop.permute.xlu0 %5461  ;;  %5088 = vst.msk [vmem:[#allocation3 + $0x1f8] sm:$0xff] %vm878_vm4, %v5014_v23 }
 0x5e3   : > { %5536 = vst.msk [vmem:[#allocation3 + $0x200] sm:$0xff] %vm685_vm3, %v5462_v49  ;;  %4841 = vrot.lane.b32.xlu1 %v12553_v56, %s9525_s16 }
 0x5e4   : > { %5863 = vrot.lane.b32.xlu0 %v5769_v4, %s9527_s18 }
 0x5e5   : > { %v5206_v59 = vpop.permute.xlu1 %5205 }
 0x5e6   : > { %v5654_v14 = vpop.permute.xlu0 %5653  ;;  %v6056_v20 = vld [vmem:[#allocation3 + $0x1e8] sm:$0xff]  ;;  %5280 = vst.msk [vmem:[#allocation3 + $0x1f8] sm:$0xff] %vm1071_vm5, %v5206_v59 }
 0x5e7   : > { %5728 = vst.msk [vmem:[#allocation3 + $0x200] sm:$0xff] %vm878_vm4, %v5654_v14  ;;  %6394 = vmatprep.mubr.f32.mxu1 %v6056_v20  ;;  %5033 = vrot.lane.b32.xlu1 %v4938_v7, %s9526_s17 }
 0x5e8   : > { %5481 = vrot.lane.b32.xlu0 %v12656_v30, %s9525_s16  ;;  %6395 = vmatmul.mubr.f32.gmra.mxu1 %v6055_v27  ;;  %v5770_v30 = vld [vmem:[#allocation2 + $0x1d2] sm:$0xff] }
 0x5e9   : > { %v4824_v56 = vpop.permute.xlu1 %4823 }
 0x5ea   : > { %v5846_v2 = vpop.permute.xlu0 %5845  ;;  %4897 = vst.msk [vmem:[#allocation3 + $0x210] sm:$0xff] %vm685_vm3, %v4824_v56 }
 0x5eb   : > { %5920 = vst.msk [vmem:[#allocation3 + $0x200] sm:$0xff] %vm1071_vm5, %v5846_v2  ;;  %5225 = vrot.lane.b32.xlu1 %v12823_v1, %s9527_s18  ;;  %v6845_v2 = vld [vmem:[#allocation2 + $0xa] sm:$0xff] }
 0x5ec   : > { %5673 = vrot.lane.b32.xlu0 %v5578_v53, %s9526_s17  ;;  %v6844_v53 = vld [vmem:[#allocation2 + $0x2] sm:$0xff] }
 0x5ed   : > { %v12903_v33 = vpop.f32.mrf.mxu1  ;;  %v5016_v17 = vpop.permute.xlu1 %5015  ;;  %v6058_v8 = vld [vmem:[#allocation3 + $0x1f8] sm:$0xff] }
 0x5ee   : > { %v5464_v22 = vpop.permute.xlu0 %5463  ;;  %5089 = vst.msk [vmem:[#allocation3 + $0x210] sm:$0xff] %vm878_vm4, %v5016_v17 }
 0x5ef   : > { %v6313_v13 = vpop.f32.mrf.mxu1  ;;  %5537 = vst.msk [vmem:[#allocation3 + $0x218] sm:$0xff] %vm685_vm3, %v5464_v22  ;;  %6910 = vrot.lane.b32.xlu1 %v6845_v2, %s9525_s16 }
 0x5f0   : > { %5865 = vrot.lane.b32.xlu0 %v5770_v30, %s9527_s18 }
 0x5f1   : > { %v5208_v11 = vpop.permute.xlu1 %5207 }
 0x5f2   : > { %v5656_v40 = vpop.permute.xlu0 %5655  ;;  %v6059_v34 = vld [vmem:[#allocation3 + $0x200] sm:$0xff]  ;;  %5281 = vst.msk [vmem:[#allocation3 + $0x210] sm:$0xff] %vm1071_vm5, %v5208_v11 }
 0x5f3   : > { %5729 = vst.msk [vmem:[#allocation3 + $0x218] sm:$0xff] %vm878_vm4, %v5656_v40  ;;  %6399 = vmatprep.mubr.f32.mxu1 %v6059_v34  ;;  %v6846_v40 = vld [vmem:[#allocation2 + $0x1a] sm:$0xff]  ;;  %v6847_v34 = vld [vmem:[#allocation2 + $0x22] sm:$0xff] }
 0x5f4   : > { %v12914_v1 = vpop.f32.mrf.mxu1  ;;  %6400 = vmatmul.mubr.f32.gmra.mxu1 %v6058_v8  ;;  %6908 = vrot.lane.b32.xlu0 %v6844_v53, %s9525_s16 }
 0x5f5   : > { %v4826_v6 = vpop.permute.xlu1 %4825  ;;  %6914 = vrot.lane.b32.xlu1 %v6847_v34, %s9525_s16 }
 0x5f6   : > { %v6318_v63 = vpop.f32.mrf.mxu1  ;;  %v5848_v15 = vpop.permute.xlu0 %5847  ;;  %4898 = vst.msk [vmem:[#allocation3 + $0x228] sm:$0xff] %vm685_vm3, %v4826_v6 }
 0x5f7   : > { %5921 = vst.msk [vmem:[#allocation3 + $0x218] sm:$0xff] %vm1071_vm5, %v5848_v15 }
 0x5f8   : > { %6912 = vrot.lane.b32.xlu0 %v6846_v40, %s9525_s16 }
 0x5f9   : > { %v5018_v62 = vpop.permute.xlu1 %5017  ;;  %v6061_v28 = vld [vmem:[#allocation3 + $0x210] sm:$0xff] }
 0x5fa   : > { %v5466_v16 = vpop.permute.xlu0 %5465  ;;  %5090 = vst.msk [vmem:[#allocation3 + $0x228] sm:$0xff] %vm878_vm4, %v5018_v62 }
 0x5fb   : > { %5538 = vst.msk [vmem:[#allocation3 + $0x230] sm:$0xff] %vm685_vm3, %v5466_v16 }
 0x5fd   : > { %v5210_v43 = vpop.permute.xlu1 %5209 }
 0x5fe   : > { %v5658_v19 = vpop.permute.xlu0 %5657  ;;  %v6062_v35 = vld [vmem:[#allocation3 + $0x218] sm:$0xff]  ;;  %5282 = vst.msk [vmem:[#allocation3 + $0x228] sm:$0xff] %vm1071_vm5, %v5210_v43 }
 0x5ff   : > { %5730 = vst.msk [vmem:[#allocation3 + $0x230] sm:$0xff] %vm878_vm4, %v5658_v19  ;;  %6404 = vmatprep.mubr.f32.mxu1 %v6062_v35 }
 0x600   : > { %v12921_v60 = vpop.f32.mrf.mxu1  ;;  %6405 = vmatmul.mubr.f32.gmra.mxu1 %v6061_v28 }
 0x601   : > { %v4828_v47 = vpop.permute.xlu1 %4827 }
 0x602   : > { %v6323_v39 = vpop.f32.mrf.mxu1  ;;  %v5850_v55 = vpop.permute.xlu0 %5849  ;;  %4899 = vst.msk [vmem:[#allocation3 + $0x240] sm:$0xff] %vm685_vm3, %v4828_v47 }
 0x603   : > { %5922 = vst.msk [vmem:[#allocation3 + $0x230] sm:$0xff] %vm1071_vm5, %v5850_v55 }
 0x605   : > { %v5020_v3 = vpop.permute.xlu1 %5019  ;;  %v6064_v10 = vld [vmem:[#allocation3 + $0x228] sm:$0xff] }
 0x606   : > { %v5468_v0 = vpop.permute.xlu0 %5467  ;;  %5091 = vst.msk [vmem:[#allocation3 + $0x240] sm:$0xff] %vm878_vm4, %v5020_v3 }
 0x607   : > { %5539 = vst.msk [vmem:[#allocation3 + $0x248] sm:$0xff] %vm685_vm3, %v5468_v0 }
 0x608   : > { %v12928_v25 = vpop.f32.mrf.mxu1 }
 0x609   : > { %v5212_v32 = vpop.permute.xlu1 %5211 }
 0x60a   : > { %v6328_v50 = vpop.f32.mrf.mxu1  ;;  %v5660_v36 = vpop.permute.xlu0 %5659  ;;  %v6065_v26 = vld [vmem:[#allocation3 + $0x230] sm:$0xff]  ;;  %5283 = vst.msk [vmem:[#allocation3 + $0x240] sm:$0xff] %vm1071_vm5, %v5212_v32 }
 0x60b   : > { %5731 = vst.msk [vmem:[#allocation3 + $0x248] sm:$0xff] %vm878_vm4, %v5660_v36  ;;  %6409 = vmatprep.mubr.f32.mxu1 %v6065_v26 }
 0x60c   : > { %6410 = vmatmul.mubr.f32.gmra.mxu1 %v6064_v10 }
 0x60d   : > { %v4830_v42 = vpop.permute.xlu1 %4829 }
 0x60e   : > { %v5852_v12 = vpop.permute.xlu0 %5851  ;;  %4900 = vst.msk [vmem:[#allocation3 + $0x258] sm:$0xff] %vm685_vm3, %v4830_v42 }
 0x60f   : > { %5923 = vst.msk [vmem:[#allocation3 + $0x248] sm:$0xff] %vm1071_vm5, %v5852_v12 }
 0x611   : > { %v5022_v51 = vpop.permute.xlu1 %5021  ;;  %v6067_v5 = vld [vmem:[#allocation3 + $0x240] sm:$0xff] }
 0x612   : > { %v5470_v52 = vpop.permute.xlu0 %5469  ;;  %5092 = vst.msk [vmem:[#allocation3 + $0x258] sm:$0xff] %vm878_vm4, %v5022_v51 }
 0x613   : > { %5540 = vst.msk [vmem:[#allocation3 + $0x260] sm:$0xff] %vm685_vm3, %v5470_v52 }
 0x615   : > { %v12935_v21 = vpop.f32.mrf.mxu1  ;;  %v5214_v44 = vpop.permute.xlu1 %5213 }
 0x616   : > { %v5662_v46 = vpop.permute.xlu0 %5661  ;;  %v6068_v54 = vld [vmem:[#allocation3 + $0x248] sm:$0xff]  ;;  %5284 = vst.msk [vmem:[#allocation3 + $0x258] sm:$0xff] %vm1071_vm5, %v5214_v44 }
 0x617   : > { %v6333_v58 = vpop.f32.mrf.mxu1  ;;  %5732 = vst.msk [vmem:[#allocation3 + $0x260] sm:$0xff] %vm878_vm4, %v5662_v46  ;;  %6414 = vmatprep.mubr.f32.mxu1 %v6068_v54 }
 0x618   : > { %6415 = vmatmul.mubr.f32.gmra.mxu1 %v6067_v5 }
 0x619   : > { %v4832_v18 = vpop.permute.xlu1 %4831 }
 0x61a   : > { %v5854_v31 = vpop.permute.xlu0 %5853  ;;  %4901 = vst.msk [vmem:[#allocation3 + $0x270] sm:$0xff] %vm685_vm3, %v4832_v18 }
 0x61b   : > { %5924 = vst.msk [vmem:[#allocation3 + $0x260] sm:$0xff] %vm1071_vm5, %v5854_v31 }
 0x61c   : > { %v12942_v57 = vpop.f32.mrf.mxu1 }
 0x61d   : > { %v5024_v61 = vpop.permute.xlu1 %5023  ;;  %v6070_v23 = vld [vmem:[#allocation3 + $0x258] sm:$0xff] }
 0x61e   : > { %v5472_v38 = vpop.permute.xlu0 %5471  ;;  %v6338_v45 = vpop.f32.mrf.mxu1  ;;  %5093 = vst.msk [vmem:[#allocation3 + $0x270] sm:$0xff] %vm878_vm4, %v5024_v61 }
 0x61f   : > { %5541 = vst.msk [vmem:[#allocation3 + $0x278] sm:$0xff] %vm685_vm3, %v5472_v38 }
 0x621   : > { %v5216_v49 = vpop.permute.xlu1 %5215 }
 0x622   : > { %v5664_v4 = vpop.permute.xlu0 %5663  ;;  %v6071_v37 = vld [vmem:[#allocation3 + $0x260] sm:$0xff]  ;;  %5285 = vst.msk [vmem:[#allocation3 + $0x270] sm:$0xff] %vm1071_vm5, %v5216_v49 }
 0x623   : > { %5733 = vst.msk [vmem:[#allocation3 + $0x278] sm:$0xff] %vm878_vm4, %v5664_v4  ;;  %6419 = vmatprep.mubr.f32.mxu1 %v6071_v37 }
 0x624   : > { %6420 = vmatmul.mubr.f32.gmra.mxu1 %v6070_v23 }
 0x625   : > { %v4834_v14 = vpop.permute.xlu1 %4833 }
 0x626   : > { %v5856_v9 = vpop.permute.xlu0 %5855  ;;  %4902 = vst.msk [vmem:[#allocation3 + $0x288] sm:$0xff] %vm685_vm3, %v4834_v14 }
 0x627   : > { %5925 = vst.msk [vmem:[#allocation3 + $0x278] sm:$0xff] %vm1071_vm5, %v5856_v9  ;;  %v12949_v20 = vpop.f32.mrf.mxu1 }
 0x629   : > { %v6343_v59 = vpop.f32.mrf.mxu1  ;;  %v5026_v7 = vpop.permute.xlu1 %5025  ;;  %v6073_v22 = vld [vmem:[#allocation3 + $0x270] sm:$0xff] }
 0x62a   : > { %v5474_v27 = vpop.permute.xlu0 %5473  ;;  %5094 = vst.msk [vmem:[#allocation3 + $0x288] sm:$0xff] %vm878_vm4, %v5026_v7 }
 0x62b   : > { %5542 = vst.msk [vmem:[#allocation3 + $0x290] sm:$0xff] %vm685_vm3, %v5474_v27  ;;  %v12995_v27 = vpop.f32.mrf.mxu0 }
 0x62d   : > { %v5218_v30 = vpop.permute.xlu1 %5217  ;;  %v12997_v53 = vpop.f32.mrf.mxu0 }
 0x62e   : > { %v5666_v56 = vpop.permute.xlu0 %5665  ;;  %v6074_v13 = vld [vmem:[#allocation3 + $0x278] sm:$0xff]  ;;  %5286 = vst.msk [vmem:[#allocation3 + $0x288] sm:$0xff] %vm1071_vm5, %v5218_v30 }
 0x62f   : > { %5734 = vst.msk [vmem:[#allocation3 + $0x290] sm:$0xff] %vm878_vm4, %v5666_v56  ;;  %6424 = vmatprep.mubr.f32.mxu1 %v6074_v13  ;;  %v13001_v13 = vpop.f32.mrf.mxu0 }
 0x630   : > { %v12958_v17 = vpop.f32.mrf.mxu1  ;;  %6425 = vmatmul.mubr.f32.gmra.mxu1 %v6073_v22 }
 0x631   : > { %v4836_v63 = vpop.permute.xlu1 %4835  ;;  %v13003_v22 = vpop.f32.mrf.mxu0 }
 0x632   : > { %v5858_v11 = vpop.permute.xlu0 %5857  ;;  %v6348_v8 = vpop.f32.mrf.mxu1  ;;  %4903 = vst.msk [vmem:[#allocation3 + $0x2a0] sm:$0xff] %vm685_vm3, %v4836_v63 }
 0x633   : > { %5926 = vst.msk [vmem:[#allocation3 + $0x290] sm:$0xff] %vm1071_vm5, %v5858_v11  ;;  %v13005_v40 = vpop.f32.mrf.mxu0 }
 0x635   : > { %v5028_v6 = vpop.permute.xlu1 %5027  ;;  %v6076_v35 = vld [vmem:[#allocation3 + $0x288] sm:$0xff]  ;;  %v13007_v34 = vpop.f32.mrf.mxu0 }
 0x636   : > { %v5476_v15 = vpop.permute.xlu0 %5475  ;;  %5095 = vst.msk [vmem:[#allocation3 + $0x2a0] sm:$0xff] %vm878_vm4, %v5028_v6 }
 0x637   : > { %5543 = vst.msk [vmem:[#allocation3 + $0x2a8] sm:$0xff] %vm685_vm3, %v5476_v15  ;;  %v13011_v8 = vpop.f32.mrf.mxu0 }
 0x639   : > { %v5220_v19 = vpop.permute.xlu1 %5219  ;;  %v13013_v15 = vpop.f32.mrf.mxu0 }
 0x63a   : > { %v5668_v16 = vpop.permute.xlu0 %5667  ;;  %v6077_v62 = vld [vmem:[#allocation3 + $0x290] sm:$0xff]  ;;  %5287 = vst.msk [vmem:[#allocation3 + $0x2a0] sm:$0xff] %vm1071_vm5, %v5220_v19 }
 0x63b   : > { %5735 = vst.msk [vmem:[#allocation3 + $0x2a8] sm:$0xff] %vm878_vm4, %v5668_v16  ;;  %6429 = vmatprep.mubr.f32.mxu1 %v6077_v62  ;;  %v13015_v6 = vpop.f32.mrf.mxu0 }
 0x63c   : > { %v12968_v43 = vpop.f32.mrf.mxu1  ;;  %6430 = vmatmul.mubr.f32.gmra.mxu1 %v6076_v35  ;;  %v8235_v35 = vld [vmem:[%s14424_s7 + $0x78] sm:$0xff] }
 0x63d   : > { %v4838_v55 = vpop.permute.xlu1 %4837  ;;  %v13017_v16 = vpop.f32.mrf.mxu0  ;;  %8360 = vmatpush1.msra.mxu0 %v8235_v35  ;;  %9442 = vmatpush1.msra.mxu1 %v8235_v35 }
 0x63e   : > { %v5860_v28 = vpop.permute.xlu0 %5859  ;;  %v6353_v39 = vpop.f32.mrf.mxu1  ;;  %4904 = vst.msk [vmem:[#allocation3 + $0x2b8] sm:$0xff] %vm685_vm3, %v4838_v55  ;;  %8361 = vmatprep.subr.mxu0 %v14459_v24  ;;  %v8233_v55 = vld [vmem:[%s14424_s7 + $0x68] sm:$0xff]  ;;  %9411 = vmatprep.subr.mxu1 %v14459_v24 }
 0x63f   : > { %5927 = vst.msk [vmem:[#allocation3 + $0x2a8] sm:$0xff] %vm1071_vm5, %v5860_v28  ;;  %v13021_v19 = vpop.f32.mrf.mxu0  ;;  %v8234_v28 = vld [vmem:[%s14424_s7 + $0x70] sm:$0xff] }
 0x640   : > { %8362 = vmatpush1.msra.mxu0 %v8234_v28  ;;  %9443 = vmatpush1.msra.mxu1 %v8234_v28  ;;  %v6781_v28 = vld [vmem:[#allocation2 + $0x8] sm:$0xff] }
 0x641   : > { %v5030_v0 = vpop.permute.xlu1 %5029  ;;  %v6079_v26 = vld [vmem:[#allocation3 + $0x2a0] sm:$0xff]  ;;  %8363 = vmatprep.subr.mxu0 %v14459_v24  ;;  %9412 = vmatprep.subr.mxu1 %v14459_v24  ;;  %6813 = vst.msk [vmem:[#allocation3 + $0x18] sm:$0xff] %vm333_vm0, %v6781_v28 }
 0x642   : > { %v5478_v47 = vpop.permute.xlu0 %5477  ;;  %5096 = vst.msk [vmem:[#allocation3 + $0x2b8] sm:$0xff] %vm878_vm4, %v5030_v0  ;;  %v8232_v0 = vld [vmem:[%s14424_s7 + $0x60] sm:$0xff]  ;;  %8364 = vmatpush1.msra.mxu0 %v8233_v55  ;;  %9444 = vmatpush1.msra.mxu1 %v8233_v55 }
 0x643   : > { %5544 = vst.msk [vmem:[#allocation3 + $0x2c0] sm:$0xff] %vm685_vm3, %v5478_v47  ;;  %v13034_v47 = vpop.f32.mrf.mxu0  ;;  %8365 = vmatprep.subr.mxu0 %v14459_v24  ;;  %9413 = vmatprep.subr.mxu1 %v14459_v24 }
 0x644   : > { %8366 = vmatpush1.msra.mxu0 %v8232_v0  ;;  %9445 = vmatpush1.msra.mxu1 %v8232_v0 }
 0x645   : > { %v5222_v36 = vpop.permute.xlu1 %5221  ;;  %8367 = vmatprep.subr.mxu0 %v14459_v24  ;;  %9414 = vmatprep.subr.mxu1 %v14459_v24 }
 0x646   : > { %v5670_v3 = vpop.permute.xlu0 %5669  ;;  %v6080_v50 = vld [vmem:[#allocation3 + $0x2a8] sm:$0xff]  ;;  %5288 = vst.msk [vmem:[#allocation3 + $0x2b8] sm:$0xff] %vm1071_vm5, %v5222_v36 }
 0x647   : > { %5736 = vst.msk [vmem:[#allocation3 + $0x2c0] sm:$0xff] %vm878_vm4, %v5670_v3  ;;  %6434 = vmatprep.mubr.f32.mxu1 %v6080_v50  ;;  %v13041_v3 = vpop.f32.mrf.mxu0  ;;  %v8231_v50 = vld [vmem:[%s14424_s7 + $0x58] sm:$0xff] }
 0x648   : > { %v12976_v32 = vpop.f32.mrf.mxu1  ;;  %6435 = vmatmul.mubr.f32.gmra.mxu1 %v6079_v26  ;;  %8368 = vmatpush1.msra.mxu0 %v8231_v50 }
 0x649   : > { %v4840_v42 = vpop.permute.xlu1 %4839  ;;  %9446 = vmatpush1.msra.mxu1 %v8231_v50  ;;  %v13050_v36 = vpop.f32.mrf.mxu0  ;;  %8369 = vmatprep.subr.mxu0 %v14459_v24  ;;  %v6782_v50 = vld [vmem:[#allocation2 + $0x18] sm:$0xff] }
 0x64a   : > { %v5862_v10 = vpop.permute.xlu0 %5861  ;;  %v6358_v12 = vpop.f32.mrf.mxu1  ;;  %4905 = vst.msk [vmem:[#allocation3 + $0x2d0] sm:$0xff] %vm685_vm3, %v4840_v42  ;;  %9415 = vmatprep.subr.mxu1 %v14459_v24  ;;  %v8230_v42 = vld [vmem:[%s14424_s7 + $0x50] sm:$0xff] }
 0x64b   : > { %5928 = vst.msk [vmem:[#allocation3 + $0x2c0] sm:$0xff] %vm1071_vm5, %v5862_v10  ;;  %v13056_v10 = vpop.f32.mrf.mxu0  ;;  %v13061_v12 = vld [vmem:[%s14423_s6] ss:$0 sm:$0xff]  ;;  %8370 = vmatpush1.msra.mxu0 %v8230_v42  ;;  %9447 = vmatpush1.msra.mxu1 %v8230_v42 }
 0x64c   : > { %8371 = vmatprep.subr.mxu0 %v14459_v24  ;;  %9416 = vmatprep.subr.mxu1 %v14459_v24  ;;  %6814 = vst.msk [vmem:[#allocation3 + $0x30] sm:$0xff] %vm333_vm0, %v6782_v50 }
 0x64d   : > { %v5032_v51 = vpop.permute.xlu1 %5031  ;;  %v6082_v44 = vld [vmem:[#allocation3 + $0x2b8] sm:$0xff] }
 0x64e   : > { %v5480_v52 = vpop.permute.xlu0 %5479  ;;  %5097 = vst.msk [vmem:[#allocation3 + $0x2d0] sm:$0xff] %vm878_vm4, %v5032_v51 }
 0x64f   : > { %5545 = vst.msk [vmem:[#allocation3 + $0x2d8] sm:$0xff] %vm685_vm3, %v5480_v52  ;;  %v8229_v52 = vld [vmem:[%s14424_s7 + $0x48] sm:$0xff] }
 0x650   : > { %8372 = vmatpush1.msra.mxu0 %v8229_v52  ;;  %9448 = vmatpush1.msra.mxu1 %v8229_v52 }
 0x651   : > { %v5224_v54 = vpop.permute.xlu1 %5223  ;;  %8373 = vmatprep.subr.mxu0 %v14459_v24  ;;  %9417 = vmatprep.subr.mxu1 %v14459_v24 }
 0x652   : > { %v5672_v58 = vpop.permute.xlu0 %5671  ;;  %v6083_v46 = vld [vmem:[#allocation3 + $0x2c0] sm:$0xff]  ;;  %5289 = vst.msk [vmem:[#allocation3 + $0x2d0] sm:$0xff] %vm1071_vm5, %v5224_v54  ;;  %v6302_v54 = vadd.f32 %v13061_v12, %v12869_v29  ;;  %v6322_v29 = vadd.f32 %v13061_v12, %v12921_v60 }
 0x653   : > { %5737 = vst.msk [vmem:[#allocation3 + $0x2d8] sm:$0xff] %vm878_vm4, %v5672_v58  ;;  %6439 = vmatprep.mubr.f32.mxu1 %v6083_v46  ;;  %v8228_v58 = vld [vmem:[%s14424_s7 + $0x40] sm:$0xff]  ;;  %v6297_v46 = vadd.f32 %v13061_v12, %v12852_v48  ;;  %v8227_v48 = vld [vmem:[%s14424_s7 + $0x38] sm:$0xff] }
 0x654   : > { %v12984_v5 = vpop.f32.mrf.mxu1  ;;  %6440 = vmatmul.mubr.f32.gmra.mxu1 %v6082_v44  ;;  %v13078_v44 = vpop.f32.mrf.mxu0  ;;  %8374 = vmatpush1.msra.mxu0 %v8228_v58 }
 0x655   : > { %v4842_v38 = vpop.permute.xlu1 %4841  ;;  %9449 = vmatpush1.msra.mxu1 %v8228_v58  ;;  %8375 = vmatprep.subr.mxu0 %v14459_v24  ;;  %v13107_v60 = vadd.f32 %v12997_v53, %v6297_v46  ;;  %v6342_v53 = vadd.f32 %v13061_v12, %v12949_v20  ;;  %v6362_v20 = vadd.f32 %v13061_v12, %v12984_v5  ;;  %v6780_v5 = vld [vmem:[#allocation2] sm:$0xff] }
 0x656   : > { %v5864_v31 = vpop.permute.xlu0 %5863  ;;  %v6363_v18 = vpop.f32.mrf.mxu1  ;;  %4906 = vst.msk [vmem:[#allocation3 + $0x2e8] sm:$0xff] %vm685_vm3, %v4842_v38  ;;  %v6317_v38 = vadd.f32 %v13061_v12, %v12914_v1  ;;  %9418 = vmatprep.subr.mxu1 %v14459_v24  ;;  %8376 = vmatpush1.msra.mxu0 %v8227_v48 }
 0x657   : > { %5929 = vst.msk [vmem:[#allocation3 + $0x2d8] sm:$0xff] %vm1071_vm5, %v5864_v31  ;;  %v6307_v31 = vadd.f32 %v13061_v12, %v12883_v41  ;;  %v6312_v18 = vadd.f32 %v13061_v12, %v12903_v33  ;;  %v6327_v41 = vadd.f32 %v13061_v12, %v12928_v25  ;;  %v6332_v33 = vadd.f32 %v13061_v12, %v12935_v21  ;;  %v13097_v1 = vpop.f32.mrf.mxu0 }
 0x658   : > { %v13110_v25 = vadd.f32 %v12995_v27, %v6302_v54  ;;  %9450 = vmatpush1.msra.mxu1 %v8227_v48  ;;  %8377 = vmatprep.subr.mxu0 %v14459_v24  ;;  %6812 = vst.msk [vmem:[#allocation3] sm:$0xff] %vm333_vm0, %v6780_v5 }
 0x659   : > { %v5034_v61 = vpop.permute.xlu1 %5033  ;;  %v6085_v23 = vld [vmem:[#allocation3 + $0x2d0] sm:$0xff]  ;;  %v13113_v21 = vadd.f32 %v13003_v22, %v6307_v31  ;;  %9419 = vmatprep.subr.mxu1 %v14459_v24  ;;  %v6601_v27 = vpop.f32.mrf.mxu0  ;;  %v6357_v22 = vadd.f32 %v13061_v12, %v12976_v32  ;;  %v8223_v32 = vld [vmem:[%s14424_s7 + $0x18] sm:$0xff] }
 0x65a   : > { %v5482_v45 = vpop.permute.xlu0 %5481  ;;  %5098 = vst.msk [vmem:[#allocation3 + $0x2e8] sm:$0xff] %vm878_vm4, %v5034_v61  ;;  %v6337_v61 = vadd.f32 %v13061_v12, %v12942_v57  ;;  %v13116_v57 = vadd.f32 %v13001_v13, %v6312_v18  ;;  %v8225_v13 = vld [vmem:[%s14424_s7 + $0x28] sm:$0xff] }
 0x65b   : > { %5546 = vst.msk [vmem:[#allocation3 + $0x2f0] sm:$0xff] %vm685_vm3, %v5482_v45  ;;  %v6680_v45 = vlaneseq }
 0x65d   : > { %v5226_v49 = vpop.permute.xlu1 %5225 }
 0x65e   : > { %v5674_v4 = vpop.permute.xlu0 %5673  ;;  %v6086_v37 = vld [vmem:[#allocation3 + $0x2d8] sm:$0xff]  ;;  %5290 = vst.msk [vmem:[#allocation3 + $0x2e8] sm:$0xff] %vm1071_vm5, %v5226_v49  ;;  %v6681_v49 = vshrl.u32 %v6680_v45, 7  ;;  %v8220_v45 = vld [vmem:[%s14424_s7] sm:$0xff] }
 0x65f   : > { %5738 = vst.msk [vmem:[#allocation3 + $0x2f0] sm:$0xff] %vm878_vm4, %v5674_v4  ;;  %6444 = vmatprep.mubr.f32.mxu1 %v6086_v37  ;;  %v8226_v4 = vld [vmem:[%s14424_s7 + $0x30] sm:$0xff]  ;;  %v13119_v37 = vadd.f32 %v13007_v34, %v6317_v38 }
 0x660   : > { %v12992_v9 = vpop.f32.mrf.mxu1  ;;  %6445 = vmatmul.mubr.f32.gmra.mxu1 %v6085_v23  ;;  %v13124_v23 = vadd.f32 %v13005_v40, %v6322_v29  ;;  %8378 = vmatpush1.msra.mxu0 %v8226_v4 }
 0x661   : > { %9451 = vmatpush1.msra.mxu1 %v8226_v4  ;;  %8379 = vmatprep.subr.mxu0 %v14459_v24  ;;  %v6367_v34 = vadd.f32 %v13061_v12, %v12992_v9  ;;  %v6911_v52 = vpop.permute.xlu1 %6910 }
 0x662   : > { %v5866_v14 = vpop.permute.xlu0 %5865  ;;  %v6368_v59 = vpop.f32.mrf.mxu1  ;;  %9420 = vmatprep.subr.mxu1 %v14459_v24  ;;  %8380 = vmatpush1.msra.mxu0 %v8225_v13  ;;  %7005 = vst.msk [vmem:[#allocation3 + $0x18] sm:$0xff] %vm685_vm3, %v6911_v52 }
 0x663   : > { %5930 = vst.msk [vmem:[#allocation3 + $0x2f0] sm:$0xff] %vm1071_vm5, %v5866_v14  ;;  %v13127_v14 = vadd.f32 %v13013_v15, %v6327_v41  ;;  %v13130_v59 = vadd.f32 %v13011_v8, %v6332_v33  ;;  %9452 = vmatpush1.msra.mxu1 %v8225_v13  ;;  %v6682_v15 = vsub.s32 7, %v6681_v49  ;;  %8381 = vmatprep.subr.mxu0 %v14459_v24 }
 0x664   : > { %9421 = vmatprep.subr.mxu1 %v14459_v24  ;;  %v6592_v58 = vadd.f32 %v13078_v44, %v6367_v34 }
 0x665   : > { %v6088_v2 = vld [vmem:[#allocation3 + $0x2e8] sm:$0xff] }
 0x66a   : > { %v6089_v7 = vld [vmem:[#allocation3 + $0x2f0] sm:$0xff] }
 0x66b   : > { %6449 = vmatprep.mubr.f32.mxu1 %v6089_v7  ;;  %v13133_v7 = vadd.f32 %v13017_v16, %v6337_v61  ;;  %v6915_v61 = vpop.permute.xlu1 %6914 }
 0x66c   : > { %v12999_v56 = vpop.f32.mrf.mxu1  ;;  %6450 = vmatmul.mubr.f32.gmra.mxu1 %v6088_v2  ;;  %v6347_v2 = vadd.f32 %v13061_v12, %v12958_v17  ;;  %v9335_v17 = vpop.f32.mrf.mxu0 }
 0x66d   : > { %v6372_v8 = vadd.f32 %v13061_v12, %v12999_v56 }
 0x66e   : > { %v6373_v30 = vpop.f32.mrf.mxu1  ;;  %v6572_v55 = vadd.f32 %v13034_v47, %v6347_v2  ;;  %v6587_v47 = vadd.f32 %v13041_v3, %v6362_v20 }
 0x66f   : > { %v6352_v30 = vadd.f32 %v13061_v12, %v12968_v43  ;;  %v8224_v43 = vld [vmem:[%s14424_s7 + $0x20] sm:$0xff]  ;;  %v6597_v46 = vadd.f32 %v13056_v10, %v6372_v8 }
 0x670   : > { %8382 = vmatpush1.msra.mxu0 %v8224_v43  ;;  %9453 = vmatpush1.msra.mxu1 %v8224_v43 }
 0x671   : > { %8383 = vmatprep.subr.mxu0 %v14459_v24  ;;  %9422 = vmatprep.subr.mxu1 %v14459_v24  ;;  %v6577_v42 = vadd.f32 %v13021_v19, %v6352_v30  ;;  %v8221_v19 = vld [vmem:[%s14424_s7 + $0x8] sm:$0xff] }
 0x672   : > { %8384 = vmatpush1.msra.mxu0 %v8223_v32  ;;  %9454 = vmatpush1.msra.mxu1 %v8223_v32 }
 0x673   : > { %8385 = vmatprep.subr.mxu0 %v14459_v24  ;;  %9423 = vmatprep.subr.mxu1 %v14459_v24 }
 0x678   : > { %v13009_v11 = vpop.f32.mrf.mxu1 }
 0x679   : > { %v6377_v9 = vadd.f32 %v13061_v12, %v13009_v11  ;;  %v6909_v11 = vpop.permute.xlu0 %6908 }
 0x67a   : > { %v6378_v63 = vpop.f32.mrf.mxu1  ;;  %7004 = vst.msk [vmem:[#allocation3] sm:$0xff] %vm685_vm3, %v6909_v11 }
 0x67b   : > { %v6602_v3 = vadd.f32 %v6601_v27, %v6377_v9 }
 0x684   : > { %v13019_v62 = vpop.f32.mrf.mxu1 }
 0x685   : > { %v6382_v56 = vadd.f32 %v13061_v12, %v13019_v62  ;;  %v8222_v62 = vld [vmem:[%s14424_s7 + $0x10] sm:$0xff] }
 0x686   : > { %v6383_v39 = vpop.f32.mrf.mxu1  ;;  %8386 = vmatpush1.msra.mxu0 %v8222_v62  ;;  %9455 = vmatpush1.msra.mxu1 %v8222_v62 }
 0x687   : > { %v6567_v39 = vadd.f32 %v13015_v6, %v6342_v53  ;;  %v6582_v6 = vadd.f32 %v13050_v36, %v6357_v22  ;;  %v6607_v36 = vadd.f32 %v13097_v1, %v6382_v56  ;;  %8387 = vmatprep.subr.mxu0 %v14459_v24  ;;  %v6913_v1 = vpop.permute.xlu0 %6912  ;;  %9424 = vmatprep.subr.mxu1 %v14459_v24 }
 0x688   : > { %8388 = vmatpush1.msra.mxu0 %v8221_v19  ;;  %7006 = vst.msk [vmem:[#allocation3 + $0x30] sm:$0xff] %vm685_vm3, %v6913_v1  ;;  %9456 = vmatpush1.msra.mxu1 %v8221_v19 }
 0x689   : > { %8389 = vmatprep.subr.mxu0 %v14459_v24  ;;  %9425 = vmatprep.subr.mxu1 %v14459_v24 }
 0x68a   : > { %8390 = vmatpush1.msra.mxu0 %v8220_v45  ;;  %9457 = vmatpush1.msra.mxu1 %v8220_v45 }
 0x68b   : > { %8391 = vmatprep.subr.mxu0 %v14459_v24  ;;  %9426 = vmatprep.subr.mxu1 %v14459_v24 }
 0x690   : > { %v13054_v26 = vpop.f32.mrf.mxu1 }
 0x691   : > { %v6387_v16 = vadd.f32 %v13061_v12, %v13054_v26  ;;  %v6783_v26 = vld [vmem:[#allocation2 + $0x20] sm:$0xff] }
 0x692   : > { %v6388_v51 = vpop.f32.mrf.mxu1  ;;  %6815 = vst.msk [vmem:[#allocation3 + $0x48] sm:$0xff] %vm333_vm0, %v6783_v26 }
 0x693   : > { %v6611_v51 = vpop.f32.mrf.mxu0  ;;  %7007 = vst.msk [vmem:[#allocation3 + $0x48] sm:$0xff] %vm685_vm3, %v6915_v61 }
 0x694   : > { %v6612_v31 = vadd.f32 %v6611_v51, %v6387_v16 }
 0x695   : > { %v13245_v43 = vpop.f32.mrf.mxu0 }
 0x69c   : > { %v6391_v40 = vpop.f32.mrf.mxu1 }
 0x69d   : > { %v6392_v63 = vadd.f32 %v13061_v12, %v6391_v40 }
 0x69e   : > { %v6393_v35 = vpop.f32.mrf.mxu1 }
 0x69f   : > { %v6617_v0 = vadd.f32 %v9335_v17, %v6392_v63  ;;  %v8250_v63 = vld [vmem:[%s14424_s7 + $0xf0] sm:$0xff] }
 0x6a1   : > { %v13186_v54 = vrot.slane %v6617_v0, %v6682_v15  ;;  %v8249_v15 = vld [vmem:[%s14424_s7 + $0xe8] sm:$0xff] }
 0x6a3   : > { %v6703_v10 = vmul.f32 %v13186_v54, %v6617_v0  ;;  %v6684_v44 = vmul.f32 %v13186_v54, %v13107_v60  ;;  %v6685_v18 = vmul.f32 %v13186_v54, %v13110_v25  ;;  %v6686_v38 = vmul.f32 %v13186_v54, %v13113_v21  ;;  %v8248_v0 = vld [vmem:[%s14424_s7 + $0xe0] sm:$0xff] }
 0x6a4   : > { %v6687_v48 = vmul.f32 %v13186_v54, %v13116_v57  ;;  %v6688_v29 = vmul.f32 %v13186_v54, %v13119_v37  ;;  %v6689_v41 = vmul.f32 %v13186_v54, %v13124_v23  ;;  %v6690_v33 = vmul.f32 %v13186_v54, %v13127_v14  ;;  %v8251_v57 = vld [vmem:[%s14424_s7 + $0xf8] sm:$0xff] }
 0x6a5   : > { %v6735_v4 = vmax.f32 %v6703_v10, 0.0  ;;  %v6691_v60 = vmul.f32 %v13186_v54, %v13130_v59  ;;  %v6692_v25 = vmul.f32 %v13186_v54, %v13133_v7  ;;  %v6693_v21 = vmul.f32 %v13186_v54, %v6567_v39  ;;  %8392 = vmatpush2.msra.mxu0 %v8251_v57  ;;  %9458 = vmatpush2.msra.mxu1 %v8251_v57 }
 0x6a6   : > { %v6694_v37 = vmul.f32 %v13186_v54, %v6572_v55  ;;  %v6695_v49 = vmul.f32 %v13186_v54, %v6577_v42  ;;  %v6696_v23 = vmul.f32 %v13186_v54, %v6582_v6  ;;  %v6697_v14 = vmul.f32 %v13186_v54, %v6587_v47  ;;  %8393 = vmatprep.subr.mxu0 %v14459_v24  ;;  %v8247_v6 = vld [vmem:[%s14424_s7 + $0xd8] sm:$0xff]  ;;  %v6621_v47 = vpop.f32.mrf.mxu0 }
 0x6a7   : > { %v6698_v59 = vmul.f32 %v13186_v54, %v6592_v58  ;;  %v6699_v27 = vmul.f32 %v13186_v54, %v6597_v46  ;;  %v6700_v7 = vmul.f32 %v13186_v54, %v6602_v3  ;;  %v6701_v53 = vmul.f32 %v13186_v54, %v6607_v36  ;;  %6767 = vst.msk [vmem:[#allocation2 + $0x112] sm:$0xff] %vm333_vm0, %v6735_v4  ;;  %v8246_v46 = vld [vmem:[%s14424_s7 + $0xd0] sm:$0xff] }
 0x6a8   : > { %v6702_v2 = vmul.f32 %v13186_v54, %v6612_v31  ;;  %v6716_v13 = vmax.f32 %v6684_v44, 0.0  ;;  %v6717_v30 = vmax.f32 %v6685_v18, 0.0  ;;  %v6718_v22 = vmax.f32 %v6686_v38, 0.0  ;;  %v6396_v20 = vpop.f32.mrf.mxu1  ;;  %8394 = vmatpush2.msra.mxu0 %v8250_v63  ;;  %9427 = vmatprep.subr.mxu1 %v14459_v24 }
 0x6a9   : > { %v6719_v40 = vmax.f32 %v6687_v48, 0.0  ;;  %v6720_v17 = vmax.f32 %v6688_v29, 0.0  ;;  %v6721_v34 = vmax.f32 %v6689_v41, 0.0  ;;  %v6722_v8 = vmax.f32 %v6690_v33, 0.0  ;;  %8395 = vmatprep.subr.mxu0 %v14459_v24  ;;  %9459 = vmatpush2.msra.mxu1 %v8250_v63 }
 0x6aa   : > { %v6723_v32 = vmax.f32 %v6691_v60, 0.0  ;;  %v6724_v5 = vmax.f32 %v6692_v25, 0.0  ;;  %v6725_v9 = vmax.f32 %v6693_v21, 0.0  ;;  %v6726_v56 = vmax.f32 %v6694_v37, 0.0  ;;  %6748 = vst.msk [vmem:[#allocation2 + $0x32] sm:$0xff] %vm333_vm0, %v6716_v13  ;;  %6749 = vst.msk [vmem:[#allocation2 + $0x3a] sm:$0xff] %vm333_vm0, %v6717_v30  ;;  %v6398_v16 = vpop.f32.mrf.mxu1  ;;  %8396 = vmatpush2.msra.mxu0 %v8249_v15  ;;  %9428 = vmatprep.subr.mxu1 %v14459_v24 }
 0x6ab   : > { %6750 = vst.msk [vmem:[#allocation2 + $0x4a] sm:$0xff] %vm333_vm0, %v6718_v22  ;;  %v6727_v35 = vmax.f32 %v6695_v49, 0.0  ;;  %v6728_v28 = vmax.f32 %v6696_v23, 0.0  ;;  %v6729_v39 = vmax.f32 %v6697_v14, 0.0  ;;  %v6730_v55 = vmax.f32 %v6698_v59, 0.0  ;;  %6751 = vst.msk [vmem:[#allocation2 + $0x52] sm:$0xff] %vm333_vm0, %v6719_v40  ;;  %8397 = vmatprep.subr.mxu0 %v14459_v24  ;;  %9460 = vmatpush2.msra.mxu1 %v8249_v15  ;;  %v13382_v40 = vpop.f32.mrf.mxu0 }
 0x6ac   : > { %6752 = vst.msk [vmem:[#allocation2 + $0x62] sm:$0xff] %vm333_vm0, %v6720_v17  ;;  %6753 = vst.msk [vmem:[#allocation2 + $0x6a] sm:$0xff] %vm333_vm0, %v6721_v34  ;;  %v6731_v11 = vmax.f32 %v6699_v27, 0.0  ;;  %v6732_v62 = vmax.f32 %v6700_v7, 0.0  ;;  %v6733_v50 = vmax.f32 %v6701_v53, 0.0  ;;  %v6734_v26 = vmax.f32 %v6702_v2, 0.0  ;;  %8398 = vmatpush2.msra.mxu0 %v8248_v0  ;;  %9429 = vmatprep.subr.mxu1 %v14459_v24 }
 0x6ad   : > { %6754 = vst.msk [vmem:[#allocation2 + $0x7a] sm:$0xff] %vm333_vm0, %v6722_v8  ;;  %6755 = vst.msk [vmem:[#allocation2 + $0x82] sm:$0xff] %vm333_vm0, %v6723_v32  ;;  %v6397_v42 = vadd.f32 %v13061_v12, %v6396_v20  ;;  %8399 = vmatprep.subr.mxu0 %v14459_v24  ;;  %9461 = vmatpush2.msra.mxu1 %v8248_v0  ;;  %v8245_v25 = vld [vmem:[%s14424_s7 + $0xc8] sm:$0xff]  ;;  %v8244_v21 = vld [vmem:[%s14424_s7 + $0xc0] sm:$0xff]  ;;  %v6631_v16 = vpop.f32.mrf.mxu0 }
 0x6ae   : > { %6756 = vst.msk [vmem:[#allocation2 + $0x92] sm:$0xff] %vm333_vm0, %v6724_v5  ;;  %6757 = vst.msk [vmem:[#allocation2 + $0x9a] sm:$0xff] %vm333_vm0, %v6725_v9  ;;  %v13277_v52 = vld [vmem:[#allocation2 + $0x114] sm:$0xff]  ;;  %8400 = vmatpush2.msra.mxu0 %v8247_v6  ;;  %9430 = vmatprep.subr.mxu1 %v14459_v24  ;;  %v7036_v17 = vld [vmem:[#allocation2 + $0x4] sm:$0xff] }
 0x6af   : > { %6758 = vst.msk [vmem:[#allocation2 + $0xaa] sm:$0xff] %vm333_vm0, %v6726_v56  ;;  %6759 = vst.msk [vmem:[#allocation2 + $0xb2] sm:$0xff] %vm333_vm0, %v6727_v35  ;;  %v7439_v51 = vld [vmem:[#allocation2 + $0x112] sm:$0xff]  ;;  %v6622_v58 = vadd.f32 %v6621_v47, %v6397_v42  ;;  %8401 = vmatprep.subr.mxu0 %v14459_v24  ;;  %9462 = vmatpush2.msra.mxu1 %v8247_v6  ;;  %v8241_v15 = vld [vmem:[%s14424_s7 + $0xa8] sm:$0xff] }
 0x6b0   : > { %6760 = vst.msk [vmem:[#allocation2 + $0xc2] sm:$0xff] %vm333_vm0, %v6728_v28  ;;  %6761 = vst.msk [vmem:[#allocation2 + $0xca] sm:$0xff] %vm333_vm0, %v6729_v39  ;;  %8402 = vmatpush2.msra.mxu0 %v8246_v46  ;;  %9431 = vmatprep.subr.mxu1 %v14459_v24  ;;  %v8243_v14 = vld [vmem:[%s14424_s7 + $0xb8] sm:$0xff]  ;;  %v8242_v30 = vld [vmem:[%s14424_s7 + $0xb0] sm:$0xff] }
 0x6b1   : > { %6762 = vst.msk [vmem:[#allocation2 + $0xda] sm:$0xff] %vm333_vm0, %v6730_v55  ;;  %6763 = vst.msk [vmem:[#allocation2 + $0xe2] sm:$0xff] %vm333_vm0, %v6731_v11  ;;  %v6704_v19 = vmul.f32 %v13186_v54, %v6622_v58  ;;  %v6849_v3 = vld [vmem:[#allocation2 + $0x3a] sm:$0xff]  ;;  %v6848_v36 = vld [vmem:[#allocation2 + $0x32] sm:$0xff]  ;;  %8403 = vmatprep.subr.mxu0 %v14459_v24  ;;  %9463 = vmatpush2.msra.mxu1 %v8246_v46 }
 0x6b2   : > { %6764 = vst.msk [vmem:[#allocation2 + $0xf2] sm:$0xff] %vm333_vm0, %v6732_v62  ;;  %6765 = vst.msk [vmem:[#allocation2 + $0xfa] sm:$0xff] %vm333_vm0, %v6733_v50  ;;  %v6850_v31 = vld [vmem:[#allocation2 + $0x4a] sm:$0xff]  ;;  %6918 = vrot.lane.b32.xlu1 %v6849_v3, %s9525_s16  ;;  %6916 = vrot.lane.b32.xlu0 %v6848_v36, %s9525_s16  ;;  %v6851_v10 = vld [vmem:[#allocation2 + $0x52] sm:$0xff] }
 0x6b3   : > { %6766 = vst.msk [vmem:[#allocation2 + $0x10a] sm:$0xff] %vm333_vm0, %v6734_v26  ;;  %8107 = vst.msk [vmem:[#allocation3 + $0x178] sm:$0xff] %vm333_vm0, %v13277_v52  ;;  %v6736_v44 = vmax.f32 %v6704_v19, 0.0  ;;  %v13295_v18 = vld [vmem:[#allocation2 + $0x60] sm:$0xff]  ;;  %v13298_v45 = vld [vmem:[#allocation2 + $0x30] sm:$0xff]  ;;  %8404 = vmatpush2.msra.mxu0 %v8245_v25  ;;  %9432 = vmatprep.subr.mxu1 %v14459_v24 }
 0x6b4   : > { %7471 = vst.msk [vmem:[#allocation3 + $0x1d0] sm:$0xff] %vm333_vm0, %v7439_v51  ;;  %7452 = vst.msk [vmem:[#allocation3 + $0x8] sm:$0xff] %vm333_vm0, %v6848_v36  ;;  %v6401_v38 = vpop.f32.mrf.mxu1  ;;  %v13300_v48 = vld [vmem:[#allocation2 + $0x68] sm:$0xff]  ;;  %v13308_v41 = vld [vmem:[#allocation2 + $0x38] sm:$0xff]  ;;  %8405 = vmatprep.subr.mxu0 %v14459_v24  ;;  %9464 = vmatpush2.msra.mxu1 %v8245_v25 }
 0x6b5   : > { %7453 = vst.msk [vmem:[#allocation3 + $0x20] sm:$0xff] %vm333_vm0, %v6849_v3  ;;  %7454 = vst.msk [vmem:[#allocation3 + $0x38] sm:$0xff] %vm333_vm0, %v6850_v31  ;;  %v6402_v29 = vadd.f32 %v13061_v12, %v6401_v38  ;;  %v13310_v33 = vld [vmem:[#allocation2 + $0x78] sm:$0xff]  ;;  %v13318_v61 = vld [vmem:[#allocation2 + $0x48] sm:$0xff]  ;;  %8406 = vmatpush2.msra.mxu0 %v8244_v21  ;;  %9433 = vmatprep.subr.mxu1 %v14459_v24 }
 0x6b6   : > { %7455 = vst.msk [vmem:[#allocation3 + $0x50] sm:$0xff] %vm333_vm0, %v6851_v10  ;;  %6820 = vst.msk [vmem:[#allocation3 + $0xc0] sm:$0xff] %vm333_vm0, %v13295_v18  ;;  %6922 = vrot.lane.b32.xlu1 %v6851_v10, %s9525_s16  ;;  %6920 = vrot.lane.b32.xlu0 %v6850_v31, %s9525_s16  ;;  %v6403_v1 = vpop.f32.mrf.mxu1  ;;  %v13322_v4 = vld [vmem:[#allocation2 + $0x50] sm:$0xff]  ;;  %v13341_v49 = vld [vmem:[#allocation2 + $0x62] sm:$0xff] }
 0x6b7   : > { %6768 = vst.msk [vmem:[#allocation2 + $0x122] sm:$0xff] %vm333_vm0, %v6736_v44  ;;  %6816 = vst.msk [vmem:[#allocation3 + $0x60] sm:$0xff] %vm333_vm0, %v13298_v45  ;;  %v6627_v60 = vadd.f32 %v13245_v43, %v6402_v29  ;;  %v13339_v37 = vld [vmem:[#allocation2 + $0x6a] sm:$0xff]  ;;  %v13344_v23 = vld [vmem:[#allocation2 + $0x82] sm:$0xff]  ;;  %8407 = vmatprep.subr.mxu0 %v14459_v24  ;;  %9465 = vmatpush2.msra.mxu1 %v8244_v21 }
 0x6b8   : > { %6821 = vst.msk [vmem:[#allocation3 + $0xd8] sm:$0xff] %vm333_vm0, %v13300_v48  ;;  %6817 = vst.msk [vmem:[#allocation3 + $0x78] sm:$0xff] %vm333_vm0, %v13308_v41  ;;  %v13354_v59 = vld [vmem:[#allocation2 + $0x92] sm:$0xff]  ;;  %v13358_v7 = vld [vmem:[#allocation2 + $0x9a] sm:$0xff]  ;;  %8408 = vmatpush2.msra.mxu0 %v8243_v14  ;;  %9434 = vmatprep.subr.mxu1 %v14459_v24 }
 0x6b9   : > { %6822 = vst.msk [vmem:[#allocation3 + $0xf0] sm:$0xff] %vm333_vm0, %v13310_v33  ;;  %6819 = vst.msk [vmem:[#allocation3 + $0xa8] sm:$0xff] %vm333_vm0, %v13322_v4  ;;  %v6705_v57 = vmul.f32 %v13186_v54, %v6627_v60  ;;  %v13362_v53 = vld [vmem:[#allocation2 + $0x34] sm:$0xff]  ;;  %v13367_v13 = vld [vmem:[#allocation2 + $0xaa] sm:$0xff]  ;;  %8409 = vmatprep.subr.mxu0 %v14459_v24  ;;  %9466 = vmatpush2.msra.mxu1 %v8243_v14 }
 0x6ba   : > { %6818 = vst.msk [vmem:[#allocation3 + $0x90] sm:$0xff] %vm333_vm0, %v13318_v61  ;;  %6926 = vrot.lane.b32.xlu1 %v13339_v37, %s9525_s16  ;;  %6924 = vrot.lane.b32.xlu0 %v13341_v49, %s9525_s16  ;;  %7459 = vst.msk [vmem:[#allocation3 + $0xb0] sm:$0xff] %vm333_vm0, %v13344_v23  ;;  %v13364_v2 = vld [vmem:[#allocation2 + $0x7a] sm:$0xff]  ;;  %v13376_v22 = vld [vmem:[#allocation2 + $0x84] sm:$0xff] }
 0x6bb   : > { %v6737_v27 = vmax.f32 %v6705_v57, 0.0  ;;  %7460 = vst.msk [vmem:[#allocation3 + $0xc8] sm:$0xff] %vm333_vm0, %v13354_v59  ;;  %7461 = vst.msk [vmem:[#allocation3 + $0xe0] sm:$0xff] %vm333_vm0, %v13358_v7  ;;  %v13378_v20 = vld [vmem:[#allocation2 + $0xb2] sm:$0xff]  ;;  %v13396_v8 = vld [vmem:[#allocation2 + $0xc2] sm:$0xff]  ;;  %8410 = vmatpush2.msra.mxu0 %v8242_v30  ;;  %9435 = vmatprep.subr.mxu1 %v14459_v24 }
 0x6bc   : > { %7462 = vst.msk [vmem:[#allocation3 + $0xf8] sm:$0xff] %vm333_vm0, %v13367_v13  ;;  %7463 = vst.msk [vmem:[#allocation3 + $0x110] sm:$0xff] %vm333_vm0, %v13378_v20  ;;  %v13394_v34 = vld [vmem:[#allocation2 + $0x94] sm:$0xff]  ;;  %v13401_v43 = vld [vmem:[#allocation2 + $0x9c] sm:$0xff]  ;;  %8411 = vmatprep.subr.mxu0 %v14459_v24  ;;  %9467 = vmatpush2.msra.mxu1 %v8242_v30 }
 0x6bd   : > { %6769 = vst.msk [vmem:[#allocation2 + $0x12a] sm:$0xff] %vm333_vm0, %v6737_v27  ;;  %8095 = vst.msk [vmem:[#allocation3 + $0x58] sm:$0xff] %vm333_vm0, %v13376_v22  ;;  %v8240_v5 = vld [vmem:[%s14424_s7 + $0xa0] sm:$0xff]  ;;  %v13413_v56 = vld [vmem:[#allocation2 + $0xca] sm:$0xff]  ;;  %8412 = vmatpush2.msra.mxu0 %v8241_v15  ;;  %9436 = vmatprep.subr.mxu1 %v14459_v24 }
 0x6be   : > { %7548 = vrot.lane.b32.xlu1 %v13362_v53, %s9525_s16  ;;  %6928 = vrot.lane.b32.xlu0 %v13364_v2, %s9525_s16  ;;  %8096 = vst.msk [vmem:[#allocation3 + $0x70] sm:$0xff] %vm333_vm0, %v13394_v34  ;;  %7464 = vst.msk [vmem:[#allocation3 + $0x128] sm:$0xff] %vm333_vm0, %v13396_v8  ;;  %v7424_v9 = vld [vmem:[#allocation2 + $0x62] sm:$0xff]  ;;  %v13421_v28 = vld [vmem:[#allocation2 + $0xda] sm:$0xff] }
 0x6bf   : > { %8097 = vst.msk [vmem:[#allocation3 + $0x88] sm:$0xff] %vm333_vm0, %v13401_v43  ;;  %7456 = vst.msk [vmem:[#allocation3 + $0x68] sm:$0xff] %vm333_vm0, %v7424_v9  ;;  %v13423_v39 = vld [vmem:[#allocation2 + $0xac] sm:$0xff]  ;;  %v13425_v55 = vld [vmem:[#allocation2 + $0xb4] sm:$0xff]  ;;  %8413 = vmatprep.subr.mxu0 %v14459_v24  ;;  %9468 = vmatpush2.msra.mxu1 %v8241_v15 }
 0x6c0   : > { %v6406_v63 = vpop.f32.mrf.mxu1  ;;  %7465 = vst.msk [vmem:[#allocation3 + $0x140] sm:$0xff] %vm333_vm0, %v13413_v56  ;;  %v7425_v11 = vld [vmem:[#allocation2 + $0x6a] sm:$0xff]  ;;  %8098 = vst.msk [vmem:[#allocation3 + $0xa0] sm:$0xff] %vm333_vm0, %v13423_v39  ;;  %8414 = vmatpush2.msra.mxu0 %v8240_v5  ;;  %v8239_v26 = vld [vmem:[%s14424_s7 + $0x98] sm:$0xff]  ;;  %9437 = vmatprep.subr.mxu1 %v14459_v24 }
 0x6c1   : > { %v6407_v32 = vadd.f32 %v13061_v12, %v6406_v63  ;;  %8099 = vst.msk [vmem:[#allocation3 + $0xb8] sm:$0xff] %vm333_vm0, %v13425_v55  ;;  %7466 = vst.msk [vmem:[#allocation3 + $0x158] sm:$0xff] %vm333_vm0, %v13421_v28  ;;  %v13446_v42 = vld [vmem:[#allocation2 + $0xc4] sm:$0xff]  ;;  %v13452_v6 = vld [vmem:[#allocation2 + $0xcc] sm:$0xff]  ;;  %8415 = vmatprep.subr.mxu0 %v14459_v24  ;;  %9469 = vmatpush2.msra.mxu1 %v8240_v5 }
 0x6c2   : > { %7100 = vrot.lane.b32.xlu1 %v7036_v17, %s9526_s17  ;;  %7740 = vrot.lane.b32.xlu0 %v13295_v18, %s9526_s17  ;;  %v6408_v35 = vpop.f32.mrf.mxu1  ;;  %7457 = vst.msk [vmem:[#allocation3 + $0x80] sm:$0xff] %vm333_vm0, %v7425_v11  ;;  %8100 = vst.msk [vmem:[#allocation3 + $0xd0] sm:$0xff] %vm333_vm0, %v13446_v42  ;;  %v13458_v51 = vld [vmem:[#allocation2 + $0xdc] sm:$0xff]  ;;  %v8238_v19 = vld [vmem:[%s14424_s7 + $0x90] sm:$0xff] }
 0x6c3   : > { %v6632_v0 = vadd.f32 %v6631_v16, %v6407_v32  ;;  %v7426_v58 = vld [vmem:[#allocation2 + $0x7a] sm:$0xff]  ;;  %8101 = vst.msk [vmem:[#allocation3 + $0xe8] sm:$0xff] %vm333_vm0, %v13452_v6  ;;  %8416 = vmatpush2.msra.mxu0 %v8239_v26  ;;  %v13468_v3 = vld [vmem:[#allocation2 + $0xe4] sm:$0xff]  ;;  %8102 = vst.msk [vmem:[#allocation3 + $0x100] sm:$0xff] %vm333_vm0, %v13458_v51  ;;  %9438 = vmatprep.subr.mxu1 %v14459_v24 }
 0x6c4   : > { %v13436_v62 = vld [vmem:[#allocation2 + $0x128] sm:$0xff]  ;;  %v13462_v46 = vld [vmem:[#allocation2 + $0x3c] sm:$0xff]  ;;  %7458 = vst.msk [vmem:[#allocation3 + $0x98] sm:$0xff] %vm333_vm0, %v7426_v58  ;;  %8417 = vmatprep.subr.mxu0 %v14459_v24  ;;  %v13478_v10 = vld [vmem:[#allocation2 + $0xf4] sm:$0xff]  ;;  %9470 = vmatpush2.msra.mxu1 %v8239_v26 }
 0x6c5   : > { %v6706_v50 = vmul.f32 %v13186_v54, %v6632_v0  ;;  %6837 = vst.msk [vmem:[#allocation3 + $0x258] sm:$0xff] %vm333_vm0, %v13436_v62  ;;  %v7037_v36 = vld [vmem:[#allocation2 + $0xc] sm:$0xff]  ;;  %v13480_v44 = vld [vmem:[#allocation2 + $0x122] sm:$0xff]  ;;  %8103 = vst.msk [vmem:[#allocation3 + $0x118] sm:$0xff] %vm333_vm0, %v13468_v3  ;;  %8418 = vmatpush2.msra.mxu0 %v8238_v19  ;;  %9439 = vmatprep.subr.mxu1 %v14459_v24 }
 0x6c6   : > { %7292 = vrot.lane.b32.xlu1 %v13298_v45, %s9527_s18  ;;  %7932 = vrot.lane.b32.xlu0 %v13341_v49, %s9527_s18  ;;  %v8237_v31 = vld [vmem:[%s14424_s7 + $0x88] sm:$0xff]  ;;  %v13488_v38 = vld [vmem:[#allocation2 + $0xfc] sm:$0xff]  ;;  %8104 = vst.msk [vmem:[#allocation3 + $0x130] sm:$0xff] %vm333_vm0, %v13478_v10  ;;  %7472 = vst.msk [vmem:[#allocation3 + $0x1e8] sm:$0xff] %vm333_vm0, %v13480_v44 }
 0x6c7   : > { %v6738_v47 = vmax.f32 %v6706_v50, 0.0  ;;  %v13490_v45 = vld [vmem:[#allocation2 + $0x12a] sm:$0xff]  ;;  %8105 = vst.msk [vmem:[#allocation3 + $0x148] sm:$0xff] %vm333_vm0, %v13488_v38  ;;  %8419 = vmatprep.subr.mxu0 %v14459_v24  ;;  %v8062_v57 = vld [vmem:[#allocation2 + $0x7c] sm:$0xff]  ;;  %9471 = vmatpush2.msra.mxu1 %v8238_v19  ;;  %v7436_v50 = vld [vmem:[#allocation2 + $0xf2] sm:$0xff] }
 0x6c8   : > { %v13492_v29 = vld [vmem:[#allocation2 + $0x10c] sm:$0xff]  ;;  %v13498_v1 = vld [vmem:[#allocation2 + $0x124] sm:$0xff]  ;;  %7473 = vst.msk [vmem:[#allocation3 + $0x200] sm:$0xff] %vm333_vm0, %v13490_v45  ;;  %8420 = vmatpush2.msra.mxu0 %v8237_v31  ;;  %8094 = vst.msk [vmem:[#allocation3 + $0x40] sm:$0xff] %vm333_vm0, %v8062_v57  ;;  %9440 = vmatprep.subr.mxu1 %v14459_v24 }
 0x6c9   : > { %6770 = vst.msk [vmem:[#allocation2 + $0x13a] sm:$0xff] %vm333_vm0, %v6738_v47  ;;  %v8060_v60 = vld [vmem:[#allocation2 + $0x64] sm:$0xff]  ;;  %v8061_v25 = vld [vmem:[#allocation2 + $0x6c] sm:$0xff]  ;;  %8106 = vst.msk [vmem:[#allocation3 + $0x160] sm:$0xff] %vm333_vm0, %v13492_v29  ;;  %8421 = vmatprep.subr.mxu0 %v14459_v24  ;;  %9472 = vmatpush2.msra.mxu1 %v8237_v31 }
 0x6ca   : > { %7742 = vrot.lane.b32.xlu1 %v13300_v48, %s9526_s17  ;;  %7550 = vrot.lane.b32.xlu0 %v13462_v46, %s9525_s16  ;;  %8092 = vst.msk [vmem:[#allocation3 + $0x10] sm:$0xff] %vm333_vm0, %v8060_v60  ;;  %8093 = vst.msk [vmem:[#allocation3 + $0x28] sm:$0xff] %vm333_vm0, %v8061_v25  ;;  %v8236_v14 = vld [vmem:[%s14424_s7 + $0x80] sm:$0xff]  ;;  %v13517_v27 = vld [vmem:[#allocation2 + $0x12c] sm:$0xff] }
 0x6cb   : > { %8108 = vst.msk [vmem:[#allocation3 + $0x190] sm:$0xff] %vm333_vm0, %v13498_v1  ;;  %14481 = vst [vmem:[#allocation4_spill] sm:$0xff] %v13517_v27  ;;  %v6791_v17 = vld [vmem:[#allocation2 + $0x80] sm:$0xff]  ;;  %v6792_v15 = vld [vmem:[#allocation2 + $0x90] sm:$0xff]  ;;  %8422 = vmatpush2.msra.mxu0 %v8236_v14  ;;  %9441 = vmatprep.subr.mxu1 %v14459_v24  ;;  %v9344_v24 = vpop.f32.mrf.mxu0 }
 0x6cc   : > { %v6411_v21 = vpop.f32.mrf.mxu1  ;;  %8109 = vst.msk [vmem:[#allocation3 + $0x1a8] sm:$0xff] %vm333_vm0, %v13517_v27  ;;  %6823 = vst.msk [vmem:[#allocation3 + $0x108] sm:$0xff] %vm333_vm0, %v6791_v17  ;;  %v13534_v9 = vld [vmem:[#allocation2 + $0x4c] sm:$0xff]  ;;  %9473 = vmatpush2.msra.mxu1 %v8236_v14  ;;  %v6793_v16 = vld [vmem:[#allocation2 + $0x98] sm:$0xff] }
 0x6cd   : > { %v6412_v49 = vadd.f32 %v13061_v12, %v6411_v21  ;;  %6824 = vst.msk [vmem:[#allocation3 + $0x120] sm:$0xff] %vm333_vm0, %v6792_v15  ;;  %v6869_v35 = vld [vmem:[#allocation2 + $0x12a] sm:$0xff]  ;;  %6825 = vst.msk [vmem:[#allocation3 + $0x138] sm:$0xff] %vm333_vm0, %v6793_v16  ;;  %v7435_v0 = vld [vmem:[#allocation2 + $0xe2] sm:$0xff] }
 0x6ce   : > { %7934 = vrot.lane.b32.xlu1 %v13339_v37, %s9527_s18  ;;  %7102 = vrot.lane.b32.xlu0 %v7037_v36, %s9526_s17  ;;  %v6413_v30 = vpop.f32.mrf.mxu1  ;;  %v6794_v11 = vld [vmem:[#allocation2 + $0xa8] sm:$0xff]  ;;  %7467 = vst.msk [vmem:[#allocation3 + $0x170] sm:$0xff] %vm333_vm0, %v7435_v0  ;;  %v6795_v26 = vld [vmem:[#allocation2 + $0xb0] sm:$0xff]  ;;  %7468 = vst.msk [vmem:[#allocation3 + $0x188] sm:$0xff] %vm333_vm0, %v7436_v50 }
 0x6cf   : > { %v6637_v63 = vadd.f32 %v13382_v40, %v6412_v49  ;;  %6826 = vst.msk [vmem:[#allocation3 + $0x150] sm:$0xff] %vm333_vm0, %v6794_v11  ;;  %6827 = vst.msk [vmem:[#allocation3 + $0x168] sm:$0xff] %vm333_vm0, %v6795_v26  ;;  %v6796_v47 = vld [vmem:[#allocation2 + $0xc0] sm:$0xff]  ;;  %v7438_v58 = vld [vmem:[#allocation2 + $0x10a] sm:$0xff]  ;;  %v6641_v30 = vpop.f32.mrf.mxu0 }
 0x6d0   : > { %v13528_v32 = vld [vmem:[#allocation2 + $0x138] sm:$0xff]  ;;  %v6797_v19 = vld [vmem:[#allocation2 + $0xc8] sm:$0xff]  ;;  %6828 = vst.msk [vmem:[#allocation3 + $0x180] sm:$0xff] %vm333_vm0, %v6796_v47  ;;  %7470 = vst.msk [vmem:[#allocation3 + $0x1b8] sm:$0xff] %vm333_vm0, %v7438_v58 }
 0x6d1   : > { %v13530_v37 = vld [vmem:[#allocation2 + $0x13a] sm:$0xff]  ;;  %v6707_v5 = vmul.f32 %v13186_v54, %v6637_v63  ;;  %6838 = vst.msk [vmem:[#allocation3 + $0x270] sm:$0xff] %vm333_vm0, %v13528_v32  ;;  %6829 = vst.msk [vmem:[#allocation3 + $0x198] sm:$0xff] %vm333_vm0, %v6797_v19  ;;  %v6800_v25 = vld [vmem:[#allocation2 + $0xf0] sm:$0xff] }
 0x6d2   : > { %7474 = vst.msk [vmem:[#allocation3 + $0x218] sm:$0xff] %vm333_vm0, %v13530_v37  ;;  %7552 = vrot.lane.b32.xlu1 %v13534_v9, %s9525_s16  ;;  %7294 = vrot.lane.b32.xlu0 %v13308_v41, %s9527_s18  ;;  %v7437_v41 = vld [vmem:[#allocation2 + $0xfa] sm:$0xff]  ;;  %6832 = vst.msk [vmem:[#allocation3 + $0x1e0] sm:$0xff] %vm333_vm0, %v6800_v25  ;;  %v6802_v49 = vld [vmem:[#allocation2 + $0x108] sm:$0xff] }
 0x6d3   : > { %v6739_v40 = vmax.f32 %v6707_v5, 0.0  ;;  %7469 = vst.msk [vmem:[#allocation3 + $0x1a0] sm:$0xff] %vm333_vm0, %v7437_v41  ;;  %v6798_v31 = vld [vmem:[#allocation2 + $0xd8] sm:$0xff]  ;;  %v6799_v60 = vld [vmem:[#allocation2 + $0xe0] sm:$0xff]  ;;  %v6803_v14 = vld [vmem:[#allocation2 + $0x110] sm:$0xff] }
 0x6d4   : > { %6830 = vst.msk [vmem:[#allocation3 + $0x1b0] sm:$0xff] %vm333_vm0, %v6798_v31  ;;  %6831 = vst.msk [vmem:[#allocation3 + $0x1c8] sm:$0xff] %vm333_vm0, %v6799_v60  ;;  %v6801_v57 = vld [vmem:[#allocation2 + $0xf8] sm:$0xff]  ;;  %v6804_v63 = vld [vmem:[#allocation2 + $0x120] sm:$0xff]  ;;  %v9347_v60 = vpop.f32.mrf.mxu0 }
 0x6d5   : > { %6771 = vst.msk [vmem:[#allocation2 + $0x142] sm:$0xff] %vm333_vm0, %v6739_v40  ;;  %6833 = vst.msk [vmem:[#allocation3 + $0x1f8] sm:$0xff] %vm333_vm0, %v6801_v57 }
 0x6d6   : > { %6958 = vrot.lane.b32.xlu1 %v6869_v35, %s9525_s16  ;;  %6834 = vst.msk [vmem:[#allocation3 + $0x210] sm:$0xff] %vm333_vm0, %v6802_v49  ;;  %6835 = vst.msk [vmem:[#allocation3 + $0x228] sm:$0xff] %vm333_vm0, %v6803_v14 }
 0x6d7   : > { %6836 = vst.msk [vmem:[#allocation3 + $0x240] sm:$0xff] %vm333_vm0, %v6804_v63 }
 0x6d8   : > { %v6416_v36 = vpop.f32.mrf.mxu1 }
 0x6d9   : > { %v6417_v21 = vadd.f32 %v13061_v12, %v6416_v36 }
 0x6da   : > { %v6418_v17 = vpop.f32.mrf.mxu1 }
 0x6db   : > { %v6642_v15 = vadd.f32 %v6641_v30, %v6417_v21 }
 0x6dc   : > { %v13565_v40 = vld [vmem:[#allocation2 + $0x140] sm:$0xff] }
 0x6dd   : > { %v6708_v5 = vmul.f32 %v13186_v54, %v6642_v15  ;;  %v13567_v16 = vld [vmem:[#allocation2 + $0x142] sm:$0xff]  ;;  %6839 = vst.msk [vmem:[#allocation3 + $0x288] sm:$0xff] %vm333_vm0, %v13565_v40 }
 0x6de   : > { %v13571_v35 = vld [vmem:[#allocation2 + $0x13c] sm:$0xff]  ;;  %v13573_v0 = vld [vmem:[#allocation2 + $0x144] sm:$0xff]  ;;  %7475 = vst.msk [vmem:[#allocation3 + $0x230] sm:$0xff] %vm333_vm0, %v13567_v16 }
 0x6df   : > { %14482 = vst [vmem:[#allocation5_spill] sm:$0xff] %v13571_v35  ;;  %14483 = vst [vmem:[#allocation6_spill] sm:$0xff] %v13573_v0  ;;  %v6740_v11 = vmax.f32 %v6708_v5, 0.0 }
 0x6e0   : > { %8110 = vst.msk [vmem:[#allocation3 + $0x1c0] sm:$0xff] %vm333_vm0, %v13571_v35  ;;  %8111 = vst.msk [vmem:[#allocation3 + $0x1d8] sm:$0xff] %vm333_vm0, %v13573_v0 }
 0x6e1   : > { %6772 = vst.msk [vmem:[#allocation2 + $0x152] sm:$0xff] %vm333_vm0, %v6740_v11 }
 0x6e4   : > { %v6421_v50 = vpop.f32.mrf.mxu1 }
 0x6e5   : > { %v6422_v26 = vadd.f32 %v13061_v12, %v6421_v50  ;;  %v7038_v50 = vld [vmem:[#allocation2 + $0x1c] sm:$0xff] }
 0x6e6   : > { %v6423_v41 = vpop.f32.mrf.mxu1 }
 0x6e7   : > { %v6647_v47 = vadd.f32 %v9344_v24, %v6422_v26  ;;  %v6651_v24 = vpop.f32.mrf.mxu0 }
 0x6e8   : > { %v13583_v58 = vld [vmem:[#allocation2 + $0x150] sm:$0xff] }
 0x6e9   : > { %v13585_v19 = vld [vmem:[#allocation2 + $0x152] sm:$0xff]  ;;  %v6709_v36 = vmul.f32 %v13186_v54, %v6647_v47  ;;  %6840 = vst.msk [vmem:[#allocation3 + $0x2a0] sm:$0xff] %vm333_vm0, %v13583_v58 }
 0x6ea   : > { %14484 = vst [vmem:[#allocation7_spill] sm:$0xff] %v13585_v19  ;;  %7476 = vst.msk [vmem:[#allocation3 + $0x248] sm:$0xff] %vm333_vm0, %v13585_v19 }
 0x6eb   : > { %v6741_v31 = vmax.f32 %v6709_v36, 0.0 }
 0x6ed   : > { %6773 = vst.msk [vmem:[#allocation2 + $0x15a] sm:$0xff] %vm333_vm0, %v6741_v31 }
 0x6f0   : > { %v6426_v25 = vpop.f32.mrf.mxu1 }
 0x6f1   : > { %v6427_v21 = vadd.f32 %v13061_v12, %v6426_v25 }
 0x6f2   : > { %v6428_v57 = vpop.f32.mrf.mxu1 }
 0x6f3   : > { %v6652_v49 = vadd.f32 %v6651_v24, %v6427_v21  ;;  %v9350_v24 = vpop.f32.mrf.mxu0  ;;  %v13631_v57 = vld [vmem:[#allocation2 + $0x54] sm:$0xff] }
 0x6f4   : > { %v13594_v14 = vld [vmem:[#allocation2 + $0x15c] sm:$0xff]  ;;  %v13607_v15 = vld [vmem:[#allocation2 + $0x154] sm:$0xff] }
 0x6f5   : > { %v13596_v30 = vld [vmem:[#allocation2 + $0x158] sm:$0xff]  ;;  %v6710_v17 = vmul.f32 %v13186_v54, %v6652_v49  ;;  %7598 = vrot.lane.b32.xlu0 %v13594_v14, %s9525_s16  ;;  %14485 = vst [vmem:[#allocation8_spill] sm:$0xff] %v13607_v15  ;;  %8112 = vst.msk [vmem:[#allocation3 + $0x1f0] sm:$0xff] %vm333_vm0, %v13607_v15  ;;  %v6661_v49 = vpop.f32.mrf.mxu0 }
 0x6f6   : > { %v13601_v63 = vld [vmem:[#allocation2 + $0x15a] sm:$0xff]  ;;  %6841 = vst.msk [vmem:[#allocation3 + $0x2b8] sm:$0xff] %vm333_vm0, %v13596_v30 }
 0x6f7   : > { %7477 = vst.msk [vmem:[#allocation3 + $0x260] sm:$0xff] %vm333_vm0, %v13601_v63  ;;  %v8081_v5 = vld [vmem:[#allocation2 + $0x15c] sm:$0xff]  ;;  %v6742_v11 = vmax.f32 %v6710_v17, 0.0  ;;  %v9353_v15 = vpop.f32.mrf.mxu0 }
 0x6f8   : > { %8113 = vst.msk [vmem:[#allocation3 + $0x208] sm:$0xff] %vm333_vm0, %v8081_v5 }
 0x6f9   : > { %6774 = vst.msk [vmem:[#allocation2 + $0x16a] sm:$0xff] %vm333_vm0, %v6742_v11  ;;  %7744 = vrot.lane.b32.xlu0 %v13310_v33, %s9526_s17  ;;  %v6671_v0 = vpop.f32.mrf.mxu0 }
 0x6fc   : > { %v6431_v26 = vpop.f32.mrf.mxu1 }
 0x6fd   : > { %v6432_v41 = vadd.f32 %v13061_v12, %v6431_v26  ;;  %7104 = vrot.lane.b32.xlu0 %v7038_v50, %s9526_s17  ;;  %v6870_v50 = vld [vmem:[#allocation2 + $0x13a] sm:$0xff] }
 0x6fe   : > { %v6433_v47 = vpop.f32.mrf.mxu1 }
 0x6ff   : > { %v6657_v36 = vadd.f32 %v9347_v60, %v6432_v41 }
 0x700   : > { %v13617_v31 = vld [vmem:[#allocation2 + $0x168] sm:$0xff] }
 0x701   : > { %v13619_v25 = vld [vmem:[#allocation2 + $0x16a] sm:$0xff]  ;;  %v6711_v21 = vmul.f32 %v13186_v54, %v6657_v36  ;;  %7936 = vrot.lane.b32.xlu0 %v13364_v2, %s9527_s18  ;;  %6842 = vst.msk [vmem:[#allocation3 + $0x2d0] sm:$0xff] %vm333_vm0, %v13617_v31  ;;  %v9515_v2 = vld [vmem:[%s14423_s6] ss:$0 sm:$0xff] }
 0x702   : > { %7478 = vst.msk [vmem:[#allocation3 + $0x278] sm:$0xff] %vm333_vm0, %v13619_v25 }
 0x703   : > { %v6743_v12 = vmax.f32 %v6711_v21, 0.0 }
 0x705   : > { %6775 = vst.msk [vmem:[#allocation2 + $0x172] sm:$0xff] %vm333_vm0, %v6743_v12  ;;  %7296 = vrot.lane.b32.xlu0 %v13318_v61, %s9527_s18 }
 0x708   : > { %v6436_v60 = vpop.f32.mrf.mxu1 }
 0x709   : > { %v6437_v17 = vadd.f32 %v9515_v2, %v6436_v60  ;;  %7554 = vrot.lane.b32.xlu0 %v13631_v57, %s9525_s16 }
 0x70a   : > { %v6438_v5 = vpop.f32.mrf.mxu1 }
 0x70b   : > { %v6662_v11 = vadd.f32 %v6661_v49, %v6437_v17 }
 0x70c   : > { %v13638_v26 = vld [vmem:[#allocation2 + $0x170] sm:$0xff] }
 0x70d   : > { %v6712_v41 = vmul.f32 %v13186_v54, %v6662_v11  ;;  %6960 = vrot.lane.b32.xlu0 %v6870_v50, %s9525_s16  ;;  %v13642_v61 = vld [vmem:[#allocation2 + $0x172] sm:$0xff]  ;;  %6843 = vst.msk [vmem:[#allocation3 + $0x2e8] sm:$0xff] %vm333_vm0, %v13638_v26 }
 0x70e   : > { %7479 = vst.msk [vmem:[#allocation3 + $0x290] sm:$0xff] %vm333_vm0, %v13642_v61  ;;  %v8082_v47 = vld [vmem:[#allocation2 + $0x16c] sm:$0xff]  ;;  %v8083_v36 = vld [vmem:[#allocation2 + $0x174] sm:$0xff] }
 0x70f   : > { %v6744_v21 = vmax.f32 %v6712_v41, 0.0  ;;  %8114 = vst.msk [vmem:[#allocation3 + $0x220] sm:$0xff] %vm333_vm0, %v8082_v47  ;;  %8115 = vst.msk [vmem:[#allocation3 + $0x238] sm:$0xff] %vm333_vm0, %v8083_v36 }
 0x711   : > { %6776 = vst.msk [vmem:[#allocation2 + $0x182] sm:$0xff] %vm333_vm0, %v6744_v21 }
 0x714   : > { %v6441_v12 = vpop.f32.mrf.mxu1 }
 0x715   : > { %v6442_v60 = vadd.f32 %v9515_v2, %v6441_v12 }
 0x716   : > { %v6443_v49 = vpop.f32.mrf.mxu1 }
 0x717   : > { %v6667_v17 = vadd.f32 %v9350_v24, %v6442_v60 }
 0x718   : > { %v7448_v5 = vld [vmem:[#allocation2 + $0x182] sm:$0xff] }
 0x719   : > { %v6713_v11 = vmul.f32 %v13186_v54, %v6667_v17  ;;  %7480 = vst.msk [vmem:[#allocation3 + $0x2a8] sm:$0xff] %vm333_vm0, %v7448_v5  ;;  %v7061_v5 = vld [vmem:[#allocation2 + $0x12c] sm:$0xff] }
 0x71b   : > { %v6745_v50 = vmax.f32 %v6713_v11, 0.0 }
 0x71d   : > { %6777 = vst.msk [vmem:[#allocation2 + $0x18a] sm:$0xff] %vm333_vm0, %v6745_v50 }
 0x720   : > { %v6446_v41 = vpop.f32.mrf.mxu1 }
 0x721   : > { %v6447_v47 = vadd.f32 %v9515_v2, %v6446_v41 }
 0x722   : > { %v6448_v35 = vpop.f32.mrf.mxu1 }
 0x723   : > { %v6672_v36 = vadd.f32 %v6671_v0, %v6447_v47 }
 0x724   : > { %v6919_v27 = vpop.permute.xlu1 %6918  ;;  %v6917_v21 = vpop.permute.xlu0 %6916  ;;  %v13654_v19 = vld [vmem:[#allocation2 + $0x188] sm:$0xff] }
 0x725   : > { %v7893_v12 = vld [vmem:[#allocation2 + $0x18a] sm:$0xff]  ;;  %7009 = vst.msk [vmem:[#allocation3 + $0x78] sm:$0xff] %vm685_vm3, %v6919_v27  ;;  %7008 = vst.msk [vmem:[#allocation3 + $0x60] sm:$0xff] %vm685_vm3, %v6917_v21  ;;  %v6714_v24 = vmul.f32 %v13186_v54, %v6672_v36  ;;  %7790 = vrot.lane.b32.xlu1 %v13654_v19, %s9526_s17 }
 0x726   : > { %7481 = vst.msk [vmem:[#allocation3 + $0x2c0] sm:$0xff] %vm333_vm0, %v7893_v12  ;;  %v8084_v60 = vld [vmem:[#allocation2 + $0x184] sm:$0xff]  ;;  %v8085_v49 = vld [vmem:[#allocation2 + $0x18c] sm:$0xff] }
 0x727   : > { %8116 = vst.msk [vmem:[#allocation3 + $0x250] sm:$0xff] %vm333_vm0, %v8084_v60  ;;  %8117 = vst.msk [vmem:[#allocation3 + $0x268] sm:$0xff] %vm333_vm0, %v8085_v49  ;;  %v6746_v35 = vmax.f32 %v6714_v24, 0.0 }
 0x728   : > { %v6923_v0 = vpop.permute.xlu1 %6922  ;;  %v6921_v17 = vpop.permute.xlu0 %6920 }
 0x729   : > { %6778 = vst.msk [vmem:[#allocation2 + $0x19a] sm:$0xff] %vm333_vm0, %v6746_v35  ;;  %7150 = vrot.lane.b32.xlu1 %v7061_v5, %s9526_s17 }
 0x72a   : > { %7011 = vst.msk [vmem:[#allocation3 + $0xa8] sm:$0xff] %vm685_vm3, %v6923_v0  ;;  %7010 = vst.msk [vmem:[#allocation3 + $0x90] sm:$0xff] %vm685_vm3, %v6921_v17  ;;  %v13681_v0 = vld [vmem:[#allocation2 + $0x16c] sm:$0xff]  ;;  %v7062_v17 = vld [vmem:[#allocation2 + $0x13c] sm:$0xff] }
 0x72c   : > { %v6927_v27 = vpop.permute.xlu1 %6926  ;;  %v6925_v11 = vpop.permute.xlu0 %6924 }
 0x72d   : > { %7013 = vst.msk [vmem:[#allocation3 + $0xd8] sm:$0xff] %vm685_vm3, %v6927_v27  ;;  %7012 = vst.msk [vmem:[#allocation3 + $0xc0] sm:$0xff] %vm685_vm3, %v6925_v11  ;;  %v6451_v50 = vpop.f32.mrf.mxu1  ;;  %7982 = vrot.lane.b32.xlu1 %v7893_v12, %s9527_s18  ;;  %v7039_v27 = vld [vmem:[#allocation2 + $0x24] sm:$0xff] }
 0x72e   : > { %v6452_v41 = vadd.f32 %v9515_v2, %v6451_v50 }
 0x72f   : > { %v6453_v47 = vpop.f32.mrf.mxu1 }
 0x730   : > { %v6677_v36 = vadd.f32 %v9353_v15, %v6452_v41  ;;  %v7549_v21 = vpop.permute.xlu1 %7548  ;;  %v6929_v24 = vpop.permute.xlu0 %6928  ;;  %v13671_v60 = vld [vmem:[#allocation2 + $0x198] sm:$0xff] }
 0x731   : > { %v7894_v49 = vld [vmem:[#allocation2 + $0x19a] sm:$0xff]  ;;  %7644 = vst.msk [vmem:[#allocation3 + $0x8] sm:$0xff] %vm685_vm3, %v7549_v21  ;;  %7014 = vst.msk [vmem:[#allocation3 + $0xf0] sm:$0xff] %vm685_vm3, %v6929_v24  ;;  %7342 = vrot.lane.b32.xlu1 %v13596_v30, %s9527_s18  ;;  %7792 = vrot.lane.b32.xlu0 %v13671_v60, %s9526_s17 }
 0x732   : > { %7482 = vst.msk [vmem:[#allocation3 + $0x2d8] sm:$0xff] %vm333_vm0, %v7894_v49  ;;  %v6715_v2 = vmul.f32 %v13186_v54, %v6677_v36  ;;  %v13689_v54 = vld [vmem:[#allocation2 + $0x80] sm:$0xff] }
 0x734   : > { %v6747_v15 = vmax.f32 %v6715_v2, 0.0  ;;  %v7101_v12 = vpop.permute.xlu1 %7100  ;;  %v7741_v35 = vpop.permute.xlu0 %7740 }
 0x735   : > { %7196 = vst.msk [vmem:[#allocation3] sm:$0xff] %vm878_vm4, %v7101_v12  ;;  %7836 = vst.msk [vmem:[#allocation3 + $0x8] sm:$0xff] %vm878_vm4, %v7741_v35  ;;  %7600 = vrot.lane.b32.xlu1 %v13681_v0, %s9525_s16  ;;  %7152 = vrot.lane.b32.xlu0 %v7062_v17, %s9526_s17  ;;  %v13716_v35 = vld [vmem:[#allocation2 + $0x90] sm:$0xff] }
 0x736   : > { %6779 = vst.msk [vmem:[#allocation2 + $0x1a2] sm:$0xff] %vm333_vm0, %v6747_v15 }
 0x738   : > { %v7293_v30 = vpop.permute.xlu1 %7292  ;;  %v7933_v5 = vpop.permute.xlu0 %7932 }
 0x739   : > { %7388 = vst.msk [vmem:[#allocation3] sm:$0xff] %vm1071_vm5, %v7293_v30  ;;  %8028 = vst.msk [vmem:[#allocation3 + $0x8] sm:$0xff] %vm1071_vm5, %v7933_v5  ;;  %7746 = vrot.lane.b32.xlu1 %v13689_v54, %s9526_s17  ;;  %7984 = vrot.lane.b32.xlu0 %v7894_v49, %s9527_s18  ;;  %v13720_v5 = vld [vmem:[#allocation2 + $0x64] sm:$0xff] }
 0x73c   : > { %v7743_v11 = vpop.permute.xlu1 %7742  ;;  %v7551_v50 = vpop.permute.xlu0 %7550 }
 0x73d   : > { %7645 = vst.msk [vmem:[#allocation3 + $0x20] sm:$0xff] %vm685_vm3, %v7551_v50  ;;  %7106 = vrot.lane.b32.xlu1 %v7039_v27, %s9526_s17  ;;  %7344 = vrot.lane.b32.xlu0 %v13617_v31, %s9527_s18  ;;  %v7895_v41 = vld [vmem:[#allocation2 + $0x1a2] sm:$0xff]  ;;  %v13708_v31 = vld [vmem:[#allocation2 + $0x174] sm:$0xff] }
 0x73e   : > { %7837 = vst.msk [vmem:[#allocation3 + $0x20] sm:$0xff] %vm878_vm4, %v7743_v11  ;;  %v8086_v47 = vld [vmem:[#allocation2 + $0x19c] sm:$0xff]  ;;  %v8087_v36 = vld [vmem:[#allocation2 + $0x1a4] sm:$0xff] }
 0x73f   : > { %7483 = vst.msk [vmem:[#allocation3 + $0x2f0] sm:$0xff] %vm333_vm0, %v7895_v41  ;;  %8118 = vst.msk [vmem:[#allocation3 + $0x280] sm:$0xff] %vm333_vm0, %v8086_v47  ;;  %v13730_v11 = vld [vmem:[#allocation2 + $0x1a0] sm:$0xff]  ;;  %v6872_v47 = vld [vmem:[#allocation2 + $0x152] sm:$0xff] }
 0x740   : > { %8119 = vst.msk [vmem:[#allocation3 + $0x298] sm:$0xff] %vm333_vm0, %v8087_v36  ;;  %v7935_v21 = vpop.permute.xlu1 %7934  ;;  %v7103_v24 = vpop.permute.xlu0 %7102  ;;  %v8125_v49 = vld [vmem:[#allocation3 + $0x8] sm:$0xff]  ;;  %v8124_v2 = vld [vmem:[#allocation3] sm:$0xff]  ;;  %v7704_v36 = vld [vmem:[#allocation2 + $0x1b0] sm:$0xff] }
 0x741   : > { %8029 = vst.msk [vmem:[#allocation3 + $0x20] sm:$0xff] %vm1071_vm5, %v7935_v21  ;;  %8423 = vmatprep.mubr.f32.mxu0 %v8125_v49  ;;  %7938 = vrot.lane.b32.xlu1 %v13344_v23, %s9527_s18  ;;  %v7063_v50 = vld [vmem:[#allocation2 + $0x144] sm:$0xff]  ;;  %v7064_v21 = vld [vmem:[#allocation2 + $0x154] sm:$0xff] }
 0x742   : > { %7197 = vst.msk [vmem:[#allocation3 + $0x18] sm:$0xff] %vm878_vm4, %v7103_v24  ;;  %8424 = vmatmul.mubr.f32.vlgmr.msra.gmra.mxu0 %v8124_v2  ;;  %7602 = vrot.lane.b32.xlu0 %v13708_v31, %s9525_s16  ;;  %v7896_v24 = vld [vmem:[#allocation2 + $0x1b2] sm:$0xff] }
 0x743   : > { %v13748_v49 = vld [vmem:[#allocation2 + $0x98] sm:$0xff] }
 0x744   : > { %v7553_v15 = vpop.permute.xlu1 %7552  ;;  %v7295_v12 = vpop.permute.xlu0 %7294 }
 0x745   : > { %7646 = vst.msk [vmem:[#allocation3 + $0x38] sm:$0xff] %vm685_vm3, %v7553_v15  ;;  %7298 = vrot.lane.b32.xlu1 %v13322_v4, %s9527_s18  ;;  %v6871_v4 = vld [vmem:[#allocation2 + $0x142] sm:$0xff]  ;;  %v7513_v15 = vld [vmem:[#allocation2 + $0x18c] sm:$0xff] }
 0x746   : > { %7389 = vst.msk [vmem:[#allocation3 + $0x18] sm:$0xff] %vm1071_vm5, %v7295_v12  ;;  %7748 = vrot.lane.b32.xlu0 %v13716_v35, %s9526_s17 }
 0x748   : > { %v6959_v17 = vpop.permute.xlu1 %6958  ;;  %v8128_v30 = vld [vmem:[#allocation3 + $0x20] sm:$0xff] }
 0x749   : > { %7029 = vst.msk [vmem:[#allocation3 + $0x258] sm:$0xff] %vm685_vm3, %v6959_v17  ;;  %8428 = vmatprep.mubr.f32.mxu0 %v8128_v30  ;;  %7556 = vrot.lane.b32.xlu1 %v13720_v5, %s9525_s16  ;;  %v13764_v17 = vld [vmem:[#allocation2 + $0xa8] sm:$0xff]  ;;  %v13769_v30 = vld [vmem:[#allocation2 + $0x7c] sm:$0xff] }
 0x74a   : > { %7108 = vrot.lane.b32.xlu0 %v13362_v53, %s9526_s17  ;;  %v13737_v53 = vld [vmem:[#allocation2 + $0x6c] sm:$0xff] }
 0x74d   : > { %v8127_v27 = vld [vmem:[#allocation3 + $0x18] sm:$0xff]  ;;  %6962 = vrot.lane.b32.xlu1 %v6871_v4, %s9525_s16 }
 0x74e   : > { %8429 = vmatmul.mubr.f32.gmra.mxu0 %v8127_v27  ;;  %7940 = vrot.lane.b32.xlu0 %v13354_v59, %s9527_s18 }
 0x751   : > { %7794 = vrot.lane.b32.xlu1 %v13730_v11, %s9526_s17 }
 0x752   : > { %7300 = vrot.lane.b32.xlu0 %v13295_v18, %s9527_s18  ;;  %v7512_v18 = vld [vmem:[#allocation2 + $0x184] sm:$0xff] }
 0x755   : > { %7154 = vrot.lane.b32.xlu1 %v7063_v50, %s9526_s17 }
 0x756   : > { %7558 = vrot.lane.b32.xlu0 %v13737_v53, %s9525_s16 }
 0x759   : > { %7986 = vrot.lane.b32.xlu1 %v7895_v41, %s9527_s18 }
 0x75a   : > { %6964 = vrot.lane.b32.xlu0 %v6872_v47, %s9525_s16 }
 0x75d   : > { %7346 = vrot.lane.b32.xlu1 %v13638_v26, %s9527_s18  ;;  %v7256_v26 = vld [vmem:[#allocation2 + $0x180] sm:$0xff] }
 0x75e   : > { %7796 = vrot.lane.b32.xlu0 %v7704_v36, %s9526_s17  ;;  %v7706_v36 = vld [vmem:[#allocation2 + $0x1c8] sm:$0xff] }
 0x761   : > { %7604 = vrot.lane.b32.xlu1 %v7512_v18, %s9525_s16  ;;  %v13798_v18 = vld [vmem:[#allocation2 + $0xb0] sm:$0xff] }
 0x762   : > { %7156 = vrot.lane.b32.xlu0 %v7064_v21, %s9526_s17  ;;  %v13814_v21 = vld [vmem:[#allocation2 + $0xc0] sm:$0xff] }
 0x765   : > { %7750 = vrot.lane.b32.xlu1 %v13748_v49, %s9526_s17 }
 0x766   : > { %7988 = vrot.lane.b32.xlu0 %v7896_v24, %s9527_s18 }
 0x767   : > { %v7599_v41 = vpop.permute.xlu0 %7598 }
 0x768   : > { %7669 = vst.msk [vmem:[#allocation3 + $0x260] sm:$0xff] %vm685_vm3, %v7599_v41 }
 0x769   : > { %7110 = vrot.lane.b32.xlu1 %v13462_v46, %s9526_s17 }
 0x76a   : > { %7348 = vrot.lane.b32.xlu0 %v7256_v26, %s9527_s18 }
 0x76b   : > { %v7745_v2 = vpop.permute.xlu0 %7744 }
 0x76c   : > { %7838 = vst.msk [vmem:[#allocation3 + $0x38] sm:$0xff] %vm878_vm4, %v7745_v2 }
 0x76d   : > { %7942 = vrot.lane.b32.xlu1 %v13358_v7, %s9527_s18 }
 0x76e   : > { %7606 = vrot.lane.b32.xlu0 %v7513_v15, %s9525_s16 }
 0x76f   : > { %v7105_v12 = vpop.permute.xlu0 %7104 }
 0x770   : > { %7198 = vst.msk [vmem:[#allocation3 + $0x30] sm:$0xff] %vm878_vm4, %v7105_v12  ;;  %v8255_v12 = vld [vmem:[%s14424_s7 + $0x118] sm:$0xff] }
 0x771   : > { %7302 = vrot.lane.b32.xlu1 %v13300_v48, %s9527_s18  ;;  %v7705_v48 = vld [vmem:[#allocation2 + $0x1b8] sm:$0xff]  ;;  %9354 = vmatprep.subr.mxu1 %v8255_v12 }
 0x772   : > { %7752 = vrot.lane.b32.xlu0 %v13764_v17, %s9526_s17 }
 0x773   : > { %v7937_v46 = vpop.permute.xlu0 %7936 }
 0x774   : > { %8030 = vst.msk [vmem:[#allocation3 + $0x38] sm:$0xff] %vm1071_vm5, %v7937_v46  ;;  %v8254_v46 = vld [vmem:[%s14424_s7 + $0x110] sm:$0xff] }
 0x775   : > { %7560 = vrot.lane.b32.xlu1 %v13769_v30, %s9525_s16 }
 0x776   : > { %7112 = vrot.lane.b32.xlu0 %v13534_v9, %s9526_s17 }
 0x777   : > { %v7297_v27 = vpop.permute.xlu0 %7296 }
 0x778   : > { %7390 = vst.msk [vmem:[#allocation3 + $0x30] sm:$0xff] %vm1071_vm5, %v7297_v27 }
 0x779   : > { %6966 = vrot.lane.b32.xlu1 %v13601_v63, %s9525_s16  ;;  %v7897_v63 = vld [vmem:[#allocation2 + $0x1ba] sm:$0xff] }
 0x77a   : > { %7944 = vrot.lane.b32.xlu0 %v13367_v13, %s9527_s18 }
 0x77b   : > { %v7555_v4 = vpop.permute.xlu0 %7554  ;;  %v8131_v50 = vld [vmem:[#allocation3 + $0x38] sm:$0xff] }
 0x77c   : > { %7647 = vst.msk [vmem:[#allocation3 + $0x50] sm:$0xff] %vm685_vm3, %v7555_v4  ;;  %8433 = vmatprep.mubr.f32.mxu0 %v8131_v50  ;;  %v8252_v4 = vld [vmem:[%s14424_s7 + $0x100] sm:$0xff] }
 0x77d   : > { %7798 = vrot.lane.b32.xlu1 %v7705_v48, %s9526_s17 }
 0x77e   : > { %7304 = vrot.lane.b32.xlu0 %v13310_v33, %s9527_s18  ;;  %v7514_v33 = vld [vmem:[#allocation2 + $0x19c] sm:$0xff] }
 0x77f   : > { %v6961_v9 = vpop.permute.xlu0 %6960  ;;  %v8130_v47 = vld [vmem:[#allocation3 + $0x30] sm:$0xff] }
 0x780   : > { %7030 = vst.msk [vmem:[#allocation3 + $0x270] sm:$0xff] %vm685_vm3, %v6961_v9  ;;  %8434 = vmatmul.mubr.f32.gmra.mxu0 %v8130_v47 }
 0x781   : > { %7158 = vrot.lane.b32.xlu1 %v13594_v14, %s9526_s17  ;;  %v7898_v14 = vld [vmem:[#allocation2 + $0x1ca] sm:$0xff] }
 0x782   : > { %7562 = vrot.lane.b32.xlu0 %v13376_v22, %s9525_s16 }
 0x785   : > { %7990 = vrot.lane.b32.xlu1 %v7897_v63, %s9527_s18 }
 0x786   : > { %6968 = vrot.lane.b32.xlu0 %v13619_v25, %s9525_s16  ;;  %v7515_v25 = vld [vmem:[#allocation2 + $0x1a4] sm:$0xff] }
 0x789   : > { %7350 = vrot.lane.b32.xlu1 %v13654_v19, %s9527_s18 }
 0x78a   : > { %7800 = vrot.lane.b32.xlu0 %v7706_v36, %s9526_s17 }
 0x78d   : > { %7608 = vrot.lane.b32.xlu1 %v7514_v33, %s9525_s16  ;;  %v13864_v33 = vld [vmem:[#allocation2 + $0xc8] sm:$0xff] }
 0x78e   : > { %7160 = vrot.lane.b32.xlu0 %v13681_v0, %s9526_s17 }
 0x791   : > { %7754 = vrot.lane.b32.xlu1 %v13798_v18, %s9526_s17 }
 0x792   : > { %7992 = vrot.lane.b32.xlu0 %v7898_v14, %s9527_s18  ;;  %v13868_v14 = vld [vmem:[#allocation2 + $0xd8] sm:$0xff] }
 0x795   : > { %7114 = vrot.lane.b32.xlu1 %v13631_v57, %s9526_s17 }
 0x796   : > { %7352 = vrot.lane.b32.xlu0 %v13671_v60, %s9527_s18 }
 0x797   : > { %v7791_v19 = vpop.permute.xlu1 %7790 }
 0x798   : > { %7861 = vst.msk [vmem:[#allocation3 + $0x260] sm:$0xff] %vm878_vm4, %v7791_v19 }
 0x799   : > { %7946 = vrot.lane.b32.xlu1 %v13378_v20, %s9527_s18 }
 0x79a   : > { %7610 = vrot.lane.b32.xlu0 %v7515_v25, %s9525_s16 }
 0x79b   : > { %v7151_v0 = vpop.permute.xlu1 %7150 }
 0x79c   : > { %7221 = vst.msk [vmem:[#allocation3 + $0x258] sm:$0xff] %vm878_vm4, %v7151_v0 }
 0x79d   : > { %7306 = vrot.lane.b32.xlu1 %v13689_v54, %s9527_s18  ;;  %v7707_v54 = vld [vmem:[#allocation2 + $0x1d0] sm:$0xff] }
 0x79e   : > { %7756 = vrot.lane.b32.xlu0 %v13814_v21, %s9526_s17 }
 0x79f   : > { %v7983_v57 = vpop.permute.xlu1 %7982 }
 0x7a0   : > { %8053 = vst.msk [vmem:[#allocation3 + $0x260] sm:$0xff] %vm1071_vm5, %v7983_v57 }
 0x7a1   : > { %7564 = vrot.lane.b32.xlu1 %v13394_v34, %s9525_s16 }
 0x7a2   : > { %7116 = vrot.lane.b32.xlu0 %v13720_v5, %s9526_s17 }
 0x7a3   : > { %v7343_v60 = vpop.permute.xlu1 %7342  ;;  %v7793_v24 = vpop.permute.xlu0 %7792 }
 0x7a4   : > { %7413 = vst.msk [vmem:[#allocation3 + $0x258] sm:$0xff] %vm1071_vm5, %v7343_v60 }
 0x7a5   : > { %6970 = vrot.lane.b32.xlu1 %v13642_v61, %s9525_s16 }
 0x7a6   : > { %7948 = vrot.lane.b32.xlu0 %v13396_v8, %s9527_s18 }
 0x7a7   : > { %v7601_v41 = vpop.permute.xlu1 %7600  ;;  %v7153_v26 = vpop.permute.xlu0 %7152  ;;  %v8200_v2 = vld [vmem:[#allocation3 + $0x260] sm:$0xff] }
 0x7a8   : > { %7670 = vst.msk [vmem:[#allocation3 + $0x278] sm:$0xff] %vm685_vm3, %v7601_v41  ;;  %8548 = vmatprep.mubr.f32.mxu1 %v8200_v2 }
 0x7a9   : > { %7222 = vst.msk [vmem:[#allocation3 + $0x270] sm:$0xff] %vm878_vm4, %v7153_v26  ;;  %7862 = vst.msk [vmem:[#allocation3 + $0x278] sm:$0xff] %vm878_vm4, %v7793_v24  ;;  %7802 = vrot.lane.b32.xlu1 %v7707_v54, %s9526_s17  ;;  %v13889_v54 = vld [vmem:[#allocation2 + $0xe0] sm:$0xff] }
 0x7aa   : > { %7308 = vrot.lane.b32.xlu0 %v13716_v35, %s9527_s18  ;;  %v7899_v35 = vld [vmem:[#allocation2 + $0x1d2] sm:$0xff] }
 0x7ab   : > { %v7747_v61 = vpop.permute.xlu1 %7746  ;;  %v7985_v5 = vpop.permute.xlu0 %7984  ;;  %v8199_v15 = vld [vmem:[#allocation3 + $0x258] sm:$0xff] }
 0x7ac   : > { %7839 = vst.msk [vmem:[#allocation3 + $0x50] sm:$0xff] %vm878_vm4, %v7747_v61  ;;  %8549 = vmatmul.mubr.f32.vlgmr.msra.gmra.mxu1 %v8199_v15  ;;  %v13897_v61 = vld [vmem:[#allocation2 + $0xe2] sm:$0xff] }
 0x7ad   : > { %8054 = vst.msk [vmem:[#allocation3 + $0x278] sm:$0xff] %vm1071_vm5, %v7985_v5  ;;  %7162 = vrot.lane.b32.xlu1 %v13708_v31, %s9526_s17  ;;  %9355 = vmatpush3.msra.mxu1 %v8255_v12  ;;  %v8253_v31 = vld [vmem:[%s14424_s7 + $0x108] sm:$0xff] }
 0x7ae   : > { %7566 = vrot.lane.b32.xlu0 %v13401_v43, %s9525_s16  ;;  %9356 = vmatprep.subr.mxu1 %v8254_v46 }
 0x7af   : > { %v7107_v27 = vpop.permute.xlu1 %7106  ;;  %v7345_v48 = vpop.permute.xlu0 %7344  ;;  %9357 = vmatpush3.msra.mxu1 %v8254_v46 }
 0x7b0   : > { %7199 = vst.msk [vmem:[#allocation3 + $0x48] sm:$0xff] %vm878_vm4, %v7107_v27  ;;  %9358 = vmatprep.subr.mxu1 %v8253_v31 }
 0x7b1   : > { %7414 = vst.msk [vmem:[#allocation3 + $0x270] sm:$0xff] %vm1071_vm5, %v7345_v48  ;;  %7994 = vrot.lane.b32.xlu1 %v7899_v35, %s9527_s18  ;;  %9359 = vmatpush3.msra.mxu1 %v8253_v31  ;;  %v13910_v35 = vld [vmem:[#allocation2 + $0xf0] sm:$0xff] }
 0x7b2   : > { %7118 = vrot.lane.b32.xlu0 %v13737_v53, %s9526_s17  ;;  %9360 = vmatprep.subr.mxu1 %v8252_v4  ;;  %v13919_v48 = vld [vmem:[#allocation2 + $0xf2] sm:$0xff] }
 0x7b3   : > { %v7939_v50 = vpop.permute.xlu1 %7938  ;;  %9361 = vmatpush3.msra.mxu1 %v8252_v4 }
 0x7b4   : > { %v8203_v9 = vld [vmem:[#allocation3 + $0x278] sm:$0xff]  ;;  %8031 = vst.msk [vmem:[#allocation3 + $0x50] sm:$0xff] %vm1071_vm5, %v7939_v50  ;;  %v7603_v47 = vpop.permute.xlu0 %7602 }
 0x7b5   : > { %8553 = vmatprep.mubr.f32.mxu1 %v8203_v9  ;;  %7671 = vst.msk [vmem:[#allocation3 + $0x290] sm:$0xff] %vm685_vm3, %v7603_v47  ;;  %7354 = vrot.lane.b32.xlu1 %v13730_v11, %s9527_s18  ;;  %v13933_v9 = vld [vmem:[#allocation2 + $0xf8] sm:$0xff] }
 0x7b6   : > { %7310 = vrot.lane.b32.xlu0 %v13748_v49, %s9527_s18 }
 0x7b7   : > { %v7299_v53 = vpop.permute.xlu1 %7298 }
 0x7b8   : > { %v8202_v63 = vld [vmem:[#allocation3 + $0x270] sm:$0xff]  ;;  %7391 = vst.msk [vmem:[#allocation3 + $0x48] sm:$0xff] %vm1071_vm5, %v7299_v53  ;;  %v7749_v36 = vpop.permute.xlu0 %7748 }
 0x7b9   : > { %8554 = vmatmul.mubr.f32.gmra.mxu1 %v8202_v63  ;;  %7758 = vrot.lane.b32.xlu1 %v13864_v33, %s9526_s17  ;;  %v13939_v63 = vld [vmem:[#allocation2 + $0xfa] sm:$0xff] }
 0x7ba   : > { %7760 = vrot.lane.b32.xlu0 %v13868_v14, %s9526_s17 }
 0x7bb   : > { %v7557_v11 = vpop.permute.xlu1 %7556  ;;  %v8134_v19 = vld [vmem:[#allocation3 + $0x50] sm:$0xff] }
 0x7bc   : > { %7648 = vst.msk [vmem:[#allocation3 + $0x68] sm:$0xff] %vm685_vm3, %v7557_v11  ;;  %v7109_v49 = vpop.permute.xlu0 %7108  ;;  %8438 = vmatprep.mubr.f32.mxu0 %v8134_v19 }
 0x7bd   : > { %7840 = vst.msk [vmem:[#allocation3 + $0x68] sm:$0xff] %vm878_vm4, %v7749_v36  ;;  %7200 = vst.msk [vmem:[#allocation3 + $0x60] sm:$0xff] %vm878_vm4, %v7109_v49  ;;  %7950 = vrot.lane.b32.xlu1 %v13413_v56, %s9527_s18 }
 0x7be   : > { %7952 = vrot.lane.b32.xlu0 %v13421_v28, %s9527_s18 }
 0x7bf   : > { %v6963_v25 = vpop.permute.xlu1 %6962  ;;  %v8133_v0 = vld [vmem:[#allocation3 + $0x48] sm:$0xff] }
 0x7c0   : > { %7031 = vst.msk [vmem:[#allocation3 + $0x288] sm:$0xff] %vm685_vm3, %v6963_v25  ;;  %v7941_v57 = vpop.permute.xlu0 %7940  ;;  %8439 = vmatmul.mubr.f32.gmra.mxu0 %v8133_v0  ;;  %v13953_v25 = vld [vmem:[#allocation2 + $0x108] sm:$0xff] }
 0x7c1   : > { %8032 = vst.msk [vmem:[#allocation3 + $0x68] sm:$0xff] %vm1071_vm5, %v7941_v57  ;;  %7568 = vrot.lane.b32.xlu1 %v13423_v39, %s9525_s16 }
 0x7c2   : > { %7570 = vrot.lane.b32.xlu0 %v13425_v55, %s9525_s16 }
 0x7c3   : > { %v7795_v60 = vpop.permute.xlu1 %7794 }
 0x7c4   : > { %7863 = vst.msk [vmem:[#allocation3 + $0x290] sm:$0xff] %vm878_vm4, %v7795_v60  ;;  %v7301_v24 = vpop.permute.xlu0 %7300  ;;  %v13961_v60 = vld [vmem:[#allocation2 + $0x10a] sm:$0xff] }
 0x7c5   : > { %7392 = vst.msk [vmem:[#allocation3 + $0x60] sm:$0xff] %vm1071_vm5, %v7301_v24  ;;  %7120 = vrot.lane.b32.xlu1 %v13769_v30, %s9526_s17 }
 0x7c6   : > { %7762 = vrot.lane.b32.xlu0 %v13889_v54, %s9526_s17 }
 0x7c7   : > { %v7155_v41 = vpop.permute.xlu1 %7154 }
 0x7c8   : > { %7223 = vst.msk [vmem:[#allocation3 + $0x288] sm:$0xff] %vm878_vm4, %v7155_v41  ;;  %v7559_v26 = vpop.permute.xlu0 %7558  ;;  %v8137_v2 = vld [vmem:[#allocation3 + $0x68] sm:$0xff] }
 0x7c9   : > { %7649 = vst.msk [vmem:[#allocation3 + $0x80] sm:$0xff] %vm685_vm3, %v7559_v26  ;;  %8443 = vmatprep.mubr.f32.mxu0 %v8137_v2  ;;  %7312 = vrot.lane.b32.xlu1 %v13764_v17, %s9527_s18  ;;  %v13975_v2 = vld [vmem:[#allocation2 + $0x110] sm:$0xff] }
 0x7ca   : > { %7954 = vrot.lane.b32.xlu0 %v13897_v61, %s9527_s18 }
 0x7cb   : > { %v7987_v30 = vpop.permute.xlu1 %7986 }
 0x7cc   : > { %8055 = vst.msk [vmem:[#allocation3 + $0x290] sm:$0xff] %vm1071_vm5, %v7987_v30  ;;  %v6965_v5 = vpop.permute.xlu0 %6964  ;;  %v8136_v15 = vld [vmem:[#allocation3 + $0x60] sm:$0xff] }
 0x7cd   : > { %7032 = vst.msk [vmem:[#allocation3 + $0x2a0] sm:$0xff] %vm685_vm3, %v6965_v5  ;;  %8444 = vmatmul.mubr.f32.gmra.mxu0 %v8136_v15  ;;  %6930 = vrot.lane.b32.xlu1 %v13344_v23, %s9525_s16  ;;  %v13983_v15 = vld [vmem:[#allocation2 + $0x112] sm:$0xff] }
 0x7ce   : > { %7572 = vrot.lane.b32.xlu0 %v13446_v42, %s9525_s16 }
 0x7cf   : > { %v7347_v17 = vpop.permute.xlu1 %7346 }
 0x7d0   : > { %7415 = vst.msk [vmem:[#allocation3 + $0x288] sm:$0xff] %vm1071_vm5, %v7347_v17  ;;  %v7797_v12 = vpop.permute.xlu0 %7796 }
 0x7d1   : > { %7122 = vrot.lane.b32.xlu1 %v13376_v22, %s9526_s17 }
 0x7d2   : > { %7764 = vrot.lane.b32.xlu0 %v13910_v35, %s9526_s17 }
 0x7d3   : > { %v7605_v46 = vpop.permute.xlu1 %7604  ;;  %v8206_v27 = vld [vmem:[#allocation3 + $0x290] sm:$0xff] }
 0x7d4   : > { %7672 = vst.msk [vmem:[#allocation3 + $0x2a8] sm:$0xff] %vm685_vm3, %v7605_v46  ;;  %v7157_v23 = vpop.permute.xlu0 %7156  ;;  %8558 = vmatprep.mubr.f32.mxu1 %v8206_v27 }
 0x7d5   : > { %7864 = vst.msk [vmem:[#allocation3 + $0x2a8] sm:$0xff] %vm878_vm4, %v7797_v12  ;;  %7224 = vst.msk [vmem:[#allocation3 + $0x2a0] sm:$0xff] %vm878_vm4, %v7157_v23  ;;  %7314 = vrot.lane.b32.xlu1 %v13798_v18, %s9527_s18 }
 0x7d6   : > { %7956 = vrot.lane.b32.xlu0 %v13919_v48, %s9527_s18 }
 0x7d7   : > { %v7751_v22 = vpop.permute.xlu1 %7750  ;;  %v8205_v31 = vld [vmem:[#allocation3 + $0x288] sm:$0xff] }
 0x7d8   : > { %7841 = vst.msk [vmem:[#allocation3 + $0x80] sm:$0xff] %vm878_vm4, %v7751_v22  ;;  %v7989_v4 = vpop.permute.xlu0 %7988  ;;  %8559 = vmatmul.mubr.f32.gmra.mxu1 %v8205_v31 }
 0x7d9   : > { %8056 = vst.msk [vmem:[#allocation3 + $0x2a8] sm:$0xff] %vm1071_vm5, %v7989_v4  ;;  %6932 = vrot.lane.b32.xlu1 %v13354_v59, %s9525_s16 }
 0x7da   : > { %7574 = vrot.lane.b32.xlu0 %v13452_v6, %s9525_s16 }
 0x7db   : > { %v7111_v18 = vpop.permute.xlu1 %7110 }
 0x7dc   : > { %7201 = vst.msk [vmem:[#allocation3 + $0x78] sm:$0xff] %vm878_vm4, %v7111_v18  ;;  %v7349_v50 = vpop.permute.xlu0 %7348 }
 0x7dd   : > { %7416 = vst.msk [vmem:[#allocation3 + $0x2a0] sm:$0xff] %vm1071_vm5, %v7349_v50  ;;  %7124 = vrot.lane.b32.xlu1 %v13394_v34, %s9526_s17 }
 0x7de   : > { %7766 = vrot.lane.b32.xlu0 %v13933_v9, %s9526_s17 }
 0x7df   : > { %v7943_v47 = vpop.permute.xlu1 %7942 }
 0x7e0   : > { %8033 = vst.msk [vmem:[#allocation3 + $0x80] sm:$0xff] %vm1071_vm5, %v7943_v47  ;;  %v7607_v59 = vpop.permute.xlu0 %7606  ;;  %v8209_v53 = vld [vmem:[#allocation3 + $0x2a8] sm:$0xff] }
 0x7e1   : > { %7673 = vst.msk [vmem:[#allocation3 + $0x2c0] sm:$0xff] %vm685_vm3, %v7607_v59  ;;  %7316 = vrot.lane.b32.xlu1 %v13814_v21, %s9527_s18  ;;  %8563 = vmatprep.mubr.f32.mxu1 %v8209_v53 }
 0x7e2   : > { %7958 = vrot.lane.b32.xlu0 %v13939_v63, %s9527_s18 }
 0x7e3   : > { %v7303_v34 = vpop.permute.xlu1 %7302 }
 0x7e4   : > { %7393 = vst.msk [vmem:[#allocation3 + $0x78] sm:$0xff] %vm1071_vm5, %v7303_v34  ;;  %v7753_v36 = vpop.permute.xlu0 %7752  ;;  %v8208_v11 = vld [vmem:[#allocation3 + $0x2a0] sm:$0xff] }
 0x7e5   : > { %8564 = vmatmul.mubr.f32.gmra.mxu1 %v8208_v11  ;;  %6934 = vrot.lane.b32.xlu1 %v13358_v7, %s9525_s16 }
 0x7e6   : > { %7576 = vrot.lane.b32.xlu0 %v13458_v51, %s9525_s16 }
 0x7e7   : > { %v7561_v19 = vpop.permute.xlu1 %7560  ;;  %v8140_v49 = vld [vmem:[#allocation3 + $0x80] sm:$0xff] }
 0x7e8   : > { %7650 = vst.msk [vmem:[#allocation3 + $0x98] sm:$0xff] %vm685_vm3, %v7561_v19  ;;  %v7113_v21 = vpop.permute.xlu0 %7112  ;;  %8448 = vmatprep.mubr.f32.mxu0 %v8140_v49 }
 0x7e9   : > { %7842 = vst.msk [vmem:[#allocation3 + $0x98] sm:$0xff] %vm878_vm4, %v7753_v36  ;;  %7202 = vst.msk [vmem:[#allocation3 + $0x90] sm:$0xff] %vm878_vm4, %v7113_v21  ;;  %7126 = vrot.lane.b32.xlu1 %v13401_v43, %s9526_s17 }
 0x7ea   : > { %7768 = vrot.lane.b32.xlu0 %v13953_v25, %s9526_s17 }
 0x7eb   : > { %v6967_v7 = vpop.permute.xlu1 %6966  ;;  %v8139_v0 = vld [vmem:[#allocation3 + $0x78] sm:$0xff] }
 0x7ec   : > { %7033 = vst.msk [vmem:[#allocation3 + $0x2b8] sm:$0xff] %vm685_vm3, %v6967_v7  ;;  %v7945_v57 = vpop.permute.xlu0 %7944  ;;  %8449 = vmatmul.mubr.f32.gmra.mxu0 %v8139_v0 }
 0x7ed   : > { %8034 = vst.msk [vmem:[#allocation3 + $0x98] sm:$0xff] %vm1071_vm5, %v7945_v57  ;;  %7318 = vrot.lane.b32.xlu1 %v13864_v33, %s9527_s18 }
 0x7ee   : > { %7960 = vrot.lane.b32.xlu0 %v13961_v60, %s9527_s18 }
 0x7ef   : > { %v7799_v43 = vpop.permute.xlu1 %7798 }
 0x7f0   : > { %7865 = vst.msk [vmem:[#allocation3 + $0x2c0] sm:$0xff] %vm878_vm4, %v7799_v43  ;;  %v7305_v24 = vpop.permute.xlu0 %7304 }
 0x7f1   : > { %7394 = vst.msk [vmem:[#allocation3 + $0x90] sm:$0xff] %vm1071_vm5, %v7305_v24  ;;  %6936 = vrot.lane.b32.xlu1 %v13367_v13, %s9525_s16 }
 0x7f2   : > { %7578 = vrot.lane.b32.xlu0 %v13468_v3, %s9525_s16 }
 0x7f3   : > { %v7159_v41 = vpop.permute.xlu1 %7158 }
 0x7f4   : > { %7225 = vst.msk [vmem:[#allocation3 + $0x2b8] sm:$0xff] %vm878_vm4, %v7159_v41  ;;  %v7563_v26 = vpop.permute.xlu0 %7562  ;;  %v8143_v33 = vld [vmem:[#allocation3 + $0x98] sm:$0xff]  ;;  %v8126_v41 = vld [vmem:[#allocation3 + $0x10] sm:$0xff] }
 0x7f5   : > { %7651 = vst.msk [vmem:[#allocation3 + $0xb0] sm:$0xff] %vm685_vm3, %v7563_v26  ;;  %8453 = vmatprep.mubr.f32.mxu0 %v8143_v33  ;;  %7128 = vrot.lane.b32.xlu1 %v13423_v39, %s9526_s17  ;;  %v8132_v33 = vld [vmem:[#allocation3 + $0x40] sm:$0xff] }
 0x7f6   : > { %7770 = vrot.lane.b32.xlu0 %v13975_v2, %s9526_s17 }
 0x7f7   : > { %v7991_v13 = vpop.permute.xlu1 %7990 }
 0x7f8   : > { %8057 = vst.msk [vmem:[#allocation3 + $0x2c0] sm:$0xff] %vm1071_vm5, %v7991_v13  ;;  %v6969_v30 = vpop.permute.xlu0 %6968  ;;  %v8142_v5 = vld [vmem:[#allocation3 + $0x90] sm:$0xff] }
 0x7f9   : > { %7034 = vst.msk [vmem:[#allocation3 + $0x2d0] sm:$0xff] %vm685_vm3, %v6969_v30  ;;  %8454 = vmatmul.mubr.f32.gmra.mxu0 %v8142_v5  ;;  %7320 = vrot.lane.b32.xlu1 %v13868_v14, %s9527_s18  ;;  %v13997_v14 = vld [vmem:[#allocation2 + $0x120] sm:$0xff]  ;;  %v8135_v30 = vld [vmem:[#allocation3 + $0x58] sm:$0xff] }
 0x7fa   : > { %7962 = vrot.lane.b32.xlu0 %v13983_v15, %s9527_s18 }
 0x7fb   : > { %v7351_v39 = vpop.permute.xlu1 %7350 }
 0x7fc   : > { %7417 = vst.msk [vmem:[#allocation3 + $0x2b8] sm:$0xff] %vm1071_vm5, %v7351_v39  ;;  %v7801_v17 = vpop.permute.xlu0 %7800 }
 0x7fd   : > { %6938 = vrot.lane.b32.xlu1 %v13378_v20, %s9525_s16 }
 0x7fe   : > { %7580 = vrot.lane.b32.xlu0 %v13478_v10, %s9525_s16 }
 0x7ff   : > { %v7609_v12 = vpop.permute.xlu1 %7608  ;;  %v8212_v46 = vld [vmem:[#allocation3 + $0x2c0] sm:$0xff] }
 0x800   : > { %7674 = vst.msk [vmem:[#allocation3 + $0x2d8] sm:$0xff] %vm685_vm3, %v7609_v12  ;;  %v7161_v27 = vpop.permute.xlu0 %7160  ;;  %8568 = vmatprep.mubr.f32.mxu1 %v8212_v46  ;;  %v8141_v46 = vld [vmem:[#allocation3 + $0x88] sm:$0xff] }
 0x801   : > { %7866 = vst.msk [vmem:[#allocation3 + $0x2d8] sm:$0xff] %vm878_vm4, %v7801_v17  ;;  %7226 = vst.msk [vmem:[#allocation3 + $0x2d0] sm:$0xff] %vm878_vm4, %v7161_v27  ;;  %7130 = vrot.lane.b32.xlu1 %v13425_v55, %s9526_s17  ;;  %v8138_v17 = vld [vmem:[#allocation3 + $0x70] sm:$0xff] }
 0x802   : > { %v14001_v23 = vpop.f32.mrf.mxu0  ;;  %7772 = vrot.lane.b32.xlu0 %v13997_v14, %s9526_s17 }
 0x803   : > { %v7755_v20 = vpop.permute.xlu1 %7754  ;;  %v8211_v22 = vld [vmem:[#allocation3 + $0x2b8] sm:$0xff] }
 0x804   : > { %v8427_v31 = vpop.f32.mrf.mxu0  ;;  %7843 = vst.msk [vmem:[#allocation3 + $0xb0] sm:$0xff] %vm878_vm4, %v7755_v20  ;;  %v7993_v4 = vpop.permute.xlu0 %7992  ;;  %8569 = vmatmul.mubr.f32.gmra.mxu1 %v8211_v22  ;;  %v8144_v20 = vld [vmem:[#allocation3 + $0xa0] sm:$0xff]  ;;  %v7697_v22 = vld [vmem:[#allocation2 + $0x158] sm:$0xff] }
 0x805   : > { %8058 = vst.msk [vmem:[#allocation3 + $0x2d8] sm:$0xff] %vm1071_vm5, %v7993_v4  ;;  %7322 = vrot.lane.b32.xlu1 %v13889_v54, %s9527_s18  ;;  %v8147_v4 = vld [vmem:[#allocation3 + $0xb8] sm:$0xff] }
 0x806   : > { %7964 = vrot.lane.b32.xlu0 %v13480_v44, %s9527_s18 }
 0x807   : > { %v7115_v55 = vpop.permute.xlu1 %7114 }
 0x808   : > { %7203 = vst.msk [vmem:[#allocation3 + $0xa8] sm:$0xff] %vm878_vm4, %v7115_v55  ;;  %v7353_v18 = vpop.permute.xlu0 %7352 }
 0x809   : > { %7418 = vst.msk [vmem:[#allocation3 + $0x2d0] sm:$0xff] %vm1071_vm5, %v7353_v18  ;;  %6940 = vrot.lane.b32.xlu1 %v13396_v8, %s9525_s16 }
 0x80a   : > { %7582 = vrot.lane.b32.xlu0 %v13488_v38, %s9525_s16 }
 0x80b   : > { %v7947_v50 = vpop.permute.xlu1 %7946 }
 0x80c   : > { %8035 = vst.msk [vmem:[#allocation3 + $0xb0] sm:$0xff] %vm1071_vm5, %v7947_v50  ;;  %v7611_v47 = vpop.permute.xlu0 %7610  ;;  %v8215_v54 = vld [vmem:[#allocation3 + $0x2d8] sm:$0xff]  ;;  %v8150_v50 = vld [vmem:[#allocation3 + $0xd0] sm:$0xff] }
 0x80d   : > { %7675 = vst.msk [vmem:[#allocation3 + $0x2f0] sm:$0xff] %vm685_vm3, %v7611_v47  ;;  %7132 = vrot.lane.b32.xlu1 %v13446_v42, %s9526_s17  ;;  %8573 = vmatprep.mubr.f32.mxu1 %v8215_v54  ;;  %v7889_v47 = vld [vmem:[#allocation2 + $0x15a] sm:$0xff] }
 0x80e   : > { %v14018_v59 = vpop.f32.mrf.mxu0  ;;  %7774 = vrot.lane.b32.xlu0 %v13436_v62, %s9526_s17 }
 0x80f   : > { %v7307_v53 = vpop.permute.xlu1 %7306 }
 0x810   : > { %v8432_v8 = vpop.f32.mrf.mxu0  ;;  %7395 = vst.msk [vmem:[#allocation3 + $0xa8] sm:$0xff] %vm1071_vm5, %v7307_v53  ;;  %v7757_v34 = vpop.permute.xlu0 %7756  ;;  %v8214_v36 = vld [vmem:[#allocation3 + $0x2d0] sm:$0xff]  ;;  %v8153_v53 = vld [vmem:[#allocation3 + $0xe8] sm:$0xff] }
 0x811   : > { %8574 = vmatmul.mubr.f32.gmra.mxu1 %v8214_v36  ;;  %7324 = vrot.lane.b32.xlu1 %v13910_v35, %s9527_s18 }
 0x812   : > { %7966 = vrot.lane.b32.xlu0 %v13490_v45, %s9527_s18 }
 0x813   : > { %v7565_v11 = vpop.permute.xlu1 %7564  ;;  %v8146_v19 = vld [vmem:[#allocation3 + $0xb0] sm:$0xff] }
 0x814   : > { %7652 = vst.msk [vmem:[#allocation3 + $0xc8] sm:$0xff] %vm685_vm3, %v7565_v11  ;;  %v7117_v42 = vpop.permute.xlu0 %7116  ;;  %8458 = vmatprep.mubr.f32.mxu0 %v8146_v19  ;;  %v8156_v11 = vld [vmem:[#allocation3 + $0x100] sm:$0xff]  ;;  %v14488_v19 = vld [vmem:[#allocation5_spill] sm:$0xff] }
 0x815   : > { %7844 = vst.msk [vmem:[#allocation3 + $0xc8] sm:$0xff] %vm878_vm4, %v7757_v34  ;;  %7204 = vst.msk [vmem:[#allocation3 + $0xc0] sm:$0xff] %vm878_vm4, %v7117_v42  ;;  %6942 = vrot.lane.b32.xlu1 %v13413_v56, %s9525_s16  ;;  %v8159_v42 = vld [vmem:[#allocation3 + $0x118] sm:$0xff] }
 0x816   : > { %7584 = vrot.lane.b32.xlu0 %v13492_v29, %s9525_s16 }
 0x817   : > { %v6971_v62 = vpop.permute.xlu1 %6970  ;;  %v8145_v35 = vld [vmem:[#allocation3 + $0xa8] sm:$0xff] }
 0x818   : > { %7035 = vst.msk [vmem:[#allocation3 + $0x2e8] sm:$0xff] %vm685_vm3, %v6971_v62  ;;  %v7949_v45 = vpop.permute.xlu0 %7948  ;;  %8459 = vmatmul.mubr.f32.gmra.mxu0 %v8145_v35  ;;  %v8162_v35 = vld [vmem:[#allocation3 + $0x130] sm:$0xff] }
 0x819   : > { %8036 = vst.msk [vmem:[#allocation3 + $0xc8] sm:$0xff] %vm1071_vm5, %v7949_v45  ;;  %7134 = vrot.lane.b32.xlu1 %v13452_v6, %s9526_s17  ;;  %v7698_v45 = vld [vmem:[#allocation2 + $0x168] sm:$0xff] }
 0x81a   : > { %7776 = vrot.lane.b32.xlu0 %v13528_v32, %s9526_s17 }
 0x81b   : > { %v7803_v49 = vpop.permute.xlu1 %7802 }
 0x81c   : > { %7867 = vst.msk [vmem:[#allocation3 + $0x2f0] sm:$0xff] %vm878_vm4, %v7803_v49  ;;  %v7309_v56 = vpop.permute.xlu0 %7308 }
 0x81d   : > { %7396 = vst.msk [vmem:[#allocation3 + $0xc0] sm:$0xff] %vm1071_vm5, %v7309_v56  ;;  %7326 = vrot.lane.b32.xlu1 %v13933_v9, %s9527_s18 }
 0x81e   : > { %7968 = vrot.lane.b32.xlu0 %v13530_v37, %s9527_s18 }
 0x81f   : > { %v7163_v21 = vpop.permute.xlu1 %7162 }
 0x820   : > { %7227 = vst.msk [vmem:[#allocation3 + $0x2e8] sm:$0xff] %vm878_vm4, %v7163_v21  ;;  %v7567_v7 = vpop.permute.xlu0 %7566  ;;  %v8149_v6 = vld [vmem:[#allocation3 + $0xc8] sm:$0xff]  ;;  %v8168_v21 = vld [vmem:[#allocation3 + $0x160] sm:$0xff] }
 0x821   : > { %7653 = vst.msk [vmem:[#allocation3 + $0xe0] sm:$0xff] %vm685_vm3, %v7567_v7  ;;  %8463 = vmatprep.mubr.f32.mxu0 %v8149_v6  ;;  %6944 = vrot.lane.b32.xlu1 %v13421_v28, %s9525_s16  ;;  %v7890_v7 = vld [vmem:[#allocation2 + $0x16a] sm:$0xff] }
 0x822   : > { %7586 = vrot.lane.b32.xlu0 %v13277_v52, %s9525_s16  ;;  %v7249_v6 = vld [vmem:[#allocation2 + $0x128] sm:$0xff] }
 0x823   : > { %v7995_v32 = vpop.permute.xlu1 %7994 }
 0x824   : > { %8059 = vst.msk [vmem:[#allocation3 + $0x2f0] sm:$0xff] %vm1071_vm5, %v7995_v32  ;;  %v7119_v9 = vpop.permute.xlu0 %7118  ;;  %v8148_v0 = vld [vmem:[#allocation3 + $0xc0] sm:$0xff] }
 0x825   : > { %7205 = vst.msk [vmem:[#allocation3 + $0xd8] sm:$0xff] %vm878_vm4, %v7119_v9  ;;  %8464 = vmatmul.mubr.f32.gmra.mxu0 %v8148_v0  ;;  %7136 = vrot.lane.b32.xlu1 %v13458_v51, %s9526_s17  ;;  %v8171_v9 = vld [vmem:[#allocation3 + $0x178] sm:$0xff] }
 0x826   : > { %7778 = vrot.lane.b32.xlu0 %v13565_v40, %s9526_s17 }
 0x827   : > { %v7355_v37 = vpop.permute.xlu1 %7354 }
 0x828   : > { %7419 = vst.msk [vmem:[#allocation3 + $0x2e8] sm:$0xff] %vm1071_vm5, %v7355_v37  ;;  %v7311_v28 = vpop.permute.xlu0 %7310  ;;  %v8174_v37 = vld [vmem:[#allocation3 + $0x190] sm:$0xff] }
 0x829   : > { %7397 = vst.msk [vmem:[#allocation3 + $0xd8] sm:$0xff] %vm1071_vm5, %v7311_v28  ;;  %7328 = vrot.lane.b32.xlu1 %v13953_v25, %s9527_s18 }
 0x82a   : > { %7970 = vrot.lane.b32.xlu0 %v13567_v16, %s9527_s18 }
 0x82b   : > { %v7759_v57 = vpop.permute.xlu1 %7758  ;;  %v8218_v43 = vld [vmem:[#allocation3 + $0x2f0] sm:$0xff] }
 0x82c   : > { %7845 = vst.msk [vmem:[#allocation3 + $0xe0] sm:$0xff] %vm878_vm4, %v7759_v57  ;;  %v7761_v51 = vpop.permute.xlu0 %7760  ;;  %8578 = vmatprep.mubr.f32.mxu1 %v8218_v43  ;;  %v14489_v57 = vld [vmem:[#allocation6_spill] sm:$0xff] }
 0x82d   : > { %6946 = vrot.lane.b32.xlu1 %v13897_v61, %s9525_s16  ;;  %v8129_v61 = vld [vmem:[#allocation3 + $0x28] sm:$0xff] }
 0x82e   : > { %7588 = vrot.lane.b32.xlu0 %v13498_v1, %s9525_s16 }
 0x82f   : > { %v7951_v40 = vpop.permute.xlu1 %7950  ;;  %v8217_v24 = vld [vmem:[#allocation3 + $0x2e8] sm:$0xff] }
 0x830   : > { %8037 = vst.msk [vmem:[#allocation3 + $0xe0] sm:$0xff] %vm1071_vm5, %v7951_v40  ;;  %v7953_v25 = vpop.permute.xlu0 %7952  ;;  %8579 = vmatmul.mubr.f32.gmra.mxu1 %v8217_v24  ;;  %v8151_v39 = vld [vmem:[#allocation3 + $0xd8] sm:$0xff]  ;;  %v8180_v24 = vld [vmem:[#allocation3 + $0x1c0] sm:$0xff] }
 0x831   : > { %9362 = vmatprep.mubr.msk.f32.mxu1 %vm333_vm0, %v8126_v41  ;;  %7138 = vrot.lane.b32.xlu1 %v13468_v3, %s9526_s17  ;;  %v14486_v3 = vld [vmem:[#allocation7_spill] sm:$0xff] }
 0x832   : > { %7780 = vrot.lane.b32.xlu0 %v13583_v58, %s9526_s17 }
 0x833   : > { %v7569_v16 = vpop.permute.xlu1 %7568 }
 0x834   : > { %7654 = vst.msk [vmem:[#allocation3 + $0xf8] sm:$0xff] %vm685_vm3, %v7569_v16  ;;  %v7571_v26 = vpop.permute.xlu0 %7570  ;;  %9363 = vmatmul.mubr.msk.f32.vlgmr.msra.gmra.mxu1 %vm333_vm0, %v8129_v61  ;;  %v8186_v61 = vld [vmem:[#allocation3 + $0x1f0] sm:$0xff] }
 0x835   : > { %7846 = vst.msk [vmem:[#allocation3 + $0xf8] sm:$0xff] %vm878_vm4, %v7761_v51  ;;  %9365 = vmatprep.mubr.msk.f32.mxu1 %vm333_vm0, %v8132_v33  ;;  %7330 = vrot.lane.b32.xlu1 %v13975_v2, %s9527_s18  ;;  %v14487_v2 = vld [vmem:[#allocation4_spill] sm:$0xff]  ;;  %v8177_v51 = vld [vmem:[#allocation3 + $0x1a8] sm:$0xff]  ;;  %v7250_v33 = vld [vmem:[#allocation2 + $0x138] sm:$0xff] }
 0x836   : > { %7655 = vst.msk [vmem:[#allocation3 + $0x110] sm:$0xff] %vm685_vm3, %v7571_v26  ;;  %7972 = vrot.lane.b32.xlu0 %v14486_v3, %s9527_s18  ;;  %v7891_v26 = vld [vmem:[#allocation2 + $0x172] sm:$0xff] }
 0x837   : > { %8038 = vst.msk [vmem:[#allocation3 + $0xf8] sm:$0xff] %vm1071_vm5, %v7953_v25  ;;  %v7121_v58 = vpop.permute.xlu1 %7120  ;;  %v8152_v13 = vld [vmem:[#allocation3 + $0xe0] sm:$0xff]  ;;  %v7699_v25 = vld [vmem:[#allocation2 + $0x170] sm:$0xff] }
 0x838   : > { %7206 = vst.msk [vmem:[#allocation3 + $0xf0] sm:$0xff] %vm878_vm4, %v7121_v58  ;;  %v7763_v5 = vpop.permute.xlu0 %7762  ;;  %8468 = vmatprep.mubr.f32.mxu0 %v8152_v13  ;;  %9366 = vmatmul.mubr.msk.f32.gmra.mxu1 %vm333_vm0, %v8135_v30  ;;  %v8189_v58 = vld [vmem:[#allocation3 + $0x208] sm:$0xff]  ;;  %v8192_v30 = vld [vmem:[#allocation3 + $0x220] sm:$0xff] }
 0x839   : > { %7847 = vst.msk [vmem:[#allocation3 + $0x110] sm:$0xff] %vm878_vm4, %v7763_v5  ;;  %8469 = vmatmul.mubr.f32.gmra.mxu0 %v8151_v39  ;;  %9368 = vmatprep.mubr.msk.f32.mxu1 %vm333_vm0, %v8138_v17  ;;  %v14490_v39 = vld [vmem:[#allocation8_spill] sm:$0xff] }
 0x83a   : > { %7590 = vrot.lane.b32.xlu0 %v14487_v2, %s9525_s16  ;;  %6948 = vrot.lane.b32.xlu1 %v13919_v48, %s9525_s16  ;;  %v8195_v2 = vld [vmem:[#allocation3 + $0x238] sm:$0xff] }
 0x83b   : > { %v7313_v12 = vpop.permute.xlu1 %7312 }
 0x83c   : > { %7398 = vst.msk [vmem:[#allocation3 + $0xf0] sm:$0xff] %vm1071_vm5, %v7313_v12  ;;  %v7955_v27 = vpop.permute.xlu0 %7954  ;;  %9369 = vmatmul.mubr.msk.f32.gmra.mxu1 %vm333_vm0, %v8141_v46  ;;  %v8198_v46 = vld [vmem:[#allocation3 + $0x250] sm:$0xff] }
 0x83d   : > { %8039 = vst.msk [vmem:[#allocation3 + $0x110] sm:$0xff] %vm1071_vm5, %v7955_v27  ;;  %9371 = vmatprep.mubr.msk.f32.mxu1 %vm333_vm0, %v8144_v20  ;;  %v7700_v27 = vld [vmem:[#allocation2 + $0x180] sm:$0xff] }
 0x83e   : > { %v8155_v31 = vld [vmem:[#allocation3 + $0xf8] sm:$0xff]  ;;  %7782 = vrot.lane.b32.xlu0 %v7697_v22, %s9526_s17  ;;  %7140 = vrot.lane.b32.xlu1 %v13478_v10, %s9526_s17 }
 0x83f   : > { %8473 = vmatprep.mubr.f32.mxu0 %v8155_v31  ;;  %v6931_v48 = vpop.permute.xlu1 %6930  ;;  %v8204_v31 = vld [vmem:[#allocation3 + $0x280] sm:$0xff] }
 0x840   : > { %7015 = vst.msk [vmem:[#allocation3 + $0x108] sm:$0xff] %vm685_vm3, %v6931_v48  ;;  %v7573_v55 = vpop.permute.xlu0 %7572  ;;  %v14104_v18 = vpop.f32.mrf.mxu0  ;;  %9372 = vmatmul.mubr.msk.f32.gmra.mxu1 %vm333_vm0, %v8147_v4  ;;  %v7892_v48 = vld [vmem:[#allocation2 + $0x182] sm:$0xff] }
 0x841   : > { %7656 = vst.msk [vmem:[#allocation3 + $0x128] sm:$0xff] %vm685_vm3, %v7573_v55  ;;  %9374 = vmatprep.mubr.msk.f32.mxu1 %vm333_vm0, %v8150_v50  ;;  %v7251_v4 = vld [vmem:[#allocation2 + $0x140] sm:$0xff]  ;;  %v8210_v55 = vld [vmem:[#allocation3 + $0x2b0] sm:$0xff] }
 0x842   : > { %7974 = vrot.lane.b32.xlu0 %v7889_v47, %s9527_s18  ;;  %7332 = vrot.lane.b32.xlu1 %v13997_v14, %s9527_s18  ;;  %v8437_v10 = vpop.f32.mrf.mxu0  ;;  %v8207_v47 = vld [vmem:[#allocation3 + $0x298] sm:$0xff] }
 0x843   : > { %v7123_v54 = vpop.permute.xlu1 %7122  ;;  %v8154_v8 = vld [vmem:[#allocation3 + $0xf0] sm:$0xff] }
 0x844   : > { %7207 = vst.msk [vmem:[#allocation3 + $0x108] sm:$0xff] %vm878_vm4, %v7123_v54  ;;  %v7765_v34 = vpop.permute.xlu0 %7764  ;;  %8474 = vmatmul.mubr.f32.gmra.mxu0 %v8154_v8  ;;  %9375 = vmatmul.mubr.msk.f32.gmra.mxu1 %vm333_vm0, %v8153_v53  ;;  %v8158_v36 = vld [vmem:[#allocation3 + $0x110] sm:$0xff]  ;;  %v8213_v8 = vld [vmem:[#allocation3 + $0x2c8] sm:$0xff]  ;;  %v8216_v53 = vld [vmem:[#allocation3 + $0x2e0] sm:$0xff] }
 0x845   : > { %7848 = vst.msk [vmem:[#allocation3 + $0x128] sm:$0xff] %vm878_vm4, %v7765_v34  ;;  %8478 = vmatprep.mubr.f32.mxu0 %v8158_v36  ;;  %9377 = vmatprep.mubr.msk.f32.mxu1 %vm333_vm0, %v8156_v11 }
 0x846   : > { %7592 = vrot.lane.b32.xlu0 %v14488_v19, %s9525_s16  ;;  %6950 = vrot.lane.b32.xlu1 %v13939_v63, %s9525_s16  ;;  %v8165_v63 = vld [vmem:[#allocation3 + $0x148] sm:$0xff]  ;;  %v8219_v19 = vld [vmem:[#allocation3 + $0x2f8] sm:$0xff] }
 0x847   : > { %v7315_v14 = vpop.permute.xlu1 %7314 }
 0x848   : > { %7399 = vst.msk [vmem:[#allocation3 + $0x108] sm:$0xff] %vm1071_vm5, %v7315_v14  ;;  %v7957_v62 = vpop.permute.xlu0 %7956  ;;  %9378 = vmatmul.mubr.msk.f32.gmra.mxu1 %vm333_vm0, %v8159_v42 }
 0x849   : > { %8040 = vst.msk [vmem:[#allocation3 + $0x128] sm:$0xff] %vm1071_vm5, %v7957_v62  ;;  %9380 = vmatprep.mubr.msk.f32.mxu1 %vm333_vm0, %v8162_v35  ;;  %v7252_v62 = vld [vmem:[#allocation2 + $0x150] sm:$0xff] }
 0x84a   : > { %7784 = vrot.lane.b32.xlu0 %v7698_v45, %s9526_s17  ;;  %7142 = vrot.lane.b32.xlu1 %v13488_v38, %s9526_s17 }
 0x84b   : > { %v6933_v49 = vpop.permute.xlu1 %6932 }
 0x84c   : > { %7016 = vst.msk [vmem:[#allocation3 + $0x120] sm:$0xff] %vm685_vm3, %v6933_v49  ;;  %v7575_v56 = vpop.permute.xlu0 %7574  ;;  %9381 = vmatmul.mubr.msk.f32.gmra.mxu1 %vm333_vm0, %v8165_v63 }
 0x84d   : > { %7657 = vst.msk [vmem:[#allocation3 + $0x140] sm:$0xff] %vm685_vm3, %v7575_v56  ;;  %9383 = vmatprep.mubr.msk.f32.mxu1 %vm333_vm0, %v8168_v21 }
 0x84e   : > { %7976 = vrot.lane.b32.xlu0 %v7890_v7, %s9527_s18  ;;  %7334 = vrot.lane.b32.xlu1 %v7249_v6, %s9527_s18 }
 0x84f   : > { %v7125_v32 = vpop.permute.xlu1 %7124  ;;  %v8157_v38 = vld [vmem:[#allocation3 + $0x108] sm:$0xff] }
 0x850   : > { %7208 = vst.msk [vmem:[#allocation3 + $0x120] sm:$0xff] %vm878_vm4, %v7125_v32  ;;  %v7767_v0 = vpop.permute.xlu0 %7766  ;;  %8479 = vmatmul.mubr.f32.gmra.mxu0 %v8157_v38  ;;  %9384 = vmatmul.mubr.msk.f32.gmra.mxu1 %vm333_vm0, %v8171_v9  ;;  %v8161_v28 = vld [vmem:[#allocation3 + $0x128] sm:$0xff] }
 0x851   : > { %7849 = vst.msk [vmem:[#allocation3 + $0x140] sm:$0xff] %vm878_vm4, %v7767_v0  ;;  %9386 = vmatprep.mubr.msk.f32.mxu1 %vm333_vm0, %v8174_v37  ;;  %8483 = vmatprep.mubr.f32.mxu0 %v8161_v28 }
 0x852   : > { %7594 = vrot.lane.b32.xlu0 %v14489_v57, %s9525_s16  ;;  %6952 = vrot.lane.b32.xlu1 %v13961_v60, %s9525_s16  ;;  %v8183_v60 = vld [vmem:[#allocation3 + $0x1d8] sm:$0xff] }
 0x853   : > { %v7317_v43 = vpop.permute.xlu1 %7316 }
 0x854   : > { %v7959_v40 = vpop.permute.xlu0 %7958  ;;  %7400 = vst.msk [vmem:[#allocation3 + $0x120] sm:$0xff] %vm1071_vm5, %v7317_v43  ;;  %9387 = vmatmul.mubr.msk.f32.gmra.mxu1 %vm333_vm0, %v8177_v51 }
 0x855   : > { %8041 = vst.msk [vmem:[#allocation3 + $0x140] sm:$0xff] %vm1071_vm5, %v7959_v40  ;;  %9389 = vmatprep.mubr.msk.f32.mxu1 %vm333_vm0, %v8180_v24 }
 0x856   : > { %7786 = vrot.lane.b32.xlu0 %v7699_v25, %s9526_s17  ;;  %7144 = vrot.lane.b32.xlu1 %v13492_v29, %s9526_s17 }
 0x857   : > { %v6935_v41 = vpop.permute.xlu1 %6934 }
 0x858   : > { %v7577_v16 = vpop.permute.xlu0 %7576  ;;  %7017 = vst.msk [vmem:[#allocation3 + $0x138] sm:$0xff] %vm685_vm3, %v6935_v41  ;;  %9390 = vmatmul.mubr.msk.f32.gmra.mxu1 %vm333_vm0, %v8183_v60 }
 0x859   : > { %7658 = vst.msk [vmem:[#allocation3 + $0x158] sm:$0xff] %vm685_vm3, %v7577_v16  ;;  %9392 = vmatprep.mubr.msk.f32.mxu1 %vm333_vm0, %v8186_v61 }
 0x85a   : > { %7978 = vrot.lane.b32.xlu0 %v7891_v26, %s9527_s18  ;;  %7336 = vrot.lane.b32.xlu1 %v7250_v33, %s9527_s18 }
 0x85b   : > { %v7127_v3 = vpop.permute.xlu1 %7126  ;;  %v8160_v29 = vld [vmem:[#allocation3 + $0x120] sm:$0xff] }
 0x85c   : > { %v7769_v13 = vpop.permute.xlu0 %7768  ;;  %7209 = vst.msk [vmem:[#allocation3 + $0x138] sm:$0xff] %vm878_vm4, %v7127_v3  ;;  %8484 = vmatmul.mubr.f32.gmra.mxu0 %v8160_v29  ;;  %9393 = vmatmul.mubr.msk.f32.gmra.mxu1 %vm333_vm0, %v8189_v58  ;;  %v8164_v5 = vld [vmem:[#allocation3 + $0x140] sm:$0xff] }
 0x85d   : > { %7850 = vst.msk [vmem:[#allocation3 + $0x158] sm:$0xff] %vm878_vm4, %v7769_v13  ;;  %9395 = vmatprep.mubr.msk.f32.mxu1 %vm333_vm0, %v8192_v30  ;;  %8488 = vmatprep.mubr.f32.mxu0 %v8164_v5 }
 0x85e   : > { %7596 = vrot.lane.b32.xlu0 %v14490_v39, %s9525_s16  ;;  %6954 = vrot.lane.b32.xlu1 %v13983_v15, %s9525_s16  ;;  %v8201_v15 = vld [vmem:[#allocation3 + $0x268] sm:$0xff] }
 0x85f   : > { %v7319_v17 = vpop.permute.xlu1 %7318 }
 0x860   : > { %v7961_v12 = vpop.permute.xlu0 %7960  ;;  %7401 = vst.msk [vmem:[#allocation3 + $0x138] sm:$0xff] %vm1071_vm5, %v7319_v17  ;;  %9396 = vmatmul.mubr.msk.f32.gmra.mxu1 %vm333_vm0, %v8195_v2 }
 0x861   : > { %8042 = vst.msk [vmem:[#allocation3 + $0x158] sm:$0xff] %vm1071_vm5, %v7961_v12  ;;  %9398 = vmatprep.mubr.msk.f32.mxu1 %vm333_vm0, %v8198_v46 }
 0x862   : > { %7788 = vrot.lane.b32.xlu0 %v7700_v27, %s9526_s17  ;;  %7146 = vrot.lane.b32.xlu1 %v13277_v52, %s9526_s17 }
 0x863   : > { %v6937_v20 = vpop.permute.xlu1 %6936 }
 0x864   : > { %v7579_v22 = vpop.permute.xlu0 %7578  ;;  %7018 = vst.msk [vmem:[#allocation3 + $0x150] sm:$0xff] %vm685_vm3, %v6937_v20  ;;  %9399 = vmatmul.mubr.msk.f32.gmra.mxu1 %vm333_vm0, %v8201_v15 }
 0x865   : > { %7659 = vst.msk [vmem:[#allocation3 + $0x170] sm:$0xff] %vm685_vm3, %v7579_v22  ;;  %9401 = vmatprep.mubr.msk.f32.mxu1 %vm333_vm0, %v8204_v31 }
 0x866   : > { %7980 = vrot.lane.b32.xlu0 %v7892_v48, %s9527_s18  ;;  %7338 = vrot.lane.b32.xlu1 %v7251_v4, %s9527_s18 }
 0x867   : > { %v7129_v52 = vpop.permute.xlu1 %7128  ;;  %v8163_v50 = vld [vmem:[#allocation3 + $0x138] sm:$0xff] }
 0x868   : > { %v7771_v10 = vpop.permute.xlu0 %7770  ;;  %7210 = vst.msk [vmem:[#allocation3 + $0x150] sm:$0xff] %vm878_vm4, %v7129_v52  ;;  %8489 = vmatmul.mubr.f32.gmra.mxu0 %v8163_v50  ;;  %9402 = vmatmul.mubr.msk.f32.gmra.mxu1 %vm333_vm0, %v8207_v47  ;;  %v8167_v54 = vld [vmem:[#allocation3 + $0x158] sm:$0xff] }
 0x869   : > { %7851 = vst.msk [vmem:[#allocation3 + $0x170] sm:$0xff] %vm878_vm4, %v7771_v10  ;;  %8493 = vmatprep.mubr.f32.mxu0 %v8167_v54  ;;  %9404 = vmatprep.mubr.msk.f32.mxu1 %vm333_vm0, %v8210_v55 }
 0x86a   : > { %6956 = vrot.lane.b32.xlu1 %v13480_v44, %s9525_s16 }
 0x86b   : > { %v7321_v34 = vpop.permute.xlu1 %7320 }
 0x86c   : > { %v7963_v36 = vpop.permute.xlu0 %7962  ;;  %7402 = vst.msk [vmem:[#allocation3 + $0x150] sm:$0xff] %vm1071_vm5, %v7321_v34  ;;  %v14182_v11 = vpop.f32.mrf.mxu1  ;;  %9405 = vmatmul.mubr.msk.f32.gmra.mxu1 %vm333_vm0, %v8213_v8 }
 0x86d   : > { %8043 = vst.msk [vmem:[#allocation3 + $0x170] sm:$0xff] %vm1071_vm5, %v7963_v36  ;;  %9407 = vmatprep.mubr.msk.f32.mxu1 %vm333_vm0, %v8216_v53 }
 0x86e   : > { %7148 = vrot.lane.b32.xlu1 %v13498_v1, %s9526_s17  ;;  %v8552_v14 = vpop.f32.mrf.mxu1 }
 0x86f   : > { %v6939_v42 = vpop.permute.xlu1 %6938 }
 0x870   : > { %v7581_v44 = vpop.permute.xlu0 %7580  ;;  %7019 = vst.msk [vmem:[#allocation3 + $0x168] sm:$0xff] %vm685_vm3, %v6939_v42  ;;  %9408 = vmatmul.mubr.msk.f32.gmra.mxu1 %vm333_vm0, %v8219_v19 }
 0x871   : > { %7660 = vst.msk [vmem:[#allocation3 + $0x188] sm:$0xff] %vm685_vm3, %v7581_v44 }
 0x872   : > { %7340 = vrot.lane.b32.xlu1 %v7252_v62, %s9527_s18 }
 0x873   : > { %v7131_v35 = vpop.permute.xlu1 %7130  ;;  %v8166_v45 = vld [vmem:[#allocation3 + $0x150] sm:$0xff] }
 0x874   : > { %v7773_v49 = vpop.permute.xlu0 %7772  ;;  %7211 = vst.msk [vmem:[#allocation3 + $0x168] sm:$0xff] %vm878_vm4, %v7131_v35  ;;  %8494 = vmatmul.mubr.f32.gmra.mxu0 %v8166_v45  ;;  %v8170_v63 = vld [vmem:[#allocation3 + $0x170] sm:$0xff] }
 0x875   : > { %7852 = vst.msk [vmem:[#allocation3 + $0x188] sm:$0xff] %vm878_vm4, %v7773_v49  ;;  %8498 = vmatprep.mubr.f32.mxu0 %v8170_v63 }
 0x877   : > { %v7323_v1 = vpop.permute.xlu1 %7322 }
 0x878   : > { %v7965_v56 = vpop.permute.xlu0 %7964  ;;  %7403 = vst.msk [vmem:[#allocation3 + $0x168] sm:$0xff] %vm1071_vm5, %v7323_v1 }
 0x879   : > { %v14196_v21 = vpop.f32.mrf.mxu1  ;;  %8044 = vst.msk [vmem:[#allocation3 + $0x188] sm:$0xff] %vm1071_vm5, %v7965_v56 }
 0x87b   : > { %v8557_v7 = vpop.f32.mrf.mxu1  ;;  %v6941_v6 = vpop.permute.xlu1 %6940 }
 0x87c   : > { %v7583_v32 = vpop.permute.xlu0 %7582  ;;  %7020 = vst.msk [vmem:[#allocation3 + $0x180] sm:$0xff] %vm685_vm3, %v6941_v6 }
 0x87d   : > { %7661 = vst.msk [vmem:[#allocation3 + $0x1a0] sm:$0xff] %vm685_vm3, %v7583_v32 }
 0x87f   : > { %v7133_v38 = vpop.permute.xlu1 %7132  ;;  %v8169_v9 = vld [vmem:[#allocation3 + $0x168] sm:$0xff] }
 0x880   : > { %v7775_v0 = vpop.permute.xlu0 %7774  ;;  %7212 = vst.msk [vmem:[#allocation3 + $0x180] sm:$0xff] %vm878_vm4, %v7133_v38  ;;  %v14202_v37 = vpop.f32.mrf.mxu0  ;;  %8499 = vmatmul.mubr.f32.gmra.mxu0 %v8169_v9  ;;  %v8173_v28 = vld [vmem:[#allocation3 + $0x188] sm:$0xff] }
 0x881   : > { %7853 = vst.msk [vmem:[#allocation3 + $0x1a0] sm:$0xff] %vm878_vm4, %v7775_v0  ;;  %8503 = vmatprep.mubr.f32.mxu0 %v8173_v28 }
 0x882   : > { %v8442_v57 = vpop.f32.mrf.mxu0 }
 0x883   : > { %v7325_v43 = vpop.permute.xlu1 %7324 }
 0x884   : > { %v7967_v51 = vpop.permute.xlu0 %7966  ;;  %7404 = vst.msk [vmem:[#allocation3 + $0x180] sm:$0xff] %vm1071_vm5, %v7325_v43 }
 0x885   : > { %8045 = vst.msk [vmem:[#allocation3 + $0x1a0] sm:$0xff] %vm1071_vm5, %v7967_v51 }
 0x887   : > { %v6943_v40 = vpop.permute.xlu1 %6942 }
 0x888   : > { %v7585_v24 = vpop.permute.xlu0 %7584  ;;  %7021 = vst.msk [vmem:[#allocation3 + $0x198] sm:$0xff] %vm685_vm3, %v6943_v40 }
 0x889   : > { %7662 = vst.msk [vmem:[#allocation3 + $0x1b8] sm:$0xff] %vm685_vm3, %v7585_v24 }
 0x88b   : > { %v7135_v25 = vpop.permute.xlu1 %7134  ;;  %v8172_v41 = vld [vmem:[#allocation3 + $0x180] sm:$0xff] }
 0x88c   : > { %v7777_v60 = vpop.permute.xlu0 %7776  ;;  %7213 = vst.msk [vmem:[#allocation3 + $0x198] sm:$0xff] %vm878_vm4, %v7135_v25  ;;  %8504 = vmatmul.mubr.f32.gmra.mxu0 %v8172_v41  ;;  %v8176_v16 = vld [vmem:[#allocation3 + $0x1a0] sm:$0xff] }
 0x88d   : > { %7854 = vst.msk [vmem:[#allocation3 + $0x1b8] sm:$0xff] %vm878_vm4, %v7777_v60  ;;  %v14211_v61 = vpop.f32.mrf.mxu0  ;;  %8508 = vmatprep.mubr.f32.mxu0 %v8176_v16 }
 0x88f   : > { %v8447_v26 = vpop.f32.mrf.mxu0  ;;  %v7327_v33 = vpop.permute.xlu1 %7326 }
 0x890   : > { %v7969_v3 = vpop.permute.xlu0 %7968  ;;  %7405 = vst.msk [vmem:[#allocation3 + $0x198] sm:$0xff] %vm1071_vm5, %v7327_v33 }
 0x891   : > { %8046 = vst.msk [vmem:[#allocation3 + $0x1b8] sm:$0xff] %vm1071_vm5, %v7969_v3 }
 0x893   : > { %v6945_v29 = vpop.permute.xlu1 %6944 }
 0x894   : > { %v7587_v58 = vpop.permute.xlu0 %7586  ;;  %7022 = vst.msk [vmem:[#allocation3 + $0x1b0] sm:$0xff] %vm685_vm3, %v6945_v29 }
 0x895   : > { %7663 = vst.msk [vmem:[#allocation3 + $0x1d0] sm:$0xff] %vm685_vm3, %v7587_v58 }
 0x897   : > { %v7137_v13 = vpop.permute.xlu1 %7136  ;;  %v8175_v30 = vld [vmem:[#allocation3 + $0x198] sm:$0xff] }
 0x898   : > { %v7779_v5 = vpop.permute.xlu0 %7778  ;;  %7214 = vst.msk [vmem:[#allocation3 + $0x1b0] sm:$0xff] %vm878_vm4, %v7137_v13  ;;  %8509 = vmatmul.mubr.f32.gmra.mxu0 %v8175_v30  ;;  %v14218_v39 = vpop.f32.mrf.mxu1  ;;  %v8179_v17 = vld [vmem:[#allocation3 + $0x1b8] sm:$0xff] }
 0x899   : > { %7855 = vst.msk [vmem:[#allocation3 + $0x1d0] sm:$0xff] %vm878_vm4, %v7779_v5  ;;  %8513 = vmatprep.mubr.f32.mxu0 %v8179_v17 }
 0x89a   : > { %v8562_v2 = vpop.f32.mrf.mxu1 }
 0x89b   : > { %v7329_v12 = vpop.permute.xlu1 %7328 }
 0x89c   : > { %v7971_v46 = vpop.permute.xlu0 %7970  ;;  %7406 = vst.msk [vmem:[#allocation3 + $0x1b0] sm:$0xff] %vm1071_vm5, %v7329_v12 }
 0x89d   : > { %8047 = vst.msk [vmem:[#allocation3 + $0x1d0] sm:$0xff] %vm1071_vm5, %v7971_v46 }
 0x89f   : > { %v6947_v27 = vpop.permute.xlu1 %6946 }
 0x8a0   : > { %v7589_v20 = vpop.permute.xlu0 %7588  ;;  %7023 = vst.msk [vmem:[#allocation3 + $0x1c8] sm:$0xff] %vm685_vm3, %v6947_v27 }
 0x8a1   : > { %7664 = vst.msk [vmem:[#allocation3 + $0x1e8] sm:$0xff] %vm685_vm3, %v7589_v20 }
 0x8a3   : > { %v7139_v15 = vpop.permute.xlu1 %7138  ;;  %v8178_v22 = vld [vmem:[#allocation3 + $0x1b0] sm:$0xff] }
 0x8a4   : > { %v7781_v31 = vpop.permute.xlu0 %7780  ;;  %7215 = vst.msk [vmem:[#allocation3 + $0x1c8] sm:$0xff] %vm878_vm4, %v7139_v15  ;;  %8514 = vmatmul.mubr.f32.gmra.mxu0 %v8178_v22  ;;  %v8182_v48 = vld [vmem:[#allocation3 + $0x1d0] sm:$0xff] }
 0x8a5   : > { %7856 = vst.msk [vmem:[#allocation3 + $0x1e8] sm:$0xff] %vm878_vm4, %v7781_v31  ;;  %v14227_v4 = vpop.f32.mrf.mxu1  ;;  %8518 = vmatprep.mubr.f32.mxu0 %v8182_v48  ;;  %v14271_v48 = vld [vmem:[%s14425_s8] ss:$0 sm:$0xff] }
 0x8a7   : > { %v8567_v55 = vpop.f32.mrf.mxu1  ;;  %v7331_v52 = vpop.permute.xlu1 %7330 }
 0x8a8   : > { %v7973_v50 = vpop.permute.xlu0 %7972  ;;  %7407 = vst.msk [vmem:[#allocation3 + $0x1c8] sm:$0xff] %vm1071_vm5, %v7331_v52  ;;  %v8431_v52 = vadd.f32 %v14271_v48, %v14018_v59  ;;  %v8441_v59 = vadd.f32 %v14271_v48, %v14202_v37 }
 0x8a9   : > { %8048 = vst.msk [vmem:[#allocation3 + $0x1e8] sm:$0xff] %vm1071_vm5, %v7973_v50 }
 0x8ac   : > { %v7591_v47 = vpop.permute.xlu0 %7590  ;;  %v6949_v10 = vpop.permute.xlu1 %6948 }
 0x8ad   : > { %7665 = vst.msk [vmem:[#allocation3 + $0x200] sm:$0xff] %vm685_vm3, %v7591_v47  ;;  %7024 = vst.msk [vmem:[#allocation3 + $0x1e0] sm:$0xff] %vm685_vm3, %v6949_v10  ;;  %v14233_v54 = vpop.f32.mrf.mxu0  ;;  %v8426_v47 = vadd.f32 %v14271_v48, %v14001_v23 }
 0x8af   : > { %v8452_v8 = vpop.f32.mrf.mxu0  ;;  %v8181_v53 = vld [vmem:[#allocation3 + $0x1c8] sm:$0xff] }
 0x8b0   : > { %v7783_v34 = vpop.permute.xlu0 %7782  ;;  %v7141_v36 = vpop.permute.xlu1 %7140  ;;  %8519 = vmatmul.mubr.f32.gmra.mxu0 %v8181_v53  ;;  %v8185_v19 = vld [vmem:[#allocation3 + $0x1e8] sm:$0xff] }
 0x8b1   : > { %7857 = vst.msk [vmem:[#allocation3 + $0x200] sm:$0xff] %vm878_vm4, %v7783_v34  ;;  %7216 = vst.msk [vmem:[#allocation3 + $0x1e0] sm:$0xff] %vm878_vm4, %v7141_v36  ;;  %8523 = vmatprep.mubr.f32.mxu0 %v8185_v19  ;;  %v8436_v36 = vadd.f32 %v14271_v48, %v14104_v18 }
 0x8b4   : > { %v7975_v14 = vpop.permute.xlu0 %7974  ;;  %v7333_v42 = vpop.permute.xlu1 %7332 }
 0x8b5   : > { %8049 = vst.msk [vmem:[#allocation3 + $0x200] sm:$0xff] %vm1071_vm5, %v7975_v14  ;;  %7408 = vst.msk [vmem:[#allocation3 + $0x1e0] sm:$0xff] %vm1071_vm5, %v7333_v42  ;;  %v8451_v42 = vadd.f32 %v14271_v48, %v14233_v54 }
 0x8b8   : > { %v7593_v44 = vpop.permute.xlu0 %7592  ;;  %v6951_v62 = vpop.permute.xlu1 %6950 }
 0x8b9   : > { %7666 = vst.msk [vmem:[#allocation3 + $0x218] sm:$0xff] %vm685_vm3, %v7593_v44  ;;  %7025 = vst.msk [vmem:[#allocation3 + $0x1f8] sm:$0xff] %vm685_vm3, %v6951_v62  ;;  %v14241_v35 = vpop.f32.mrf.mxu0 }
 0x8bb   : > { %v8457_v45 = vpop.f32.mrf.mxu0 }
 0x8bc   : > { %v7785_v49 = vpop.permute.xlu0 %7784  ;;  %v7143_v63 = vpop.permute.xlu1 %7142  ;;  %v8184_v1 = vld [vmem:[#allocation3 + $0x1e0] sm:$0xff]  ;;  %v8446_v45 = vadd.f32 %v14271_v48, %v14211_v61 }
 0x8bd   : > { %v8188_v56 = vld [vmem:[#allocation3 + $0x200] sm:$0xff]  ;;  %7858 = vst.msk [vmem:[#allocation3 + $0x218] sm:$0xff] %vm878_vm4, %v7785_v49  ;;  %7217 = vst.msk [vmem:[#allocation3 + $0x1f8] sm:$0xff] %vm878_vm4, %v7143_v63  ;;  %8524 = vmatmul.mubr.f32.gmra.mxu0 %v8184_v1 }
 0x8be   : > { %8528 = vmatprep.mubr.f32.mxu0 %v8188_v56  ;;  %v8456_v56 = vadd.f32 %v14271_v48, %v14241_v35 }
 0x8c0   : > { %v7977_v7 = vpop.permute.xlu0 %7976  ;;  %v7335_v6 = vpop.permute.xlu1 %7334 }
 0x8c1   : > { %8050 = vst.msk [vmem:[#allocation3 + $0x218] sm:$0xff] %vm1071_vm5, %v7977_v7  ;;  %7409 = vst.msk [vmem:[#allocation3 + $0x1f8] sm:$0xff] %vm1071_vm5, %v7335_v6 }
 0x8c4   : > { %v7595_v32 = vpop.permute.xlu0 %7594  ;;  %v6953_v38 = vpop.permute.xlu1 %6952 }
 0x8c5   : > { %7667 = vst.msk [vmem:[#allocation3 + $0x230] sm:$0xff] %vm685_vm3, %v7595_v32  ;;  %7026 = vst.msk [vmem:[#allocation3 + $0x210] sm:$0xff] %vm685_vm3, %v6953_v38  ;;  %v14249_v9 = vpop.f32.mrf.mxu1 }
 0x8c7   : > { %v8572_v0 = vpop.f32.mrf.mxu1 }
 0x8c8   : > { %v7787_v28 = vpop.permute.xlu0 %7786  ;;  %v7145_v57 = vpop.permute.xlu1 %7144  ;;  %v8187_v43 = vld [vmem:[#allocation3 + $0x1f8] sm:$0xff] }
 0x8c9   : > { %v8191_v51 = vld [vmem:[#allocation3 + $0x218] sm:$0xff]  ;;  %7859 = vst.msk [vmem:[#allocation3 + $0x230] sm:$0xff] %vm878_vm4, %v7787_v28  ;;  %7218 = vst.msk [vmem:[#allocation3 + $0x210] sm:$0xff] %vm878_vm4, %v7145_v57  ;;  %8529 = vmatmul.mubr.f32.gmra.mxu0 %v8187_v43 }
 0x8ca   : > { %8533 = vmatprep.mubr.f32.mxu0 %v8191_v51 }
 0x8cc   : > { %v7979_v40 = vpop.permute.xlu0 %7978  ;;  %v7337_v24 = vpop.permute.xlu1 %7336 }
 0x8cd   : > { %8051 = vst.msk [vmem:[#allocation3 + $0x230] sm:$0xff] %vm1071_vm5, %v7979_v40  ;;  %7410 = vst.msk [vmem:[#allocation3 + $0x210] sm:$0xff] %vm1071_vm5, %v7337_v24 }
 0x8d0   : > { %v7597_v25 = vpop.permute.xlu0 %7596  ;;  %v6955_v41 = vpop.permute.xlu1 %6954 }
 0x8d1   : > { %7668 = vst.msk [vmem:[#allocation3 + $0x248] sm:$0xff] %vm685_vm3, %v7597_v25  ;;  %7027 = vst.msk [vmem:[#allocation3 + $0x228] sm:$0xff] %vm685_vm3, %v6955_v41  ;;  %v14257_v60 = vpop.f32.mrf.mxu1 }
 0x8d3   : > { %v8577_v16 = vpop.f32.mrf.mxu1 }
 0x8d4   : > { %v7789_v26 = vpop.permute.xlu0 %7788  ;;  %v7147_v33 = vpop.permute.xlu1 %7146  ;;  %v8190_v3 = vld [vmem:[#allocation3 + $0x210] sm:$0xff] }
 0x8d5   : > { %v8194_v29 = vld [vmem:[#allocation3 + $0x230] sm:$0xff]  ;;  %7860 = vst.msk [vmem:[#allocation3 + $0x248] sm:$0xff] %vm878_vm4, %v7789_v26  ;;  %7219 = vst.msk [vmem:[#allocation3 + $0x228] sm:$0xff] %vm878_vm4, %v7147_v33  ;;  %8534 = vmatmul.mubr.f32.gmra.mxu0 %v8190_v3 }
 0x8d6   : > { %8538 = vmatprep.mubr.f32.mxu0 %v8194_v29 }
 0x8d8   : > { %v7981_v58 = vpop.permute.xlu0 %7980  ;;  %v7339_v13 = vpop.permute.xlu1 %7338 }
 0x8d9   : > { %8052 = vst.msk [vmem:[#allocation3 + $0x248] sm:$0xff] %vm1071_vm5, %v7981_v58  ;;  %7411 = vst.msk [vmem:[#allocation3 + $0x228] sm:$0xff] %vm1071_vm5, %v7339_v13  ;;  %v8460_v30 = vpop.f32.mrf.mxu0 }
 0x8da   : > { %v8461_v63 = vadd.f32 %v14271_v48, %v8460_v30 }
 0x8db   : > { %v8462_v5 = vpop.f32.mrf.mxu0 }
 0x8dc   : > { %v6957_v17 = vpop.permute.xlu1 %6956 }
 0x8dd   : > { %7028 = vst.msk [vmem:[#allocation3 + $0x240] sm:$0xff] %vm685_vm3, %v6957_v17 }
 0x8e0   : > { %v7149_v2 = vpop.permute.xlu1 %7148  ;;  %v8193_v12 = vld [vmem:[#allocation3 + $0x228] sm:$0xff] }
 0x8e1   : > { %v8197_v46 = vld [vmem:[#allocation3 + $0x248] sm:$0xff]  ;;  %7220 = vst.msk [vmem:[#allocation3 + $0x240] sm:$0xff] %vm878_vm4, %v7149_v2  ;;  %8539 = vmatmul.mubr.f32.gmra.mxu0 %v8193_v12 }
 0x8e2   : > { %8543 = vmatprep.mubr.f32.mxu0 %v8197_v46 }
 0x8e4   : > { %v7341_v27 = vpop.permute.xlu1 %7340 }
 0x8e5   : > { %7412 = vst.msk [vmem:[#allocation3 + $0x240] sm:$0xff] %vm1071_vm5, %v7341_v27  ;;  %v8465_v20 = vpop.f32.mrf.mxu0 }
 0x8e6   : > { %v8466_v28 = vadd.f32 %v14271_v48, %v8465_v20 }
 0x8e7   : > { %v8467_v15 = vpop.f32.mrf.mxu0 }
 0x8ec   : > { %v8196_v22 = vld [vmem:[#allocation3 + $0x240] sm:$0xff] }
 0x8ed   : > { %8544 = vmatmul.mubr.f32.gmra.mxu0 %v8196_v22 }
 0x8f0   : > { %v14266_v31 = vpop.f32.mrf.mxu1 }
 0x8f2   : > { %v8582_v55 = vpop.f32.mrf.mxu1 }
 0x8f4   : > { %v9364_v50 = vpop.f32.mrf.mxu1 }
 0x8f5   : > { %v8656_v10 = vadd.f32 %v9364_v50, %v8431_v52 }
 0x8f6   : > { %v8650_v8 = vpop.f32.mrf.mxu1 }
 0x8f7   : > { %8811 = vst.msk [vmem:[%s14280_s20 + $0x8] sm:$0xff] %vm8809_vm6, %v8656_v10  ;;  %v8651_v53 = vadd.f32 %v8650_v8, %v8426_v47  ;;  %v8551_v47 = vadd.f32 %v14271_v48, %v14182_v11 }
 0x8f8   : > { %v9367_v34 = vpop.f32.mrf.mxu1 }
 0x8f9   : > { %8810 = vst.msk [vmem:[%s14280_s20] sm:$0xff] %vm8809_vm6, %v8651_v53  ;;  %v8666_v19 = vadd.f32 %v9367_v34, %v8441_v59  ;;  %v8470_v14 = vpop.f32.mrf.mxu0  ;;  %v8561_v53 = vadd.f32 %v14271_v48, %v14218_v39 }
 0x8fa   : > { %v8660_v23 = vpop.f32.mrf.mxu1  ;;  %v8471_v6 = vadd.f32 %v14271_v48, %v8470_v14 }
 0x8fb   : > { %8813 = vst.msk [vmem:[%s14280_s20 + $0x18] sm:$0xff] %vm8809_vm6, %v8666_v19  ;;  %v8661_v37 = vadd.f32 %v8660_v23, %v8436_v36  ;;  %v8472_v44 = vpop.f32.mrf.mxu0  ;;  %v8556_v19 = vadd.f32 %v14271_v48, %v14196_v21 }
 0x8fc   : > { %v9370_v62 = vpop.f32.mrf.mxu1 }
 0x8fd   : > { %8812 = vst.msk [vmem:[%s14280_s20 + $0x10] sm:$0xff] %vm8809_vm6, %v8661_v37  ;;  %v8676_v18 = vadd.f32 %v9370_v62, %v8451_v42  ;;  %v8571_v37 = vadd.f32 %v14271_v48, %v14249_v9  ;;  %v8581_v9 = vadd.f32 %v14271_v48, %v14266_v31 }
 0x8fe   : > { %v8670_v49 = vpop.f32.mrf.mxu1 }
 0x8ff   : > { %8815 = vst.msk [vmem:[%s14280_s20 + $0x28] sm:$0xff] %vm8809_vm6, %v8676_v18  ;;  %v8671_v1 = vadd.f32 %v8670_v49, %v8446_v45  ;;  %v8566_v45 = vadd.f32 %v14271_v48, %v14227_v4 }
 0x900   : > { %v9373_v54 = vpop.f32.mrf.mxu1 }
 0x901   : > { %8814 = vst.msk [vmem:[%s14280_s20 + $0x20] sm:$0xff] %vm8809_vm6, %v8671_v1  ;;  %v8686_v7 = vadd.f32 %v9373_v54, %v8461_v63  ;;  %v8576_v1 = vadd.f32 %v14271_v48, %v14257_v60 }
 0x902   : > { %v8680_v61 = vpop.f32.mrf.mxu1 }
 0x903   : > { %8817 = vst.msk [vmem:[%s14280_s20 + $0x38] sm:$0xff] %vm8809_vm6, %v8686_v7  ;;  %v8681_v32 = vadd.f32 %v8680_v61, %v8456_v56 }
 0x904   : > { %v8475_v38 = vpop.f32.mrf.mxu0  ;;  %v9376_v0 = vpop.f32.mrf.mxu1 }
 0x905   : > { %8816 = vst.msk [vmem:[%s14280_s20 + $0x30] sm:$0xff] %vm8809_vm6, %v8681_v32  ;;  %v8696_v57 = vadd.f32 %v9376_v0, %v8471_v6  ;;  %v8476_v24 = vadd.f32 %v14271_v48, %v8475_v38 }
 0x906   : > { %v8477_v43 = vpop.f32.mrf.mxu0  ;;  %v8690_v35 = vpop.f32.mrf.mxu1 }
 0x907   : > { %8819 = vst.msk [vmem:[%s14280_s20 + $0x48] sm:$0xff] %vm8809_vm6, %v8696_v57  ;;  %v8691_v51 = vadd.f32 %v8690_v35, %v8466_v28 }
 0x908   : > { %v9379_v40 = vpop.f32.mrf.mxu1 }
 0x909   : > { %8818 = vst.msk [vmem:[%s14280_s20 + $0x40] sm:$0xff] %vm8809_vm6, %v8691_v51 }
 0x90a   : > { %v8700_v25 = vpop.f32.mrf.mxu1 }
 0x90b   : > { %v8701_v41 = vadd.f32 %v8700_v25, %v8476_v24 }
 0x90c   : > { %v9382_v16 = vpop.f32.mrf.mxu1 }
 0x90d   : > { %8820 = vst.msk [vmem:[%s14280_s20 + $0x50] sm:$0xff] %vm8809_vm6, %v8701_v41 }
 0x90e   : > { %v8710_v26 = vpop.f32.mrf.mxu1 }
 0x910   : > { %v8480_v33 = vpop.f32.mrf.mxu0  ;;  %v9385_v3 = vpop.f32.mrf.mxu1 }
 0x911   : > { %v8481_v29 = vadd.f32 %v14271_v48, %v8480_v33 }
 0x912   : > { %v8482_v58 = vpop.f32.mrf.mxu0  ;;  %v8720_v13 = vpop.f32.mrf.mxu1 }
 0x913   : > { %v8706_v30 = vadd.f32 %v9379_v40, %v8481_v29 }
 0x914   : > { %v14321_v5 = vpop.f32.mrf.mxu1 }
 0x915   : > { %8821 = vst.msk [vmem:[%s14280_s20 + $0x58] sm:$0xff] %vm8809_vm6, %v8706_v30 }
 0x916   : > { %v8730_v17 = vpop.f32.mrf.mxu1 }
 0x918   : > { %v14325_v2 = vpop.f32.mrf.mxu1 }
 0x91a   : > { %v14327_v12 = vpop.f32.mrf.mxu1 }
 0x91c   : > { %v8485_v46 = vpop.f32.mrf.mxu0  ;;  %v14329_v27 = vpop.f32.mrf.mxu1 }
 0x91d   : > { %v8486_v20 = vadd.f32 %v14271_v48, %v8485_v46 }
 0x91e   : > { %v8487_v15 = vpop.f32.mrf.mxu0  ;;  %v14332_v22 = vpop.f32.mrf.mxu1 }
 0x91f   : > { %v8711_v55 = vadd.f32 %v8710_v26, %v8486_v20 }
 0x920   : > { %v14334_v52 = vpop.f32.mrf.mxu1 }
 0x921   : > { %8822 = vst.msk [vmem:[%s14280_s20 + $0x60] sm:$0xff] %vm8809_vm6, %v8711_v55 }
 0x922   : > { %v14338_v50 = vpop.f32.mrf.mxu1 }
 0x924   : > { %v9400_v10 = vpop.f32.mrf.mxu1 }
 0x925   : > { %v8776_v8 = vadd.f32 %v9400_v10, %v8551_v47 }
 0x926   : > { %v14342_v59 = vpop.f32.mrf.mxu1 }
 0x927   : > { %8835 = vst.msk [vmem:[%s14280_s20 + $0xc8] sm:$0xff] %vm8809_vm6, %v8776_v8 }
 0x928   : > { %v8490_v34 = vpop.f32.mrf.mxu0  ;;  %v9403_v36 = vpop.f32.mrf.mxu1 }
 0x929   : > { %v8491_v14 = vadd.f32 %v14271_v48, %v8490_v34  ;;  %v8786_v11 = vadd.f32 %v9403_v36, %v8561_v53 }
 0x92a   : > { %v8492_v23 = vpop.f32.mrf.mxu0  ;;  %v8780_v42 = vpop.f32.mrf.mxu1 }
 0x92b   : > { %v8716_v44 = vadd.f32 %v9382_v16, %v8491_v14  ;;  %8837 = vst.msk [vmem:[%s14280_s20 + $0xd8] sm:$0xff] %vm8809_vm6, %v8786_v11  ;;  %v8781_v39 = vadd.f32 %v8780_v42, %v8556_v19 }
 0x92c   : > { %v9406_v62 = vpop.f32.mrf.mxu1 }
 0x92d   : > { %8823 = vst.msk [vmem:[%s14280_s20 + $0x68] sm:$0xff] %vm8809_vm6, %v8716_v44  ;;  %8836 = vst.msk [vmem:[%s14280_s20 + $0xd0] sm:$0xff] %vm8809_vm6, %v8781_v39  ;;  %v8796_v21 = vadd.f32 %v9406_v62, %v8571_v37 }
 0x92e   : > { %v8790_v18 = vpop.f32.mrf.mxu1 }
 0x92f   : > { %8839 = vst.msk [vmem:[%s14280_s20 + $0xe8] sm:$0xff] %vm8809_vm6, %v8796_v21  ;;  %v8791_v49 = vadd.f32 %v8790_v18, %v8566_v45 }
 0x930   : > { %v9409_v63 = vpop.f32.mrf.mxu1 }
 0x931   : > { %8838 = vst.msk [vmem:[%s14280_s20 + $0xe0] sm:$0xff] %vm8809_vm6, %v8791_v49  ;;  %v8806_v4 = vadd.f32 %v9409_v63, %v8581_v9 }
 0x932   : > { %v8800_v54 = vpop.f32.mrf.mxu1 }
 0x933   : > { %8841 = vst.msk [vmem:[%s14280_s20 + $0xf8] sm:$0xff] %vm8809_vm6, %v8806_v4  ;;  %v8801_v56 = vadd.f32 %v8800_v54, %v8576_v1 }
 0x934   : > { %v8495_v7 = vpop.f32.mrf.mxu0 }
 0x935   : > { %8840 = vst.msk [vmem:[%s14280_s20 + $0xf0] sm:$0xff] %vm8809_vm6, %v8801_v56  ;;  %v8496_v31 = vadd.f32 %v14271_v48, %v8495_v7 }
 0x936   : > { %v8497_v61 = vpop.f32.mrf.mxu0 }
 0x937   : > { %v8721_v6 = vadd.f32 %v8720_v13, %v8496_v31 }
 0x939   : > { %8824 = vst.msk [vmem:[%s14280_s20 + $0x70] sm:$0xff] %vm8809_vm6, %v8721_v6 }
 0x940   : > { %v8500_v60 = vpop.f32.mrf.mxu0 }
 0x941   : > { %v8501_v32 = vadd.f32 %v14271_v48, %v8500_v60 }
 0x942   : > { %v8502_v38 = vpop.f32.mrf.mxu0 }
 0x943   : > { %v8726_v0 = vadd.f32 %v9385_v3, %v8501_v32 }
 0x945   : > { %8825 = vst.msk [vmem:[%s14280_s20 + $0x78] sm:$0xff] %vm8809_vm6, %v8726_v0 }
 0x94c   : > { %v8505_v28 = vpop.f32.mrf.mxu0 }
 0x94d   : > { %v8506_v57 = vadd.f32 %v14271_v48, %v8505_v28 }
 0x94e   : > { %v8507_v43 = vpop.f32.mrf.mxu0 }
 0x94f   : > { %v8731_v35 = vadd.f32 %v8730_v17, %v8506_v57 }
 0x951   : > { %8826 = vst.msk [vmem:[%s14280_s20 + $0x80] sm:$0xff] %vm8809_vm6, %v8731_v35 }
 0x958   : > { %v8510_v51 = vpop.f32.mrf.mxu0 }
 0x959   : > { %v8511_v40 = vadd.f32 %v14271_v48, %v8510_v51 }
 0x95a   : > { %v8512_v24 = vpop.f32.mrf.mxu0 }
 0x95b   : > { %v8736_v25 = vadd.f32 %v14321_v5, %v8511_v40 }
 0x95d   : > { %8827 = vst.msk [vmem:[%s14280_s20 + $0x88] sm:$0xff] %vm8809_vm6, %v8736_v25 }
 0x964   : > { %v8515_v41 = vpop.f32.mrf.mxu0 }
 0x965   : > { %v8516_v16 = vadd.f32 %v14271_v48, %v8515_v41 }
 0x966   : > { %v8517_v26 = vpop.f32.mrf.mxu0 }
 0x967   : > { %v8741_v33 = vadd.f32 %v14327_v12, %v8516_v16 }
 0x969   : > { %8828 = vst.msk [vmem:[%s14280_s20 + $0x90] sm:$0xff] %vm8809_vm6, %v8741_v33 }
 0x970   : > { %v8520_v3 = vpop.f32.mrf.mxu0 }
 0x971   : > { %v8521_v29 = vadd.f32 %v14271_v48, %v8520_v3 }
 0x972   : > { %v8522_v58 = vpop.f32.mrf.mxu0 }
 0x973   : > { %v8746_v13 = vadd.f32 %v14325_v2, %v8521_v29 }
 0x975   : > { %8829 = vst.msk [vmem:[%s14280_s20 + $0x98] sm:$0xff] %vm8809_vm6, %v8746_v13 }
 0x97d   : > { %v8525_v30 = vpop.f32.mrf.mxu0 }
 0x97e   : > { %v8526_v5 = vadd.f32 %v14271_v48, %v8525_v30 }
 0x97f   : > { %v8527_v17 = vpop.f32.mrf.mxu0 }
 0x980   : > { %v8751_v46 = vadd.f32 %v14332_v22, %v8526_v5 }
 0x982   : > { %8830 = vst.msk [vmem:[%s14280_s20 + $0xa0] sm:$0xff] %vm8809_vm6, %v8751_v46 }
 0x989   : > { %v8530_v12 = vpop.f32.mrf.mxu0 }
 0x98a   : > { %v8531_v20 = vadd.f32 %v14271_v48, %v8530_v12 }
 0x98b   : > { %v8532_v15 = vpop.f32.mrf.mxu0 }
 0x98c   : > { %v8756_v55 = vadd.f32 %v14329_v27, %v8531_v20 }
 0x98e   : > { %8831 = vst.msk [vmem:[%s14280_s20 + $0xa8] sm:$0xff] %vm8809_vm6, %v8756_v55 }
 0x995   : > { %v8535_v2 = vpop.f32.mrf.mxu0 }
 0x996   : > { %v8536_v47 = vadd.f32 %v14271_v48, %v8535_v2 }
 0x997   : > { %v8537_v10 = vpop.f32.mrf.mxu0 }
 0x998   : > { %v8761_v8 = vadd.f32 %v14338_v50, %v8536_v47 }
 0x99a   : > { %8832 = vst.msk [vmem:[%s14280_s20 + $0xb0] sm:$0xff] %vm8809_vm6, %v8761_v8 }
 0x9a1   : > { %v8540_v22 = vpop.f32.mrf.mxu0 }
 0x9a2   : > { %v8541_v53 = vadd.f32 %v14271_v48, %v8540_v22 }
 0x9a3   : > { %v8542_v34 = vpop.f32.mrf.mxu0 }
 0x9a4   : > { %v8766_v36 = vadd.f32 %v14334_v52, %v8541_v53 }
 0x9a6   : > { %8833 = vst.msk [vmem:[%s14280_s20 + $0xb8] sm:$0xff] %vm8809_vm6, %v8766_v36 }
 0x9ad   : > { %v8545_v27 = vpop.f32.mrf.mxu0 }
 0x9ae   : > { %v8546_v19 = vadd.f32 %v14271_v48, %v8545_v27 }
 0x9af   : > { %v8547_v14 = vpop.f32.mrf.mxu0 }
 0x9b0   : > { %v8771_v11 = vadd.f32 %v14342_v59, %v8546_v19 }
 0x9b2   : > { %8834 = vst.msk [vmem:[%s14280_s20 + $0xc0] sm:$0xff] %vm8809_vm6, %v8771_v11 }
 0x9b3 PF: > { %s19_s30 = sadd.s32 1, %s9522_s30  }
 0x9b4   : > { %p16_p4 = scmp.ge.s32.totalorder %s19_s30, 4  }
 0x9b6   :  { %18 = sbr.rel (!%p16_p4) target bundleno = 1 (0x1), region = 88 }

</bundles_post_ra>
